<compile_context>
chip_gen: v6e
topology: v6e:2x2x1
jax: 0.10.0
libtpu: 0.0.40
codegen_flags: <defaults>
</compile_context>

<pallas_src>
import jax
import jax.numpy as jnp
from jax.experimental import pallas as pl
from jax.experimental.pallas import tpu as pltpu

LANE = 128
VMEM_LIMIT = 32 * 1024 * 1024   # portable scoped-VMEM budget (fits v5e/v6e/v7x)


def _round_up(x, m):
    return (x + m - 1) // m * m


# ----------------------------- fused kernel --------------------------------

def make_fused_kernel(n_conv_blocks, pool, num_lstm_layers, Hp, NCp):
    """Whole forward pass in one kernel: conv blocks -> BiLSTM stack -> MLP head."""

    def conv_block(xv, wmat, scale, bias):
        # xv: (B, Hf, W, C) f32  (batch, freq, frames, channels)
        B, Hf, W, C = xv.shape
        Cout = wmat.shape[1]
        # zero halo (Conv2d padding=1), built in-register
        zf = jnp.zeros((B, 1, W, C), xv.dtype)
        xp = jnp.concatenate([zf, xv, zf], axis=1)                 # (B, Hf+2, W, C)
        zw = jnp.zeros((B, Hf + 2, 1, C), xv.dtype)
        xp = jnp.concatenate([zw, xp, zw], axis=2)                 # (B, Hf+2, W+2, C)
        # im2col from 9 static shifted views -> ONE MXU dot with K = 9*C
        taps = []
        for kh in range(3):
            for kw in range(3):
                taps.append(xp[:, kh:kh + Hf, kw:kw + W, :])
        patch = jnp.concatenate(taps, axis=-1)                     # (B, Hf, W, 9C)
        y = jnp.dot(patch.reshape(B * Hf * W, 9 * C), wmat,
                    preferred_element_type=jnp.float32)            # (B*Hf*W, Cout)
        y = jnp.maximum(y * scale + bias, 0.0)                     # BN(eval)+ReLU (Dropout=id)
        # MaxPool2d((pool, 1)) floor mode
        Ho = Hf // pool
        y = y.reshape(B, Hf, W, Cout)[:, :Ho * pool, :, :]
        z = y.reshape(B * Ho, pool * W, Cout)
        pooled = z[:, 0:W, :]
        for r in range(1, pool):
            pooled = jnp.maximum(pooled, z[:, r * W:(r + 1) * W, :])
        return pooled.reshape(B, Ho, W, Cout)

    def lstm_cell(gx, h, c, wh):
        # gx already holds x_t @ W_ih + (b_ih + b_hh); only the recurrence is done here.
        g = gx + jnp.dot(h, wh, preferred_element_type=jnp.float32)   # (B, 4Hp)
        i = jax.nn.sigmoid(g[:, 0:Hp])
        f = jax.nn.sigmoid(g[:, Hp:2 * Hp])
        gg = jnp.tanh(g[:, 2 * Hp:3 * Hp])
        o = jax.nn.sigmoid(g[:, 3 * Hp:4 * Hp])
        c = f * c + i * gg
        h = o * jnp.tanh(c)
        return h, c

    def bilstm_layer(xseq, wif, whf, bf, wib, whb, bb, out_sc):
        # xseq: (B, T, D).  Input projection hoisted out of the recurrence (one big dot per
        # direction with M = B*T); only (B,Hp)@(Hp,4Hp) stays in the time loop.
        B, T, D = xseq.shape
        x2d = xseq.reshape(B * T, D)
        gxf = (jnp.dot(x2d, wif, preferred_element_type=jnp.float32) + bf).reshape(B, T, 4 * Hp)
        gxb = (jnp.dot(x2d, wib, preferred_element_type=jnp.float32) + bb).reshape(B, T, 4 * Hp)
        h_f = jnp.zeros((B, Hp), jnp.float32)
        c_f = jnp.zeros((B, Hp), jnp.float32)
        h_b = jnp.zeros((B, Hp), jnp.float32)
        c_b = jnp.zeros((B, Hp), jnp.float32)
        for t in range(T):                       # static unroll (T is small here)
            h_f, c_f = lstm_cell(gxf[:, t, :], h_f, c_f, whf)
            out_sc[:, t, 0:Hp] = h_f
            tb = T - 1 - t
            h_b, c_b = lstm_cell(gxb[:, tb, :], h_b, c_b, whb)
            out_sc[:, tb, Hp:2 * Hp] = h_b

    def kernel(*refs):
        it = iter(refs)
        x_ref = next(it)
        conv_w = [(next(it), next(it), next(it)) for _ in range(n_conv_blocks)]
        lstm_w = [[(next(it), next(it), next(it)) for _ in range(2)]
                  for _ in range(num_lstm_layers)]
        w1_ref, b1_ref, w2_ref, b2_ref = next(it), next(it), next(it), next(it)
        o_ref = next(it)
        seq_sc = [next(it), next(it)]

        # --- CNN feature extractor (activations stay in VMEM) ---
        h = x_ref[...]                                             # (B, H0, W, 1)
        for wm, sc, bi in conv_w:
            h = conv_block(h, wm[...], sc[...], bi[...])
        B, Ho, T, C = h.shape
        # torch.cat over channels + permute -> per-frame features.  Built here by lane
        # concatenation in (freq-major, channel-minor) order; the matching row permutation
        # is folded into the layer-0 LSTM input weight on the host side (zero kernel cost).
        feats = jnp.concatenate([h[:, i, :, :] for i in range(Ho)], axis=-1)   # (B, T, Ho*C)

        # --- bidirectional LSTM stack (h/c carried in f32 registers) ---
        seq = feats
        for l, ((wif, whf, bf), (wib, whb, bb)) in enumerate(lstm_w):
            out_sc = seq_sc[l % 2]
            bilstm_layer(seq, wif[...], whf[...], bf[...],
                         wib[...], whb[...], bb[...], out_sc)
            seq = out_sc[...]                                      # (B, T, 2Hp)

        # --- MLP head (Linear -> ReLU -> Linear), lane-padded to 128 ---
        y = seq.reshape(B * T, 2 * Hp)
        hid = jnp.maximum(jnp.dot(y, w1_ref[...], preferred_element_type=jnp.float32)
                          + b1_ref[...], 0.0)
        logits = jnp.dot(hid, w2_ref[...], preferred_element_type=jnp.float32) + b2_ref[...]
        o_ref[...] = logits.reshape(B, T, NCp)                     # single lane-dense HBM store

    return kernel


# ----------------------------- wrapper --------------------------------------

def _full_spec(arr):
    zeros = (0,) * arr.ndim
    return pl.BlockSpec(arr.shape, lambda i: zeros)


def recurrent_cnn_forward(x, kparams, cfg):
    """x: (B, 1, input_height, frames) f32 -> (B, n_classes, frames) f32 (eval mode)."""
    B, _, H0, T = x.shape
    Hp, NCp = kparams["Hp"], kparams["NCp"]
    x_k = jnp.transpose(x, (0, 2, 3, 1)).astype(jnp.float32)       # (B, freq, frames, 1)

    inputs = [x_k]
    for blk in kparams["conv"]:
        inputs += [blk["wmat"], blk["scale"], blk["bias"]]
    for layer in kparams["lstm"]:
        for wi, wh, b in layer:
            inputs += [wi, wh, b]
    inputs += [kparams["w1"], kparams["b1"], kparams["w2"], kparams["b2"]]

    kernel = make_fused_kernel(cfg["n_conv_blocks"], cfg["pool_factor"],
                               cfg["num_lstm_layers"], Hp, NCp)
    out = pl.pallas_call(
        kernel,
        grid=(1,),
        in_specs=[_full_spec(a) for a in inputs],
        out_specs=pl.BlockSpec((B, T, NCp), lambda i: (0, 0, 0)),
        out_shape=jax.ShapeDtypeStruct((B, T, NCp), jnp.float32),
        scratch_shapes=[pltpu.VMEM((B, T, 2 * Hp), jnp.float32),
                        pltpu.VMEM((B, T, 2 * Hp), jnp.float32)],
        compiler_params=pltpu.CompilerParams(
            dimension_semantics=("arbitrary",),
            vmem_limit_bytes=VMEM_LIMIT),
    )(*inputs)
    # tiny XLA ops: drop class-lane padding, permute to (B, n_classes, frames)
    return jnp.transpose(out[:, :, :cfg["n_classes"]], (0, 2, 1))


# ----------------------------- parameters -----------------------------------

def init_torch_params(key, cfg):
    """Random parameters in PyTorch layouts (Conv2d / BatchNorm2d / LSTM / Linear)."""
    keys = iter(jax.random.split(key, 128))
    nxt = lambda: next(keys)
    p = {"conv": [], "lstm": []}

    in_ch, height = 1, cfg["input_height"]
    for b in range(cfg["n_conv_blocks"]):
        out_ch = cfg["start_n_filters"] if b == 0 else in_ch * cfg["filters_factor"]
        p["conv"].append(dict(
            w=0.1 * jax.random.normal(nxt(), (out_ch, in_ch, 3, 3), jnp.float32),
            b=0.1 * jax.random.normal(nxt(), (out_ch,), jnp.float32),
            gamma=1.0 + 0.1 * jax.random.normal(nxt(), (out_ch,), jnp.float32),
            beta=0.1 * jax.random.normal(nxt(), (out_ch,), jnp.float32),
            mean=0.05 * jax.random.normal(nxt(), (out_ch,), jnp.float32),
            var=1.0 + 0.1 * jax.random.uniform(nxt(), (out_ch,), jnp.float32),
        ))
        in_ch = out_ch
        height //= cfg["pool_factor"]

    H = cfg["lstm_h"]
    feat_dim = height * in_ch
    s = 1.0 / float(H) ** 0.5
    for layer in range(cfg["num_lstm_layers"]):
        d_in = feat_dim if layer == 0 else 2 * H
        dirs = []
        for _ in range(2):     # forward, reverse
            dirs.append(dict(
                w_ih=s * jax.random.normal(nxt(), (4 * H, d_in), jnp.float32),
                w_hh=s * jax.random.normal(nxt(), (4 * H, H), jnp.float32),
                b_ih=s * jax.random.normal(nxt(), (4 * H,), jnp.float32),
                b_hh=s * jax.random.normal(nxt(), (4 * H,), jnp.float32),
            ))
        p["lstm"].append(dirs)

    p["w1"] = 0.1 * jax.random.normal(nxt(), (32, 2 * H), jnp.float32)
    p["b1"] = 0.1 * jax.random.normal(nxt(), (32,), jnp.float32)
    p["w2"] = 0.1 * jax.random.normal(nxt(), (cfg["n_classes"], 32), jnp.float32)
    p["b2"] = 0.1 * jax.random.normal(nxt(), (cfg["n_classes"],), jnp.float32)
    p["_out_height"] = height
    p["_out_channels"] = in_ch
    return p


def prepare_kernel_params(tp, cfg):
    """Fold BN+conv bias, transpose weights to (in, out), zero-pad the LSTM hidden dim so
    4*Hp == 128 lanes, pad MLP hidden/class dims to 128, and pre-permute the layer-0 LSTM
    input weight so the kernel can build features in (freq-major, channel-minor) order
    with no in-kernel transpose.  Padded hidden units stay exactly zero through the LSTM."""
    H = cfg["lstm_h"]
    Hp = _round_up(max(H, 1), 32)                # 4*Hp is a multiple of the 128-lane width
    NCp = _round_up(cfg["n_classes"], LANE)
    MHp = _round_up(32, LANE)
    Ho, C = tp["_out_height"], tp["_out_channels"]

    kp = {"Hp": Hp, "NCp": NCp, "conv": [], "lstm": []}

    for blk in tp["conv"]:
        cout, cin = blk["w"].shape[:2]
        wmat = jnp.transpose(blk["w"], (2, 3, 1, 0)).reshape(9 * cin, cout)   # k = kh*3+kw
        scale = blk["gamma"] / jnp.sqrt(blk["var"] + 1e-5)
        bias = blk["beta"] + (blk["b"] - blk["mean"]) * scale                 # conv bias folded
        kp["conv"].append(dict(wmat=wmat, scale=scale.reshape(1, -1),
                               bias=bias.reshape(1, -1)))

    def pad_gate_cols(w_t):                      # (rows, 4H) -> (rows, 4Hp); gate order i,f,g,o
        out = jnp.zeros((w_t.shape[0], 4 * Hp), jnp.float32)
        for g in range(4):
            out = out.at[:, g * Hp:g * Hp + H].set(w_t[:, g * H:(g + 1) * H])
        return out

    for layer, dirs in enumerate(tp["lstm"]):
        kdirs = []
        for d in dirs:
            wi_t = d["w_ih"].T                                   # (d_in, 4H)
            if layer == 0:
                # PyTorch feature order is c*Ho + h; kernel builds features as h*C + c.
                perm = jnp.array([c * Ho + h for h in range(Ho) for c in range(C)])
                wi_t = wi_t[perm, :]
            else:
                padded = jnp.zeros((2 * Hp, 4 * H), jnp.float32)
                padded = padded.at[0:H, :].set(wi_t[0:H, :])             # forward features
                padded = padded.at[Hp:Hp + H, :].set(wi_t[H:2 * H, :])   # backward features
                wi_t = padded
            wi = pad_gate_cols(wi_t)
            wh = pad_gate_cols(jnp.zeros((Hp, 4 * H), jnp.float32).at[0:H, :].set(d["w_hh"].T))
            b = pad_gate_cols((d["b_ih"] + d["b_hh"]).reshape(1, 4 * H))
            kdirs.append((wi, wh, b))
        kp["lstm"].append(kdirs)

    w1_t = tp["w1"].T                                            # (2H, 32)
    w1p = jnp.zeros((2 * Hp, MHp), jnp.float32)
    w1p = w1p.at[0:H, 0:32].set(w1_t[0:H, :])
    w1p = w1p.at[Hp:Hp + H, 0:32].set(w1_t[H:2 * H, :])
    b1p = jnp.zeros((1, MHp), jnp.float32).at[0, 0:32].set(tp["b1"])
    w2p = jnp.zeros((MHp, NCp), jnp.float32).at[0:32, 0:cfg["n_classes"]].set(tp["w2"].T)
    b2p = jnp.zeros((1, NCp), jnp.float32).at[0, 0:cfg["n_classes"]].set(tp["b2"])
    kp.update(w1=w1p, b1=b1p, w2=w2p, b2=b2p)
    return kp


# ----------------------------- main ------------------------------------------

if __name__ == "__main__":
    cfg = dict(
        n_conv_blocks=2,
        n_classes=6,
        input_height=16,
        start_n_filters=8,
        filters_factor=1,
        lstm_h=16,
        pool_factor=2,
        num_lstm_layers=2,
    )
    batch, frames = 2, 8

    key = jax.random.PRNGKey(0)
    k_param, k_x = jax.random.split(key)
    torch_params = init_torch_params(k_param, cfg)
    kparams = prepare_kernel_params(torch_params, cfg)

    x = jax.random.normal(k_x, (batch, 1, cfg["input_height"], frames), jnp.float32)

    out = recurrent_cnn_forward(x, kparams, cfg)
    out = jax.block_until_ready(out)

    assert out.shape == (batch, cfg["n_classes"], frames), out.shape
    assert bool(jnp.all(jnp.isfinite(out)))
    print("KERNEL_OK")
</pallas_src>

<mosaic_0001>
module attributes {stable_mosaic.version = 11 : i64} {
  func.func @kernel(%arg0: i32, %arg1: memref<2x16x8x1xf32, #tpu.memory_space<vmem>>, %arg2: memref<9x8xf32, #tpu.memory_space<vmem>>, %arg3: memref<1x8xf32, #tpu.memory_space<vmem>>, %arg4: memref<1x8xf32, #tpu.memory_space<vmem>>, %arg5: memref<72x8xf32, #tpu.memory_space<vmem>>, %arg6: memref<1x8xf32, #tpu.memory_space<vmem>>, %arg7: memref<1x8xf32, #tpu.memory_space<vmem>>, %arg8: memref<32x128xf32, #tpu.memory_space<vmem>>, %arg9: memref<32x128xf32, #tpu.memory_space<vmem>>, %arg10: memref<1x128xf32, #tpu.memory_space<vmem>>, %arg11: memref<32x128xf32, #tpu.memory_space<vmem>>, %arg12: memref<32x128xf32, #tpu.memory_space<vmem>>, %arg13: memref<1x128xf32, #tpu.memory_space<vmem>>, %arg14: memref<64x128xf32, #tpu.memory_space<vmem>>, %arg15: memref<32x128xf32, #tpu.memory_space<vmem>>, %arg16: memref<1x128xf32, #tpu.memory_space<vmem>>, %arg17: memref<64x128xf32, #tpu.memory_space<vmem>>, %arg18: memref<32x128xf32, #tpu.memory_space<vmem>>, %arg19: memref<1x128xf32, #tpu.memory_space<vmem>>, %arg20: memref<64x128xf32, #tpu.memory_space<vmem>>, %arg21: memref<1x128xf32, #tpu.memory_space<vmem>>, %arg22: memref<128x128xf32, #tpu.memory_space<vmem>>, %arg23: memref<1x128xf32, #tpu.memory_space<vmem>>, %arg24: memref<2x8x128xf32, #tpu.memory_space<vmem>>, %arg25: memref<2x8x64xf32, #tpu.memory_space<vmem>>, %arg26: memref<2x8x64xf32, #tpu.memory_space<vmem>>) attributes {dimension_semantics = [#tpu.dimension_semantics<arbitrary>], iteration_bounds = array<i64: 1>, scalar_prefetch = 0 : i64, scratch_operands = 2 : i64, tpu.core_type = #tpu.core_type<tc>, window_params = [{pipeline_mode = #tpu.pipeline_mode<synchronous>, transform_indices = @transform_0, window_bounds = array<i64: 2, 16, 8, 1>}, {pipeline_mode = #tpu.pipeline_mode<synchronous>, transform_indices = @transform_1, window_bounds = array<i64: 9, 8>}, {pipeline_mode = #tpu.pipeline_mode<synchronous>, transform_indices = @transform_2, window_bounds = array<i64: 1, 8>}, {pipeline_mode = #tpu.pipeline_mode<synchronous>, transform_indices = @transform_3, window_bounds = array<i64: 1, 8>}, {pipeline_mode = #tpu.pipeline_mode<synchronous>, transform_indices = @transform_4, window_bounds = array<i64: 72, 8>}, {pipeline_mode = #tpu.pipeline_mode<synchronous>, transform_indices = @transform_5, window_bounds = array<i64: 1, 8>}, {pipeline_mode = #tpu.pipeline_mode<synchronous>, transform_indices = @transform_6, window_bounds = array<i64: 1, 8>}, {pipeline_mode = #tpu.pipeline_mode<synchronous>, transform_indices = @transform_7, window_bounds = array<i64: 32, 128>}, {pipeline_mode = #tpu.pipeline_mode<synchronous>, transform_indices = @transform_8, window_bounds = array<i64: 32, 128>}, {pipeline_mode = #tpu.pipeline_mode<synchronous>, transform_indices = @transform_9, window_bounds = array<i64: 1, 128>}, {pipeline_mode = #tpu.pipeline_mode<synchronous>, transform_indices = @transform_10, window_bounds = array<i64: 32, 128>}, {pipeline_mode = #tpu.pipeline_mode<synchronous>, transform_indices = @transform_11, window_bounds = array<i64: 32, 128>}, {pipeline_mode = #tpu.pipeline_mode<synchronous>, transform_indices = @transform_12, window_bounds = array<i64: 1, 128>}, {pipeline_mode = #tpu.pipeline_mode<synchronous>, transform_indices = @transform_13, window_bounds = array<i64: 64, 128>}, {pipeline_mode = #tpu.pipeline_mode<synchronous>, transform_indices = @transform_14, window_bounds = array<i64: 32, 128>}, {pipeline_mode = #tpu.pipeline_mode<synchronous>, transform_indices = @transform_15, window_bounds = array<i64: 1, 128>}, {pipeline_mode = #tpu.pipeline_mode<synchronous>, transform_indices = @transform_16, window_bounds = array<i64: 64, 128>}, {pipeline_mode = #tpu.pipeline_mode<synchronous>, transform_indices = @transform_17, window_bounds = array<i64: 32, 128>}, {pipeline_mode = #tpu.pipeline_mode<synchronous>, transform_indices = @transform_18, window_bounds = array<i64: 1, 128>}, {pipeline_mode = #tpu.pipeline_mode<synchronous>, transform_indices = @transform_19, window_bounds = array<i64: 64, 128>}, {pipeline_mode = #tpu.pipeline_mode<synchronous>, transform_indices = @transform_20, window_bounds = array<i64: 1, 128>}, {pipeline_mode = #tpu.pipeline_mode<synchronous>, transform_indices = @transform_21, window_bounds = array<i64: 128, 128>}, {pipeline_mode = #tpu.pipeline_mode<synchronous>, transform_indices = @transform_22, window_bounds = array<i64: 1, 128>}, {pipeline_mode = #tpu.pipeline_mode<synchronous>, transform_indices = @transform_23, window_bounds = array<i64: 2, 8, 128>}]} {
    %c0 = arith.constant 0 : index
    %c0_0 = arith.constant 0 : index
    %c0_1 = arith.constant 0 : index
    %c0_2 = arith.constant 0 : index
    %0 = vector.load %arg1[%c0, %c0_0, %c0_1, %c0_2] : memref<2x16x8x1xf32, #tpu.memory_space<vmem>>, vector<2x16x8x1xf32>
    %c0_3 = arith.constant 0 : index
    %c0_4 = arith.constant 0 : index
    %1 = vector.load %arg2[%c0_3, %c0_4] : memref<9x8xf32, #tpu.memory_space<vmem>>, vector<9x8xf32>
    %c0_5 = arith.constant 0 : index
    %c0_6 = arith.constant 0 : index
    %2 = vector.load %arg3[%c0_5, %c0_6] : memref<1x8xf32, #tpu.memory_space<vmem>>, vector<1x8xf32>
    %c0_7 = arith.constant 0 : index
    %c0_8 = arith.constant 0 : index
    %3 = vector.load %arg4[%c0_7, %c0_8] : memref<1x8xf32, #tpu.memory_space<vmem>>, vector<1x8xf32>
    %cst = arith.constant 0.000000e+00 : f32
    %4 = vector.broadcast %cst : f32 to vector<2x1x8x1xf32>
    %5 = tpu.concatenate %4, %0, %4 in 1 : vector<2x1x8x1xf32>, vector<2x16x8x1xf32>, vector<2x1x8x1xf32> -> vector<2x18x8x1xf32>
    %cst_9 = arith.constant 0.000000e+00 : f32
    %6 = vector.broadcast %cst_9 : f32 to vector<2x18x1x1xf32>
    %7 = tpu.concatenate %6, %5, %6 in 2 : vector<2x18x1x1xf32>, vector<2x18x8x1xf32>, vector<2x18x1x1xf32> -> vector<2x18x10x1xf32>
    %8 = vector.extract_strided_slice %7 {offsets = [0, 0, 0, 0], sizes = [2, 16, 8, 1], strides = [1, 1, 1, 1]} : vector<2x18x10x1xf32> to vector<2x16x8x1xf32>
    %9 = vector.extract_strided_slice %7 {offsets = [0, 0, 1, 0], sizes = [2, 16, 8, 1], strides = [1, 1, 1, 1]} : vector<2x18x10x1xf32> to vector<2x16x8x1xf32>
    %10 = vector.extract_strided_slice %7 {offsets = [0, 0, 2, 0], sizes = [2, 16, 8, 1], strides = [1, 1, 1, 1]} : vector<2x18x10x1xf32> to vector<2x16x8x1xf32>
    %11 = vector.extract_strided_slice %7 {offsets = [0, 1, 0, 0], sizes = [2, 16, 8, 1], strides = [1, 1, 1, 1]} : vector<2x18x10x1xf32> to vector<2x16x8x1xf32>
    %12 = vector.extract_strided_slice %7 {offsets = [0, 1, 1, 0], sizes = [2, 16, 8, 1], strides = [1, 1, 1, 1]} : vector<2x18x10x1xf32> to vector<2x16x8x1xf32>
    %13 = vector.extract_strided_slice %7 {offsets = [0, 1, 2, 0], sizes = [2, 16, 8, 1], strides = [1, 1, 1, 1]} : vector<2x18x10x1xf32> to vector<2x16x8x1xf32>
    %14 = vector.extract_strided_slice %7 {offsets = [0, 2, 0, 0], sizes = [2, 16, 8, 1], strides = [1, 1, 1, 1]} : vector<2x18x10x1xf32> to vector<2x16x8x1xf32>
    %15 = vector.extract_strided_slice %7 {offsets = [0, 2, 1, 0], sizes = [2, 16, 8, 1], strides = [1, 1, 1, 1]} : vector<2x18x10x1xf32> to vector<2x16x8x1xf32>
    %16 = vector.extract_strided_slice %7 {offsets = [0, 2, 2, 0], sizes = [2, 16, 8, 1], strides = [1, 1, 1, 1]} : vector<2x18x10x1xf32> to vector<2x16x8x1xf32>
    %17 = tpu.concatenate %8, %9, %10, %11, %12, %13, %14, %15, %16 in 3 : vector<2x16x8x1xf32>, vector<2x16x8x1xf32>, vector<2x16x8x1xf32>, vector<2x16x8x1xf32>, vector<2x16x8x1xf32>, vector<2x16x8x1xf32>, vector<2x16x8x1xf32>, vector<2x16x8x1xf32>, vector<2x16x8x1xf32> -> vector<2x16x8x9xf32>
    %18 = vector.shape_cast %17 : vector<2x16x8x9xf32> to vector<256x9xf32>
    %cst_10 = arith.constant dense<0.000000e+00> : vector<256x8xf32>
    %19 = tpu.matmul %18, %1, %cst_10 {dimension_numbers = #tpu.dot_dimension_numbers<[1], [0], [0], [1], [0, 0, 1, 1], [], []>} : vector<256x9xf32>, vector<9x8xf32>, vector<256x8xf32> -> vector<256x8xf32>
    %20 = vector.broadcast %2 : vector<1x8xf32> to vector<256x8xf32>
    %21 = arith.mulf %19, %20 : vector<256x8xf32>
    %22 = vector.broadcast %3 : vector<1x8xf32> to vector<256x8xf32>
    %23 = arith.addf %21, %22 : vector<256x8xf32>
    %cst_11 = arith.constant 0.000000e+00 : f32
    %24 = vector.broadcast %cst_11 : f32 to vector<256x8xf32>
    %25 = arith.maximumf %23, %24 : vector<256x8xf32>
    %26 = vector.shape_cast %25 : vector<256x8xf32> to vector<2x16x8x8xf32>
    %27 = vector.shape_cast %26 : vector<2x16x8x8xf32> to vector<16x16x8xf32>
    %28 = vector.extract_strided_slice %27 {offsets = [0, 0, 0], sizes = [16, 8, 8], strides = [1, 1, 1]} : vector<16x16x8xf32> to vector<16x8x8xf32>
    %29 = vector.extract_strided_slice %27 {offsets = [0, 8, 0], sizes = [16, 8, 8], strides = [1, 1, 1]} : vector<16x16x8xf32> to vector<16x8x8xf32>
    %30 = arith.maximumf %28, %29 : vector<16x8x8xf32>
    %31 = vector.shape_cast %30 : vector<16x8x8xf32> to vector<2x8x8x8xf32>
    %c0_12 = arith.constant 0 : index
    %c0_13 = arith.constant 0 : index
    %32 = vector.load %arg5[%c0_12, %c0_13] : memref<72x8xf32, #tpu.memory_space<vmem>>, vector<72x8xf32>
    %c0_14 = arith.constant 0 : index
    %c0_15 = arith.constant 0 : index
    %33 = vector.load %arg6[%c0_14, %c0_15] : memref<1x8xf32, #tpu.memory_space<vmem>>, vector<1x8xf32>
    %c0_16 = arith.constant 0 : index
    %c0_17 = arith.constant 0 : index
    %34 = vector.load %arg7[%c0_16, %c0_17] : memref<1x8xf32, #tpu.memory_space<vmem>>, vector<1x8xf32>
    %cst_18 = arith.constant 0.000000e+00 : f32
    %35 = vector.broadcast %cst_18 : f32 to vector<2x1x8x8xf32>
    %36 = tpu.concatenate %35, %31, %35 in 1 : vector<2x1x8x8xf32>, vector<2x8x8x8xf32>, vector<2x1x8x8xf32> -> vector<2x10x8x8xf32>
    %cst_19 = arith.constant 0.000000e+00 : f32
    %37 = vector.broadcast %cst_19 : f32 to vector<2x10x1x8xf32>
    %38 = tpu.concatenate %37, %36, %37 in 2 : vector<2x10x1x8xf32>, vector<2x10x8x8xf32>, vector<2x10x1x8xf32> -> vector<2x10x10x8xf32>
    %39 = vector.extract_strided_slice %38 {offsets = [0, 0, 0, 0], sizes = [2, 8, 8, 8], strides = [1, 1, 1, 1]} : vector<2x10x10x8xf32> to vector<2x8x8x8xf32>
    %40 = vector.extract_strided_slice %38 {offsets = [0, 0, 1, 0], sizes = [2, 8, 8, 8], strides = [1, 1, 1, 1]} : vector<2x10x10x8xf32> to vector<2x8x8x8xf32>
    %41 = vector.extract_strided_slice %38 {offsets = [0, 0, 2, 0], sizes = [2, 8, 8, 8], strides = [1, 1, 1, 1]} : vector<2x10x10x8xf32> to vector<2x8x8x8xf32>
    %42 = vector.extract_strided_slice %38 {offsets = [0, 1, 0, 0], sizes = [2, 8, 8, 8], strides = [1, 1, 1, 1]} : vector<2x10x10x8xf32> to vector<2x8x8x8xf32>
    %43 = vector.extract_strided_slice %38 {offsets = [0, 1, 1, 0], sizes = [2, 8, 8, 8], strides = [1, 1, 1, 1]} : vector<2x10x10x8xf32> to vector<2x8x8x8xf32>
    %44 = vector.extract_strided_slice %38 {offsets = [0, 1, 2, 0], sizes = [2, 8, 8, 8], strides = [1, 1, 1, 1]} : vector<2x10x10x8xf32> to vector<2x8x8x8xf32>
    %45 = vector.extract_strided_slice %38 {offsets = [0, 2, 0, 0], sizes = [2, 8, 8, 8], strides = [1, 1, 1, 1]} : vector<2x10x10x8xf32> to vector<2x8x8x8xf32>
    %46 = vector.extract_strided_slice %38 {offsets = [0, 2, 1, 0], sizes = [2, 8, 8, 8], strides = [1, 1, 1, 1]} : vector<2x10x10x8xf32> to vector<2x8x8x8xf32>
    %47 = vector.extract_strided_slice %38 {offsets = [0, 2, 2, 0], sizes = [2, 8, 8, 8], strides = [1, 1, 1, 1]} : vector<2x10x10x8xf32> to vector<2x8x8x8xf32>
    %48 = tpu.concatenate %39, %40, %41, %42, %43, %44, %45, %46, %47 in 3 : vector<2x8x8x8xf32>, vector<2x8x8x8xf32>, vector<2x8x8x8xf32>, vector<2x8x8x8xf32>, vector<2x8x8x8xf32>, vector<2x8x8x8xf32>, vector<2x8x8x8xf32>, vector<2x8x8x8xf32>, vector<2x8x8x8xf32> -> vector<2x8x8x72xf32>
    %49 = vector.shape_cast %48 : vector<2x8x8x72xf32> to vector<128x72xf32>
    %cst_20 = arith.constant dense<0.000000e+00> : vector<128x8xf32>
    %50 = tpu.matmul %49, %32, %cst_20 {dimension_numbers = #tpu.dot_dimension_numbers<[1], [0], [0], [1], [0, 0, 1, 1], [], []>} : vector<128x72xf32>, vector<72x8xf32>, vector<128x8xf32> -> vector<128x8xf32>
    %51 = vector.broadcast %33 : vector<1x8xf32> to vector<128x8xf32>
    %52 = arith.mulf %50, %51 : vector<128x8xf32>
    %53 = vector.broadcast %34 : vector<1x8xf32> to vector<128x8xf32>
    %54 = arith.addf %52, %53 : vector<128x8xf32>
    %cst_21 = arith.constant 0.000000e+00 : f32
    %55 = vector.broadcast %cst_21 : f32 to vector<128x8xf32>
    %56 = arith.maximumf %54, %55 : vector<128x8xf32>
    %57 = vector.shape_cast %56 : vector<128x8xf32> to vector<2x8x8x8xf32>
    %58 = vector.shape_cast %57 : vector<2x8x8x8xf32> to vector<8x16x8xf32>
    %59 = vector.extract_strided_slice %58 {offsets = [0, 0, 0], sizes = [8, 8, 8], strides = [1, 1, 1]} : vector<8x16x8xf32> to vector<8x8x8xf32>
    %60 = vector.extract_strided_slice %58 {offsets = [0, 8, 0], sizes = [8, 8, 8], strides = [1, 1, 1]} : vector<8x16x8xf32> to vector<8x8x8xf32>
    %61 = arith.maximumf %59, %60 : vector<8x8x8xf32>
    %62 = vector.shape_cast %61 : vector<8x8x8xf32> to vector<2x4x8x8xf32>
    %63 = vector.extract_strided_slice %62 {offsets = [0, 0, 0, 0], sizes = [2, 1, 8, 8], strides = [1, 1, 1, 1]} : vector<2x4x8x8xf32> to vector<2x1x8x8xf32>
    %64 = vector.shape_cast %63 : vector<2x1x8x8xf32> to vector<2x8x8xf32>
    %65 = vector.extract_strided_slice %62 {offsets = [0, 1, 0, 0], sizes = [2, 1, 8, 8], strides = [1, 1, 1, 1]} : vector<2x4x8x8xf32> to vector<2x1x8x8xf32>
    %66 = vector.shape_cast %65 : vector<2x1x8x8xf32> to vector<2x8x8xf32>
    %67 = vector.extract_strided_slice %62 {offsets = [0, 2, 0, 0], sizes = [2, 1, 8, 8], strides = [1, 1, 1, 1]} : vector<2x4x8x8xf32> to vector<2x1x8x8xf32>
    %68 = vector.shape_cast %67 : vector<2x1x8x8xf32> to vector<2x8x8xf32>
    %69 = vector.extract_strided_slice %62 {offsets = [0, 3, 0, 0], sizes = [2, 1, 8, 8], strides = [1, 1, 1, 1]} : vector<2x4x8x8xf32> to vector<2x1x8x8xf32>
    %70 = vector.shape_cast %69 : vector<2x1x8x8xf32> to vector<2x8x8xf32>
    %71 = tpu.concatenate %64, %66, %68, %70 in 2 : vector<2x8x8xf32>, vector<2x8x8xf32>, vector<2x8x8xf32>, vector<2x8x8xf32> -> vector<2x8x32xf32>
    %c0_22 = arith.constant 0 : index
    %c0_23 = arith.constant 0 : index
    %72 = vector.load %arg8[%c0_22, %c0_23] : memref<32x128xf32, #tpu.memory_space<vmem>>, vector<32x128xf32>
    %c0_24 = arith.constant 0 : index
    %c0_25 = arith.constant 0 : index
    %73 = vector.load %arg9[%c0_24, %c0_25] : memref<32x128xf32, #tpu.memory_space<vmem>>, vector<32x128xf32>
    %c0_26 = arith.constant 0 : index
    %c0_27 = arith.constant 0 : index
    %74 = vector.load %arg10[%c0_26, %c0_27] : memref<1x128xf32, #tpu.memory_space<vmem>>, vector<1x128xf32>
    %c0_28 = arith.constant 0 : index
    %c0_29 = arith.constant 0 : index
    %75 = vector.load %arg11[%c0_28, %c0_29] : memref<32x128xf32, #tpu.memory_space<vmem>>, vector<32x128xf32>
    %c0_30 = arith.constant 0 : index
    %c0_31 = arith.constant 0 : index
    %76 = vector.load %arg12[%c0_30, %c0_31] : memref<32x128xf32, #tpu.memory_space<vmem>>, vector<32x128xf32>
    %c0_32 = arith.constant 0 : index
    %c0_33 = arith.constant 0 : index
    %77 = vector.load %arg13[%c0_32, %c0_33] : memref<1x128xf32, #tpu.memory_space<vmem>>, vector<1x128xf32>
    %78 = vector.shape_cast %71 : vector<2x8x32xf32> to vector<16x32xf32>
    %cst_34 = arith.constant dense<0.000000e+00> : vector<16x128xf32>
    %79 = tpu.matmul %78, %72, %cst_34 {dimension_numbers = #tpu.dot_dimension_numbers<[1], [0], [0], [1], [0, 0, 1, 1], [], []>} : vector<16x32xf32>, vector<32x128xf32>, vector<16x128xf32> -> vector<16x128xf32>
    %80 = vector.broadcast %74 : vector<1x128xf32> to vector<16x128xf32>
    %81 = arith.addf %79, %80 : vector<16x128xf32>
    %82 = vector.shape_cast %81 : vector<16x128xf32> to vector<2x8x128xf32>
    %cst_35 = arith.constant dense<0.000000e+00> : vector<16x128xf32>
    %83 = tpu.matmul %78, %75, %cst_35 {dimension_numbers = #tpu.dot_dimension_numbers<[1], [0], [0], [1], [0, 0, 1, 1], [], []>} : vector<16x32xf32>, vector<32x128xf32>, vector<16x128xf32> -> vector<16x128xf32>
    %84 = vector.broadcast %77 : vector<1x128xf32> to vector<16x128xf32>
    %85 = arith.addf %83, %84 : vector<16x128xf32>
    %86 = vector.shape_cast %85 : vector<16x128xf32> to vector<2x8x128xf32>
    %cst_36 = arith.constant 0.000000e+00 : f32
    %87 = vector.broadcast %cst_36 : f32 to vector<2x32xf32>
    %cst_37 = arith.constant 0.000000e+00 : f32
    %88 = vector.broadcast %cst_37 : f32 to vector<2x32xf32>
    %cst_38 = arith.constant 0.000000e+00 : f32
    %89 = vector.broadcast %cst_38 : f32 to vector<2x32xf32>
    %cst_39 = arith.constant 0.000000e+00 : f32
    %90 = vector.broadcast %cst_39 : f32 to vector<2x32xf32>
    %91 = vector.extract_strided_slice %82 {offsets = [0, 0, 0], sizes = [2, 1, 128], strides = [1, 1, 1]} : vector<2x8x128xf32> to vector<2x1x128xf32>
    %92 = vector.shape_cast %91 : vector<2x1x128xf32> to vector<2x128xf32>
    %cst_40 = arith.constant dense<0.000000e+00> : vector<2x128xf32>
    %93 = tpu.matmul %87, %73, %cst_40 {dimension_numbers = #tpu.dot_dimension_numbers<[1], [0], [0], [1], [0, 0, 1, 1], [], []>} : vector<2x32xf32>, vector<32x128xf32>, vector<2x128xf32> -> vector<2x128xf32>
    %94 = arith.addf %92, %93 : vector<2x128xf32>
    %95 = vector.extract_strided_slice %94 {offsets = [0, 0], sizes = [2, 32], strides = [1, 1]} : vector<2x128xf32> to vector<2x32xf32>
    %96 = arith.negf %95 : vector<2x32xf32>
    %97 = math.exp %96 : vector<2x32xf32>
    %cst_41 = arith.constant 1.000000e+00 : f32
    %98 = vector.broadcast %cst_41 : f32 to vector<2x32xf32>
    %99 = arith.addf %98, %97 : vector<2x32xf32>
    %100 = arith.divf %98, %99 : vector<2x32xf32>
    %101 = vector.extract_strided_slice %94 {offsets = [0, 32], sizes = [2, 32], strides = [1, 1]} : vector<2x128xf32> to vector<2x32xf32>
    %102 = arith.negf %101 : vector<2x32xf32>
    %103 = math.exp %102 : vector<2x32xf32>
    %cst_42 = arith.constant 1.000000e+00 : f32
    %104 = vector.broadcast %cst_42 : f32 to vector<2x32xf32>
    %105 = arith.addf %104, %103 : vector<2x32xf32>
    %106 = arith.divf %104, %105 : vector<2x32xf32>
    %107 = vector.extract_strided_slice %94 {offsets = [0, 64], sizes = [2, 32], strides = [1, 1]} : vector<2x128xf32> to vector<2x32xf32>
    %108 = math.tanh %107 : vector<2x32xf32>
    %109 = vector.extract_strided_slice %94 {offsets = [0, 96], sizes = [2, 32], strides = [1, 1]} : vector<2x128xf32> to vector<2x32xf32>
    %110 = arith.negf %109 : vector<2x32xf32>
    %111 = math.exp %110 : vector<2x32xf32>
    %cst_43 = arith.constant 1.000000e+00 : f32
    %112 = vector.broadcast %cst_43 : f32 to vector<2x32xf32>
    %113 = arith.addf %112, %111 : vector<2x32xf32>
    %114 = arith.divf %112, %113 : vector<2x32xf32>
    %115 = arith.mulf %106, %88 : vector<2x32xf32>
    %116 = arith.mulf %100, %108 : vector<2x32xf32>
    %117 = arith.addf %115, %116 : vector<2x32xf32>
    %118 = math.tanh %117 : vector<2x32xf32>
    %119 = arith.mulf %114, %118 : vector<2x32xf32>
    %c0_44 = arith.constant 0 : index
    %c0_45 = arith.constant 0 : index
    %c0_46 = arith.constant 0 : index
    %120 = vector.load %arg25[%c0_44, %c0_45, %c0_46] : memref<2x8x64xf32, #tpu.memory_space<vmem>>, vector<2x1x32xf32>
    %121 = vector.shape_cast %120 : vector<2x1x32xf32> to vector<2x32xf32>
    %122 = vector.shape_cast %119 : vector<2x32xf32> to vector<2x1x32xf32>
    tpu.vector_store %arg25[%c0_44, %c0_45, %c0_46], %122 {strides = array<i32>} : memref<2x8x64xf32, #tpu.memory_space<vmem>>, vector<2x1x32xf32>,
    %123 = vector.extract_strided_slice %86 {offsets = [0, 7, 0], sizes = [2, 1, 128], strides = [1, 1, 1]} : vector<2x8x128xf32> to vector<2x1x128xf32>
    %124 = vector.shape_cast %123 : vector<2x1x128xf32> to vector<2x128xf32>
    %cst_47 = arith.constant dense<0.000000e+00> : vector<2x128xf32>
    %125 = tpu.matmul %89, %76, %cst_47 {dimension_numbers = #tpu.dot_dimension_numbers<[1], [0], [0], [1], [0, 0, 1, 1], [], []>} : vector<2x32xf32>, vector<32x128xf32>, vector<2x128xf32> -> vector<2x128xf32>
    %126 = arith.addf %124, %125 : vector<2x128xf32>
    %127 = vector.extract_strided_slice %126 {offsets = [0, 0], sizes = [2, 32], strides = [1, 1]} : vector<2x128xf32> to vector<2x32xf32>
    %128 = arith.negf %127 : vector<2x32xf32>
    %129 = math.exp %128 : vector<2x32xf32>
    %cst_48 = arith.constant 1.000000e+00 : f32
    %130 = vector.broadcast %cst_48 : f32 to vector<2x32xf32>
    %131 = arith.addf %130, %129 : vector<2x32xf32>
    %132 = arith.divf %130, %131 : vector<2x32xf32>
    %133 = vector.extract_strided_slice %126 {offsets = [0, 32], sizes = [2, 32], strides = [1, 1]} : vector<2x128xf32> to vector<2x32xf32>
    %134 = arith.negf %133 : vector<2x32xf32>
    %135 = math.exp %134 : vector<2x32xf32>
    %cst_49 = arith.constant 1.000000e+00 : f32
    %136 = vector.broadcast %cst_49 : f32 to vector<2x32xf32>
    %137 = arith.addf %136, %135 : vector<2x32xf32>
    %138 = arith.divf %136, %137 : vector<2x32xf32>
    %139 = vector.extract_strided_slice %126 {offsets = [0, 64], sizes = [2, 32], strides = [1, 1]} : vector<2x128xf32> to vector<2x32xf32>
    %140 = math.tanh %139 : vector<2x32xf32>
    %141 = vector.extract_strided_slice %126 {offsets = [0, 96], sizes = [2, 32], strides = [1, 1]} : vector<2x128xf32> to vector<2x32xf32>
    %142 = arith.negf %141 : vector<2x32xf32>
    %143 = math.exp %142 : vector<2x32xf32>
    %cst_50 = arith.constant 1.000000e+00 : f32
    %144 = vector.broadcast %cst_50 : f32 to vector<2x32xf32>
    %145 = arith.addf %144, %143 : vector<2x32xf32>
    %146 = arith.divf %144, %145 : vector<2x32xf32>
    %147 = arith.mulf %138, %90 : vector<2x32xf32>
    %148 = arith.mulf %132, %140 : vector<2x32xf32>
    %149 = arith.addf %147, %148 : vector<2x32xf32>
    %150 = math.tanh %149 : vector<2x32xf32>
    %151 = arith.mulf %146, %150 : vector<2x32xf32>
    %c0_51 = arith.constant 0 : index
    %c7 = arith.constant 7 : index
    %c32 = arith.constant 32 : index
    %152 = vector.load %arg25[%c0_51, %c7, %c32] : memref<2x8x64xf32, #tpu.memory_space<vmem>>, vector<2x1x32xf32>
    %153 = vector.shape_cast %152 : vector<2x1x32xf32> to vector<2x32xf32>
    %154 = vector.shape_cast %151 : vector<2x32xf32> to vector<2x1x32xf32>
    tpu.vector_store %arg25[%c0_51, %c7, %c32], %154 {strides = array<i32>} : memref<2x8x64xf32, #tpu.memory_space<vmem>>, vector<2x1x32xf32>,
    %155 = vector.extract_strided_slice %82 {offsets = [0, 1, 0], sizes = [2, 1, 128], strides = [1, 1, 1]} : vector<2x8x128xf32> to vector<2x1x128xf32>
    %156 = vector.shape_cast %155 : vector<2x1x128xf32> to vector<2x128xf32>
    %cst_52 = arith.constant dense<0.000000e+00> : vector<2x128xf32>
    %157 = tpu.matmul %119, %73, %cst_52 {dimension_numbers = #tpu.dot_dimension_numbers<[1], [0], [0], [1], [0, 0, 1, 1], [], []>} : vector<2x32xf32>, vector<32x128xf32>, vector<2x128xf32> -> vector<2x128xf32>
    %158 = arith.addf %156, %157 : vector<2x128xf32>
    %159 = vector.extract_strided_slice %158 {offsets = [0, 0], sizes = [2, 32], strides = [1, 1]} : vector<2x128xf32> to vector<2x32xf32>
    %160 = arith.negf %159 : vector<2x32xf32>
    %161 = math.exp %160 : vector<2x32xf32>
    %cst_53 = arith.constant 1.000000e+00 : f32
    %162 = vector.broadcast %cst_53 : f32 to vector<2x32xf32>
    %163 = arith.addf %162, %161 : vector<2x32xf32>
    %164 = arith.divf %162, %163 : vector<2x32xf32>
    %165 = vector.extract_strided_slice %158 {offsets = [0, 32], sizes = [2, 32], strides = [1, 1]} : vector<2x128xf32> to vector<2x32xf32>
    %166 = arith.negf %165 : vector<2x32xf32>
    %167 = math.exp %166 : vector<2x32xf32>
    %cst_54 = arith.constant 1.000000e+00 : f32
    %168 = vector.broadcast %cst_54 : f32 to vector<2x32xf32>
    %169 = arith.addf %168, %167 : vector<2x32xf32>
    %170 = arith.divf %168, %169 : vector<2x32xf32>
    %171 = vector.extract_strided_slice %158 {offsets = [0, 64], sizes = [2, 32], strides = [1, 1]} : vector<2x128xf32> to vector<2x32xf32>
    %172 = math.tanh %171 : vector<2x32xf32>
    %173 = vector.extract_strided_slice %158 {offsets = [0, 96], sizes = [2, 32], strides = [1, 1]} : vector<2x128xf32> to vector<2x32xf32>
    %174 = arith.negf %173 : vector<2x32xf32>
    %175 = math.exp %174 : vector<2x32xf32>
    %cst_55 = arith.constant 1.000000e+00 : f32
    %176 = vector.broadcast %cst_55 : f32 to vector<2x32xf32>
    %177 = arith.addf %176, %175 : vector<2x32xf32>
    %178 = arith.divf %176, %177 : vector<2x32xf32>
    %179 = arith.mulf %170, %117 : vector<2x32xf32>
    %180 = arith.mulf %164, %172 : vector<2x32xf32>
    %181 = arith.addf %179, %180 : vector<2x32xf32>
    %182 = math.tanh %181 : vector<2x32xf32>
    %183 = arith.mulf %178, %182 : vector<2x32xf32>
    %c0_56 = arith.constant 0 : index
    %c1 = arith.constant 1 : index
    %c0_57 = arith.constant 0 : index
    %184 = vector.load %arg25[%c0_56, %c1, %c0_57] : memref<2x8x64xf32, #tpu.memory_space<vmem>>, vector<2x1x32xf32>
    %185 = vector.shape_cast %184 : vector<2x1x32xf32> to vector<2x32xf32>
    %186 = vector.shape_cast %183 : vector<2x32xf32> to vector<2x1x32xf32>
    tpu.vector_store %arg25[%c0_56, %c1, %c0_57], %186 {strides = array<i32>} : memref<2x8x64xf32, #tpu.memory_space<vmem>>, vector<2x1x32xf32>,
    %187 = vector.extract_strided_slice %86 {offsets = [0, 6, 0], sizes = [2, 1, 128], strides = [1, 1, 1]} : vector<2x8x128xf32> to vector<2x1x128xf32>
    %188 = vector.shape_cast %187 : vector<2x1x128xf32> to vector<2x128xf32>
    %cst_58 = arith.constant dense<0.000000e+00> : vector<2x128xf32>
    %189 = tpu.matmul %151, %76, %cst_58 {dimension_numbers = #tpu.dot_dimension_numbers<[1], [0], [0], [1], [0, 0, 1, 1], [], []>} : vector<2x32xf32>, vector<32x128xf32>, vector<2x128xf32> -> vector<2x128xf32>
    %190 = arith.addf %188, %189 : vector<2x128xf32>
    %191 = vector.extract_strided_slice %190 {offsets = [0, 0], sizes = [2, 32], strides = [1, 1]} : vector<2x128xf32> to vector<2x32xf32>
    %192 = arith.negf %191 : vector<2x32xf32>
    %193 = math.exp %192 : vector<2x32xf32>
    %cst_59 = arith.constant 1.000000e+00 : f32
    %194 = vector.broadcast %cst_59 : f32 to vector<2x32xf32>
    %195 = arith.addf %194, %193 : vector<2x32xf32>
    %196 = arith.divf %194, %195 : vector<2x32xf32>
    %197 = vector.extract_strided_slice %190 {offsets = [0, 32], sizes = [2, 32], strides = [1, 1]} : vector<2x128xf32> to vector<2x32xf32>
    %198 = arith.negf %197 : vector<2x32xf32>
    %199 = math.exp %198 : vector<2x32xf32>
    %cst_60 = arith.constant 1.000000e+00 : f32
    %200 = vector.broadcast %cst_60 : f32 to vector<2x32xf32>
    %201 = arith.addf %200, %199 : vector<2x32xf32>
    %202 = arith.divf %200, %201 : vector<2x32xf32>
    %203 = vector.extract_strided_slice %190 {offsets = [0, 64], sizes = [2, 32], strides = [1, 1]} : vector<2x128xf32> to vector<2x32xf32>
    %204 = math.tanh %203 : vector<2x32xf32>
    %205 = vector.extract_strided_slice %190 {offsets = [0, 96], sizes = [2, 32], strides = [1, 1]} : vector<2x128xf32> to vector<2x32xf32>
    %206 = arith.negf %205 : vector<2x32xf32>
    %207 = math.exp %206 : vector<2x32xf32>
    %cst_61 = arith.constant 1.000000e+00 : f32
    %208 = vector.broadcast %cst_61 : f32 to vector<2x32xf32>
    %209 = arith.addf %208, %207 : vector<2x32xf32>
    %210 = arith.divf %208, %209 : vector<2x32xf32>
    %211 = arith.mulf %202, %149 : vector<2x32xf32>
    %212 = arith.mulf %196, %204 : vector<2x32xf32>
    %213 = arith.addf %211, %212 : vector<2x32xf32>
    %214 = math.tanh %213 : vector<2x32xf32>
    %215 = arith.mulf %210, %214 : vector<2x32xf32>
    %c0_62 = arith.constant 0 : index
    %c6 = arith.constant 6 : index
    %c32_63 = arith.constant 32 : index
    %216 = vector.load %arg25[%c0_62, %c6, %c32_63] : memref<2x8x64xf32, #tpu.memory_space<vmem>>, vector<2x1x32xf32>
    %217 = vector.shape_cast %216 : vector<2x1x32xf32> to vector<2x32xf32>
    %218 = vector.shape_cast %215 : vector<2x32xf32> to vector<2x1x32xf32>
    tpu.vector_store %arg25[%c0_62, %c6, %c32_63], %218 {strides = array<i32>} : memref<2x8x64xf32, #tpu.memory_space<vmem>>, vector<2x1x32xf32>,
    %219 = vector.extract_strided_slice %82 {offsets = [0, 2, 0], sizes = [2, 1, 128], strides = [1, 1, 1]} : vector<2x8x128xf32> to vector<2x1x128xf32>
    %220 = vector.shape_cast %219 : vector<2x1x128xf32> to vector<2x128xf32>
    %cst_64 = arith.constant dense<0.000000e+00> : vector<2x128xf32>
    %221 = tpu.matmul %183, %73, %cst_64 {dimension_numbers = #tpu.dot_dimension_numbers<[1], [0], [0], [1], [0, 0, 1, 1], [], []>} : vector<2x32xf32>, vector<32x128xf32>, vector<2x128xf32> -> vector<2x128xf32>
    %222 = arith.addf %220, %221 : vector<2x128xf32>
    %223 = vector.extract_strided_slice %222 {offsets = [0, 0], sizes = [2, 32], strides = [1, 1]} : vector<2x128xf32> to vector<2x32xf32>
    %224 = arith.negf %223 : vector<2x32xf32>
    %225 = math.exp %224 : vector<2x32xf32>
    %cst_65 = arith.constant 1.000000e+00 : f32
    %226 = vector.broadcast %cst_65 : f32 to vector<2x32xf32>
    %227 = arith.addf %226, %225 : vector<2x32xf32>
    %228 = arith.divf %226, %227 : vector<2x32xf32>
    %229 = vector.extract_strided_slice %222 {offsets = [0, 32], sizes = [2, 32], strides = [1, 1]} : vector<2x128xf32> to vector<2x32xf32>
    %230 = arith.negf %229 : vector<2x32xf32>
    %231 = math.exp %230 : vector<2x32xf32>
    %cst_66 = arith.constant 1.000000e+00 : f32
    %232 = vector.broadcast %cst_66 : f32 to vector<2x32xf32>
    %233 = arith.addf %232, %231 : vector<2x32xf32>
    %234 = arith.divf %232, %233 : vector<2x32xf32>
    %235 = vector.extract_strided_slice %222 {offsets = [0, 64], sizes = [2, 32], strides = [1, 1]} : vector<2x128xf32> to vector<2x32xf32>
    %236 = math.tanh %235 : vector<2x32xf32>
    %237 = vector.extract_strided_slice %222 {offsets = [0, 96], sizes = [2, 32], strides = [1, 1]} : vector<2x128xf32> to vector<2x32xf32>
    %238 = arith.negf %237 : vector<2x32xf32>
    %239 = math.exp %238 : vector<2x32xf32>
    %cst_67 = arith.constant 1.000000e+00 : f32
    %240 = vector.broadcast %cst_67 : f32 to vector<2x32xf32>
    %241 = arith.addf %240, %239 : vector<2x32xf32>
    %242 = arith.divf %240, %241 : vector<2x32xf32>
    %243 = arith.mulf %234, %181 : vector<2x32xf32>
    %244 = arith.mulf %228, %236 : vector<2x32xf32>
    %245 = arith.addf %243, %244 : vector<2x32xf32>
    %246 = math.tanh %245 : vector<2x32xf32>
    %247 = arith.mulf %242, %246 : vector<2x32xf32>
    %c0_68 = arith.constant 0 : index
    %c2 = arith.constant 2 : index
    %c0_69 = arith.constant 0 : index
    %248 = vector.load %arg25[%c0_68, %c2, %c0_69] : memref<2x8x64xf32, #tpu.memory_space<vmem>>, vector<2x1x32xf32>
    %249 = vector.shape_cast %248 : vector<2x1x32xf32> to vector<2x32xf32>
    %250 = vector.shape_cast %247 : vector<2x32xf32> to vector<2x1x32xf32>
    tpu.vector_store %arg25[%c0_68, %c2, %c0_69], %250 {strides = array<i32>} : memref<2x8x64xf32, #tpu.memory_space<vmem>>, vector<2x1x32xf32>,
    %251 = vector.extract_strided_slice %86 {offsets = [0, 5, 0], sizes = [2, 1, 128], strides = [1, 1, 1]} : vector<2x8x128xf32> to vector<2x1x128xf32>
    %252 = vector.shape_cast %251 : vector<2x1x128xf32> to vector<2x128xf32>
    %cst_70 = arith.constant dense<0.000000e+00> : vector<2x128xf32>
    %253 = tpu.matmul %215, %76, %cst_70 {dimension_numbers = #tpu.dot_dimension_numbers<[1], [0], [0], [1], [0, 0, 1, 1], [], []>} : vector<2x32xf32>, vector<32x128xf32>, vector<2x128xf32> -> vector<2x128xf32>
    %254 = arith.addf %252, %253 : vector<2x128xf32>
    %255 = vector.extract_strided_slice %254 {offsets = [0, 0], sizes = [2, 32], strides = [1, 1]} : vector<2x128xf32> to vector<2x32xf32>
    %256 = arith.negf %255 : vector<2x32xf32>
    %257 = math.exp %256 : vector<2x32xf32>
    %cst_71 = arith.constant 1.000000e+00 : f32
    %258 = vector.broadcast %cst_71 : f32 to vector<2x32xf32>
    %259 = arith.addf %258, %257 : vector<2x32xf32>
    %260 = arith.divf %258, %259 : vector<2x32xf32>
    %261 = vector.extract_strided_slice %254 {offsets = [0, 32], sizes = [2, 32], strides = [1, 1]} : vector<2x128xf32> to vector<2x32xf32>
    %262 = arith.negf %261 : vector<2x32xf32>
    %263 = math.exp %262 : vector<2x32xf32>
    %cst_72 = arith.constant 1.000000e+00 : f32
    %264 = vector.broadcast %cst_72 : f32 to vector<2x32xf32>
    %265 = arith.addf %264, %263 : vector<2x32xf32>
    %266 = arith.divf %264, %265 : vector<2x32xf32>
    %267 = vector.extract_strided_slice %254 {offsets = [0, 64], sizes = [2, 32], strides = [1, 1]} : vector<2x128xf32> to vector<2x32xf32>
    %268 = math.tanh %267 : vector<2x32xf32>
    %269 = vector.extract_strided_slice %254 {offsets = [0, 96], sizes = [2, 32], strides = [1, 1]} : vector<2x128xf32> to vector<2x32xf32>
    %270 = arith.negf %269 : vector<2x32xf32>
    %271 = math.exp %270 : vector<2x32xf32>
    %cst_73 = arith.constant 1.000000e+00 : f32
    %272 = vector.broadcast %cst_73 : f32 to vector<2x32xf32>
    %273 = arith.addf %272, %271 : vector<2x32xf32>
    %274 = arith.divf %272, %273 : vector<2x32xf32>
    %275 = arith.mulf %266, %213 : vector<2x32xf32>
    %276 = arith.mulf %260, %268 : vector<2x32xf32>
    %277 = arith.addf %275, %276 : vector<2x32xf32>
    %278 = math.tanh %277 : vector<2x32xf32>
    %279 = arith.mulf %274, %278 : vector<2x32xf32>
    %c0_74 = arith.constant 0 : index
    %c5 = arith.constant 5 : index
    %c32_75 = arith.constant 32 : index
    %280 = vector.load %arg25[%c0_74, %c5, %c32_75] : memref<2x8x64xf32, #tpu.memory_space<vmem>>, vector<2x1x32xf32>
    %281 = vector.shape_cast %280 : vector<2x1x32xf32> to vector<2x32xf32>
    %282 = vector.shape_cast %279 : vector<2x32xf32> to vector<2x1x32xf32>
    tpu.vector_store %arg25[%c0_74, %c5, %c32_75], %282 {strides = array<i32>} : memref<2x8x64xf32, #tpu.memory_space<vmem>>, vector<2x1x32xf32>,
    %283 = vector.extract_strided_slice %82 {offsets = [0, 3, 0], sizes = [2, 1, 128], strides = [1, 1, 1]} : vector<2x8x128xf32> to vector<2x1x128xf32>
    %284 = vector.shape_cast %283 : vector<2x1x128xf32> to vector<2x128xf32>
    %cst_76 = arith.constant dense<0.000000e+00> : vector<2x128xf32>
    %285 = tpu.matmul %247, %73, %cst_76 {dimension_numbers = #tpu.dot_dimension_numbers<[1], [0], [0], [1], [0, 0, 1, 1], [], []>} : vector<2x32xf32>, vector<32x128xf32>, vector<2x128xf32> -> vector<2x128xf32>
    %286 = arith.addf %284, %285 : vector<2x128xf32>
    %287 = vector.extract_strided_slice %286 {offsets = [0, 0], sizes = [2, 32], strides = [1, 1]} : vector<2x128xf32> to vector<2x32xf32>
    %288 = arith.negf %287 : vector<2x32xf32>
    %289 = math.exp %288 : vector<2x32xf32>
    %cst_77 = arith.constant 1.000000e+00 : f32
    %290 = vector.broadcast %cst_77 : f32 to vector<2x32xf32>
    %291 = arith.addf %290, %289 : vector<2x32xf32>
    %292 = arith.divf %290, %291 : vector<2x32xf32>
    %293 = vector.extract_strided_slice %286 {offsets = [0, 32], sizes = [2, 32], strides = [1, 1]} : vector<2x128xf32> to vector<2x32xf32>
    %294 = arith.negf %293 : vector<2x32xf32>
    %295 = math.exp %294 : vector<2x32xf32>
    %cst_78 = arith.constant 1.000000e+00 : f32
    %296 = vector.broadcast %cst_78 : f32 to vector<2x32xf32>
    %297 = arith.addf %296, %295 : vector<2x32xf32>
    %298 = arith.divf %296, %297 : vector<2x32xf32>
    %299 = vector.extract_strided_slice %286 {offsets = [0, 64], sizes = [2, 32], strides = [1, 1]} : vector<2x128xf32> to vector<2x32xf32>
    %300 = math.tanh %299 : vector<2x32xf32>
    %301 = vector.extract_strided_slice %286 {offsets = [0, 96], sizes = [2, 32], strides = [1, 1]} : vector<2x128xf32> to vector<2x32xf32>
    %302 = arith.negf %301 : vector<2x32xf32>
    %303 = math.exp %302 : vector<2x32xf32>
    %cst_79 = arith.constant 1.000000e+00 : f32
    %304 = vector.broadcast %cst_79 : f32 to vector<2x32xf32>
    %305 = arith.addf %304, %303 : vector<2x32xf32>
    %306 = arith.divf %304, %305 : vector<2x32xf32>
    %307 = arith.mulf %298, %245 : vector<2x32xf32>
    %308 = arith.mulf %292, %300 : vector<2x32xf32>
    %309 = arith.addf %307, %308 : vector<2x32xf32>
    %310 = math.tanh %309 : vector<2x32xf32>
    %311 = arith.mulf %306, %310 : vector<2x32xf32>
    %c0_80 = arith.constant 0 : index
    %c3 = arith.constant 3 : index
    %c0_81 = arith.constant 0 : index
    %312 = vector.load %arg25[%c0_80, %c3, %c0_81] : memref<2x8x64xf32, #tpu.memory_space<vmem>>, vector<2x1x32xf32>
    %313 = vector.shape_cast %312 : vector<2x1x32xf32> to vector<2x32xf32>
    %314 = vector.shape_cast %311 : vector<2x32xf32> to vector<2x1x32xf32>
    tpu.vector_store %arg25[%c0_80, %c3, %c0_81], %314 {strides = array<i32>} : memref<2x8x64xf32, #tpu.memory_space<vmem>>, vector<2x1x32xf32>,
    %315 = vector.extract_strided_slice %86 {offsets = [0, 4, 0], sizes = [2, 1, 128], strides = [1, 1, 1]} : vector<2x8x128xf32> to vector<2x1x128xf32>
    %316 = vector.shape_cast %315 : vector<2x1x128xf32> to vector<2x128xf32>
    %cst_82 = arith.constant dense<0.000000e+00> : vector<2x128xf32>
    %317 = tpu.matmul %279, %76, %cst_82 {dimension_numbers = #tpu.dot_dimension_numbers<[1], [0], [0], [1], [0, 0, 1, 1], [], []>} : vector<2x32xf32>, vector<32x128xf32>, vector<2x128xf32> -> vector<2x128xf32>
    %318 = arith.addf %316, %317 : vector<2x128xf32>
    %319 = vector.extract_strided_slice %318 {offsets = [0, 0], sizes = [2, 32], strides = [1, 1]} : vector<2x128xf32> to vector<2x32xf32>
    %320 = arith.negf %319 : vector<2x32xf32>
    %321 = math.exp %320 : vector<2x32xf32>
    %cst_83 = arith.constant 1.000000e+00 : f32
    %322 = vector.broadcast %cst_83 : f32 to vector<2x32xf32>
    %323 = arith.addf %322, %321 : vector<2x32xf32>
    %324 = arith.divf %322, %323 : vector<2x32xf32>
    %325 = vector.extract_strided_slice %318 {offsets = [0, 32], sizes = [2, 32], strides = [1, 1]} : vector<2x128xf32> to vector<2x32xf32>
    %326 = arith.negf %325 : vector<2x32xf32>
    %327 = math.exp %326 : vector<2x32xf32>
    %cst_84 = arith.constant 1.000000e+00 : f32
    %328 = vector.broadcast %cst_84 : f32 to vector<2x32xf32>
    %329 = arith.addf %328, %327 : vector<2x32xf32>
    %330 = arith.divf %328, %329 : vector<2x32xf32>
    %331 = vector.extract_strided_slice %318 {offsets = [0, 64], sizes = [2, 32], strides = [1, 1]} : vector<2x128xf32> to vector<2x32xf32>
    %332 = math.tanh %331 : vector<2x32xf32>
    %333 = vector.extract_strided_slice %318 {offsets = [0, 96], sizes = [2, 32], strides = [1, 1]} : vector<2x128xf32> to vector<2x32xf32>
    %334 = arith.negf %333 : vector<2x32xf32>
    %335 = math.exp %334 : vector<2x32xf32>
    %cst_85 = arith.constant 1.000000e+00 : f32
    %336 = vector.broadcast %cst_85 : f32 to vector<2x32xf32>
    %337 = arith.addf %336, %335 : vector<2x32xf32>
    %338 = arith.divf %336, %337 : vector<2x32xf32>
    %339 = arith.mulf %330, %277 : vector<2x32xf32>
    %340 = arith.mulf %324, %332 : vector<2x32xf32>
    %341 = arith.addf %339, %340 : vector<2x32xf32>
    %342 = math.tanh %341 : vector<2x32xf32>
    %343 = arith.mulf %338, %342 : vector<2x32xf32>
    %c0_86 = arith.constant 0 : index
    %c4 = arith.constant 4 : index
    %c32_87 = arith.constant 32 : index
    %344 = vector.load %arg25[%c0_86, %c4, %c32_87] : memref<2x8x64xf32, #tpu.memory_space<vmem>>, vector<2x1x32xf32>
    %345 = vector.shape_cast %344 : vector<2x1x32xf32> to vector<2x32xf32>
    %346 = vector.shape_cast %343 : vector<2x32xf32> to vector<2x1x32xf32>
    tpu.vector_store %arg25[%c0_86, %c4, %c32_87], %346 {strides = array<i32>} : memref<2x8x64xf32, #tpu.memory_space<vmem>>, vector<2x1x32xf32>,
    %347 = vector.extract_strided_slice %82 {offsets = [0, 4, 0], sizes = [2, 1, 128], strides = [1, 1, 1]} : vector<2x8x128xf32> to vector<2x1x128xf32>
    %348 = vector.shape_cast %347 : vector<2x1x128xf32> to vector<2x128xf32>
    %cst_88 = arith.constant dense<0.000000e+00> : vector<2x128xf32>
    %349 = tpu.matmul %311, %73, %cst_88 {dimension_numbers = #tpu.dot_dimension_numbers<[1], [0], [0], [1], [0, 0, 1, 1], [], []>} : vector<2x32xf32>, vector<32x128xf32>, vector<2x128xf32> -> vector<2x128xf32>
    %350 = arith.addf %348, %349 : vector<2x128xf32>
    %351 = vector.extract_strided_slice %350 {offsets = [0, 0], sizes = [2, 32], strides = [1, 1]} : vector<2x128xf32> to vector<2x32xf32>
    %352 = arith.negf %351 : vector<2x32xf32>
    %353 = math.exp %352 : vector<2x32xf32>
    %cst_89 = arith.constant 1.000000e+00 : f32
    %354 = vector.broadcast %cst_89 : f32 to vector<2x32xf32>
    %355 = arith.addf %354, %353 : vector<2x32xf32>
    %356 = arith.divf %354, %355 : vector<2x32xf32>
    %357 = vector.extract_strided_slice %350 {offsets = [0, 32], sizes = [2, 32], strides = [1, 1]} : vector<2x128xf32> to vector<2x32xf32>
    %358 = arith.negf %357 : vector<2x32xf32>
    %359 = math.exp %358 : vector<2x32xf32>
    %cst_90 = arith.constant 1.000000e+00 : f32
    %360 = vector.broadcast %cst_90 : f32 to vector<2x32xf32>
    %361 = arith.addf %360, %359 : vector<2x32xf32>
    %362 = arith.divf %360, %361 : vector<2x32xf32>
    %363 = vector.extract_strided_slice %350 {offsets = [0, 64], sizes = [2, 32], strides = [1, 1]} : vector<2x128xf32> to vector<2x32xf32>
    %364 = math.tanh %363 : vector<2x32xf32>
    %365 = vector.extract_strided_slice %350 {offsets = [0, 96], sizes = [2, 32], strides = [1, 1]} : vector<2x128xf32> to vector<2x32xf32>
    %366 = arith.negf %365 : vector<2x32xf32>
    %367 = math.exp %366 : vector<2x32xf32>
    %cst_91 = arith.constant 1.000000e+00 : f32
    %368 = vector.broadcast %cst_91 : f32 to vector<2x32xf32>
    %369 = arith.addf %368, %367 : vector<2x32xf32>
    %370 = arith.divf %368, %369 : vector<2x32xf32>
    %371 = arith.mulf %362, %309 : vector<2x32xf32>
    %372 = arith.mulf %356, %364 : vector<2x32xf32>
    %373 = arith.addf %371, %372 : vector<2x32xf32>
    %374 = math.tanh %373 : vector<2x32xf32>
    %375 = arith.mulf %370, %374 : vector<2x32xf32>
    %c0_92 = arith.constant 0 : index
    %c4_93 = arith.constant 4 : index
    %c0_94 = arith.constant 0 : index
    %376 = vector.load %arg25[%c0_92, %c4_93, %c0_94] : memref<2x8x64xf32, #tpu.memory_space<vmem>>, vector<2x1x32xf32>
    %377 = vector.shape_cast %376 : vector<2x1x32xf32> to vector<2x32xf32>
    %378 = vector.shape_cast %375 : vector<2x32xf32> to vector<2x1x32xf32>
    tpu.vector_store %arg25[%c0_92, %c4_93, %c0_94], %378 {strides = array<i32>} : memref<2x8x64xf32, #tpu.memory_space<vmem>>, vector<2x1x32xf32>,
    %379 = vector.extract_strided_slice %86 {offsets = [0, 3, 0], sizes = [2, 1, 128], strides = [1, 1, 1]} : vector<2x8x128xf32> to vector<2x1x128xf32>
    %380 = vector.shape_cast %379 : vector<2x1x128xf32> to vector<2x128xf32>
    %cst_95 = arith.constant dense<0.000000e+00> : vector<2x128xf32>
    %381 = tpu.matmul %343, %76, %cst_95 {dimension_numbers = #tpu.dot_dimension_numbers<[1], [0], [0], [1], [0, 0, 1, 1], [], []>} : vector<2x32xf32>, vector<32x128xf32>, vector<2x128xf32> -> vector<2x128xf32>
    %382 = arith.addf %380, %381 : vector<2x128xf32>
    %383 = vector.extract_strided_slice %382 {offsets = [0, 0], sizes = [2, 32], strides = [1, 1]} : vector<2x128xf32> to vector<2x32xf32>
    %384 = arith.negf %383 : vector<2x32xf32>
    %385 = math.exp %384 : vector<2x32xf32>
    %cst_96 = arith.constant 1.000000e+00 : f32
    %386 = vector.broadcast %cst_96 : f32 to vector<2x32xf32>
    %387 = arith.addf %386, %385 : vector<2x32xf32>
    %388 = arith.divf %386, %387 : vector<2x32xf32>
    %389 = vector.extract_strided_slice %382 {offsets = [0, 32], sizes = [2, 32], strides = [1, 1]} : vector<2x128xf32> to vector<2x32xf32>
    %390 = arith.negf %389 : vector<2x32xf32>
    %391 = math.exp %390 : vector<2x32xf32>
    %cst_97 = arith.constant 1.000000e+00 : f32
    %392 = vector.broadcast %cst_97 : f32 to vector<2x32xf32>
    %393 = arith.addf %392, %391 : vector<2x32xf32>
    %394 = arith.divf %392, %393 : vector<2x32xf32>
    %395 = vector.extract_strided_slice %382 {offsets = [0, 64], sizes = [2, 32], strides = [1, 1]} : vector<2x128xf32> to vector<2x32xf32>
    %396 = math.tanh %395 : vector<2x32xf32>
    %397 = vector.extract_strided_slice %382 {offsets = [0, 96], sizes = [2, 32], strides = [1, 1]} : vector<2x128xf32> to vector<2x32xf32>
    %398 = arith.negf %397 : vector<2x32xf32>
    %399 = math.exp %398 : vector<2x32xf32>
    %cst_98 = arith.constant 1.000000e+00 : f32
    %400 = vector.broadcast %cst_98 : f32 to vector<2x32xf32>
    %401 = arith.addf %400, %399 : vector<2x32xf32>
    %402 = arith.divf %400, %401 : vector<2x32xf32>
    %403 = arith.mulf %394, %341 : vector<2x32xf32>
    %404 = arith.mulf %388, %396 : vector<2x32xf32>
    %405 = arith.addf %403, %404 : vector<2x32xf32>
    %406 = math.tanh %405 : vector<2x32xf32>
    %407 = arith.mulf %402, %406 : vector<2x32xf32>
    %c0_99 = arith.constant 0 : index
    %c3_100 = arith.constant 3 : index
    %c32_101 = arith.constant 32 : index
    %408 = vector.load %arg25[%c0_99, %c3_100, %c32_101] : memref<2x8x64xf32, #tpu.memory_space<vmem>>, vector<2x1x32xf32>
    %409 = vector.shape_cast %408 : vector<2x1x32xf32> to vector<2x32xf32>
    %410 = vector.shape_cast %407 : vector<2x32xf32> to vector<2x1x32xf32>
    tpu.vector_store %arg25[%c0_99, %c3_100, %c32_101], %410 {strides = array<i32>} : memref<2x8x64xf32, #tpu.memory_space<vmem>>, vector<2x1x32xf32>,
    %411 = vector.extract_strided_slice %82 {offsets = [0, 5, 0], sizes = [2, 1, 128], strides = [1, 1, 1]} : vector<2x8x128xf32> to vector<2x1x128xf32>
    %412 = vector.shape_cast %411 : vector<2x1x128xf32> to vector<2x128xf32>
    %cst_102 = arith.constant dense<0.000000e+00> : vector<2x128xf32>
    %413 = tpu.matmul %375, %73, %cst_102 {dimension_numbers = #tpu.dot_dimension_numbers<[1], [0], [0], [1], [0, 0, 1, 1], [], []>} : vector<2x32xf32>, vector<32x128xf32>, vector<2x128xf32> -> vector<2x128xf32>
    %414 = arith.addf %412, %413 : vector<2x128xf32>
    %415 = vector.extract_strided_slice %414 {offsets = [0, 0], sizes = [2, 32], strides = [1, 1]} : vector<2x128xf32> to vector<2x32xf32>
    %416 = arith.negf %415 : vector<2x32xf32>
    %417 = math.exp %416 : vector<2x32xf32>
    %cst_103 = arith.constant 1.000000e+00 : f32
    %418 = vector.broadcast %cst_103 : f32 to vector<2x32xf32>
    %419 = arith.addf %418, %417 : vector<2x32xf32>
    %420 = arith.divf %418, %419 : vector<2x32xf32>
    %421 = vector.extract_strided_slice %414 {offsets = [0, 32], sizes = [2, 32], strides = [1, 1]} : vector<2x128xf32> to vector<2x32xf32>
    %422 = arith.negf %421 : vector<2x32xf32>
    %423 = math.exp %422 : vector<2x32xf32>
    %cst_104 = arith.constant 1.000000e+00 : f32
    %424 = vector.broadcast %cst_104 : f32 to vector<2x32xf32>
    %425 = arith.addf %424, %423 : vector<2x32xf32>
    %426 = arith.divf %424, %425 : vector<2x32xf32>
    %427 = vector.extract_strided_slice %414 {offsets = [0, 64], sizes = [2, 32], strides = [1, 1]} : vector<2x128xf32> to vector<2x32xf32>
    %428 = math.tanh %427 : vector<2x32xf32>
    %429 = vector.extract_strided_slice %414 {offsets = [0, 96], sizes = [2, 32], strides = [1, 1]} : vector<2x128xf32> to vector<2x32xf32>
    %430 = arith.negf %429 : vector<2x32xf32>
    %431 = math.exp %430 : vector<2x32xf32>
    %cst_105 = arith.constant 1.000000e+00 : f32
    %432 = vector.broadcast %cst_105 : f32 to vector<2x32xf32>
    %433 = arith.addf %432, %431 : vector<2x32xf32>
    %434 = arith.divf %432, %433 : vector<2x32xf32>
    %435 = arith.mulf %426, %373 : vector<2x32xf32>
    %436 = arith.mulf %420, %428 : vector<2x32xf32>
    %437 = arith.addf %435, %436 : vector<2x32xf32>
    %438 = math.tanh %437 : vector<2x32xf32>
    %439 = arith.mulf %434, %438 : vector<2x32xf32>
    %c0_106 = arith.constant 0 : index
    %c5_107 = arith.constant 5 : index
    %c0_108 = arith.constant 0 : index
    %440 = vector.load %arg25[%c0_106, %c5_107, %c0_108] : memref<2x8x64xf32, #tpu.memory_space<vmem>>, vector<2x1x32xf32>
    %441 = vector.shape_cast %440 : vector<2x1x32xf32> to vector<2x32xf32>
    %442 = vector.shape_cast %439 : vector<2x32xf32> to vector<2x1x32xf32>
    tpu.vector_store %arg25[%c0_106, %c5_107, %c0_108], %442 {strides = array<i32>} : memref<2x8x64xf32, #tpu.memory_space<vmem>>, vector<2x1x32xf32>,
    %443 = vector.extract_strided_slice %86 {offsets = [0, 2, 0], sizes = [2, 1, 128], strides = [1, 1, 1]} : vector<2x8x128xf32> to vector<2x1x128xf32>
    %444 = vector.shape_cast %443 : vector<2x1x128xf32> to vector<2x128xf32>
    %cst_109 = arith.constant dense<0.000000e+00> : vector<2x128xf32>
    %445 = tpu.matmul %407, %76, %cst_109 {dimension_numbers = #tpu.dot_dimension_numbers<[1], [0], [0], [1], [0, 0, 1, 1], [], []>} : vector<2x32xf32>, vector<32x128xf32>, vector<2x128xf32> -> vector<2x128xf32>
    %446 = arith.addf %444, %445 : vector<2x128xf32>
    %447 = vector.extract_strided_slice %446 {offsets = [0, 0], sizes = [2, 32], strides = [1, 1]} : vector<2x128xf32> to vector<2x32xf32>
    %448 = arith.negf %447 : vector<2x32xf32>
    %449 = math.exp %448 : vector<2x32xf32>
    %cst_110 = arith.constant 1.000000e+00 : f32
    %450 = vector.broadcast %cst_110 : f32 to vector<2x32xf32>
    %451 = arith.addf %450, %449 : vector<2x32xf32>
    %452 = arith.divf %450, %451 : vector<2x32xf32>
    %453 = vector.extract_strided_slice %446 {offsets = [0, 32], sizes = [2, 32], strides = [1, 1]} : vector<2x128xf32> to vector<2x32xf32>
    %454 = arith.negf %453 : vector<2x32xf32>
    %455 = math.exp %454 : vector<2x32xf32>
    %cst_111 = arith.constant 1.000000e+00 : f32
    %456 = vector.broadcast %cst_111 : f32 to vector<2x32xf32>
    %457 = arith.addf %456, %455 : vector<2x32xf32>
    %458 = arith.divf %456, %457 : vector<2x32xf32>
    %459 = vector.extract_strided_slice %446 {offsets = [0, 64], sizes = [2, 32], strides = [1, 1]} : vector<2x128xf32> to vector<2x32xf32>
    %460 = math.tanh %459 : vector<2x32xf32>
    %461 = vector.extract_strided_slice %446 {offsets = [0, 96], sizes = [2, 32], strides = [1, 1]} : vector<2x128xf32> to vector<2x32xf32>
    %462 = arith.negf %461 : vector<2x32xf32>
    %463 = math.exp %462 : vector<2x32xf32>
    %cst_112 = arith.constant 1.000000e+00 : f32
    %464 = vector.broadcast %cst_112 : f32 to vector<2x32xf32>
    %465 = arith.addf %464, %463 : vector<2x32xf32>
    %466 = arith.divf %464, %465 : vector<2x32xf32>
    %467 = arith.mulf %458, %405 : vector<2x32xf32>
    %468 = arith.mulf %452, %460 : vector<2x32xf32>
    %469 = arith.addf %467, %468 : vector<2x32xf32>
    %470 = math.tanh %469 : vector<2x32xf32>
    %471 = arith.mulf %466, %470 : vector<2x32xf32>
    %c0_113 = arith.constant 0 : index
    %c2_114 = arith.constant 2 : index
    %c32_115 = arith.constant 32 : index
    %472 = vector.load %arg25[%c0_113, %c2_114, %c32_115] : memref<2x8x64xf32, #tpu.memory_space<vmem>>, vector<2x1x32xf32>
    %473 = vector.shape_cast %472 : vector<2x1x32xf32> to vector<2x32xf32>
    %474 = vector.shape_cast %471 : vector<2x32xf32> to vector<2x1x32xf32>
    tpu.vector_store %arg25[%c0_113, %c2_114, %c32_115], %474 {strides = array<i32>} : memref<2x8x64xf32, #tpu.memory_space<vmem>>, vector<2x1x32xf32>,
    %475 = vector.extract_strided_slice %82 {offsets = [0, 6, 0], sizes = [2, 1, 128], strides = [1, 1, 1]} : vector<2x8x128xf32> to vector<2x1x128xf32>
    %476 = vector.shape_cast %475 : vector<2x1x128xf32> to vector<2x128xf32>
    %cst_116 = arith.constant dense<0.000000e+00> : vector<2x128xf32>
    %477 = tpu.matmul %439, %73, %cst_116 {dimension_numbers = #tpu.dot_dimension_numbers<[1], [0], [0], [1], [0, 0, 1, 1], [], []>} : vector<2x32xf32>, vector<32x128xf32>, vector<2x128xf32> -> vector<2x128xf32>
    %478 = arith.addf %476, %477 : vector<2x128xf32>
    %479 = vector.extract_strided_slice %478 {offsets = [0, 0], sizes = [2, 32], strides = [1, 1]} : vector<2x128xf32> to vector<2x32xf32>
    %480 = arith.negf %479 : vector<2x32xf32>
    %481 = math.exp %480 : vector<2x32xf32>
    %cst_117 = arith.constant 1.000000e+00 : f32
    %482 = vector.broadcast %cst_117 : f32 to vector<2x32xf32>
    %483 = arith.addf %482, %481 : vector<2x32xf32>
    %484 = arith.divf %482, %483 : vector<2x32xf32>
    %485 = vector.extract_strided_slice %478 {offsets = [0, 32], sizes = [2, 32], strides = [1, 1]} : vector<2x128xf32> to vector<2x32xf32>
    %486 = arith.negf %485 : vector<2x32xf32>
    %487 = math.exp %486 : vector<2x32xf32>
    %cst_118 = arith.constant 1.000000e+00 : f32
    %488 = vector.broadcast %cst_118 : f32 to vector<2x32xf32>
    %489 = arith.addf %488, %487 : vector<2x32xf32>
    %490 = arith.divf %488, %489 : vector<2x32xf32>
    %491 = vector.extract_strided_slice %478 {offsets = [0, 64], sizes = [2, 32], strides = [1, 1]} : vector<2x128xf32> to vector<2x32xf32>
    %492 = math.tanh %491 : vector<2x32xf32>
    %493 = vector.extract_strided_slice %478 {offsets = [0, 96], sizes = [2, 32], strides = [1, 1]} : vector<2x128xf32> to vector<2x32xf32>
    %494 = arith.negf %493 : vector<2x32xf32>
    %495 = math.exp %494 : vector<2x32xf32>
    %cst_119 = arith.constant 1.000000e+00 : f32
    %496 = vector.broadcast %cst_119 : f32 to vector<2x32xf32>
    %497 = arith.addf %496, %495 : vector<2x32xf32>
    %498 = arith.divf %496, %497 : vector<2x32xf32>
    %499 = arith.mulf %490, %437 : vector<2x32xf32>
    %500 = arith.mulf %484, %492 : vector<2x32xf32>
    %501 = arith.addf %499, %500 : vector<2x32xf32>
    %502 = math.tanh %501 : vector<2x32xf32>
    %503 = arith.mulf %498, %502 : vector<2x32xf32>
    %c0_120 = arith.constant 0 : index
    %c6_121 = arith.constant 6 : index
    %c0_122 = arith.constant 0 : index
    %504 = vector.load %arg25[%c0_120, %c6_121, %c0_122] : memref<2x8x64xf32, #tpu.memory_space<vmem>>, vector<2x1x32xf32>
    %505 = vector.shape_cast %504 : vector<2x1x32xf32> to vector<2x32xf32>
    %506 = vector.shape_cast %503 : vector<2x32xf32> to vector<2x1x32xf32>
    tpu.vector_store %arg25[%c0_120, %c6_121, %c0_122], %506 {strides = array<i32>} : memref<2x8x64xf32, #tpu.memory_space<vmem>>, vector<2x1x32xf32>,
    %507 = vector.extract_strided_slice %86 {offsets = [0, 1, 0], sizes = [2, 1, 128], strides = [1, 1, 1]} : vector<2x8x128xf32> to vector<2x1x128xf32>
    %508 = vector.shape_cast %507 : vector<2x1x128xf32> to vector<2x128xf32>
    %cst_123 = arith.constant dense<0.000000e+00> : vector<2x128xf32>
    %509 = tpu.matmul %471, %76, %cst_123 {dimension_numbers = #tpu.dot_dimension_numbers<[1], [0], [0], [1], [0, 0, 1, 1], [], []>} : vector<2x32xf32>, vector<32x128xf32>, vector<2x128xf32> -> vector<2x128xf32>
    %510 = arith.addf %508, %509 : vector<2x128xf32>
    %511 = vector.extract_strided_slice %510 {offsets = [0, 0], sizes = [2, 32], strides = [1, 1]} : vector<2x128xf32> to vector<2x32xf32>
    %512 = arith.negf %511 : vector<2x32xf32>
    %513 = math.exp %512 : vector<2x32xf32>
    %cst_124 = arith.constant 1.000000e+00 : f32
    %514 = vector.broadcast %cst_124 : f32 to vector<2x32xf32>
    %515 = arith.addf %514, %513 : vector<2x32xf32>
    %516 = arith.divf %514, %515 : vector<2x32xf32>
    %517 = vector.extract_strided_slice %510 {offsets = [0, 32], sizes = [2, 32], strides = [1, 1]} : vector<2x128xf32> to vector<2x32xf32>
    %518 = arith.negf %517 : vector<2x32xf32>
    %519 = math.exp %518 : vector<2x32xf32>
    %cst_125 = arith.constant 1.000000e+00 : f32
    %520 = vector.broadcast %cst_125 : f32 to vector<2x32xf32>
    %521 = arith.addf %520, %519 : vector<2x32xf32>
    %522 = arith.divf %520, %521 : vector<2x32xf32>
    %523 = vector.extract_strided_slice %510 {offsets = [0, 64], sizes = [2, 32], strides = [1, 1]} : vector<2x128xf32> to vector<2x32xf32>
    %524 = math.tanh %523 : vector<2x32xf32>
    %525 = vector.extract_strided_slice %510 {offsets = [0, 96], sizes = [2, 32], strides = [1, 1]} : vector<2x128xf32> to vector<2x32xf32>
    %526 = arith.negf %525 : vector<2x32xf32>
    %527 = math.exp %526 : vector<2x32xf32>
    %cst_126 = arith.constant 1.000000e+00 : f32
    %528 = vector.broadcast %cst_126 : f32 to vector<2x32xf32>
    %529 = arith.addf %528, %527 : vector<2x32xf32>
    %530 = arith.divf %528, %529 : vector<2x32xf32>
    %531 = arith.mulf %522, %469 : vector<2x32xf32>
    %532 = arith.mulf %516, %524 : vector<2x32xf32>
    %533 = arith.addf %531, %532 : vector<2x32xf32>
    %534 = math.tanh %533 : vector<2x32xf32>
    %535 = arith.mulf %530, %534 : vector<2x32xf32>
    %c0_127 = arith.constant 0 : index
    %c1_128 = arith.constant 1 : index
    %c32_129 = arith.constant 32 : index
    %536 = vector.load %arg25[%c0_127, %c1_128, %c32_129] : memref<2x8x64xf32, #tpu.memory_space<vmem>>, vector<2x1x32xf32>
    %537 = vector.shape_cast %536 : vector<2x1x32xf32> to vector<2x32xf32>
    %538 = vector.shape_cast %535 : vector<2x32xf32> to vector<2x1x32xf32>
    tpu.vector_store %arg25[%c0_127, %c1_128, %c32_129], %538 {strides = array<i32>} : memref<2x8x64xf32, #tpu.memory_space<vmem>>, vector<2x1x32xf32>,
    %539 = vector.extract_strided_slice %82 {offsets = [0, 7, 0], sizes = [2, 1, 128], strides = [1, 1, 1]} : vector<2x8x128xf32> to vector<2x1x128xf32>
    %540 = vector.shape_cast %539 : vector<2x1x128xf32> to vector<2x128xf32>
    %cst_130 = arith.constant dense<0.000000e+00> : vector<2x128xf32>
    %541 = tpu.matmul %503, %73, %cst_130 {dimension_numbers = #tpu.dot_dimension_numbers<[1], [0], [0], [1], [0, 0, 1, 1], [], []>} : vector<2x32xf32>, vector<32x128xf32>, vector<2x128xf32> -> vector<2x128xf32>
    %542 = arith.addf %540, %541 : vector<2x128xf32>
    %543 = vector.extract_strided_slice %542 {offsets = [0, 0], sizes = [2, 32], strides = [1, 1]} : vector<2x128xf32> to vector<2x32xf32>
    %544 = arith.negf %543 : vector<2x32xf32>
    %545 = math.exp %544 : vector<2x32xf32>
    %cst_131 = arith.constant 1.000000e+00 : f32
    %546 = vector.broadcast %cst_131 : f32 to vector<2x32xf32>
    %547 = arith.addf %546, %545 : vector<2x32xf32>
    %548 = arith.divf %546, %547 : vector<2x32xf32>
    %549 = vector.extract_strided_slice %542 {offsets = [0, 32], sizes = [2, 32], strides = [1, 1]} : vector<2x128xf32> to vector<2x32xf32>
    %550 = arith.negf %549 : vector<2x32xf32>
    %551 = math.exp %550 : vector<2x32xf32>
    %cst_132 = arith.constant 1.000000e+00 : f32
    %552 = vector.broadcast %cst_132 : f32 to vector<2x32xf32>
    %553 = arith.addf %552, %551 : vector<2x32xf32>
    %554 = arith.divf %552, %553 : vector<2x32xf32>
    %555 = vector.extract_strided_slice %542 {offsets = [0, 64], sizes = [2, 32], strides = [1, 1]} : vector<2x128xf32> to vector<2x32xf32>
    %556 = math.tanh %555 : vector<2x32xf32>
    %557 = vector.extract_strided_slice %542 {offsets = [0, 96], sizes = [2, 32], strides = [1, 1]} : vector<2x128xf32> to vector<2x32xf32>
    %558 = arith.negf %557 : vector<2x32xf32>
    %559 = math.exp %558 : vector<2x32xf32>
    %cst_133 = arith.constant 1.000000e+00 : f32
    %560 = vector.broadcast %cst_133 : f32 to vector<2x32xf32>
    %561 = arith.addf %560, %559 : vector<2x32xf32>
    %562 = arith.divf %560, %561 : vector<2x32xf32>
    %563 = arith.mulf %554, %501 : vector<2x32xf32>
    %564 = arith.mulf %548, %556 : vector<2x32xf32>
    %565 = arith.addf %563, %564 : vector<2x32xf32>
    %566 = math.tanh %565 : vector<2x32xf32>
    %567 = arith.mulf %562, %566 : vector<2x32xf32>
    %c0_134 = arith.constant 0 : index
    %c7_135 = arith.constant 7 : index
    %c0_136 = arith.constant 0 : index
    %568 = vector.load %arg25[%c0_134, %c7_135, %c0_136] : memref<2x8x64xf32, #tpu.memory_space<vmem>>, vector<2x1x32xf32>
    %569 = vector.shape_cast %568 : vector<2x1x32xf32> to vector<2x32xf32>
    %570 = vector.shape_cast %567 : vector<2x32xf32> to vector<2x1x32xf32>
    tpu.vector_store %arg25[%c0_134, %c7_135, %c0_136], %570 {strides = array<i32>} : memref<2x8x64xf32, #tpu.memory_space<vmem>>, vector<2x1x32xf32>,
    %571 = vector.extract_strided_slice %86 {offsets = [0, 0, 0], sizes = [2, 1, 128], strides = [1, 1, 1]} : vector<2x8x128xf32> to vector<2x1x128xf32>
    %572 = vector.shape_cast %571 : vector<2x1x128xf32> to vector<2x128xf32>
    %cst_137 = arith.constant dense<0.000000e+00> : vector<2x128xf32>
    %573 = tpu.matmul %535, %76, %cst_137 {dimension_numbers = #tpu.dot_dimension_numbers<[1], [0], [0], [1], [0, 0, 1, 1], [], []>} : vector<2x32xf32>, vector<32x128xf32>, vector<2x128xf32> -> vector<2x128xf32>
    %574 = arith.addf %572, %573 : vector<2x128xf32>
    %575 = vector.extract_strided_slice %574 {offsets = [0, 0], sizes = [2, 32], strides = [1, 1]} : vector<2x128xf32> to vector<2x32xf32>
    %576 = arith.negf %575 : vector<2x32xf32>
    %577 = math.exp %576 : vector<2x32xf32>
    %cst_138 = arith.constant 1.000000e+00 : f32
    %578 = vector.broadcast %cst_138 : f32 to vector<2x32xf32>
    %579 = arith.addf %578, %577 : vector<2x32xf32>
    %580 = arith.divf %578, %579 : vector<2x32xf32>
    %581 = vector.extract_strided_slice %574 {offsets = [0, 32], sizes = [2, 32], strides = [1, 1]} : vector<2x128xf32> to vector<2x32xf32>
    %582 = arith.negf %581 : vector<2x32xf32>
    %583 = math.exp %582 : vector<2x32xf32>
    %cst_139 = arith.constant 1.000000e+00 : f32
    %584 = vector.broadcast %cst_139 : f32 to vector<2x32xf32>
    %585 = arith.addf %584, %583 : vector<2x32xf32>
    %586 = arith.divf %584, %585 : vector<2x32xf32>
    %587 = vector.extract_strided_slice %574 {offsets = [0, 64], sizes = [2, 32], strides = [1, 1]} : vector<2x128xf32> to vector<2x32xf32>
    %588 = math.tanh %587 : vector<2x32xf32>
    %589 = vector.extract_strided_slice %574 {offsets = [0, 96], sizes = [2, 32], strides = [1, 1]} : vector<2x128xf32> to vector<2x32xf32>
    %590 = arith.negf %589 : vector<2x32xf32>
    %591 = math.exp %590 : vector<2x32xf32>
    %cst_140 = arith.constant 1.000000e+00 : f32
    %592 = vector.broadcast %cst_140 : f32 to vector<2x32xf32>
    %593 = arith.addf %592, %591 : vector<2x32xf32>
    %594 = arith.divf %592, %593 : vector<2x32xf32>
    %595 = arith.mulf %586, %533 : vector<2x32xf32>
    %596 = arith.mulf %580, %588 : vector<2x32xf32>
    %597 = arith.addf %595, %596 : vector<2x32xf32>
    %598 = math.tanh %597 : vector<2x32xf32>
    %599 = arith.mulf %594, %598 : vector<2x32xf32>
    %c0_141 = arith.constant 0 : index
    %c0_142 = arith.constant 0 : index
    %c32_143 = arith.constant 32 : index
    %600 = vector.load %arg25[%c0_141, %c0_142, %c32_143] : memref<2x8x64xf32, #tpu.memory_space<vmem>>, vector<2x1x32xf32>
    %601 = vector.shape_cast %600 : vector<2x1x32xf32> to vector<2x32xf32>
    %602 = vector.shape_cast %599 : vector<2x32xf32> to vector<2x1x32xf32>
    tpu.vector_store %arg25[%c0_141, %c0_142, %c32_143], %602 {strides = array<i32>} : memref<2x8x64xf32, #tpu.memory_space<vmem>>, vector<2x1x32xf32>,
    %c0_144 = arith.constant 0 : index
    %c0_145 = arith.constant 0 : index
    %c0_146 = arith.constant 0 : index
    %603 = vector.load %arg25[%c0_144, %c0_145, %c0_146] : memref<2x8x64xf32, #tpu.memory_space<vmem>>, vector<2x8x64xf32>
    %c0_147 = arith.constant 0 : index
    %c0_148 = arith.constant 0 : index
    %604 = vector.load %arg14[%c0_147, %c0_148] : memref<64x128xf32, #tpu.memory_space<vmem>>, vector<64x128xf32>
    %c0_149 = arith.constant 0 : index
    %c0_150 = arith.constant 0 : index
    %605 = vector.load %arg15[%c0_149, %c0_150] : memref<32x128xf32, #tpu.memory_space<vmem>>, vector<32x128xf32>
    %c0_151 = arith.constant 0 : index
    %c0_152 = arith.constant 0 : index
    %606 = vector.load %arg16[%c0_151, %c0_152] : memref<1x128xf32, #tpu.memory_space<vmem>>, vector<1x128xf32>
    %c0_153 = arith.constant 0 : index
    %c0_154 = arith.constant 0 : index
    %607 = vector.load %arg17[%c0_153, %c0_154] : memref<64x128xf32, #tpu.memory_space<vmem>>, vector<64x128xf32>
    %c0_155 = arith.constant 0 : index
    %c0_156 = arith.constant 0 : index
    %608 = vector.load %arg18[%c0_155, %c0_156] : memref<32x128xf32, #tpu.memory_space<vmem>>, vector<32x128xf32>
    %c0_157 = arith.constant 0 : index
    %c0_158 = arith.constant 0 : index
    %609 = vector.load %arg19[%c0_157, %c0_158] : memref<1x128xf32, #tpu.memory_space<vmem>>, vector<1x128xf32>
    %610 = vector.shape_cast %603 : vector<2x8x64xf32> to vector<16x64xf32>
    %cst_159 = arith.constant dense<0.000000e+00> : vector<16x128xf32>
    %611 = tpu.matmul %610, %604, %cst_159 {dimension_numbers = #tpu.dot_dimension_numbers<[1], [0], [0], [1], [0, 0, 1, 1], [], []>} : vector<16x64xf32>, vector<64x128xf32>, vector<16x128xf32> -> vector<16x128xf32>
    %612 = vector.broadcast %606 : vector<1x128xf32> to vector<16x128xf32>
    %613 = arith.addf %611, %612 : vector<16x128xf32>
    %614 = vector.shape_cast %613 : vector<16x128xf32> to vector<2x8x128xf32>
    %cst_160 = arith.constant dense<0.000000e+00> : vector<16x128xf32>
    %615 = tpu.matmul %610, %607, %cst_160 {dimension_numbers = #tpu.dot_dimension_numbers<[1], [0], [0], [1], [0, 0, 1, 1], [], []>} : vector<16x64xf32>, vector<64x128xf32>, vector<16x128xf32> -> vector<16x128xf32>
    %616 = vector.broadcast %609 : vector<1x128xf32> to vector<16x128xf32>
    %617 = arith.addf %615, %616 : vector<16x128xf32>
    %618 = vector.shape_cast %617 : vector<16x128xf32> to vector<2x8x128xf32>
    %cst_161 = arith.constant 0.000000e+00 : f32
    %619 = vector.broadcast %cst_161 : f32 to vector<2x32xf32>
    %cst_162 = arith.constant 0.000000e+00 : f32
    %620 = vector.broadcast %cst_162 : f32 to vector<2x32xf32>
    %cst_163 = arith.constant 0.000000e+00 : f32
    %621 = vector.broadcast %cst_163 : f32 to vector<2x32xf32>
    %cst_164 = arith.constant 0.000000e+00 : f32
    %622 = vector.broadcast %cst_164 : f32 to vector<2x32xf32>
    %623 = vector.extract_strided_slice %614 {offsets = [0, 0, 0], sizes = [2, 1, 128], strides = [1, 1, 1]} : vector<2x8x128xf32> to vector<2x1x128xf32>
    %624 = vector.shape_cast %623 : vector<2x1x128xf32> to vector<2x128xf32>
    %cst_165 = arith.constant dense<0.000000e+00> : vector<2x128xf32>
    %625 = tpu.matmul %619, %605, %cst_165 {dimension_numbers = #tpu.dot_dimension_numbers<[1], [0], [0], [1], [0, 0, 1, 1], [], []>} : vector<2x32xf32>, vector<32x128xf32>, vector<2x128xf32> -> vector<2x128xf32>
    %626 = arith.addf %624, %625 : vector<2x128xf32>
    %627 = vector.extract_strided_slice %626 {offsets = [0, 0], sizes = [2, 32], strides = [1, 1]} : vector<2x128xf32> to vector<2x32xf32>
    %628 = arith.negf %627 : vector<2x32xf32>
    %629 = math.exp %628 : vector<2x32xf32>
    %cst_166 = arith.constant 1.000000e+00 : f32
    %630 = vector.broadcast %cst_166 : f32 to vector<2x32xf32>
    %631 = arith.addf %630, %629 : vector<2x32xf32>
    %632 = arith.divf %630, %631 : vector<2x32xf32>
    %633 = vector.extract_strided_slice %626 {offsets = [0, 32], sizes = [2, 32], strides = [1, 1]} : vector<2x128xf32> to vector<2x32xf32>
    %634 = arith.negf %633 : vector<2x32xf32>
    %635 = math.exp %634 : vector<2x32xf32>
    %cst_167 = arith.constant 1.000000e+00 : f32
    %636 = vector.broadcast %cst_167 : f32 to vector<2x32xf32>
    %637 = arith.addf %636, %635 : vector<2x32xf32>
    %638 = arith.divf %636, %637 : vector<2x32xf32>
    %639 = vector.extract_strided_slice %626 {offsets = [0, 64], sizes = [2, 32], strides = [1, 1]} : vector<2x128xf32> to vector<2x32xf32>
    %640 = math.tanh %639 : vector<2x32xf32>
    %641 = vector.extract_strided_slice %626 {offsets = [0, 96], sizes = [2, 32], strides = [1, 1]} : vector<2x128xf32> to vector<2x32xf32>
    %642 = arith.negf %641 : vector<2x32xf32>
    %643 = math.exp %642 : vector<2x32xf32>
    %cst_168 = arith.constant 1.000000e+00 : f32
    %644 = vector.broadcast %cst_168 : f32 to vector<2x32xf32>
    %645 = arith.addf %644, %643 : vector<2x32xf32>
    %646 = arith.divf %644, %645 : vector<2x32xf32>
    %647 = arith.mulf %638, %620 : vector<2x32xf32>
    %648 = arith.mulf %632, %640 : vector<2x32xf32>
    %649 = arith.addf %647, %648 : vector<2x32xf32>
    %650 = math.tanh %649 : vector<2x32xf32>
    %651 = arith.mulf %646, %650 : vector<2x32xf32>
    %c0_169 = arith.constant 0 : index
    %c0_170 = arith.constant 0 : index
    %c0_171 = arith.constant 0 : index
    %652 = vector.load %arg26[%c0_169, %c0_170, %c0_171] : memref<2x8x64xf32, #tpu.memory_space<vmem>>, vector<2x1x32xf32>
    %653 = vector.shape_cast %652 : vector<2x1x32xf32> to vector<2x32xf32>
    %654 = vector.shape_cast %651 : vector<2x32xf32> to vector<2x1x32xf32>
    tpu.vector_store %arg26[%c0_169, %c0_170, %c0_171], %654 {strides = array<i32>} : memref<2x8x64xf32, #tpu.memory_space<vmem>>, vector<2x1x32xf32>,
    %655 = vector.extract_strided_slice %618 {offsets = [0, 7, 0], sizes = [2, 1, 128], strides = [1, 1, 1]} : vector<2x8x128xf32> to vector<2x1x128xf32>
    %656 = vector.shape_cast %655 : vector<2x1x128xf32> to vector<2x128xf32>
    %cst_172 = arith.constant dense<0.000000e+00> : vector<2x128xf32>
    %657 = tpu.matmul %621, %608, %cst_172 {dimension_numbers = #tpu.dot_dimension_numbers<[1], [0], [0], [1], [0, 0, 1, 1], [], []>} : vector<2x32xf32>, vector<32x128xf32>, vector<2x128xf32> -> vector<2x128xf32>
    %658 = arith.addf %656, %657 : vector<2x128xf32>
    %659 = vector.extract_strided_slice %658 {offsets = [0, 0], sizes = [2, 32], strides = [1, 1]} : vector<2x128xf32> to vector<2x32xf32>
    %660 = arith.negf %659 : vector<2x32xf32>
    %661 = math.exp %660 : vector<2x32xf32>
    %cst_173 = arith.constant 1.000000e+00 : f32
    %662 = vector.broadcast %cst_173 : f32 to vector<2x32xf32>
    %663 = arith.addf %662, %661 : vector<2x32xf32>
    %664 = arith.divf %662, %663 : vector<2x32xf32>
    %665 = vector.extract_strided_slice %658 {offsets = [0, 32], sizes = [2, 32], strides = [1, 1]} : vector<2x128xf32> to vector<2x32xf32>
    %666 = arith.negf %665 : vector<2x32xf32>
    %667 = math.exp %666 : vector<2x32xf32>
    %cst_174 = arith.constant 1.000000e+00 : f32
    %668 = vector.broadcast %cst_174 : f32 to vector<2x32xf32>
    %669 = arith.addf %668, %667 : vector<2x32xf32>
    %670 = arith.divf %668, %669 : vector<2x32xf32>
    %671 = vector.extract_strided_slice %658 {offsets = [0, 64], sizes = [2, 32], strides = [1, 1]} : vector<2x128xf32> to vector<2x32xf32>
    %672 = math.tanh %671 : vector<2x32xf32>
    %673 = vector.extract_strided_slice %658 {offsets = [0, 96], sizes = [2, 32], strides = [1, 1]} : vector<2x128xf32> to vector<2x32xf32>
    %674 = arith.negf %673 : vector<2x32xf32>
    %675 = math.exp %674 : vector<2x32xf32>
    %cst_175 = arith.constant 1.000000e+00 : f32
    %676 = vector.broadcast %cst_175 : f32 to vector<2x32xf32>
    %677 = arith.addf %676, %675 : vector<2x32xf32>
    %678 = arith.divf %676, %677 : vector<2x32xf32>
    %679 = arith.mulf %670, %622 : vector<2x32xf32>
    %680 = arith.mulf %664, %672 : vector<2x32xf32>
    %681 = arith.addf %679, %680 : vector<2x32xf32>
    %682 = math.tanh %681 : vector<2x32xf32>
    %683 = arith.mulf %678, %682 : vector<2x32xf32>
    %c0_176 = arith.constant 0 : index
    %c7_177 = arith.constant 7 : index
    %c32_178 = arith.constant 32 : index
    %684 = vector.load %arg26[%c0_176, %c7_177, %c32_178] : memref<2x8x64xf32, #tpu.memory_space<vmem>>, vector<2x1x32xf32>
    %685 = vector.shape_cast %684 : vector<2x1x32xf32> to vector<2x32xf32>
    %686 = vector.shape_cast %683 : vector<2x32xf32> to vector<2x1x32xf32>
    tpu.vector_store %arg26[%c0_176, %c7_177, %c32_178], %686 {strides = array<i32>} : memref<2x8x64xf32, #tpu.memory_space<vmem>>, vector<2x1x32xf32>,
    %687 = vector.extract_strided_slice %614 {offsets = [0, 1, 0], sizes = [2, 1, 128], strides = [1, 1, 1]} : vector<2x8x128xf32> to vector<2x1x128xf32>
    %688 = vector.shape_cast %687 : vector<2x1x128xf32> to vector<2x128xf32>
    %cst_179 = arith.constant dense<0.000000e+00> : vector<2x128xf32>
    %689 = tpu.matmul %651, %605, %cst_179 {dimension_numbers = #tpu.dot_dimension_numbers<[1], [0], [0], [1], [0, 0, 1, 1], [], []>} : vector<2x32xf32>, vector<32x128xf32>, vector<2x128xf32> -> vector<2x128xf32>
    %690 = arith.addf %688, %689 : vector<2x128xf32>
    %691 = vector.extract_strided_slice %690 {offsets = [0, 0], sizes = [2, 32], strides = [1, 1]} : vector<2x128xf32> to vector<2x32xf32>
    %692 = arith.negf %691 : vector<2x32xf32>
    %693 = math.exp %692 : vector<2x32xf32>
    %cst_180 = arith.constant 1.000000e+00 : f32
    %694 = vector.broadcast %cst_180 : f32 to vector<2x32xf32>
    %695 = arith.addf %694, %693 : vector<2x32xf32>
    %696 = arith.divf %694, %695 : vector<2x32xf32>
    %697 = vector.extract_strided_slice %690 {offsets = [0, 32], sizes = [2, 32], strides = [1, 1]} : vector<2x128xf32> to vector<2x32xf32>
    %698 = arith.negf %697 : vector<2x32xf32>
    %699 = math.exp %698 : vector<2x32xf32>
    %cst_181 = arith.constant 1.000000e+00 : f32
    %700 = vector.broadcast %cst_181 : f32 to vector<2x32xf32>
    %701 = arith.addf %700, %699 : vector<2x32xf32>
    %702 = arith.divf %700, %701 : vector<2x32xf32>
    %703 = vector.extract_strided_slice %690 {offsets = [0, 64], sizes = [2, 32], strides = [1, 1]} : vector<2x128xf32> to vector<2x32xf32>
    %704 = math.tanh %703 : vector<2x32xf32>
    %705 = vector.extract_strided_slice %690 {offsets = [0, 96], sizes = [2, 32], strides = [1, 1]} : vector<2x128xf32> to vector<2x32xf32>
    %706 = arith.negf %705 : vector<2x32xf32>
    %707 = math.exp %706 : vector<2x32xf32>
    %cst_182 = arith.constant 1.000000e+00 : f32
    %708 = vector.broadcast %cst_182 : f32 to vector<2x32xf32>
    %709 = arith.addf %708, %707 : vector<2x32xf32>
    %710 = arith.divf %708, %709 : vector<2x32xf32>
    %711 = arith.mulf %702, %649 : vector<2x32xf32>
    %712 = arith.mulf %696, %704 : vector<2x32xf32>
    %713 = arith.addf %711, %712 : vector<2x32xf32>
    %714 = math.tanh %713 : vector<2x32xf32>
    %715 = arith.mulf %710, %714 : vector<2x32xf32>
    %c0_183 = arith.constant 0 : index
    %c1_184 = arith.constant 1 : index
    %c0_185 = arith.constant 0 : index
    %716 = vector.load %arg26[%c0_183, %c1_184, %c0_185] : memref<2x8x64xf32, #tpu.memory_space<vmem>>, vector<2x1x32xf32>
    %717 = vector.shape_cast %716 : vector<2x1x32xf32> to vector<2x32xf32>
    %718 = vector.shape_cast %715 : vector<2x32xf32> to vector<2x1x32xf32>
    tpu.vector_store %arg26[%c0_183, %c1_184, %c0_185], %718 {strides = array<i32>} : memref<2x8x64xf32, #tpu.memory_space<vmem>>, vector<2x1x32xf32>,
    %719 = vector.extract_strided_slice %618 {offsets = [0, 6, 0], sizes = [2, 1, 128], strides = [1, 1, 1]} : vector<2x8x128xf32> to vector<2x1x128xf32>
    %720 = vector.shape_cast %719 : vector<2x1x128xf32> to vector<2x128xf32>
    %cst_186 = arith.constant dense<0.000000e+00> : vector<2x128xf32>
    %721 = tpu.matmul %683, %608, %cst_186 {dimension_numbers = #tpu.dot_dimension_numbers<[1], [0], [0], [1], [0, 0, 1, 1], [], []>} : vector<2x32xf32>, vector<32x128xf32>, vector<2x128xf32> -> vector<2x128xf32>
    %722 = arith.addf %720, %721 : vector<2x128xf32>
    %723 = vector.extract_strided_slice %722 {offsets = [0, 0], sizes = [2, 32], strides = [1, 1]} : vector<2x128xf32> to vector<2x32xf32>
    %724 = arith.negf %723 : vector<2x32xf32>
    %725 = math.exp %724 : vector<2x32xf32>
    %cst_187 = arith.constant 1.000000e+00 : f32
    %726 = vector.broadcast %cst_187 : f32 to vector<2x32xf32>
    %727 = arith.addf %726, %725 : vector<2x32xf32>
    %728 = arith.divf %726, %727 : vector<2x32xf32>
    %729 = vector.extract_strided_slice %722 {offsets = [0, 32], sizes = [2, 32], strides = [1, 1]} : vector<2x128xf32> to vector<2x32xf32>
    %730 = arith.negf %729 : vector<2x32xf32>
    %731 = math.exp %730 : vector<2x32xf32>
    %cst_188 = arith.constant 1.000000e+00 : f32
    %732 = vector.broadcast %cst_188 : f32 to vector<2x32xf32>
    %733 = arith.addf %732, %731 : vector<2x32xf32>
    %734 = arith.divf %732, %733 : vector<2x32xf32>
    %735 = vector.extract_strided_slice %722 {offsets = [0, 64], sizes = [2, 32], strides = [1, 1]} : vector<2x128xf32> to vector<2x32xf32>
    %736 = math.tanh %735 : vector<2x32xf32>
    %737 = vector.extract_strided_slice %722 {offsets = [0, 96], sizes = [2, 32], strides = [1, 1]} : vector<2x128xf32> to vector<2x32xf32>
    %738 = arith.negf %737 : vector<2x32xf32>
    %739 = math.exp %738 : vector<2x32xf32>
    %cst_189 = arith.constant 1.000000e+00 : f32
    %740 = vector.broadcast %cst_189 : f32 to vector<2x32xf32>
    %741 = arith.addf %740, %739 : vector<2x32xf32>
    %742 = arith.divf %740, %741 : vector<2x32xf32>
    %743 = arith.mulf %734, %681 : vector<2x32xf32>
    %744 = arith.mulf %728, %736 : vector<2x32xf32>
    %745 = arith.addf %743, %744 : vector<2x32xf32>
    %746 = math.tanh %745 : vector<2x32xf32>
    %747 = arith.mulf %742, %746 : vector<2x32xf32>
    %c0_190 = arith.constant 0 : index
    %c6_191 = arith.constant 6 : index
    %c32_192 = arith.constant 32 : index
    %748 = vector.load %arg26[%c0_190, %c6_191, %c32_192] : memref<2x8x64xf32, #tpu.memory_space<vmem>>, vector<2x1x32xf32>
    %749 = vector.shape_cast %748 : vector<2x1x32xf32> to vector<2x32xf32>
    %750 = vector.shape_cast %747 : vector<2x32xf32> to vector<2x1x32xf32>
    tpu.vector_store %arg26[%c0_190, %c6_191, %c32_192], %750 {strides = array<i32>} : memref<2x8x64xf32, #tpu.memory_space<vmem>>, vector<2x1x32xf32>,
    %751 = vector.extract_strided_slice %614 {offsets = [0, 2, 0], sizes = [2, 1, 128], strides = [1, 1, 1]} : vector<2x8x128xf32> to vector<2x1x128xf32>
    %752 = vector.shape_cast %751 : vector<2x1x128xf32> to vector<2x128xf32>
    %cst_193 = arith.constant dense<0.000000e+00> : vector<2x128xf32>
    %753 = tpu.matmul %715, %605, %cst_193 {dimension_numbers = #tpu.dot_dimension_numbers<[1], [0], [0], [1], [0, 0, 1, 1], [], []>} : vector<2x32xf32>, vector<32x128xf32>, vector<2x128xf32> -> vector<2x128xf32>
    %754 = arith.addf %752, %753 : vector<2x128xf32>
    %755 = vector.extract_strided_slice %754 {offsets = [0, 0], sizes = [2, 32], strides = [1, 1]} : vector<2x128xf32> to vector<2x32xf32>
    %756 = arith.negf %755 : vector<2x32xf32>
    %757 = math.exp %756 : vector<2x32xf32>
    %cst_194 = arith.constant 1.000000e+00 : f32
    %758 = vector.broadcast %cst_194 : f32 to vector<2x32xf32>
    %759 = arith.addf %758, %757 : vector<2x32xf32>
    %760 = arith.divf %758, %759 : vector<2x32xf32>
    %761 = vector.extract_strided_slice %754 {offsets = [0, 32], sizes = [2, 32], strides = [1, 1]} : vector<2x128xf32> to vector<2x32xf32>
    %762 = arith.negf %761 : vector<2x32xf32>
    %763 = math.exp %762 : vector<2x32xf32>
    %cst_195 = arith.constant 1.000000e+00 : f32
    %764 = vector.broadcast %cst_195 : f32 to vector<2x32xf32>
    %765 = arith.addf %764, %763 : vector<2x32xf32>
    %766 = arith.divf %764, %765 : vector<2x32xf32>
    %767 = vector.extract_strided_slice %754 {offsets = [0, 64], sizes = [2, 32], strides = [1, 1]} : vector<2x128xf32> to vector<2x32xf32>
    %768 = math.tanh %767 : vector<2x32xf32>
    %769 = vector.extract_strided_slice %754 {offsets = [0, 96], sizes = [2, 32], strides = [1, 1]} : vector<2x128xf32> to vector<2x32xf32>
    %770 = arith.negf %769 : vector<2x32xf32>
    %771 = math.exp %770 : vector<2x32xf32>
    %cst_196 = arith.constant 1.000000e+00 : f32
    %772 = vector.broadcast %cst_196 : f32 to vector<2x32xf32>
    %773 = arith.addf %772, %771 : vector<2x32xf32>
    %774 = arith.divf %772, %773 : vector<2x32xf32>
    %775 = arith.mulf %766, %713 : vector<2x32xf32>
    %776 = arith.mulf %760, %768 : vector<2x32xf32>
    %777 = arith.addf %775, %776 : vector<2x32xf32>
    %778 = math.tanh %777 : vector<2x32xf32>
    %779 = arith.mulf %774, %778 : vector<2x32xf32>
    %c0_197 = arith.constant 0 : index
    %c2_198 = arith.constant 2 : index
    %c0_199 = arith.constant 0 : index
    %780 = vector.load %arg26[%c0_197, %c2_198, %c0_199] : memref<2x8x64xf32, #tpu.memory_space<vmem>>, vector<2x1x32xf32>
    %781 = vector.shape_cast %780 : vector<2x1x32xf32> to vector<2x32xf32>
    %782 = vector.shape_cast %779 : vector<2x32xf32> to vector<2x1x32xf32>
    tpu.vector_store %arg26[%c0_197, %c2_198, %c0_199], %782 {strides = array<i32>} : memref<2x8x64xf32, #tpu.memory_space<vmem>>, vector<2x1x32xf32>,
    %783 = vector.extract_strided_slice %618 {offsets = [0, 5, 0], sizes = [2, 1, 128], strides = [1, 1, 1]} : vector<2x8x128xf32> to vector<2x1x128xf32>
    %784 = vector.shape_cast %783 : vector<2x1x128xf32> to vector<2x128xf32>
    %cst_200 = arith.constant dense<0.000000e+00> : vector<2x128xf32>
    %785 = tpu.matmul %747, %608, %cst_200 {dimension_numbers = #tpu.dot_dimension_numbers<[1], [0], [0], [1], [0, 0, 1, 1], [], []>} : vector<2x32xf32>, vector<32x128xf32>, vector<2x128xf32> -> vector<2x128xf32>
    %786 = arith.addf %784, %785 : vector<2x128xf32>
    %787 = vector.extract_strided_slice %786 {offsets = [0, 0], sizes = [2, 32], strides = [1, 1]} : vector<2x128xf32> to vector<2x32xf32>
    %788 = arith.negf %787 : vector<2x32xf32>
    %789 = math.exp %788 : vector<2x32xf32>
    %cst_201 = arith.constant 1.000000e+00 : f32
    %790 = vector.broadcast %cst_201 : f32 to vector<2x32xf32>
    %791 = arith.addf %790, %789 : vector<2x32xf32>
    %792 = arith.divf %790, %791 : vector<2x32xf32>
    %793 = vector.extract_strided_slice %786 {offsets = [0, 32], sizes = [2, 32], strides = [1, 1]} : vector<2x128xf32> to vector<2x32xf32>
    %794 = arith.negf %793 : vector<2x32xf32>
    %795 = math.exp %794 : vector<2x32xf32>
    %cst_202 = arith.constant 1.000000e+00 : f32
    %796 = vector.broadcast %cst_202 : f32 to vector<2x32xf32>
    %797 = arith.addf %796, %795 : vector<2x32xf32>
    %798 = arith.divf %796, %797 : vector<2x32xf32>
    %799 = vector.extract_strided_slice %786 {offsets = [0, 64], sizes = [2, 32], strides = [1, 1]} : vector<2x128xf32> to vector<2x32xf32>
    %800 = math.tanh %799 : vector<2x32xf32>
    %801 = vector.extract_strided_slice %786 {offsets = [0, 96], sizes = [2, 32], strides = [1, 1]} : vector<2x128xf32> to vector<2x32xf32>
    %802 = arith.negf %801 : vector<2x32xf32>
    %803 = math.exp %802 : vector<2x32xf32>
    %cst_203 = arith.constant 1.000000e+00 : f32
    %804 = vector.broadcast %cst_203 : f32 to vector<2x32xf32>
    %805 = arith.addf %804, %803 : vector<2x32xf32>
    %806 = arith.divf %804, %805 : vector<2x32xf32>
    %807 = arith.mulf %798, %745 : vector<2x32xf32>
    %808 = arith.mulf %792, %800 : vector<2x32xf32>
    %809 = arith.addf %807, %808 : vector<2x32xf32>
    %810 = math.tanh %809 : vector<2x32xf32>
    %811 = arith.mulf %806, %810 : vector<2x32xf32>
    %c0_204 = arith.constant 0 : index
    %c5_205 = arith.constant 5 : index
    %c32_206 = arith.constant 32 : index
    %812 = vector.load %arg26[%c0_204, %c5_205, %c32_206] : memref<2x8x64xf32, #tpu.memory_space<vmem>>, vector<2x1x32xf32>
    %813 = vector.shape_cast %812 : vector<2x1x32xf32> to vector<2x32xf32>
    %814 = vector.shape_cast %811 : vector<2x32xf32> to vector<2x1x32xf32>
    tpu.vector_store %arg26[%c0_204, %c5_205, %c32_206], %814 {strides = array<i32>} : memref<2x8x64xf32, #tpu.memory_space<vmem>>, vector<2x1x32xf32>,
    %815 = vector.extract_strided_slice %614 {offsets = [0, 3, 0], sizes = [2, 1, 128], strides = [1, 1, 1]} : vector<2x8x128xf32> to vector<2x1x128xf32>
    %816 = vector.shape_cast %815 : vector<2x1x128xf32> to vector<2x128xf32>
    %cst_207 = arith.constant dense<0.000000e+00> : vector<2x128xf32>
    %817 = tpu.matmul %779, %605, %cst_207 {dimension_numbers = #tpu.dot_dimension_numbers<[1], [0], [0], [1], [0, 0, 1, 1], [], []>} : vector<2x32xf32>, vector<32x128xf32>, vector<2x128xf32> -> vector<2x128xf32>
    %818 = arith.addf %816, %817 : vector<2x128xf32>
    %819 = vector.extract_strided_slice %818 {offsets = [0, 0], sizes = [2, 32], strides = [1, 1]} : vector<2x128xf32> to vector<2x32xf32>
    %820 = arith.negf %819 : vector<2x32xf32>
    %821 = math.exp %820 : vector<2x32xf32>
    %cst_208 = arith.constant 1.000000e+00 : f32
    %822 = vector.broadcast %cst_208 : f32 to vector<2x32xf32>
    %823 = arith.addf %822, %821 : vector<2x32xf32>
    %824 = arith.divf %822, %823 : vector<2x32xf32>
    %825 = vector.extract_strided_slice %818 {offsets = [0, 32], sizes = [2, 32], strides = [1, 1]} : vector<2x128xf32> to vector<2x32xf32>
    %826 = arith.negf %825 : vector<2x32xf32>
    %827 = math.exp %826 : vector<2x32xf32>
    %cst_209 = arith.constant 1.000000e+00 : f32
    %828 = vector.broadcast %cst_209 : f32 to vector<2x32xf32>
    %829 = arith.addf %828, %827 : vector<2x32xf32>
    %830 = arith.divf %828, %829 : vector<2x32xf32>
    %831 = vector.extract_strided_slice %818 {offsets = [0, 64], sizes = [2, 32], strides = [1, 1]} : vector<2x128xf32> to vector<2x32xf32>
    %832 = math.tanh %831 : vector<2x32xf32>
    %833 = vector.extract_strided_slice %818 {offsets = [0, 96], sizes = [2, 32], strides = [1, 1]} : vector<2x128xf32> to vector<2x32xf32>
    %834 = arith.negf %833 : vector<2x32xf32>
    %835 = math.exp %834 : vector<2x32xf32>
    %cst_210 = arith.constant 1.000000e+00 : f32
    %836 = vector.broadcast %cst_210 : f32 to vector<2x32xf32>
    %837 = arith.addf %836, %835 : vector<2x32xf32>
    %838 = arith.divf %836, %837 : vector<2x32xf32>
    %839 = arith.mulf %830, %777 : vector<2x32xf32>
    %840 = arith.mulf %824, %832 : vector<2x32xf32>
    %841 = arith.addf %839, %840 : vector<2x32xf32>
    %842 = math.tanh %841 : vector<2x32xf32>
    %843 = arith.mulf %838, %842 : vector<2x32xf32>
    %c0_211 = arith.constant 0 : index
    %c3_212 = arith.constant 3 : index
    %c0_213 = arith.constant 0 : index
    %844 = vector.load %arg26[%c0_211, %c3_212, %c0_213] : memref<2x8x64xf32, #tpu.memory_space<vmem>>, vector<2x1x32xf32>
    %845 = vector.shape_cast %844 : vector<2x1x32xf32> to vector<2x32xf32>
    %846 = vector.shape_cast %843 : vector<2x32xf32> to vector<2x1x32xf32>
    tpu.vector_store %arg26[%c0_211, %c3_212, %c0_213], %846 {strides = array<i32>} : memref<2x8x64xf32, #tpu.memory_space<vmem>>, vector<2x1x32xf32>,
    %847 = vector.extract_strided_slice %618 {offsets = [0, 4, 0], sizes = [2, 1, 128], strides = [1, 1, 1]} : vector<2x8x128xf32> to vector<2x1x128xf32>
    %848 = vector.shape_cast %847 : vector<2x1x128xf32> to vector<2x128xf32>
    %cst_214 = arith.constant dense<0.000000e+00> : vector<2x128xf32>
    %849 = tpu.matmul %811, %608, %cst_214 {dimension_numbers = #tpu.dot_dimension_numbers<[1], [0], [0], [1], [0, 0, 1, 1], [], []>} : vector<2x32xf32>, vector<32x128xf32>, vector<2x128xf32> -> vector<2x128xf32>
    %850 = arith.addf %848, %849 : vector<2x128xf32>
    %851 = vector.extract_strided_slice %850 {offsets = [0, 0], sizes = [2, 32], strides = [1, 1]} : vector<2x128xf32> to vector<2x32xf32>
    %852 = arith.negf %851 : vector<2x32xf32>
    %853 = math.exp %852 : vector<2x32xf32>
    %cst_215 = arith.constant 1.000000e+00 : f32
    %854 = vector.broadcast %cst_215 : f32 to vector<2x32xf32>
    %855 = arith.addf %854, %853 : vector<2x32xf32>
    %856 = arith.divf %854, %855 : vector<2x32xf32>
    %857 = vector.extract_strided_slice %850 {offsets = [0, 32], sizes = [2, 32], strides = [1, 1]} : vector<2x128xf32> to vector<2x32xf32>
    %858 = arith.negf %857 : vector<2x32xf32>
    %859 = math.exp %858 : vector<2x32xf32>
    %cst_216 = arith.constant 1.000000e+00 : f32
    %860 = vector.broadcast %cst_216 : f32 to vector<2x32xf32>
    %861 = arith.addf %860, %859 : vector<2x32xf32>
    %862 = arith.divf %860, %861 : vector<2x32xf32>
    %863 = vector.extract_strided_slice %850 {offsets = [0, 64], sizes = [2, 32], strides = [1, 1]} : vector<2x128xf32> to vector<2x32xf32>
    %864 = math.tanh %863 : vector<2x32xf32>
    %865 = vector.extract_strided_slice %850 {offsets = [0, 96], sizes = [2, 32], strides = [1, 1]} : vector<2x128xf32> to vector<2x32xf32>
    %866 = arith.negf %865 : vector<2x32xf32>
    %867 = math.exp %866 : vector<2x32xf32>
    %cst_217 = arith.constant 1.000000e+00 : f32
    %868 = vector.broadcast %cst_217 : f32 to vector<2x32xf32>
    %869 = arith.addf %868, %867 : vector<2x32xf32>
    %870 = arith.divf %868, %869 : vector<2x32xf32>
    %871 = arith.mulf %862, %809 : vector<2x32xf32>
    %872 = arith.mulf %856, %864 : vector<2x32xf32>
    %873 = arith.addf %871, %872 : vector<2x32xf32>
    %874 = math.tanh %873 : vector<2x32xf32>
    %875 = arith.mulf %870, %874 : vector<2x32xf32>
    %c0_218 = arith.constant 0 : index
    %c4_219 = arith.constant 4 : index
    %c32_220 = arith.constant 32 : index
    %876 = vector.load %arg26[%c0_218, %c4_219, %c32_220] : memref<2x8x64xf32, #tpu.memory_space<vmem>>, vector<2x1x32xf32>
    %877 = vector.shape_cast %876 : vector<2x1x32xf32> to vector<2x32xf32>
    %878 = vector.shape_cast %875 : vector<2x32xf32> to vector<2x1x32xf32>
    tpu.vector_store %arg26[%c0_218, %c4_219, %c32_220], %878 {strides = array<i32>} : memref<2x8x64xf32, #tpu.memory_space<vmem>>, vector<2x1x32xf32>,
    %879 = vector.extract_strided_slice %614 {offsets = [0, 4, 0], sizes = [2, 1, 128], strides = [1, 1, 1]} : vector<2x8x128xf32> to vector<2x1x128xf32>
    %880 = vector.shape_cast %879 : vector<2x1x128xf32> to vector<2x128xf32>
    %cst_221 = arith.constant dense<0.000000e+00> : vector<2x128xf32>
    %881 = tpu.matmul %843, %605, %cst_221 {dimension_numbers = #tpu.dot_dimension_numbers<[1], [0], [0], [1], [0, 0, 1, 1], [], []>} : vector<2x32xf32>, vector<32x128xf32>, vector<2x128xf32> -> vector<2x128xf32>
    %882 = arith.addf %880, %881 : vector<2x128xf32>
    %883 = vector.extract_strided_slice %882 {offsets = [0, 0], sizes = [2, 32], strides = [1, 1]} : vector<2x128xf32> to vector<2x32xf32>
    %884 = arith.negf %883 : vector<2x32xf32>
    %885 = math.exp %884 : vector<2x32xf32>
    %cst_222 = arith.constant 1.000000e+00 : f32
    %886 = vector.broadcast %cst_222 : f32 to vector<2x32xf32>
    %887 = arith.addf %886, %885 : vector<2x32xf32>
    %888 = arith.divf %886, %887 : vector<2x32xf32>
    %889 = vector.extract_strided_slice %882 {offsets = [0, 32], sizes = [2, 32], strides = [1, 1]} : vector<2x128xf32> to vector<2x32xf32>
    %890 = arith.negf %889 : vector<2x32xf32>
    %891 = math.exp %890 : vector<2x32xf32>
    %cst_223 = arith.constant 1.000000e+00 : f32
    %892 = vector.broadcast %cst_223 : f32 to vector<2x32xf32>
    %893 = arith.addf %892, %891 : vector<2x32xf32>
    %894 = arith.divf %892, %893 : vector<2x32xf32>
    %895 = vector.extract_strided_slice %882 {offsets = [0, 64], sizes = [2, 32], strides = [1, 1]} : vector<2x128xf32> to vector<2x32xf32>
    %896 = math.tanh %895 : vector<2x32xf32>
    %897 = vector.extract_strided_slice %882 {offsets = [0, 96], sizes = [2, 32], strides = [1, 1]} : vector<2x128xf32> to vector<2x32xf32>
    %898 = arith.negf %897 : vector<2x32xf32>
    %899 = math.exp %898 : vector<2x32xf32>
    %cst_224 = arith.constant 1.000000e+00 : f32
    %900 = vector.broadcast %cst_224 : f32 to vector<2x32xf32>
    %901 = arith.addf %900, %899 : vector<2x32xf32>
    %902 = arith.divf %900, %901 : vector<2x32xf32>
    %903 = arith.mulf %894, %841 : vector<2x32xf32>
    %904 = arith.mulf %888, %896 : vector<2x32xf32>
    %905 = arith.addf %903, %904 : vector<2x32xf32>
    %906 = math.tanh %905 : vector<2x32xf32>
    %907 = arith.mulf %902, %906 : vector<2x32xf32>
    %c0_225 = arith.constant 0 : index
    %c4_226 = arith.constant 4 : index
    %c0_227 = arith.constant 0 : index
    %908 = vector.load %arg26[%c0_225, %c4_226, %c0_227] : memref<2x8x64xf32, #tpu.memory_space<vmem>>, vector<2x1x32xf32>
    %909 = vector.shape_cast %908 : vector<2x1x32xf32> to vector<2x32xf32>
    %910 = vector.shape_cast %907 : vector<2x32xf32> to vector<2x1x32xf32>
    tpu.vector_store %arg26[%c0_225, %c4_226, %c0_227], %910 {strides = array<i32>} : memref<2x8x64xf32, #tpu.memory_space<vmem>>, vector<2x1x32xf32>,
    %911 = vector.extract_strided_slice %618 {offsets = [0, 3, 0], sizes = [2, 1, 128], strides = [1, 1, 1]} : vector<2x8x128xf32> to vector<2x1x128xf32>
    %912 = vector.shape_cast %911 : vector<2x1x128xf32> to vector<2x128xf32>
    %cst_228 = arith.constant dense<0.000000e+00> : vector<2x128xf32>
    %913 = tpu.matmul %875, %608, %cst_228 {dimension_numbers = #tpu.dot_dimension_numbers<[1], [0], [0], [1], [0, 0, 1, 1], [], []>} : vector<2x32xf32>, vector<32x128xf32>, vector<2x128xf32> -> vector<2x128xf32>
    %914 = arith.addf %912, %913 : vector<2x128xf32>
    %915 = vector.extract_strided_slice %914 {offsets = [0, 0], sizes = [2, 32], strides = [1, 1]} : vector<2x128xf32> to vector<2x32xf32>
    %916 = arith.negf %915 : vector<2x32xf32>
    %917 = math.exp %916 : vector<2x32xf32>
    %cst_229 = arith.constant 1.000000e+00 : f32
    %918 = vector.broadcast %cst_229 : f32 to vector<2x32xf32>
    %919 = arith.addf %918, %917 : vector<2x32xf32>
    %920 = arith.divf %918, %919 : vector<2x32xf32>
    %921 = vector.extract_strided_slice %914 {offsets = [0, 32], sizes = [2, 32], strides = [1, 1]} : vector<2x128xf32> to vector<2x32xf32>
    %922 = arith.negf %921 : vector<2x32xf32>
    %923 = math.exp %922 : vector<2x32xf32>
    %cst_230 = arith.constant 1.000000e+00 : f32
    %924 = vector.broadcast %cst_230 : f32 to vector<2x32xf32>
    %925 = arith.addf %924, %923 : vector<2x32xf32>
    %926 = arith.divf %924, %925 : vector<2x32xf32>
    %927 = vector.extract_strided_slice %914 {offsets = [0, 64], sizes = [2, 32], strides = [1, 1]} : vector<2x128xf32> to vector<2x32xf32>
    %928 = math.tanh %927 : vector<2x32xf32>
    %929 = vector.extract_strided_slice %914 {offsets = [0, 96], sizes = [2, 32], strides = [1, 1]} : vector<2x128xf32> to vector<2x32xf32>
    %930 = arith.negf %929 : vector<2x32xf32>
    %931 = math.exp %930 : vector<2x32xf32>
    %cst_231 = arith.constant 1.000000e+00 : f32
    %932 = vector.broadcast %cst_231 : f32 to vector<2x32xf32>
    %933 = arith.addf %932, %931 : vector<2x32xf32>
    %934 = arith.divf %932, %933 : vector<2x32xf32>
    %935 = arith.mulf %926, %873 : vector<2x32xf32>
    %936 = arith.mulf %920, %928 : vector<2x32xf32>
    %937 = arith.addf %935, %936 : vector<2x32xf32>
    %938 = math.tanh %937 : vector<2x32xf32>
    %939 = arith.mulf %934, %938 : vector<2x32xf32>
    %c0_232 = arith.constant 0 : index
    %c3_233 = arith.constant 3 : index
    %c32_234 = arith.constant 32 : index
    %940 = vector.load %arg26[%c0_232, %c3_233, %c32_234] : memref<2x8x64xf32, #tpu.memory_space<vmem>>, vector<2x1x32xf32>
    %941 = vector.shape_cast %940 : vector<2x1x32xf32> to vector<2x32xf32>
    %942 = vector.shape_cast %939 : vector<2x32xf32> to vector<2x1x32xf32>
    tpu.vector_store %arg26[%c0_232, %c3_233, %c32_234], %942 {strides = array<i32>} : memref<2x8x64xf32, #tpu.memory_space<vmem>>, vector<2x1x32xf32>,
    %943 = vector.extract_strided_slice %614 {offsets = [0, 5, 0], sizes = [2, 1, 128], strides = [1, 1, 1]} : vector<2x8x128xf32> to vector<2x1x128xf32>
    %944 = vector.shape_cast %943 : vector<2x1x128xf32> to vector<2x128xf32>
    %cst_235 = arith.constant dense<0.000000e+00> : vector<2x128xf32>
    %945 = tpu.matmul %907, %605, %cst_235 {dimension_numbers = #tpu.dot_dimension_numbers<[1], [0], [0], [1], [0, 0, 1, 1], [], []>} : vector<2x32xf32>, vector<32x128xf32>, vector<2x128xf32> -> vector<2x128xf32>
    %946 = arith.addf %944, %945 : vector<2x128xf32>
    %947 = vector.extract_strided_slice %946 {offsets = [0, 0], sizes = [2, 32], strides = [1, 1]} : vector<2x128xf32> to vector<2x32xf32>
    %948 = arith.negf %947 : vector<2x32xf32>
    %949 = math.exp %948 : vector<2x32xf32>
    %cst_236 = arith.constant 1.000000e+00 : f32
    %950 = vector.broadcast %cst_236 : f32 to vector<2x32xf32>
    %951 = arith.addf %950, %949 : vector<2x32xf32>
    %952 = arith.divf %950, %951 : vector<2x32xf32>
    %953 = vector.extract_strided_slice %946 {offsets = [0, 32], sizes = [2, 32], strides = [1, 1]} : vector<2x128xf32> to vector<2x32xf32>
    %954 = arith.negf %953 : vector<2x32xf32>
    %955 = math.exp %954 : vector<2x32xf32>
    %cst_237 = arith.constant 1.000000e+00 : f32
    %956 = vector.broadcast %cst_237 : f32 to vector<2x32xf32>
    %957 = arith.addf %956, %955 : vector<2x32xf32>
    %958 = arith.divf %956, %957 : vector<2x32xf32>
    %959 = vector.extract_strided_slice %946 {offsets = [0, 64], sizes = [2, 32], strides = [1, 1]} : vector<2x128xf32> to vector<2x32xf32>
    %960 = math.tanh %959 : vector<2x32xf32>
    %961 = vector.extract_strided_slice %946 {offsets = [0, 96], sizes = [2, 32], strides = [1, 1]} : vector<2x128xf32> to vector<2x32xf32>
    %962 = arith.negf %961 : vector<2x32xf32>
    %963 = math.exp %962 : vector<2x32xf32>
    %cst_238 = arith.constant 1.000000e+00 : f32
    %964 = vector.broadcast %cst_238 : f32 to vector<2x32xf32>
    %965 = arith.addf %964, %963 : vector<2x32xf32>
    %966 = arith.divf %964, %965 : vector<2x32xf32>
    %967 = arith.mulf %958, %905 : vector<2x32xf32>
    %968 = arith.mulf %952, %960 : vector<2x32xf32>
    %969 = arith.addf %967, %968 : vector<2x32xf32>
    %970 = math.tanh %969 : vector<2x32xf32>
    %971 = arith.mulf %966, %970 : vector<2x32xf32>
    %c0_239 = arith.constant 0 : index
    %c5_240 = arith.constant 5 : index
    %c0_241 = arith.constant 0 : index
    %972 = vector.load %arg26[%c0_239, %c5_240, %c0_241] : memref<2x8x64xf32, #tpu.memory_space<vmem>>, vector<2x1x32xf32>
    %973 = vector.shape_cast %972 : vector<2x1x32xf32> to vector<2x32xf32>
    %974 = vector.shape_cast %971 : vector<2x32xf32> to vector<2x1x32xf32>
    tpu.vector_store %arg26[%c0_239, %c5_240, %c0_241], %974 {strides = array<i32>} : memref<2x8x64xf32, #tpu.memory_space<vmem>>, vector<2x1x32xf32>,
    %975 = vector.extract_strided_slice %618 {offsets = [0, 2, 0], sizes = [2, 1, 128], strides = [1, 1, 1]} : vector<2x8x128xf32> to vector<2x1x128xf32>
    %976 = vector.shape_cast %975 : vector<2x1x128xf32> to vector<2x128xf32>
    %cst_242 = arith.constant dense<0.000000e+00> : vector<2x128xf32>
    %977 = tpu.matmul %939, %608, %cst_242 {dimension_numbers = #tpu.dot_dimension_numbers<[1], [0], [0], [1], [0, 0, 1, 1], [], []>} : vector<2x32xf32>, vector<32x128xf32>, vector<2x128xf32> -> vector<2x128xf32>
    %978 = arith.addf %976, %977 : vector<2x128xf32>
    %979 = vector.extract_strided_slice %978 {offsets = [0, 0], sizes = [2, 32], strides = [1, 1]} : vector<2x128xf32> to vector<2x32xf32>
    %980 = arith.negf %979 : vector<2x32xf32>
    %981 = math.exp %980 : vector<2x32xf32>
    %cst_243 = arith.constant 1.000000e+00 : f32
    %982 = vector.broadcast %cst_243 : f32 to vector<2x32xf32>
    %983 = arith.addf %982, %981 : vector<2x32xf32>
    %984 = arith.divf %982, %983 : vector<2x32xf32>
    %985 = vector.extract_strided_slice %978 {offsets = [0, 32], sizes = [2, 32], strides = [1, 1]} : vector<2x128xf32> to vector<2x32xf32>
    %986 = arith.negf %985 : vector<2x32xf32>
    %987 = math.exp %986 : vector<2x32xf32>
    %cst_244 = arith.constant 1.000000e+00 : f32
    %988 = vector.broadcast %cst_244 : f32 to vector<2x32xf32>
    %989 = arith.addf %988, %987 : vector<2x32xf32>
    %990 = arith.divf %988, %989 : vector<2x32xf32>
    %991 = vector.extract_strided_slice %978 {offsets = [0, 64], sizes = [2, 32], strides = [1, 1]} : vector<2x128xf32> to vector<2x32xf32>
    %992 = math.tanh %991 : vector<2x32xf32>
    %993 = vector.extract_strided_slice %978 {offsets = [0, 96], sizes = [2, 32], strides = [1, 1]} : vector<2x128xf32> to vector<2x32xf32>
    %994 = arith.negf %993 : vector<2x32xf32>
    %995 = math.exp %994 : vector<2x32xf32>
    %cst_245 = arith.constant 1.000000e+00 : f32
    %996 = vector.broadcast %cst_245 : f32 to vector<2x32xf32>
    %997 = arith.addf %996, %995 : vector<2x32xf32>
    %998 = arith.divf %996, %997 : vector<2x32xf32>
    %999 = arith.mulf %990, %937 : vector<2x32xf32>
    %1000 = arith.mulf %984, %992 : vector<2x32xf32>
    %1001 = arith.addf %999, %1000 : vector<2x32xf32>
    %1002 = math.tanh %1001 : vector<2x32xf32>
    %1003 = arith.mulf %998, %1002 : vector<2x32xf32>
    %c0_246 = arith.constant 0 : index
    %c2_247 = arith.constant 2 : index
    %c32_248 = arith.constant 32 : index
    %1004 = vector.load %arg26[%c0_246, %c2_247, %c32_248] : memref<2x8x64xf32, #tpu.memory_space<vmem>>, vector<2x1x32xf32>
    %1005 = vector.shape_cast %1004 : vector<2x1x32xf32> to vector<2x32xf32>
    %1006 = vector.shape_cast %1003 : vector<2x32xf32> to vector<2x1x32xf32>
    tpu.vector_store %arg26[%c0_246, %c2_247, %c32_248], %1006 {strides = array<i32>} : memref<2x8x64xf32, #tpu.memory_space<vmem>>, vector<2x1x32xf32>,
    %1007 = vector.extract_strided_slice %614 {offsets = [0, 6, 0], sizes = [2, 1, 128], strides = [1, 1, 1]} : vector<2x8x128xf32> to vector<2x1x128xf32>
    %1008 = vector.shape_cast %1007 : vector<2x1x128xf32> to vector<2x128xf32>
    %cst_249 = arith.constant dense<0.000000e+00> : vector<2x128xf32>
    %1009 = tpu.matmul %971, %605, %cst_249 {dimension_numbers = #tpu.dot_dimension_numbers<[1], [0], [0], [1], [0, 0, 1, 1], [], []>} : vector<2x32xf32>, vector<32x128xf32>, vector<2x128xf32> -> vector<2x128xf32>
    %1010 = arith.addf %1008, %1009 : vector<2x128xf32>
    %1011 = vector.extract_strided_slice %1010 {offsets = [0, 0], sizes = [2, 32], strides = [1, 1]} : vector<2x128xf32> to vector<2x32xf32>
    %1012 = arith.negf %1011 : vector<2x32xf32>
    %1013 = math.exp %1012 : vector<2x32xf32>
    %cst_250 = arith.constant 1.000000e+00 : f32
    %1014 = vector.broadcast %cst_250 : f32 to vector<2x32xf32>
    %1015 = arith.addf %1014, %1013 : vector<2x32xf32>
    %1016 = arith.divf %1014, %1015 : vector<2x32xf32>
    %1017 = vector.extract_strided_slice %1010 {offsets = [0, 32], sizes = [2, 32], strides = [1, 1]} : vector<2x128xf32> to vector<2x32xf32>
    %1018 = arith.negf %1017 : vector<2x32xf32>
    %1019 = math.exp %1018 : vector<2x32xf32>
    %cst_251 = arith.constant 1.000000e+00 : f32
    %1020 = vector.broadcast %cst_251 : f32 to vector<2x32xf32>
    %1021 = arith.addf %1020, %1019 : vector<2x32xf32>
    %1022 = arith.divf %1020, %1021 : vector<2x32xf32>
    %1023 = vector.extract_strided_slice %1010 {offsets = [0, 64], sizes = [2, 32], strides = [1, 1]} : vector<2x128xf32> to vector<2x32xf32>
    %1024 = math.tanh %1023 : vector<2x32xf32>
    %1025 = vector.extract_strided_slice %1010 {offsets = [0, 96], sizes = [2, 32], strides = [1, 1]} : vector<2x128xf32> to vector<2x32xf32>
    %1026 = arith.negf %1025 : vector<2x32xf32>
    %1027 = math.exp %1026 : vector<2x32xf32>
    %cst_252 = arith.constant 1.000000e+00 : f32
    %1028 = vector.broadcast %cst_252 : f32 to vector<2x32xf32>
    %1029 = arith.addf %1028, %1027 : vector<2x32xf32>
    %1030 = arith.divf %1028, %1029 : vector<2x32xf32>
    %1031 = arith.mulf %1022, %969 : vector<2x32xf32>
    %1032 = arith.mulf %1016, %1024 : vector<2x32xf32>
    %1033 = arith.addf %1031, %1032 : vector<2x32xf32>
    %1034 = math.tanh %1033 : vector<2x32xf32>
    %1035 = arith.mulf %1030, %1034 : vector<2x32xf32>
    %c0_253 = arith.constant 0 : index
    %c6_254 = arith.constant 6 : index
    %c0_255 = arith.constant 0 : index
    %1036 = vector.load %arg26[%c0_253, %c6_254, %c0_255] : memref<2x8x64xf32, #tpu.memory_space<vmem>>, vector<2x1x32xf32>
    %1037 = vector.shape_cast %1036 : vector<2x1x32xf32> to vector<2x32xf32>
    %1038 = vector.shape_cast %1035 : vector<2x32xf32> to vector<2x1x32xf32>
    tpu.vector_store %arg26[%c0_253, %c6_254, %c0_255], %1038 {strides = array<i32>} : memref<2x8x64xf32, #tpu.memory_space<vmem>>, vector<2x1x32xf32>,
    %1039 = vector.extract_strided_slice %618 {offsets = [0, 1, 0], sizes = [2, 1, 128], strides = [1, 1, 1]} : vector<2x8x128xf32> to vector<2x1x128xf32>
    %1040 = vector.shape_cast %1039 : vector<2x1x128xf32> to vector<2x128xf32>
    %cst_256 = arith.constant dense<0.000000e+00> : vector<2x128xf32>
    %1041 = tpu.matmul %1003, %608, %cst_256 {dimension_numbers = #tpu.dot_dimension_numbers<[1], [0], [0], [1], [0, 0, 1, 1], [], []>} : vector<2x32xf32>, vector<32x128xf32>, vector<2x128xf32> -> vector<2x128xf32>
    %1042 = arith.addf %1040, %1041 : vector<2x128xf32>
    %1043 = vector.extract_strided_slice %1042 {offsets = [0, 0], sizes = [2, 32], strides = [1, 1]} : vector<2x128xf32> to vector<2x32xf32>
    %1044 = arith.negf %1043 : vector<2x32xf32>
    %1045 = math.exp %1044 : vector<2x32xf32>
    %cst_257 = arith.constant 1.000000e+00 : f32
    %1046 = vector.broadcast %cst_257 : f32 to vector<2x32xf32>
    %1047 = arith.addf %1046, %1045 : vector<2x32xf32>
    %1048 = arith.divf %1046, %1047 : vector<2x32xf32>
    %1049 = vector.extract_strided_slice %1042 {offsets = [0, 32], sizes = [2, 32], strides = [1, 1]} : vector<2x128xf32> to vector<2x32xf32>
    %1050 = arith.negf %1049 : vector<2x32xf32>
    %1051 = math.exp %1050 : vector<2x32xf32>
    %cst_258 = arith.constant 1.000000e+00 : f32
    %1052 = vector.broadcast %cst_258 : f32 to vector<2x32xf32>
    %1053 = arith.addf %1052, %1051 : vector<2x32xf32>
    %1054 = arith.divf %1052, %1053 : vector<2x32xf32>
    %1055 = vector.extract_strided_slice %1042 {offsets = [0, 64], sizes = [2, 32], strides = [1, 1]} : vector<2x128xf32> to vector<2x32xf32>
    %1056 = math.tanh %1055 : vector<2x32xf32>
    %1057 = vector.extract_strided_slice %1042 {offsets = [0, 96], sizes = [2, 32], strides = [1, 1]} : vector<2x128xf32> to vector<2x32xf32>
    %1058 = arith.negf %1057 : vector<2x32xf32>
    %1059 = math.exp %1058 : vector<2x32xf32>
    %cst_259 = arith.constant 1.000000e+00 : f32
    %1060 = vector.broadcast %cst_259 : f32 to vector<2x32xf32>
    %1061 = arith.addf %1060, %1059 : vector<2x32xf32>
    %1062 = arith.divf %1060, %1061 : vector<2x32xf32>
    %1063 = arith.mulf %1054, %1001 : vector<2x32xf32>
    %1064 = arith.mulf %1048, %1056 : vector<2x32xf32>
    %1065 = arith.addf %1063, %1064 : vector<2x32xf32>
    %1066 = math.tanh %1065 : vector<2x32xf32>
    %1067 = arith.mulf %1062, %1066 : vector<2x32xf32>
    %c0_260 = arith.constant 0 : index
    %c1_261 = arith.constant 1 : index
    %c32_262 = arith.constant 32 : index
    %1068 = vector.load %arg26[%c0_260, %c1_261, %c32_262] : memref<2x8x64xf32, #tpu.memory_space<vmem>>, vector<2x1x32xf32>
    %1069 = vector.shape_cast %1068 : vector<2x1x32xf32> to vector<2x32xf32>
    %1070 = vector.shape_cast %1067 : vector<2x32xf32> to vector<2x1x32xf32>
    tpu.vector_store %arg26[%c0_260, %c1_261, %c32_262], %1070 {strides = array<i32>} : memref<2x8x64xf32, #tpu.memory_space<vmem>>, vector<2x1x32xf32>,
    %1071 = vector.extract_strided_slice %614 {offsets = [0, 7, 0], sizes = [2, 1, 128], strides = [1, 1, 1]} : vector<2x8x128xf32> to vector<2x1x128xf32>
    %1072 = vector.shape_cast %1071 : vector<2x1x128xf32> to vector<2x128xf32>
    %cst_263 = arith.constant dense<0.000000e+00> : vector<2x128xf32>
    %1073 = tpu.matmul %1035, %605, %cst_263 {dimension_numbers = #tpu.dot_dimension_numbers<[1], [0], [0], [1], [0, 0, 1, 1], [], []>} : vector<2x32xf32>, vector<32x128xf32>, vector<2x128xf32> -> vector<2x128xf32>
    %1074 = arith.addf %1072, %1073 : vector<2x128xf32>
    %1075 = vector.extract_strided_slice %1074 {offsets = [0, 0], sizes = [2, 32], strides = [1, 1]} : vector<2x128xf32> to vector<2x32xf32>
    %1076 = arith.negf %1075 : vector<2x32xf32>
    %1077 = math.exp %1076 : vector<2x32xf32>
    %cst_264 = arith.constant 1.000000e+00 : f32
    %1078 = vector.broadcast %cst_264 : f32 to vector<2x32xf32>
    %1079 = arith.addf %1078, %1077 : vector<2x32xf32>
    %1080 = arith.divf %1078, %1079 : vector<2x32xf32>
    %1081 = vector.extract_strided_slice %1074 {offsets = [0, 32], sizes = [2, 32], strides = [1, 1]} : vector<2x128xf32> to vector<2x32xf32>
    %1082 = arith.negf %1081 : vector<2x32xf32>
    %1083 = math.exp %1082 : vector<2x32xf32>
    %cst_265 = arith.constant 1.000000e+00 : f32
    %1084 = vector.broadcast %cst_265 : f32 to vector<2x32xf32>
    %1085 = arith.addf %1084, %1083 : vector<2x32xf32>
    %1086 = arith.divf %1084, %1085 : vector<2x32xf32>
    %1087 = vector.extract_strided_slice %1074 {offsets = [0, 64], sizes = [2, 32], strides = [1, 1]} : vector<2x128xf32> to vector<2x32xf32>
    %1088 = math.tanh %1087 : vector<2x32xf32>
    %1089 = vector.extract_strided_slice %1074 {offsets = [0, 96], sizes = [2, 32], strides = [1, 1]} : vector<2x128xf32> to vector<2x32xf32>
    %1090 = arith.negf %1089 : vector<2x32xf32>
    %1091 = math.exp %1090 : vector<2x32xf32>
    %cst_266 = arith.constant 1.000000e+00 : f32
    %1092 = vector.broadcast %cst_266 : f32 to vector<2x32xf32>
    %1093 = arith.addf %1092, %1091 : vector<2x32xf32>
    %1094 = arith.divf %1092, %1093 : vector<2x32xf32>
    %1095 = arith.mulf %1086, %1033 : vector<2x32xf32>
    %1096 = arith.mulf %1080, %1088 : vector<2x32xf32>
    %1097 = arith.addf %1095, %1096 : vector<2x32xf32>
    %1098 = math.tanh %1097 : vector<2x32xf32>
    %1099 = arith.mulf %1094, %1098 : vector<2x32xf32>
    %c0_267 = arith.constant 0 : index
    %c7_268 = arith.constant 7 : index
    %c0_269 = arith.constant 0 : index
    %1100 = vector.load %arg26[%c0_267, %c7_268, %c0_269] : memref<2x8x64xf32, #tpu.memory_space<vmem>>, vector<2x1x32xf32>
    %1101 = vector.shape_cast %1100 : vector<2x1x32xf32> to vector<2x32xf32>
    %1102 = vector.shape_cast %1099 : vector<2x32xf32> to vector<2x1x32xf32>
    tpu.vector_store %arg26[%c0_267, %c7_268, %c0_269], %1102 {strides = array<i32>} : memref<2x8x64xf32, #tpu.memory_space<vmem>>, vector<2x1x32xf32>,
    %1103 = vector.extract_strided_slice %618 {offsets = [0, 0, 0], sizes = [2, 1, 128], strides = [1, 1, 1]} : vector<2x8x128xf32> to vector<2x1x128xf32>
    %1104 = vector.shape_cast %1103 : vector<2x1x128xf32> to vector<2x128xf32>
    %cst_270 = arith.constant dense<0.000000e+00> : vector<2x128xf32>
    %1105 = tpu.matmul %1067, %608, %cst_270 {dimension_numbers = #tpu.dot_dimension_numbers<[1], [0], [0], [1], [0, 0, 1, 1], [], []>} : vector<2x32xf32>, vector<32x128xf32>, vector<2x128xf32> -> vector<2x128xf32>
    %1106 = arith.addf %1104, %1105 : vector<2x128xf32>
    %1107 = vector.extract_strided_slice %1106 {offsets = [0, 0], sizes = [2, 32], strides = [1, 1]} : vector<2x128xf32> to vector<2x32xf32>
    %1108 = arith.negf %1107 : vector<2x32xf32>
    %1109 = math.exp %1108 : vector<2x32xf32>
    %cst_271 = arith.constant 1.000000e+00 : f32
    %1110 = vector.broadcast %cst_271 : f32 to vector<2x32xf32>
    %1111 = arith.addf %1110, %1109 : vector<2x32xf32>
    %1112 = arith.divf %1110, %1111 : vector<2x32xf32>
    %1113 = vector.extract_strided_slice %1106 {offsets = [0, 32], sizes = [2, 32], strides = [1, 1]} : vector<2x128xf32> to vector<2x32xf32>
    %1114 = arith.negf %1113 : vector<2x32xf32>
    %1115 = math.exp %1114 : vector<2x32xf32>
    %cst_272 = arith.constant 1.000000e+00 : f32
    %1116 = vector.broadcast %cst_272 : f32 to vector<2x32xf32>
    %1117 = arith.addf %1116, %1115 : vector<2x32xf32>
    %1118 = arith.divf %1116, %1117 : vector<2x32xf32>
    %1119 = vector.extract_strided_slice %1106 {offsets = [0, 64], sizes = [2, 32], strides = [1, 1]} : vector<2x128xf32> to vector<2x32xf32>
    %1120 = math.tanh %1119 : vector<2x32xf32>
    %1121 = vector.extract_strided_slice %1106 {offsets = [0, 96], sizes = [2, 32], strides = [1, 1]} : vector<2x128xf32> to vector<2x32xf32>
    %1122 = arith.negf %1121 : vector<2x32xf32>
    %1123 = math.exp %1122 : vector<2x32xf32>
    %cst_273 = arith.constant 1.000000e+00 : f32
    %1124 = vector.broadcast %cst_273 : f32 to vector<2x32xf32>
    %1125 = arith.addf %1124, %1123 : vector<2x32xf32>
    %1126 = arith.divf %1124, %1125 : vector<2x32xf32>
    %1127 = arith.mulf %1118, %1065 : vector<2x32xf32>
    %1128 = arith.mulf %1112, %1120 : vector<2x32xf32>
    %1129 = arith.addf %1127, %1128 : vector<2x32xf32>
    %1130 = math.tanh %1129 : vector<2x32xf32>
    %1131 = arith.mulf %1126, %1130 : vector<2x32xf32>
    %c0_274 = arith.constant 0 : index
    %c0_275 = arith.constant 0 : index
    %c32_276 = arith.constant 32 : index
    %1132 = vector.load %arg26[%c0_274, %c0_275, %c32_276] : memref<2x8x64xf32, #tpu.memory_space<vmem>>, vector<2x1x32xf32>
    %1133 = vector.shape_cast %1132 : vector<2x1x32xf32> to vector<2x32xf32>
    %1134 = vector.shape_cast %1131 : vector<2x32xf32> to vector<2x1x32xf32>
    tpu.vector_store %arg26[%c0_274, %c0_275, %c32_276], %1134 {strides = array<i32>} : memref<2x8x64xf32, #tpu.memory_space<vmem>>, vector<2x1x32xf32>,
    %c0_277 = arith.constant 0 : index
    %c0_278 = arith.constant 0 : index
    %c0_279 = arith.constant 0 : index
    %1135 = vector.load %arg26[%c0_277, %c0_278, %c0_279] : memref<2x8x64xf32, #tpu.memory_space<vmem>>, vector<2x8x64xf32>
    %1136 = vector.shape_cast %1135 : vector<2x8x64xf32> to vector<16x64xf32>
    %c0_280 = arith.constant 0 : index
    %c0_281 = arith.constant 0 : index
    %1137 = vector.load %arg20[%c0_280, %c0_281] : memref<64x128xf32, #tpu.memory_space<vmem>>, vector<64x128xf32>
    %cst_282 = arith.constant dense<0.000000e+00> : vector<16x128xf32>
    %1138 = tpu.matmul %1136, %1137, %cst_282 {dimension_numbers = #tpu.dot_dimension_numbers<[1], [0], [0], [1], [0, 0, 1, 1], [], []>} : vector<16x64xf32>, vector<64x128xf32>, vector<16x128xf32> -> vector<16x128xf32>
    %c0_283 = arith.constant 0 : index
    %c0_284 = arith.constant 0 : index
    %1139 = vector.load %arg21[%c0_283, %c0_284] : memref<1x128xf32, #tpu.memory_space<vmem>>, vector<1x128xf32>
    %1140 = vector.broadcast %1139 : vector<1x128xf32> to vector<16x128xf32>
    %1141 = arith.addf %1138, %1140 : vector<16x128xf32>
    %cst_285 = arith.constant 0.000000e+00 : f32
    %1142 = vector.broadcast %cst_285 : f32 to vector<16x128xf32>
    %1143 = arith.maximumf %1141, %1142 : vector<16x128xf32>
    %c0_286 = arith.constant 0 : index
    %c0_287 = arith.constant 0 : index
    %1144 = vector.load %arg22[%c0_286, %c0_287] : memref<128x128xf32, #tpu.memory_space<vmem>>, vector<128x128xf32>
    %cst_288 = arith.constant dense<0.000000e+00> : vector<16x128xf32>
    %1145 = tpu.matmul %1143, %1144, %cst_288 {dimension_numbers = #tpu.dot_dimension_numbers<[1], [0], [0], [1], [0, 0, 1, 1], [], []>} : vector<16x128xf32>, vector<128x128xf32>, vector<16x128xf32> -> vector<16x128xf32>
    %c0_289 = arith.constant 0 : index
    %c0_290 = arith.constant 0 : index
    %1146 = vector.load %arg23[%c0_289, %c0_290] : memref<1x128xf32, #tpu.memory_space<vmem>>, vector<1x128xf32>
    %1147 = vector.broadcast %1146 : vector<1x128xf32> to vector<16x128xf32>
    %1148 = arith.addf %1145, %1147 : vector<16x128xf32>
    %1149 = vector.shape_cast %1148 : vector<16x128xf32> to vector<2x8x128xf32>
    %c0_291 = arith.constant 0 : index
    %c0_292 = arith.constant 0 : index
    %c0_293 = arith.constant 0 : index
    %1150 = vector.load %arg24[%c0_291, %c0_292, %c0_293] : memref<2x8x128xf32, #tpu.memory_space<vmem>>, vector<2x8x128xf32>
    tpu.vector_store %arg24[%c0_291, %c0_292, %c0_293], %1149 {strides = array<i32>} : memref<2x8x128xf32, #tpu.memory_space<vmem>>, vector<2x8x128xf32>,
    return
  }
  func.func @transform_0(%arg0: i32) -> (i32, i32, i32, i32) {
    %c0_i32 = arith.constant 0 : i32
    %c0_i32_0 = arith.constant 0 : i32
    %c0_i32_1 = arith.constant 0 : i32
    %c0_i32_2 = arith.constant 0 : i32
    %c0_i32_3 = arith.constant 0 : i32
    return %c0_i32, %c0_i32_0, %c0_i32_1, %c0_i32_2 : i32, i32, i32, i32
  }
  func.func @transform_1(%arg0: i32) -> (i32, i32) {
    %c0_i32 = arith.constant 0 : i32
    %c0_i32_0 = arith.constant 0 : i32
    %c0_i32_1 = arith.constant 0 : i32
    return %c0_i32, %c0_i32_0 : i32, i32
  }
  func.func @transform_2(%arg0: i32) -> (i32, i32) {
    %c0_i32 = arith.constant 0 : i32
    %c0_i32_0 = arith.constant 0 : i32
    %c0_i32_1 = arith.constant 0 : i32
    return %c0_i32, %c0_i32_0 : i32, i32
  }
  func.func @transform_3(%arg0: i32) -> (i32, i32) {
    %c0_i32 = arith.constant 0 : i32
    %c0_i32_0 = arith.constant 0 : i32
    %c0_i32_1 = arith.constant 0 : i32
    return %c0_i32, %c0_i32_0 : i32, i32
  }
  func.func @transform_4(%arg0: i32) -> (i32, i32) {
    %c0_i32 = arith.constant 0 : i32
    %c0_i32_0 = arith.constant 0 : i32
    %c0_i32_1 = arith.constant 0 : i32
    return %c0_i32, %c0_i32_0 : i32, i32
  }
  func.func @transform_5(%arg0: i32) -> (i32, i32) {
    %c0_i32 = arith.constant 0 : i32
    %c0_i32_0 = arith.constant 0 : i32
    %c0_i32_1 = arith.constant 0 : i32
    return %c0_i32, %c0_i32_0 : i32, i32
  }
  func.func @transform_6(%arg0: i32) -> (i32, i32) {
    %c0_i32 = arith.constant 0 : i32
    %c0_i32_0 = arith.constant 0 : i32
    %c0_i32_1 = arith.constant 0 : i32
    return %c0_i32, %c0_i32_0 : i32, i32
  }
  func.func @transform_7(%arg0: i32) -> (i32, i32) {
    %c0_i32 = arith.constant 0 : i32
    %c0_i32_0 = arith.constant 0 : i32
    %c0_i32_1 = arith.constant 0 : i32
    return %c0_i32, %c0_i32_0 : i32, i32
  }
  func.func @transform_8(%arg0: i32) -> (i32, i32) {
    %c0_i32 = arith.constant 0 : i32
    %c0_i32_0 = arith.constant 0 : i32
    %c0_i32_1 = arith.constant 0 : i32
    return %c0_i32, %c0_i32_0 : i32, i32
  }
  func.func @transform_9(%arg0: i32) -> (i32, i32) {
    %c0_i32 = arith.constant 0 : i32
    %c0_i32_0 = arith.constant 0 : i32
    %c0_i32_1 = arith.constant 0 : i32
    return %c0_i32, %c0_i32_0 : i32, i32
  }
  func.func @transform_10(%arg0: i32) -> (i32, i32) {
    %c0_i32 = arith.constant 0 : i32
    %c0_i32_0 = arith.constant 0 : i32
    %c0_i32_1 = arith.constant 0 : i32
    return %c0_i32, %c0_i32_0 : i32, i32
  }
  func.func @transform_11(%arg0: i32) -> (i32, i32) {
    %c0_i32 = arith.constant 0 : i32
    %c0_i32_0 = arith.constant 0 : i32
    %c0_i32_1 = arith.constant 0 : i32
    return %c0_i32, %c0_i32_0 : i32, i32
  }
  func.func @transform_12(%arg0: i32) -> (i32, i32) {
    %c0_i32 = arith.constant 0 : i32
    %c0_i32_0 = arith.constant 0 : i32
    %c0_i32_1 = arith.constant 0 : i32
    return %c0_i32, %c0_i32_0 : i32, i32
  }
  func.func @transform_13(%arg0: i32) -> (i32, i32) {
    %c0_i32 = arith.constant 0 : i32
    %c0_i32_0 = arith.constant 0 : i32
    %c0_i32_1 = arith.constant 0 : i32
    return %c0_i32, %c0_i32_0 : i32, i32
  }
  func.func @transform_14(%arg0: i32) -> (i32, i32) {
    %c0_i32 = arith.constant 0 : i32
    %c0_i32_0 = arith.constant 0 : i32
    %c0_i32_1 = arith.constant 0 : i32
    return %c0_i32, %c0_i32_0 : i32, i32
  }
  func.func @transform_15(%arg0: i32) -> (i32, i32) {
    %c0_i32 = arith.constant 0 : i32
    %c0_i32_0 = arith.constant 0 : i32
    %c0_i32_1 = arith.constant 0 : i32
    return %c0_i32, %c0_i32_0 : i32, i32
  }
  func.func @transform_16(%arg0: i32) -> (i32, i32) {
    %c0_i32 = arith.constant 0 : i32
    %c0_i32_0 = arith.constant 0 : i32
    %c0_i32_1 = arith.constant 0 : i32
    return %c0_i32, %c0_i32_0 : i32, i32
  }
  func.func @transform_17(%arg0: i32) -> (i32, i32) {
    %c0_i32 = arith.constant 0 : i32
    %c0_i32_0 = arith.constant 0 : i32
    %c0_i32_1 = arith.constant 0 : i32
    return %c0_i32, %c0_i32_0 : i32, i32
  }
  func.func @transform_18(%arg0: i32) -> (i32, i32) {
    %c0_i32 = arith.constant 0 : i32
    %c0_i32_0 = arith.constant 0 : i32
    %c0_i32_1 = arith.constant 0 : i32
    return %c0_i32, %c0_i32_0 : i32, i32
  }
  func.func @transform_19(%arg0: i32) -> (i32, i32) {
    %c0_i32 = arith.constant 0 : i32
    %c0_i32_0 = arith.constant 0 : i32
    %c0_i32_1 = arith.constant 0 : i32
    return %c0_i32, %c0_i32_0 : i32, i32
  }
  func.func @transform_20(%arg0: i32) -> (i32, i32) {
    %c0_i32 = arith.constant 0 : i32
    %c0_i32_0 = arith.constant 0 : i32
    %c0_i32_1 = arith.constant 0 : i32
    return %c0_i32, %c0_i32_0 : i32, i32
  }
  func.func @transform_21(%arg0: i32) -> (i32, i32) {
    %c0_i32 = arith.constant 0 : i32
    %c0_i32_0 = arith.constant 0 : i32
    %c0_i32_1 = arith.constant 0 : i32
    return %c0_i32, %c0_i32_0 : i32, i32
  }
  func.func @transform_22(%arg0: i32) -> (i32, i32) {
    %c0_i32 = arith.constant 0 : i32
    %c0_i32_0 = arith.constant 0 : i32
    %c0_i32_1 = arith.constant 0 : i32
    return %c0_i32, %c0_i32_0 : i32, i32
  }
  func.func @transform_23(%arg0: i32) -> (i32, i32, i32) {
    %c0_i32 = arith.constant 0 : i32
    %c0_i32_0 = arith.constant 0 : i32
    %c0_i32_1 = arith.constant 0 : i32
    %c0_i32_2 = arith.constant 0 : i32
    return %c0_i32, %c0_i32_0, %c0_i32_1 : i32, i32, i32
  }
}

</mosaic_0001>

<bundles_post_ra>
// kernel: tpu_custom_call.1
= control target key start
LH: loop header
LB: loop body
LE: loop exit
PB: predicated region body
PF: predicated region fallthrough
CT: control target
= control target key end

     0   :  { %s14010_s0 = inlined_call_operand.vmem [shape: f32[2,16,8,1], index: 0, kind: input, shape index: {}]   ;;  %s14011_s1 = inlined_call_operand.vmem [shape: f32[9,8], index: 1, kind: input, shape index: {}]   ;;  %s14012_s2 = inlined_call_operand.vmem [shape: f32[1,8], index: 2, kind: input, shape index: {}]   ;;  %s14013_s3 = inlined_call_operand.vmem [shape: f32[1,8], index: 3, kind: input, shape index: {}]   ;;  %s14014_s4 = inlined_call_operand.vmem [shape: f32[72,8], index: 4, kind: input, shape index: {}]   ;;  %s14015_s5 = inlined_call_operand.hbm [shape: f32[1,8], index: 5, kind: input, shape index: {}]   ;;  %s14016_s6 = inlined_call_operand.hbm [shape: f32[1,8], index: 6, kind: input, shape index: {}]   ;;  %s14017_s7 = inlined_call_operand.vmem [shape: f32[32,128], index: 7, kind: input, shape index: {}]   ;;  %s14018_s8 = inlined_call_operand.vmem [shape: f32[32,128], index: 8, kind: input, shape index: {}]   ;;  %s14019_s9 = inlined_call_operand.vmem [shape: f32[1,128], index: 9, kind: input, shape index: {}]   ;;  %s14020_s10 = inlined_call_operand.hbm [shape: f32[32,128], index: 10, kind: input, shape index: {}]   ;;  %s14021_s11 = inlined_call_operand.hbm [shape: f32[32,128], index: 11, kind: input, shape index: {}]   ;;  %s14022_s12 = inlined_call_operand.vmem [shape: f32[1,128], index: 12, kind: input, shape index: {}]   ;;  %s14023_s13 = inlined_call_operand.vmem [shape: f32[64,128], index: 13, kind: input, shape index: {}]   ;;  %s14024_s14 = inlined_call_operand.hbm [shape: f32[32,128], index: 14, kind: input, shape index: {}]   ;;  %s14025_s15 = inlined_call_operand.vmem [shape: f32[1,128], index: 15, kind: input, shape index: {}]   ;;  %s14026_s16 = inlined_call_operand.vmem [shape: f32[64,128], index: 16, kind: input, shape index: {}]   ;;  %s14027_s17 = inlined_call_operand.hbm [shape: f32[32,128], index: 17, kind: input, shape index: {}]   ;;  %s14028_s18 = inlined_call_operand.vmem [shape: f32[1,128], index: 18, kind: input, shape index: {}]   ;;  %s14029_s19 = inlined_call_operand.vmem [shape: f32[64,128], index: 19, kind: input, shape index: {}]   ;;  %s14030_s20 = inlined_call_operand.vmem [shape: f32[1,128], index: 20, kind: input, shape index: {}]   ;;  %s14031_s21 = inlined_call_operand.vmem [shape: f32[128,128], index: 21, kind: input, shape index: {}]   ;;  %s14032_s22 = inlined_call_operand.vmem [shape: f32[1,128], index: 22, kind: input, shape index: {}]   ;;  %s14033_s23 = inlined_call_operand.hbm [shape: f32[2,8,128], index: 23, kind: output, shape index: {}]  }
   0x1   :  { %14044 = sst [smem:[#allocation21_spill]] %s14010_s0 }
   0x2   :  { %14045 = sst [smem:[#allocation22_spill]] %s14011_s1 }
   0x3   :  { %14046 = sst [smem:[#allocation23_spill]] %s14012_s2 }
   0x4   :  { %14047 = sst [smem:[#allocation24_spill]] %s14013_s3 }
   0x5   :  { %14048 = sst [smem:[#allocation25_spill]] %s14014_s4 }
   0x6   :  { %14049 = sst [smem:[#allocation26_spill]] %s14015_s5 }
   0x7   :  { %14050 = sst [smem:[#allocation27_spill]] %s14016_s6 }
   0x8   :  { %14051 = sst [smem:[#allocation28_spill]] %s14017_s7 }
   0x9   :  { %28 = vsyncpa [#allocation5], 0 }
   0xa   :  { %29 = vsyncpa [#allocation8], 0 }
   0xb   :  { %30 = vsyncpa [#allocation11], 0 }
   0xc   :  { %31 = vsyncpa [#allocation14], 0 }
   0xd   :  { %32 = vsyncpa [#allocation6], 0  ;;  %s10094_s4 = smov [#allocation7]  }
   0xe   :  { %s59_s30 = sshll.u32 %s10094_s4, 4  ;;  %s60_s30 = int_to_ptr.vmem [resolvable:$true] %s59_s30 }
   0xf   :  { %s9952_s24 = scalar_lea.vmem %s60_s30, 16  ;;  %s9956_s25 = scalar_lea.vmem %s60_s30, 32 }
  0x10   :  { %p9953_p0 = scmp.ne.s32.totalorder %s60_s30, %s9952_s24  ;;  %p9957_p1 = scmp.lt.s32.totalorder %s60_s30, %s60_s30 }
  0x11   :  { %p9958_p2 = scmp.lt.s32.totalorder %s9956_s25, %s9952_s24 }
  0x13   :  { %p9959_p3 = por %p9958_p2, %p9957_p1 }
  0x15   :  { %p9960_p4 = pnand %p9959_p3, %p9953_p0 }
  0x17   :  { %9963 = shalt.err (!%p9960_p4)
}
  0x18   :  { %s14052_s26 = sld [smem:[#allocation27_spill]]  ;;  %s10095_s2 = smov [#allocation10]  }
  0x19   :  { %s86_s6 = sshll.u32 %s10095_s2, 4  ;;  %s10096_s27 = smov [#allocation4]   ;;  %s87_s6 = int_to_ptr.vmem [resolvable:$true] %s86_s6 }
  0x1a   :  { %s49_s7 = sshll.u32 %s10096_s27, 4  ;;  %s9972_s28 = scalar_lea.vmem %s87_s6, 512  ;;  %s50_s7 = int_to_ptr.vmem [resolvable:$true] %s49_s7 }
  0x1b   :  { %p9973_p5 = scmp.ne.s32.totalorder %s87_s6, %s9972_s28  ;;  %p9977_p6 = scmp.lt.s32.totalorder %s87_s6, %s87_s6 }
  0x1c   :  { %p9978_p7 = scmp.lt.s32.totalorder %s9972_s28, %s9972_s28 }
  0x1e   :  { %62 = dma.hbm_to_vmem [thread:$0]  %s14052_s26, 16, %s60_s30, [#allocation8]  }
  0x1f   :  { %p9979_p8 = por %p9978_p7, %p9977_p6 }
  0x21   :  { %p9980_p9 = pnand %p9979_p8, %p9973_p5 }
  0x23   :  { %9983 = shalt.err (!%p9980_p9)
}
  0x24   :  { %s10097_s29 = smov 128   ;;  %s10098_s3 = smov 8  }
  0x25   :  { %92 = dma.hbm_to_vmem [thread:$0]  %s14021_s11, 512, %s87_s6, [#allocation11], %s10097_s29, %s10097_s29, %s10098_s3  }
  0x26   :  { %s9992_s30 = scalar_lea.vmem %s50_s7, 16  ;;  %s9996_s24 = scalar_lea.vmem %s50_s7, 32 }
  0x27   :  { %p9993_p10 = scmp.ne.s32.totalorder %s50_s7, %s9992_s30  ;;  %p9997_p11 = scmp.lt.s32.totalorder %s50_s7, %s50_s7 }
  0x28   :  { %p9998_p12 = scmp.lt.s32.totalorder %s9996_s24, %s9992_s30 }
  0x2a   :  { %p9999_p13 = por %p9998_p12, %p9997_p11 }
  0x2c   :  { %p10000_p0 = pnand %p9999_p13, %p9993_p10 }
  0x2e   :  { %10003 = shalt.err (!%p10000_p0)
}
  0x2f   :  { %s14053_s1 = sld [smem:[#allocation26_spill]]  ;;  %s10099_s26 = smov [#allocation9]  }
  0x30   :  { %s74_s2 = sshll.u32 %s10099_s26, 4  ;;  %s10100_s27 = smov [#allocation12]   ;;  %s75_s2 = int_to_ptr.vmem [resolvable:$true] %s74_s2 }
  0x31   :  { %s102_s28 = sshll.u32 %s10100_s27, 4  ;;  %s10012_s0 = scalar_lea.vmem %s75_s2, 512  ;;  %s103_s28 = int_to_ptr.vmem [resolvable:$true] %s102_s28 }
  0x32   :  { %p10013_p1 = scmp.ne.s32.totalorder %s75_s2, %s10012_s0  ;;  %p10017_p2 = scmp.lt.s32.totalorder %s75_s2, %s75_s2 }
  0x33   :  { %p10018_p3 = scmp.lt.s32.totalorder %s10012_s0, %s10012_s0 }
  0x35   :  { %52 = dma.hbm_to_vmem [thread:$0]  %s14053_s1, 16, %s50_s7, [#allocation5]  }
  0x36   :  { %p10019_p4 = por %p10018_p3, %p10017_p2 }
  0x38   :  { %p10020_p5 = pnand %p10019_p4, %p10013_p1 }
  0x3a   :  { %10023 = shalt.err (!%p10020_p5)
}
  0x3b   :  { %80 = dma.hbm_to_vmem [thread:$0]  %s14020_s10, 512, %s75_s2, [#allocation8], %s10097_s29, %s10097_s29, %s10098_s3  }
  0x3c   :  { %s10032_s7 = scalar_lea.vmem %s103_s28, 512  ;;  %p10037_p7 = scmp.lt.s32.totalorder %s103_s28, %s103_s28 }
  0x3d   :  { %p10033_p6 = scmp.ne.s32.totalorder %s103_s28, %s10032_s7  ;;  %p10038_p8 = scmp.lt.s32.totalorder %s10032_s7, %s10032_s7 }
  0x3f   :  { %p10039_p9 = por %p10038_p8, %p10037_p7 }
  0x41   :  { %p10040_p10 = pnand %p10039_p9, %p10033_p6 }
  0x43   :  { %10043 = shalt.err (!%p10040_p10)
}
  0x44   :  { %108 = dma.hbm_to_vmem [thread:$0]  %s14024_s14, 512, %s103_s28, [#allocation11], %s10097_s29, %s10097_s29, %s10098_s3  }
  0x45   :  { %s10101_s24 = smov [#allocation13]  }
  0x46   :  { %s118_s25 = sshll.u32 %s10101_s24, 4  ;;  %s119_s25 = int_to_ptr.vmem [resolvable:$true] %s118_s25 }
  0x47   :  { %s10052_s5 = scalar_lea.vmem %s119_s25, 512  ;;  %p10057_p12 = scmp.lt.s32.totalorder %s119_s25, %s119_s25 }
  0x48   :  { %p10053_p11 = scmp.ne.s32.totalorder %s119_s25, %s10052_s5  ;;  %p10058_p13 = scmp.lt.s32.totalorder %s10052_s5, %s10052_s5 }
  0x4a   :  { %p10059_p0 = por %p10058_p13, %p10057_p12 }
  0x4c   :  { %p10060_p1 = pnand %p10059_p0, %p10053_p11 }
  0x4e   :  { %10063 = shalt.err (!%p10060_p1)
}
  0x4f   :  { %124 = dma.hbm_to_vmem [thread:$0]  %s14027_s17, 512, %s119_s25, [#allocation14], %s10097_s29, %s10097_s29, %s10098_s3  }
  0x50   :  { %10084 = dma.done.wait [#allocation5], 16  }
  0x51   :  { %10085 = vsyncadd [#allocation5], 4294967280 }
  0x52   :  { %10086 = dma.done.wait [#allocation8], 528  }
  0x53   :  { %10087 = vsyncadd [#allocation8], 4294966768 }
  0x54   :  { %10088 = dma.done.wait [#allocation11], 1024  }
  0x55   :  { %10089 = vsyncadd [#allocation11], 4294966272 }
  0x56   :  { %10090 = dma.done.wait [#allocation14], 512  }
  0x57   :  { %10091 = vsyncadd [#allocation14], 4294966784  ;;  %vm288_vm0 = vcmask 1040384   ;;  %v10102_v0 = vmov 0.0   ;;  %vm604_vm1 = vcmask 1045504   ;;  %vm417_vm2 = vcmask 1046528  }
  0x58   :  { %v222_v1 = vrot.slane %v10102_v0, 7  ;;  %s10103_s14 = smov 2   ;;  %s10104_s17 = smov 1   ;;  %vm1374_vm3 = vcmask 7168   ;;  %vm1406_vm4 = vcmask 15360   ;;  %vm1438_vm5 = vcmask 23552  }
  0x59   :  { %s14054_s27 = sld [smem:[#allocation21_spill]]  ;;  %s10105_s7 = smov 3   ;;  %vm1471_vm6 = vcmask 31744   ;;  %vm1504_vm7 = vcmask 39936   ;;  %vm1537_vm8 = vcmask 48128   ;;  %vm1570_vm9 = vcmask 56320  }
  0x5a   :  { %v10271_v2 = vsel %vm288_vm0, 0.0, %v222_v1  ;;  %v322_v3 = vsel %vm288_vm0, %v222_v1, 0.0  ;;  %s10106_s4 = smov 4   ;;  %s10107_s30 = smov 5   ;;  %vm1603_vm10 = vcmask 64512   ;;  %vm1636_vm11 = vcmask 72704  }
  0x5b   :  { %v605_v4 = vrot.slane %v10271_v2, 2  ;;  %v606_v5 = vrot.slane %v322_v3, 2  ;;  %v418_v6 = vrot.slane %v10271_v2, 1  ;;  %v419_v7 = vrot.slane %v322_v3, 1  ;;  %s10108_s24 = smov 6   ;;  %s14055_s26 = sld [smem:[#allocation22_spill]] }
  0x5c   :  { %s10109_s2 = smov 7   ;;  %s14056_s25 = sld [smem:[#allocation23_spill]]  ;;  %vm2688_vm12 = vcmask 130048   ;;  %vm2704_vm13 = vcmask 195584   ;;  %vm2721_vm14 = vcmask 261120   ;;  %vm2738_vm15 = vcmask 326656  }
  0x5d   :  { %v10277_v8 = vsel %vm604_vm1, %v605_v4, %v606_v5  ;;  %v10280_v9 = vsel %vm417_vm2, %v418_v6, %v419_v7  ;;  %s14057_s10 = sld [smem:[#allocation24_spill]]  ;;  %s10115_s0 = smov 56  }
  0x5e   :  { %698 = vrot.lane.b32.xlu1 %v10277_v8, %s10103_s14  ;;  %511 = vrot.lane.b32.xlu0 %v10280_v9, %s10104_s17  ;;  %s10116_s1 = smov 64  }
  0x5f   :  { %v154_v10 = vld [vmem:[%s14054_s27 + $0x8] sm:$0xff]  ;;  %v153_v11 = vld [vmem:[%s14054_s27] sm:$0xff]  ;;  %v155_v18 = vld [vmem:[%s14054_s27 + $0x10] sm:$0xff] }
  0x60   :  { %v224_v12 = vrot.slane %v154_v10, 7  ;;  %v223_v13 = vrot.slane %v153_v11, 7  ;;  %v225_v27 = vrot.slane %v155_v18, 7  ;;  %v156_v40 = vld [vmem:[%s14054_s27 + $0x18] sm:$0xff]  ;;  %v157_v46 = vld [vmem:[%s14054_s27 + $0x20] sm:$0xff]  ;;  %v158_v62 = vld [vmem:[%s14054_s27 + $0x28] sm:$0xff] }
  0x61   :  { %v226_v41 = vrot.slane %v156_v40, 7  ;;  %v186_v42 = vld [vmem:[%s14055_s26 + $0x8] sm:$0x1]  ;;  %v185_v43 = vld [vmem:[%s14055_s26] sm:$0xff]  ;;  %v227_v49 = vrot.slane %v157_v46, 7  ;;  %v228_v63 = vrot.slane %v158_v62, 7 }
  0x62   :  { %v10293_v14 = vsel %vm288_vm0, 0.0, %v224_v12  ;;  %v10296_v15 = vsel %vm288_vm0, 0.0, %v223_v13  ;;  %v323_v16 = vsel %vm288_vm0, %v223_v13, 0.0  ;;  %v324_v17 = vsel %vm288_vm0, %v224_v12, 0.0  ;;  %8829 = vmatprep.subr.msk.mxu0 %vm288_vm0, %v186_v42  ;;  %v159_v4 = vld [vmem:[%s14054_s27 + $0x30] sm:$0xff]  ;;  %s14058_s26 = sld [smem:[#allocation25_spill]] }
  0x63   :  { %795 = vrot.lane.b32.xlu1 %v10293_v14, %s10105_s7  ;;  %793 = vrot.lane.b32.xlu0 %v10296_v15, %s10105_s7  ;;  %v608_v19 = vrot.slane %v10296_v15, 2  ;;  %v609_v20 = vrot.slane %v323_v16, 2  ;;  %v421_v21 = vrot.slane %v10296_v15, 1  ;;  %v422_v22 = vrot.slane %v323_v16, 1 }
  0x64   :  { %v424_v23 = vrot.slane %v10293_v14, 1  ;;  %v425_v24 = vrot.slane %v324_v17, 1  ;;  %v10316_v29 = vsel %vm288_vm0, 0.0, %v225_v27  ;;  %v325_v30 = vsel %vm288_vm0, %v225_v27, 0.0  ;;  %8830 = vmatpush3.msk.msra.mxu0 %vm288_vm0, %v186_v42 }
  0x65   :  { %v610_v25 = vsel %vm604_vm1, %v608_v19, %v609_v20  ;;  %v423_v26 = vsel %vm417_vm2, %v421_v21, %v422_v22  ;;  %v611_v31 = vrot.slane %v10293_v14, 2  ;;  %v612_v32 = vrot.slane %v324_v17, 2  ;;  %8831 = vmatprep.subr.mxu0 %v185_v43 }
  0x66   :  { %v426_v28 = vsel %vm417_vm2, %v424_v23, %v425_v24  ;;  %v427_v33 = vrot.slane %v10316_v29, 1  ;;  %v428_v34 = vrot.slane %v325_v30, 1  ;;  %v614_v37 = vrot.slane %v10316_v29, 2  ;;  %8832 = vmatpush3.msra.mxu0 %v185_v43  ;;  %v160_v24 = vld [vmem:[%s14054_s27 + $0x38] sm:$0xff] }
  0x67   :  { %700 = vrot.lane.b32.xlu1 %v610_v25, %s10103_s14  ;;  %513 = vrot.lane.b32.xlu0 %v423_v26, %s10104_s17  ;;  %v613_v35 = vsel %vm604_vm1, %v611_v31, %v612_v32  ;;  %v615_v38 = vrot.slane %v325_v30, 2  ;;  %v10350_v44 = vsel %vm288_vm0, 0.0, %v226_v41  ;;  %v326_v45 = vsel %vm288_vm0, %v226_v41, 0.0 }
  0x68   :  { %v429_v36 = vsel %vm417_vm2, %v427_v33, %v428_v34  ;;  %v430_v47 = vrot.slane %v10350_v44, 1  ;;  %v431_v48 = vrot.slane %v326_v45, 1  ;;  %8978 = vmatprep.subr.mxu0 %v10102_v0  ;;  %v10367_v51 = vsel %vm288_vm0, 0.0, %v227_v49 }
  0x69   :  { %v616_v39 = vsel %vm604_vm1, %v614_v37, %v615_v38  ;;  %v327_v52 = vsel %vm288_vm0, %v227_v49, 0.0  ;;  %v617_v53 = vrot.slane %v10350_v44, 2  ;;  %v618_v54 = vrot.slane %v326_v45, 2 }
  0x6a   :  { %v432_v50 = vsel %vm417_vm2, %v430_v47, %v431_v48  ;;  %v433_v55 = vrot.slane %v10367_v51, 1  ;;  %v434_v56 = vrot.slane %v327_v52, 1  ;;  %v620_v59 = vrot.slane %v10367_v51, 2 }
  0x6b   :  { %515 = vrot.lane.b32.xlu1 %v426_v28, %s10104_s17  ;;  %897 = vrot.lane.b32.xlu0 %v423_v26, %s10106_s4  ;;  %v619_v57 = vsel %vm604_vm1, %v617_v53, %v618_v54  ;;  %v621_v60 = vrot.slane %v327_v52, 2  ;;  %v10395_v1 = vsel %vm288_vm0, 0.0, %v228_v63  ;;  %v328_v3 = vsel %vm288_vm0, %v228_v63, 0.0  ;;  %v162_v53 = vld [vmem:[%s14054_s27 + $0x48] sm:$0xff] }
  0x6c   :  { %v435_v58 = vsel %vm417_vm2, %v433_v55, %v434_v56  ;;  %v436_v5 = vrot.slane %v10395_v1, 1  ;;  %v437_v6 = vrot.slane %v328_v3, 1  ;;  %v229_v7 = vrot.slane %v159_v4, 7 }
  0x6d   :  { %v622_v61 = vsel %vm604_vm1, %v620_v59, %v621_v60  ;;  %v623_v13 = vrot.slane %v10395_v1, 2  ;;  %v624_v16 = vrot.slane %v328_v3, 2  ;;  %v232_v54 = vrot.slane %v162_v53, 7 }
  0x6e   :  { %v438_v10 = vsel %vm417_vm2, %v436_v5, %v437_v6  ;;  %v10409_v11 = vsel %vm288_vm0, 0.0, %v229_v7  ;;  %v329_v12 = vsel %vm288_vm0, %v229_v7, 0.0 }
  0x6f   :  { %999 = vrot.lane.b32.xlu1 %v610_v25, %s10107_s30  ;;  %899 = vrot.lane.b32.xlu0 %v426_v28, %s10106_s4  ;;  %v439_v17 = vrot.slane %v10409_v11, 1  ;;  %v440_v18 = vrot.slane %v329_v12, 1  ;;  %v625_v19 = vsel %vm604_vm1, %v623_v13, %v624_v16  ;;  %v626_v21 = vrot.slane %v10409_v11, 2 }
  0x70   :  { %v627_v22 = vrot.slane %v329_v12, 2  ;;  %v230_v25 = vrot.slane %v160_v24, 7  ;;  %v332_v60 = vsel %vm288_vm0, %v232_v54, 0.0 }
  0x71   :  { %v441_v20 = vsel %vm417_vm2, %v439_v17, %v440_v18  ;;  %v449_v63 = vrot.slane %v332_v60, 1  ;;  %v636_v17 = vrot.slane %v332_v60, 2 }
  0x72   :  { %v628_v23 = vsel %vm604_vm1, %v626_v21, %v627_v22  ;;  %v10437_v26 = vsel %vm288_vm0, 0.0, %v230_v25  ;;  %v330_v27 = vsel %vm288_vm0, %v230_v25, 0.0 }
  0x73   :  { %702 = vrot.lane.b32.xlu1 %v613_v35, %s10103_s14  ;;  %517 = vrot.lane.b32.xlu0 %v429_v36, %s10104_s17  ;;  %v442_v30 = vrot.slane %v10437_v26, 1  ;;  %v443_v31 = vrot.slane %v330_v27, 1  ;;  %v630_v37 = vrot.slane %v330_v27, 2 }
  0x75   :  { %v444_v33 = vsel %vm417_vm2, %v442_v30, %v443_v31 }
  0x77   :  { %1095 = vrot.lane.b32.xlu1 %v10293_v14, %s10108_s24  ;;  %1001 = vrot.lane.b32.xlu0 %v613_v35, %s10107_s30 }
  0x7b   :  { %797 = vrot.lane.b32.xlu1 %v10316_v29, %s10105_s7  ;;  %704 = vrot.lane.b32.xlu0 %v616_v39, %s10103_s14 }
  0x7f   :  { %1188 = vrot.lane.b32.xlu1 %v426_v28, %s10109_s2  ;;  %1097 = vrot.lane.b32.xlu0 %v10316_v29, %s10108_s24  ;;  %v161_v28 = vld [vmem:[%s14054_s27 + $0x40] sm:$0xff] }
  0x80   :  { %v231_v32 = vrot.slane %v161_v28, 7 }
  0x82   :  { %v10451_v34 = vsel %vm288_vm0, 0.0, %v231_v32 }
  0x83   :  { %901 = vrot.lane.b32.xlu1 %v429_v36, %s10106_s4  ;;  %799 = vrot.lane.b32.xlu0 %v10350_v44, %s10105_s7  ;;  %v445_v38 = vrot.slane %v10451_v34, 1  ;;  %v632_v45 = vrot.slane %v10451_v34, 2 }
  0x87   :  { %1281 = vrot.lane.b32.xlu1 %v613_v35, %s10098_s3  ;;  %1190 = vrot.lane.b32.xlu0 %v429_v36, %s10109_s2  ;;  %v331_v35 = vsel %vm288_vm0, %v231_v32, 0.0  ;;  %v629_v36 = vrot.slane %v10437_v26, 2 }
  0x88   :  { %v633_v46 = vrot.slane %v331_v35, 2 }
  0x89   :  { %v631_v40 = vsel %vm604_vm1, %v629_v36, %v630_v37 }
  0x8a   :  { %v634_v49 = vsel %vm604_vm1, %v632_v45, %v633_v46 }
  0x8b   :  { %903 = vrot.lane.b32.xlu1 %v432_v50, %s10106_s4  ;;  %519 = vrot.lane.b32.xlu0 %v432_v50, %s10104_s17 }
  0x8f   :  { %1283 = vrot.lane.b32.xlu1 %v616_v39, %s10098_s3  ;;  %1003 = vrot.lane.b32.xlu0 %v616_v39, %s10107_s30  ;;  %v446_v39 = vrot.slane %v331_v35, 1 }
  0x91   :  { %v447_v41 = vsel %vm417_vm2, %v445_v38, %v446_v39 }
  0x93   :  { %706 = vrot.lane.b32.xlu1 %v619_v57, %s10103_s14  ;;  %521 = vrot.lane.b32.xlu0 %v435_v58, %s10104_s17 }
  0x97   :  { %1099 = vrot.lane.b32.xlu1 %v10350_v44, %s10108_s24  ;;  %1005 = vrot.lane.b32.xlu0 %v619_v57, %s10107_s30 }
  0x9b   :  { %801 = vrot.lane.b32.xlu1 %v10367_v51, %s10105_s7  ;;  %708 = vrot.lane.b32.xlu0 %v622_v61, %s10103_s14 }
  0x9f   :  { %1192 = vrot.lane.b32.xlu1 %v432_v50, %s10109_s2  ;;  %1101 = vrot.lane.b32.xlu0 %v10367_v51, %s10108_s24 }
  0xa3   :  { %905 = vrot.lane.b32.xlu1 %v435_v58, %s10106_s4  ;;  %803 = vrot.lane.b32.xlu0 %v10395_v1, %s10105_s7 }
  0xa7   :  { %1285 = vrot.lane.b32.xlu1 %v619_v57, %s10098_s3  ;;  %1194 = vrot.lane.b32.xlu0 %v435_v58, %s10109_s2  ;;  %v10485_v57 = vsel %vm288_vm0, 0.0, %v232_v54 }
  0xa8   :  { %v448_v62 = vrot.slane %v10485_v57, 1  ;;  %v635_v16 = vrot.slane %v10485_v57, 2 }
  0xaa   :  { %v450_v6 = vsel %vm417_vm2, %v448_v62, %v449_v63  ;;  %v637_v22 = vsel %vm604_vm1, %v635_v16, %v636_v17  ;;  %v165_v63 = vld [vmem:[%s14054_s27 + $0x60] sm:$0xff] }
  0xab   :  { %907 = vrot.lane.b32.xlu1 %v438_v10, %s10106_s4  ;;  %523 = vrot.lane.b32.xlu0 %v438_v10, %s10104_s17 }
  0xaf   :  { %1287 = vrot.lane.b32.xlu1 %v622_v61, %s10098_s3  ;;  %1007 = vrot.lane.b32.xlu0 %v622_v61, %s10107_s30  ;;  %v163_v61 = vld [vmem:[%s14054_s27 + $0x50] sm:$0xff] }
  0xb0   :  { %v233_v5 = vrot.slane %v163_v61, 7 }
  0xb2   :  { %v10505_v12 = vsel %vm288_vm0, 0.0, %v233_v5  ;;  %v333_v13 = vsel %vm288_vm0, %v233_v5, 0.0 }
  0xb3   :  { %710 = vrot.lane.b32.xlu1 %v625_v19, %s10103_s14  ;;  %525 = vrot.lane.b32.xlu0 %v441_v20, %s10104_s17  ;;  %v451_v18 = vrot.slane %v10505_v12, 1  ;;  %v638_v30 = vrot.slane %v10505_v12, 2  ;;  %v639_v31 = vrot.slane %v333_v13, 2 }
  0xb7   :  { %1103 = vrot.lane.b32.xlu1 %v10395_v1, %s10108_s24  ;;  %1009 = vrot.lane.b32.xlu0 %v625_v19, %s10107_s30 }
  0xbb   :  { %805 = vrot.lane.b32.xlu1 %v10409_v11, %s10105_s7  ;;  %712 = vrot.lane.b32.xlu0 %v628_v23, %s10103_s14 }
  0xbf   :  { %1196 = vrot.lane.b32.xlu1 %v438_v10, %s10109_s2  ;;  %1105 = vrot.lane.b32.xlu0 %v10409_v11, %s10108_s24 }
  0xc3   :  { %909 = vrot.lane.b32.xlu1 %v441_v20, %s10106_s4  ;;  %807 = vrot.lane.b32.xlu0 %v10437_v26, %s10105_s7 }
  0xc7   :  { %1289 = vrot.lane.b32.xlu1 %v625_v19, %s10098_s3  ;;  %1198 = vrot.lane.b32.xlu0 %v441_v20, %s10109_s2  ;;  %v452_v19 = vrot.slane %v333_v13, 1  ;;  %v235_v13 = vrot.slane %v165_v63, 7 }
  0xcb   :  { %911 = vrot.lane.b32.xlu1 %v444_v33, %s10106_s4  ;;  %527 = vrot.lane.b32.xlu0 %v444_v33, %s10104_s17 }
  0xcf   :  { %1291 = vrot.lane.b32.xlu1 %v628_v23, %s10098_s3  ;;  %1011 = vrot.lane.b32.xlu0 %v628_v23, %s10107_s30  ;;  %v453_v23 = vsel %vm417_vm2, %v451_v18, %v452_v19  ;;  %v10589_v19 = vsel %vm288_vm0, 0.0, %v235_v13 }
  0xd0   :  { %v699_v42 = vpop.permute.xlu1 %698  ;;  %v512_v43 = vpop.permute.xlu0 %511 }
  0xd1   :  { %v1375_v24 = vsel %vm1374_vm3, %v10271_v2, %v512_v43 }
  0xd2   :  { %v10525_v28 = vsel %vm1406_vm4, %v1375_v24, %v699_v42  ;;  %v335_v24 = vsel %vm288_vm0, %v235_v13, 0.0  ;;  %v167_v13 = vld [vmem:[%s14054_s27 + $0x70] sm:$0xff] }
  0xd3   :  { %714 = vrot.lane.b32.xlu1 %v631_v40, %s10103_s14  ;;  %529 = vrot.lane.b32.xlu0 %v447_v41, %s10104_s17 }
  0xd5   :  { %v10465_v47 = vpop.permute.xlu1 %795  ;;  %v794_v48 = vpop.permute.xlu0 %793 }
  0xd6   :  { %v1439_v32 = vsel %vm1438_vm5, %v10525_v28, %v794_v48 }
  0xd7   :  { %1107 = vrot.lane.b32.xlu1 %v10437_v26, %s10108_s24  ;;  %1013 = vrot.lane.b32.xlu0 %v631_v40, %s10107_s30 }
  0xd9   :  { %v10471_v50 = vpop.permute.xlu1 %700  ;;  %v514_v52 = vpop.permute.xlu0 %513 }
  0xda   :  { %v1376_v37 = vsel %vm1374_vm3, %v10296_v15, %v514_v52  ;;  %v164_v15 = vld [vmem:[%s14054_s27 + $0x58] sm:$0xff] }
  0xdb   :  { %809 = vrot.lane.b32.xlu1 %v10451_v34, %s10105_s7  ;;  %716 = vrot.lane.b32.xlu0 %v634_v49, %s10103_s14  ;;  %v1408_v45 = vsel %vm1406_vm4, %v1376_v37, %v10471_v50  ;;  %v234_v48 = vrot.slane %v164_v15, 7 }
  0xdd   :  { %v10479_v55 = vpop.permute.xlu1 %515  ;;  %v898_v56 = vpop.permute.xlu0 %897  ;;  %v334_v62 = vsel %vm288_vm0, %v234_v48, 0.0 }
  0xde   :  { %v1472_v36 = vsel %vm1471_vm6, %v1439_v32, %v898_v56  ;;  %v1377_v37 = vsel %vm1374_vm3, %v10293_v14, %v10479_v55 }
  0xdf   :  { %1200 = vrot.lane.b32.xlu1 %v444_v33, %s10109_s2  ;;  %1109 = vrot.lane.b32.xlu0 %v10451_v34, %s10108_s24 }
  0xe1   :  { %v1000_v58 = vpop.permute.xlu1 %999  ;;  %v10487_v59 = vpop.permute.xlu0 %899 }
  0xe2   :  { %v1505_v38 = vsel %vm1504_vm7, %v1472_v36, %v1000_v58  ;;  %v10568_v58 = vsel %vm288_vm0, 0.0, %v234_v48 }
  0xe3   :  { %913 = vrot.lane.b32.xlu1 %v447_v41, %s10106_s4  ;;  %811 = vrot.lane.b32.xlu0 %v10485_v57, %s10105_s7  ;;  %v454_v5 = vrot.slane %v10568_v58, 1 }
  0xe5   :  { %v10497_v3 = vpop.permute.xlu1 %702  ;;  %v10499_v4 = vpop.permute.xlu0 %517 }
  0xe7   :  { %1293 = vrot.lane.b32.xlu1 %v631_v40, %s10098_s3  ;;  %1202 = vrot.lane.b32.xlu0 %v447_v41, %s10109_s2  ;;  %v640_v40 = vsel %vm604_vm1, %v638_v30, %v639_v31  ;;  %v458_v30 = vrot.slane %v335_v24, 1 }
  0xe9   :  { %v1096_v7 = vpop.permute.xlu1 %1095  ;;  %v1002_v10 = vpop.permute.xlu0 %1001 }
  0xea   :  { %v1538_v39 = vsel %vm1537_vm8, %v1505_v38, %v1096_v7 }
  0xeb   :  { %915 = vrot.lane.b32.xlu1 %v450_v6, %s10106_s4  ;;  %531 = vrot.lane.b32.xlu0 %v450_v6, %s10104_s17 }
  0xed   :  { %v10512_v20 = vpop.permute.xlu1 %797  ;;  %v10514_v21 = vpop.permute.xlu0 %704 }
  0xef   :  { %1295 = vrot.lane.b32.xlu1 %v634_v49, %s10098_s3  ;;  %1015 = vrot.lane.b32.xlu0 %v634_v49, %s10107_s30  ;;  %v1440_v49 = vsel %vm1438_vm5, %v1408_v45, %v10465_v47 }
  0xf0   :  { %v1473_v50 = vsel %vm1471_vm6, %v1440_v49, %v10487_v59 }
  0xf1   :  { %v1189_v25 = vpop.permute.xlu1 %1188  ;;  %v1098_v27 = vpop.permute.xlu0 %1097  ;;  %v1506_v54 = vsel %vm1504_vm7, %v1473_v50, %v1002_v10  ;;  %v166_v50 = vld [vmem:[%s14054_s27 + $0x68] sm:$0xff] }
  0xf2   :  { %v1571_v41 = vsel %vm1570_vm9, %v1538_v39, %v1189_v25  ;;  %v1539_v56 = vsel %vm1537_vm8, %v1506_v54, %v1098_v27  ;;  %v641_v25 = vrot.slane %v10568_v58, 2  ;;  %v642_v27 = vrot.slane %v334_v62, 2 }
  0xf3   :  { %718 = vrot.lane.b32.xlu1 %v637_v22, %s10103_s14  ;;  %533 = vrot.lane.b32.xlu0 %v453_v23, %s10104_s17  ;;  %v1378_v54 = vsel %vm1374_vm3, %v10316_v29, %v10499_v4 }
  0xf4   :  { %v643_v32 = vsel %vm604_vm1, %v641_v25, %v642_v27  ;;  %v237_v25 = vrot.slane %v167_v13, 7 }
  0xf5   :  { %v10530_v33 = vpop.permute.xlu1 %901  ;;  %v10532_v35 = vpop.permute.xlu0 %799 }
  0xf7   :  { %1111 = vrot.lane.b32.xlu1 %v10485_v57, %s10108_s24  ;;  %1017 = vrot.lane.b32.xlu0 %v637_v22, %s10107_s30 }
  0xf9   :  { %v1282_v42 = vpop.permute.xlu1 %1281  ;;  %v1191_v43 = vpop.permute.xlu0 %1190 }
  0xfa   :  { %v1604_v46 = vsel %vm1603_vm10, %v1571_v41, %v1282_v42  ;;  %v1572_v47 = vsel %vm1570_vm9, %v1539_v56, %v1191_v43  ;;  %v1409_v41 = vsel %vm1406_vm4, %v1377_v37, %v10497_v3  ;;  %v644_v42 = vrot.slane %v10589_v19, 2 }
  0xfb   :  { %813 = vrot.lane.b32.xlu1 %v10505_v12, %s10105_s7  ;;  %720 = vrot.lane.b32.xlu0 %v640_v40, %s10103_s14  ;;  %v1441_v43 = vsel %vm1438_vm5, %v1409_v41, %v10512_v20  ;;  %v1410_v56 = vsel %vm1406_vm4, %v1378_v54, %v10514_v21  ;;  %v10675_v37 = vsel %vm288_vm0, 0.0, %v237_v25 }
  0xfc   :  { %8833 = vmatprep.mubr.msk.f32.mxu0 %vm1636_vm11, %v1604_v46  ;;  %v1474_v14 = vsel %vm1471_vm6, %v1441_v43, %v10530_v33 }
  0xfd   :  { %v10556_v52 = vpop.permute.xlu1 %903  ;;  %v10558_v53 = vpop.permute.xlu0 %519 }
  0xff   :  { %1204 = vrot.lane.b32.xlu1 %v450_v6, %s10109_s2  ;;  %1113 = vrot.lane.b32.xlu0 %v10505_v12, %s10108_s24  ;;  %v455_v6 = vrot.slane %v334_v62, 1 }
 0x101   :  { %v1284_v60 = vpop.permute.xlu1 %1283  ;;  %v1004_v61 = vpop.permute.xlu0 %1003  ;;  %v456_v16 = vsel %vm417_vm2, %v454_v5, %v455_v6 }
 0x102   :  { %v1605_v59 = vsel %vm1603_vm10, %v1572_v47, %v1284_v60  ;;  %v1507_v55 = vsel %vm1504_vm7, %v1474_v14, %v1004_v61  ;;  %v236_v47 = vrot.slane %v166_v50, 7  ;;  %v1442_v60 = vsel %vm1438_vm5, %v1410_v56, %v10532_v35 }
 0x103   :  { %917 = vrot.lane.b32.xlu1 %v453_v23, %s10106_s4  ;;  %815 = vrot.lane.b32.xlu0 %v10568_v58, %s10105_s7  ;;  %v1475_v29 = vsel %vm1471_vm6, %v1442_v60, %v10556_v52 }
 0x104   :  { %8834 = vmatmul.mubr.msk.f32.vlgmr.msra.gmra.mxu0 %vm1636_vm11, %v1605_v59  ;;  %v10654_v59 = vsel %vm288_vm0, 0.0, %v236_v47  ;;  %v336_v6 = vsel %vm288_vm0, %v236_v47, 0.0 }
 0x105   :  { %v10581_v7 = vpop.permute.xlu1 %706  ;;  %v10583_v10 = vpop.permute.xlu0 %521  ;;  %v648_v41 = vrot.slane %v336_v6, 2 }
 0x107   :  { %1297 = vrot.lane.b32.xlu1 %v637_v22, %s10098_s3  ;;  %1206 = vrot.lane.b32.xlu0 %v453_v23, %s10109_s2  ;;  %v457_v22 = vrot.slane %v10589_v19, 1 }
 0x109   :  { %v1100_v17 = vpop.permute.xlu1 %1099  ;;  %v1006_v18 = vpop.permute.xlu0 %1005  ;;  %v459_v36 = vsel %vm417_vm2, %v457_v22, %v458_v30 }
 0x10a   :  { %v1540_v3 = vsel %vm1537_vm8, %v1507_v55, %v1100_v17  ;;  %v1508_v4 = vsel %vm1504_vm7, %v1475_v29, %v1006_v18  ;;  %v461_v17 = vrot.slane %v336_v6, 1  ;;  %v168_v29 = vld [vmem:[%s14054_s27 + $0x78] sm:$0xff] }
 0x10b   :  { %919 = vrot.lane.b32.xlu1 %v456_v16, %s10106_s4  ;;  %535 = vrot.lane.b32.xlu0 %v456_v16, %s10104_s17 }
 0x10d   :  { %v10596_v23 = vpop.permute.xlu1 %801  ;;  %v10598_v31 = vpop.permute.xlu0 %708 }
 0x10f   :  { %1299 = vrot.lane.b32.xlu1 %v640_v40, %s10098_s3  ;;  %1019 = vrot.lane.b32.xlu0 %v640_v40, %s10107_s30  ;;  %v645_v40 = vrot.slane %v335_v24, 2 }
 0x111   :  { %v1193_v38 = vpop.permute.xlu1 %1192  ;;  %v1102_v39 = vpop.permute.xlu0 %1101  ;;  %v646_v46 = vsel %vm604_vm1, %v644_v42, %v645_v40 }
 0x112   :  { %v1573_v20 = vsel %vm1570_vm9, %v1540_v3, %v1193_v38  ;;  %v1541_v21 = vsel %vm1537_vm8, %v1508_v4, %v1102_v39  ;;  %v337_v38 = vsel %vm288_vm0, %v237_v25, 0.0  ;;  %v647_v39 = vrot.slane %v10654_v59, 2 }
 0x113   :  { %722 = vrot.lane.b32.xlu1 %v643_v32, %s10103_s14  ;;  %537 = vrot.lane.b32.xlu0 %v459_v36, %s10104_s17  ;;  %v464_v42 = vrot.slane %v337_v38, 1  ;;  %v1380_v4 = vsel %vm1374_vm3, %v10367_v51, %v10583_v10  ;;  %v169_v10 = vld [vmem:[%s14054_s27 + $0x80] sm:$0xff] }
 0x114   :  { %v649_v43 = vsel %vm604_vm1, %v647_v39, %v648_v41  ;;  %v239_v25 = vrot.slane %v169_v10, 7 }
 0x115   :  { %v10614_v15 = vpop.permute.xlu1 %905  ;;  %v10616_v45 = vpop.permute.xlu0 %803 }
 0x116   :  { %v10754_v41 = vsel %vm288_vm0, 0.0, %v239_v25 }
 0x117   :  { %1115 = vrot.lane.b32.xlu1 %v10568_v58, %s10108_s24  ;;  %1021 = vrot.lane.b32.xlu0 %v643_v32, %s10107_s30 }
 0x119   :  { %v1286_v48 = vpop.permute.xlu1 %1285  ;;  %v1195_v49 = vpop.permute.xlu0 %1194 }
 0x11a   :  { %v1606_v33 = vsel %vm1603_vm10, %v1573_v20, %v1286_v48  ;;  %v1574_v35 = vsel %vm1570_vm9, %v1541_v21, %v1195_v49  ;;  %v1379_v20 = vsel %vm1374_vm3, %v10350_v44, %v10558_v53  ;;  %v650_v49 = vrot.slane %v10675_v37, 2 }
 0x11b   :  { %817 = vrot.lane.b32.xlu1 %v10589_v19, %s10105_s7  ;;  %724 = vrot.lane.b32.xlu0 %v646_v46, %s10103_s14  ;;  %v1411_v48 = vsel %vm1406_vm4, %v1379_v20, %v10581_v7  ;;  %v1412_v21 = vsel %vm1406_vm4, %v1380_v4, %v10598_v31 }
 0x11c   :  { %8836 = vmatprep.mubr.msk.f32.mxu0 %vm1636_vm11, %v1606_v33  ;;  %v1443_v50 = vsel %vm1438_vm5, %v1411_v48, %v10596_v23 }
 0x11d   :  { %v10642_v61 = vpop.permute.xlu1 %907  ;;  %v10644_v62 = vpop.permute.xlu0 %523  ;;  %v1476_v44 = vsel %vm1471_vm6, %v1443_v50, %v10614_v15 }
 0x11f   :  { %1208 = vrot.lane.b32.xlu1 %v456_v16, %s10109_s2  ;;  %1117 = vrot.lane.b32.xlu0 %v10589_v19, %s10108_s24  ;;  %v460_v16 = vrot.slane %v10654_v59, 1 }
 0x121   :  { %v1288_v63 = vpop.permute.xlu1 %1287  ;;  %v1008_v5 = vpop.permute.xlu0 %1007  ;;  %v462_v27 = vsel %vm417_vm2, %v460_v16, %v461_v17 }
 0x122   :  { %v1607_v52 = vsel %vm1603_vm10, %v1574_v35, %v1288_v63  ;;  %v1509_v53 = vsel %vm1504_vm7, %v1476_v44, %v1008_v5  ;;  %v238_v35 = vrot.slane %v168_v29, 7  ;;  %v1444_v63 = vsel %vm1438_vm5, %v1412_v21, %v10616_v45 }
 0x123   :  { %921 = vrot.lane.b32.xlu1 %v459_v36, %s10106_s4  ;;  %819 = vrot.lane.b32.xlu0 %v10654_v59, %s10105_s7  ;;  %v1477_v51 = vsel %vm1471_vm6, %v1444_v63, %v10642_v61 }
 0x124   :  { %8837 = vmatmul.mubr.msk.f32.gmra.mxu0 %vm1636_vm11, %v1607_v52  ;;  %v305_v45 = vsel %vm288_vm0, 0.0, %v238_v35  ;;  %v338_v61 = vsel %vm288_vm0, %v238_v35, 0.0 }
 0x125   :  { %v10667_v18 = vpop.permute.xlu1 %710  ;;  %v10669_v24 = vpop.permute.xlu0 %525  ;;  %v994_v50 = vrot.slane %v338_v61, 2 }
 0x127   :  { %1301 = vrot.lane.b32.xlu1 %v643_v32, %s10098_s3  ;;  %1210 = vrot.lane.b32.xlu0 %v459_v36, %s10109_s2  ;;  %v463_v32 = vrot.slane %v10675_v37, 1 }
 0x129   :  { %v1104_v22 = vpop.permute.xlu1 %1103  ;;  %v1010_v30 = vpop.permute.xlu0 %1009  ;;  %v465_v14 = vsel %vm417_vm2, %v463_v32, %v464_v42  ;;  %v339_v32 = vsel %vm288_vm0, %v239_v25, 0.0 }
 0x12a   :  { %v1542_v7 = vsel %vm1537_vm8, %v1509_v53, %v1104_v22  ;;  %v1510_v52 = vsel %vm1504_vm7, %v1477_v51, %v1010_v30  ;;  %v892_v30 = vrot.slane %v338_v61, 1  ;;  %v653_v53 = vrot.slane %v10754_v41, 2 }
 0x12b   :  { %923 = vrot.lane.b32.xlu1 %v462_v27, %s10106_s4  ;;  %539 = vrot.lane.b32.xlu0 %v462_v27, %s10104_s17 }
 0x12d   :  { %v10682_v36 = vpop.permute.xlu1 %805  ;;  %v10684_v40 = vpop.permute.xlu0 %712 }
 0x12f   :  { %1303 = vrot.lane.b32.xlu1 %v646_v46, %s10098_s3  ;;  %1023 = vrot.lane.b32.xlu0 %v646_v46, %s10107_s30  ;;  %v651_v46 = vrot.slane %v337_v38, 2 }
 0x131   :  { %v1197_v55 = vpop.permute.xlu1 %1196  ;;  %v1106_v3 = vpop.permute.xlu0 %1105  ;;  %v652_v56 = vsel %vm604_vm1, %v650_v49, %v651_v46  ;;  %v993_v49 = vrot.slane %v305_v45, 2 }
 0x132   :  { %v1575_v23 = vsel %vm1570_vm9, %v1542_v7, %v1197_v55  ;;  %v1543_v31 = vsel %vm1537_vm8, %v1510_v52, %v1106_v3  ;;  %v466_v55 = vrot.slane %v10754_v41, 1  ;;  %v467_v3 = vrot.slane %v339_v32, 1 }
 0x133   :  { %726 = vrot.lane.b32.xlu1 %v649_v43, %s10103_s14  ;;  %541 = vrot.lane.b32.xlu0 %v465_v14, %s10104_s17  ;;  %v654_v7 = vrot.slane %v339_v32, 2 }
 0x134   :  { %v468_v46 = vsel %vm417_vm2, %v466_v55, %v467_v3 }
 0x135   :  { %v10700_v33 = vpop.permute.xlu1 %909  ;;  %v10702_v54 = vpop.permute.xlu0 %807 }
 0x137   :  { %1119 = vrot.lane.b32.xlu1 %v10654_v59, %s10108_s24  ;;  %1025 = vrot.lane.b32.xlu0 %v649_v43, %s10107_s30 }
 0x139   :  { %v1290_v47 = vpop.permute.xlu1 %1289  ;;  %v1199_v60 = vpop.permute.xlu0 %1198 }
 0x13a   :  { %v1608_v15 = vsel %vm1603_vm10, %v1575_v23, %v1290_v47  ;;  %v1576_v13 = vsel %vm1570_vm9, %v1543_v31, %v1199_v60  ;;  %v1381_v60 = vsel %vm1374_vm3, %v10395_v1, %v10644_v62  ;;  %v170_v1 = vld [vmem:[%s14054_s27 + $0x88] sm:$0xff] }
 0x13b   :  { %821 = vrot.lane.b32.xlu1 %v10675_v37, %s10105_s7  ;;  %728 = vrot.lane.b32.xlu0 %v652_v56, %s10103_s14  ;;  %v1413_v29 = vsel %vm1406_vm4, %v1381_v60, %v10667_v18 }
 0x13c   :  { %8839 = vmatprep.mubr.msk.f32.mxu0 %vm1636_vm11, %v1608_v15  ;;  %v1445_v15 = vsel %vm1438_vm5, %v1413_v29, %v10682_v36  ;;  %v240_v36 = vrot.slane %v170_v1, 7 }
 0x13d   :  { %v10728_v5 = vpop.permute.xlu1 %911  ;;  %v10730_v6 = vpop.permute.xlu0 %527  ;;  %v1478_v62 = vsel %vm1471_vm6, %v1445_v15, %v10700_v33  ;;  %v1382_v33 = vsel %vm1374_vm3, %v10409_v11, %v10669_v24 }
 0x13e   :  { %v1414_v31 = vsel %vm1406_vm4, %v1382_v33, %v10684_v40  ;;  %v340_v11 = vsel %vm288_vm0, %v240_v36, 0.0  ;;  %v171_v40 = vld [vmem:[%s14054_s27 + $0x90] sm:$0xff] }
 0x13f   :  { %1212 = vrot.lane.b32.xlu1 %v462_v27, %s10109_s2  ;;  %1121 = vrot.lane.b32.xlu0 %v10675_v37, %s10108_s24  ;;  %v891_v27 = vrot.slane %v305_v45, 1  ;;  %v241_v32 = vrot.slane %v171_v40, 7 }
 0x141   :  { %v1292_v16 = vpop.permute.xlu1 %1291  ;;  %v1012_v17 = vpop.permute.xlu0 %1011  ;;  %v893_v42 = vsel %vm417_vm2, %v891_v27, %v892_v30 }
 0x142   :  { %v1609_v22 = vsel %vm1603_vm10, %v1576_v13, %v1292_v16  ;;  %v1511_v35 = vsel %vm1504_vm7, %v1478_v62, %v1012_v17  ;;  %v1446_v13 = vsel %vm1438_vm5, %v1414_v31, %v10702_v54 }
 0x143   :  { %925 = vrot.lane.b32.xlu1 %v465_v14, %s10106_s4  ;;  %823 = vrot.lane.b32.xlu0 %v305_v45, %s10105_s7  ;;  %v1479_v24 = vsel %vm1471_vm6, %v1446_v13, %v10728_v5 }
 0x144   :  { %8840 = vmatmul.mubr.msk.f32.gmra.mxu0 %vm1636_vm11, %v1609_v22  ;;  %v470_v22 = vrot.slane %v340_v11, 1 }
 0x145   :  { %v10749_v38 = vpop.permute.xlu1 %714  ;;  %v10751_v39 = vpop.permute.xlu0 %529 }
 0x147   :  { %1305 = vrot.lane.b32.xlu1 %v649_v43, %s10098_s3  ;;  %1214 = vrot.lane.b32.xlu0 %v465_v14, %s10109_s2  ;;  %v995_v14 = vsel %vm604_vm1, %v993_v49, %v994_v50  ;;  %v341_v49 = vsel %vm288_vm0, %v241_v32, 0.0  ;;  %v657_v50 = vrot.slane %v340_v11, 2 }
 0x148   :  { %v660_v62 = vrot.slane %v341_v49, 2 }
 0x149   :  { %v1108_v20 = vpop.permute.xlu1 %1107  ;;  %v1014_v48 = vpop.permute.xlu0 %1013 }
 0x14a   :  { %v1544_v18 = vsel %vm1537_vm8, %v1511_v35, %v1108_v20  ;;  %v1512_v61 = vsel %vm1504_vm7, %v1479_v24, %v1014_v48  ;;  %v10840_v48 = vsel %vm288_vm0, 0.0, %v241_v32 }
 0x14b   :  { %1027 = vrot.lane.b32.xlu1 %v652_v56, %s10107_s30  ;;  %927 = vrot.lane.b32.xlu0 %v893_v42, %s10106_s4  ;;  %v659_v1 = vrot.slane %v10840_v48, 2 }
 0x14d   :  { %v10764_v44 = vpop.permute.xlu1 %809  ;;  %v10766_v43 = vpop.permute.xlu0 %716 }
 0x14f   :  { %543 = vrot.lane.b32.xlu1 %v468_v46, %s10104_s17  ;;  %1307 = vrot.lane.b32.xlu0 %v652_v56, %s10098_s3  ;;  %v655_v56 = vsel %vm604_vm1, %v653_v53, %v654_v7  ;;  %v473_v53 = vrot.slane %v341_v49, 1 }
 0x151   :  { %v1201_v23 = vpop.permute.xlu1 %1200  ;;  %v1110_v47 = vpop.permute.xlu0 %1109 }
 0x152   :  { %v1577_v63 = vsel %vm1570_vm9, %v1544_v18, %v1201_v23  ;;  %v1545_v54 = vsel %vm1537_vm8, %v1512_v61, %v1110_v47 }
 0x153   :  { %1123 = vrot.lane.b32.xlu1 %v305_v45, %s10108_s24  ;;  %1029 = vrot.lane.b32.xlu0 %v995_v14, %s10107_s30  ;;  %v10808_v45 = vsel %vm288_vm0, 0.0, %v240_v36 }
 0x154   :  { %v469_v25 = vrot.slane %v10808_v45, 1 }
 0x155   :  { %v10782_v4 = vpop.permute.xlu1 %913  ;;  %v10784_v21 = vpop.permute.xlu0 %811 }
 0x156   :  { %v471_v55 = vsel %vm417_vm2, %v469_v25, %v470_v22 }
 0x157   :  { %825 = vrot.lane.b32.xlu1 %v10754_v41, %s10105_s7  ;;  %730 = vrot.lane.b32.xlu0 %v655_v56, %s10103_s14 }
 0x159   :  { %v1294_v51 = vpop.permute.xlu1 %1293  ;;  %v1203_v10 = vpop.permute.xlu0 %1202 }
 0x15a   :  { %v1610_v52 = vsel %vm1603_vm10, %v1577_v63, %v1294_v51  ;;  %v1578_v27 = vsel %vm1570_vm9, %v1545_v54, %v1203_v10  ;;  %v661_v63 = vsel %vm604_vm1, %v659_v1, %v660_v62 }
 0x15b   :  { %1216 = vrot.lane.b32.xlu1 %v893_v42, %s10109_s2  ;;  %1125 = vrot.lane.b32.xlu0 %v10271_v2, %s10108_s24 }
 0x15c   :  { %8842 = vmatprep.mubr.msk.f32.mxu0 %vm1636_vm11, %v1610_v52 }
 0x15d   :  { %v10812_v16 = vpop.permute.xlu1 %915  ;;  %v10814_v17 = vpop.permute.xlu0 %531 }
 0x15f   :  { %929 = vrot.lane.b32.xlu1 %v468_v46, %s10106_s4  ;;  %827 = vrot.lane.b32.xlu0 %v10808_v45, %s10105_s7  ;;  %v656_v46 = vrot.slane %v10808_v45, 2 }
 0x161   :  { %v1296_v30 = vpop.permute.xlu1 %1295  ;;  %v1016_v5 = vpop.permute.xlu0 %1015  ;;  %v658_v47 = vsel %vm604_vm1, %v656_v46, %v657_v50 }
 0x162   :  { %v1611_v42 = vsel %vm1603_vm10, %v1578_v27, %v1296_v30 }
 0x163   :  { %1309 = vrot.lane.b32.xlu1 %v995_v14, %s10098_s3  ;;  %1218 = vrot.lane.b32.xlu0 %v10280_v9, %s10109_s2  ;;  %v472_v14 = vrot.slane %v10840_v48, 1 }
 0x164   :  { %8843 = vmatmul.mubr.msk.f32.gmra.mxu0 %vm1636_vm11, %v1611_v42 }
 0x165   :  { %v10835_v3 = vpop.permute.xlu1 %718  ;;  %v10837_v20 = vpop.permute.xlu0 %533  ;;  %v474_v60 = vsel %vm417_vm2, %v472_v14, %v473_v53 }
 0x167   :  { %931 = vrot.lane.b32.xlu1 %v471_v55, %s10106_s4  ;;  %545 = vrot.lane.b32.xlu0 %v471_v55, %s10104_s17 }
 0x169   :  { %v1112_v7 = vpop.permute.xlu1 %1111  ;;  %v1018_v23 = vpop.permute.xlu0 %1017 }
 0x16b   :  { %1311 = vrot.lane.b32.xlu1 %v10277_v8, %s10098_s3  ;;  %1031 = vrot.lane.b32.xlu0 %v655_v56, %s10107_s30  ;;  %v1383_v56 = vsel %vm1374_vm3, %v10437_v26, %v10730_v6  ;;  %v172_v26 = vld [vmem:[%s14054_s27 + $0x98] sm:$0xff] }
 0x16c   :  { %v1415_v36 = vsel %vm1406_vm4, %v1383_v56, %v10749_v38 }
 0x16d   :  { %v10852_v29 = vpop.permute.xlu1 %813  ;;  %v10854_v15 = vpop.permute.xlu0 %720  ;;  %v1447_v51 = vsel %vm1438_vm5, %v1415_v36, %v10764_v44  ;;  %v242_v44 = vrot.slane %v172_v26, 7 }
 0x16e   :  { %v1480_v6 = vsel %vm1471_vm6, %v1447_v51, %v10782_v4  ;;  %v1384_v4 = vsel %vm1374_vm3, %v10451_v34, %v10751_v39 }
 0x16f   :  { %732 = vrot.lane.b32.xlu1 %v658_v47, %s10103_s14  ;;  %547 = vrot.lane.b32.xlu0 %v474_v60, %s10104_s17  ;;  %v1513_v33 = vsel %vm1504_vm7, %v1480_v6, %v1016_v5  ;;  %v1416_v40 = vsel %vm1406_vm4, %v1384_v4, %v10766_v43  ;;  %v10896_v61 = vsel %vm288_vm0, 0.0, %v242_v44  ;;  %v342_v34 = vsel %vm288_vm0, %v242_v44, 0.0  ;;  %v173_v43 = vld [vmem:[%s14054_s27 + $0xa0] sm:$0xff] }
 0x170   :  { %v1546_v38 = vsel %vm1537_vm8, %v1513_v33, %v1112_v7  ;;  %v1448_v54 = vsel %vm1438_vm5, %v1416_v40, %v10784_v21  ;;  %v475_v30 = vrot.slane %v10896_v61, 1  ;;  %v476_v5 = vrot.slane %v342_v34, 1 }
 0x171   :  { %v1205_v35 = vpop.permute.xlu1 %1204  ;;  %v1114_v18 = vpop.permute.xlu0 %1113  ;;  %v1481_v39 = vsel %vm1471_vm6, %v1448_v54, %v10812_v16 }
 0x172   :  { %v1579_v31 = vsel %vm1570_vm9, %v1546_v38, %v1205_v35  ;;  %v1514_v27 = vsel %vm1504_vm7, %v1481_v39, %v1018_v23  ;;  %v477_v46 = vsel %vm417_vm2, %v475_v30, %v476_v5  ;;  %v662_v23 = vrot.slane %v10896_v61, 2 }
 0x173   :  { %1127 = vrot.lane.b32.xlu1 %v10808_v45, %s10108_s24  ;;  %1033 = vrot.lane.b32.xlu0 %v658_v47, %s10107_s30  ;;  %v1547_v21 = vsel %vm1537_vm8, %v1514_v27, %v1114_v18 }
 0x175   :  { %v10870_v10 = vpop.permute.xlu1 %917  ;;  %v10872_v52 = vpop.permute.xlu0 %815 }
 0x177   :  { %829 = vrot.lane.b32.xlu1 %v10840_v48, %s10105_s7  ;;  %734 = vrot.lane.b32.xlu0 %v661_v63, %s10103_s14 }
 0x179   :  { %v1298_v13 = vpop.permute.xlu1 %1297  ;;  %v1207_v11 = vpop.permute.xlu0 %1206 }
 0x17a   :  { %v1612_v24 = vsel %vm1603_vm10, %v1579_v31, %v1298_v13  ;;  %v1580_v32 = vsel %vm1570_vm9, %v1547_v21, %v1207_v11 }
 0x17b   :  { %1220 = vrot.lane.b32.xlu1 %v471_v55, %s10109_s2  ;;  %1129 = vrot.lane.b32.xlu0 %v10840_v48, %s10108_s24  ;;  %v243_v55 = vrot.slane %v173_v43, 7 }
 0x17c   :  { %8845 = vmatprep.mubr.msk.f32.mxu0 %vm1636_vm11, %v1612_v24 }
 0x17d   :  { %v10900_v25 = vpop.permute.xlu1 %919  ;;  %v10902_v22 = vpop.permute.xlu0 %535  ;;  %v10927_v53 = vsel %vm288_vm0, 0.0, %v243_v55  ;;  %v343_v7 = vsel %vm288_vm0, %v243_v55, 0.0 }
 0x17e   :  { %v479_v1 = vrot.slane %v343_v7, 1  ;;  %v665_v26 = vrot.slane %v10927_v53, 2  ;;  %v666_v6 = vrot.slane %v343_v7, 2 }
 0x17f   :  { %933 = vrot.lane.b32.xlu1 %v474_v60, %s10106_s4  ;;  %831 = vrot.lane.b32.xlu0 %v10896_v61, %s10105_s7 }
 0x180   :  { %v667_v31 = vsel %vm604_vm1, %v665_v26, %v666_v6 }
 0x181   :  { %v1300_v42 = vpop.permute.xlu1 %1299  ;;  %v1020_v16 = vpop.permute.xlu0 %1019 }
 0x182   :  { %v1613_v49 = vsel %vm1603_vm10, %v1580_v32, %v1300_v42 }
 0x183   :  { %1313 = vrot.lane.b32.xlu1 %v658_v47, %s10098_s3  ;;  %1222 = vrot.lane.b32.xlu0 %v474_v60, %s10109_s2  ;;  %v663_v47 = vrot.slane %v342_v34, 2  ;;  %v478_v60 = vrot.slane %v10927_v53, 1 }
 0x184   :  { %8846 = vmatmul.mubr.msk.f32.gmra.mxu0 %vm1636_vm11, %v1613_v49 }
 0x185   :  { %v10922_v50 = vpop.permute.xlu1 %722  ;;  %v10924_v14 = vpop.permute.xlu0 %537  ;;  %v664_v18 = vsel %vm604_vm1, %v662_v23, %v663_v47  ;;  %v480_v56 = vsel %vm417_vm2, %v478_v60, %v479_v1 }
 0x187   :  { %935 = vrot.lane.b32.xlu1 %v477_v46, %s10106_s4  ;;  %549 = vrot.lane.b32.xlu0 %v477_v46, %s10104_s17 }
 0x189   :  { %v1116_v62 = vpop.permute.xlu1 %1115  ;;  %v1022_v35 = vpop.permute.xlu0 %1021 }
 0x18b   :  { %1315 = vrot.lane.b32.xlu1 %v661_v63, %s10098_s3  ;;  %1035 = vrot.lane.b32.xlu0 %v661_v63, %s10107_s30  ;;  %v1385_v63 = vsel %vm1374_vm3, %v10485_v57, %v10814_v17  ;;  %v174_v57 = vld [vmem:[%s14054_s27 + $0xa8] sm:$0xff] }
 0x18c   :  { %v1417_v44 = vsel %vm1406_vm4, %v1385_v63, %v10835_v3 }
 0x18d   :  { %v10938_v36 = vpop.permute.xlu1 %817  ;;  %v10940_v51 = vpop.permute.xlu0 %724  ;;  %v1449_v13 = vsel %vm1438_vm5, %v1417_v44, %v10852_v29  ;;  %v244_v29 = vrot.slane %v174_v57, 7 }
 0x18e   :  { %v1482_v17 = vsel %vm1471_vm6, %v1449_v13, %v10870_v10  ;;  %v1386_v10 = vsel %vm1374_vm3, %v10505_v12, %v10837_v20 }
 0x18f   :  { %736 = vrot.lane.b32.xlu1 %v664_v18, %s10103_s14  ;;  %551 = vrot.lane.b32.xlu0 %v480_v56, %s10104_s17  ;;  %v1515_v4 = vsel %vm1504_vm7, %v1482_v17, %v1020_v16  ;;  %v1418_v43 = vsel %vm1406_vm4, %v1386_v10, %v10854_v15  ;;  %v10982_v27 = vsel %vm288_vm0, 0.0, %v244_v29  ;;  %v344_v12 = vsel %vm288_vm0, %v244_v29, 0.0  ;;  %v175_v15 = vld [vmem:[%s14054_s27 + $0xb0] sm:$0xff] }
 0x190   :  { %v1548_v3 = vsel %vm1537_vm8, %v1515_v4, %v1116_v62  ;;  %v1450_v21 = vsel %vm1438_vm5, %v1418_v43, %v10872_v52  ;;  %v481_v42 = vrot.slane %v10982_v27, 1  ;;  %v482_v16 = vrot.slane %v344_v12, 1 }
 0x191   :  { %v1209_v33 = vpop.permute.xlu1 %1208  ;;  %v1118_v38 = vpop.permute.xlu0 %1117  ;;  %v1483_v20 = vsel %vm1471_vm6, %v1450_v21, %v10900_v25 }
 0x192   :  { %v1581_v40 = vsel %vm1570_vm9, %v1548_v3, %v1209_v33  ;;  %v1516_v32 = vsel %vm1504_vm7, %v1483_v20, %v1022_v35  ;;  %v483_v23 = vsel %vm417_vm2, %v481_v42, %v482_v16  ;;  %v668_v35 = vrot.slane %v10982_v27, 2 }
 0x193   :  { %1131 = vrot.lane.b32.xlu1 %v10896_v61, %s10108_s24  ;;  %1037 = vrot.lane.b32.xlu0 %v664_v18, %s10107_s30  ;;  %v1549_v52 = vsel %vm1537_vm8, %v1516_v32, %v1118_v38 }
 0x195   :  { %v10956_v11 = vpop.permute.xlu1 %921  ;;  %v10958_v24 = vpop.permute.xlu0 %819 }
 0x197   :  { %833 = vrot.lane.b32.xlu1 %v10927_v53, %s10105_s7  ;;  %738 = vrot.lane.b32.xlu0 %v667_v31, %s10103_s14 }
 0x199   :  { %v1302_v54 = vpop.permute.xlu1 %1301  ;;  %v1211_v34 = vpop.permute.xlu0 %1210 }
 0x19a   :  { %v1614_v39 = vsel %vm1603_vm10, %v1581_v40, %v1302_v54  ;;  %v1582_v55 = vsel %vm1570_vm9, %v1549_v52, %v1211_v34 }
 0x19b   :  { %1224 = vrot.lane.b32.xlu1 %v477_v46, %s10109_s2  ;;  %1133 = vrot.lane.b32.xlu0 %v10927_v53, %s10108_s24  ;;  %v245_v46 = vrot.slane %v175_v15, 7 }
 0x19c   :  { %8848 = vmatprep.mubr.msk.f32.mxu0 %vm1636_vm11, %v1614_v39 }
 0x19d   :  { %v10986_v30 = vpop.permute.xlu1 %923  ;;  %v10988_v5 = vpop.permute.xlu0 %539  ;;  %v11013_v1 = vsel %vm288_vm0, 0.0, %v245_v46  ;;  %v345_v62 = vsel %vm288_vm0, %v245_v46, 0.0 }
 0x19e   :  { %v485_v26 = vrot.slane %v345_v62, 1  ;;  %v671_v57 = vrot.slane %v11013_v1, 2  ;;  %v672_v17 = vrot.slane %v345_v62, 2 }
 0x19f   :  { %937 = vrot.lane.b32.xlu1 %v480_v56, %s10106_s4  ;;  %835 = vrot.lane.b32.xlu0 %v10982_v27, %s10105_s7 }
 0x1a0   :  { %v673_v40 = vsel %vm604_vm1, %v671_v57, %v672_v17 }
 0x1a1   :  { %v1304_v49 = vpop.permute.xlu1 %1303  ;;  %v1024_v25 = vpop.permute.xlu0 %1023 }
 0x1a2   :  { %v1615_v7 = vsel %vm1603_vm10, %v1582_v55, %v1304_v49 }
 0x1a3   :  { %1317 = vrot.lane.b32.xlu1 %v664_v18, %s10098_s3  ;;  %1226 = vrot.lane.b32.xlu0 %v480_v56, %s10109_s2  ;;  %v669_v18 = vrot.slane %v344_v12, 2  ;;  %v484_v56 = vrot.slane %v11013_v1, 1 }
 0x1a4   :  { %8849 = vmatmul.mubr.msk.f32.gmra.mxu0 %vm1636_vm11, %v1615_v7 }
 0x1a5   :  { %v11008_v47 = vpop.permute.xlu1 %726  ;;  %v11010_v60 = vpop.permute.xlu0 %541  ;;  %v670_v38 = vsel %vm604_vm1, %v668_v35, %v669_v18  ;;  %v486_v63 = vsel %vm417_vm2, %v484_v56, %v485_v26 }
 0x1a7   :  { %939 = vrot.lane.b32.xlu1 %v483_v23, %s10106_s4  ;;  %553 = vrot.lane.b32.xlu0 %v483_v23, %s10104_s17 }
 0x1a9   :  { %v1120_v6 = vpop.permute.xlu1 %1119  ;;  %v1026_v33 = vpop.permute.xlu0 %1025 }
 0x1ab   :  { %1319 = vrot.lane.b32.xlu1 %v667_v31, %s10098_s3  ;;  %1039 = vrot.lane.b32.xlu0 %v667_v31, %s10107_s30  ;;  %v1387_v31 = vsel %vm1374_vm3, %v10568_v58, %v10902_v22  ;;  %v176_v58 = vld [vmem:[%s14054_s27 + $0xb8] sm:$0xff] }
 0x1ac   :  { %v1419_v29 = vsel %vm1406_vm4, %v1387_v31, %v10922_v50 }
 0x1ad   :  { %v11024_v44 = vpop.permute.xlu1 %821  ;;  %v11026_v13 = vpop.permute.xlu0 %728  ;;  %v1451_v54 = vsel %vm1438_vm5, %v1419_v29, %v10938_v36  ;;  %v246_v36 = vrot.slane %v176_v58, 7  ;;  %v1389_v58 = vsel %vm1374_vm3, %v10654_v59, %v10988_v5 }
 0x1ae   :  { %v1484_v22 = vsel %vm1471_vm6, %v1451_v54, %v10956_v11  ;;  %v1388_v11 = vsel %vm1374_vm3, %v10589_v19, %v10924_v14 }
 0x1af   :  { %740 = vrot.lane.b32.xlu1 %v670_v38, %s10103_s14  ;;  %555 = vrot.lane.b32.xlu0 %v486_v63, %s10104_s17  ;;  %v1517_v10 = vsel %vm1504_vm7, %v1484_v22, %v1024_v25  ;;  %v1420_v15 = vsel %vm1406_vm4, %v1388_v11, %v10940_v51  ;;  %v11068_v32 = vsel %vm288_vm0, 0.0, %v246_v36  ;;  %v346_v19 = vsel %vm288_vm0, %v246_v36, 0.0  ;;  %v177_v51 = vld [vmem:[%s14054_s27 + $0xc0] sm:$0xff] }
 0x1b0   :  { %v1550_v50 = vsel %vm1537_vm8, %v1517_v10, %v1120_v6  ;;  %v1452_v52 = vsel %vm1438_vm5, %v1420_v15, %v10958_v24  ;;  %v487_v49 = vrot.slane %v11068_v32, 1  ;;  %v488_v25 = vrot.slane %v346_v19, 1 }
 0x1b1   :  { %v1213_v4 = vpop.permute.xlu1 %1212  ;;  %v1122_v3 = vpop.permute.xlu0 %1121  ;;  %v1485_v14 = vsel %vm1471_vm6, %v1452_v52, %v10986_v30  ;;  %v1421_v22 = vsel %vm1406_vm4, %v1389_v58, %v11008_v47  ;;  %v1390_v15 = vsel %vm1374_vm3, %v10675_v37, %v11010_v60 }
 0x1b2   :  { %v1583_v43 = vsel %vm1570_vm9, %v1550_v50, %v1213_v4  ;;  %v1518_v55 = vsel %vm1504_vm7, %v1485_v14, %v1026_v33  ;;  %v489_v35 = vsel %vm417_vm2, %v487_v49, %v488_v25  ;;  %v674_v33 = vrot.slane %v11068_v32, 2 }
 0x1b3   :  { %1135 = vrot.lane.b32.xlu1 %v10982_v27, %s10108_s24  ;;  %1041 = vrot.lane.b32.xlu0 %v670_v38, %s10107_s30  ;;  %v1551_v24 = vsel %vm1537_vm8, %v1518_v55, %v1122_v3  ;;  %v1453_v50 = vsel %vm1438_vm5, %v1421_v22, %v11024_v44  ;;  %v1422_v52 = vsel %vm1406_vm4, %v1390_v15, %v11026_v13 }
 0x1b5   :  { %v11042_v34 = vpop.permute.xlu1 %925  ;;  %v11044_v39 = vpop.permute.xlu0 %823 }
 0x1b6   :  { %v1486_v59 = vsel %vm1471_vm6, %v1453_v50, %v11042_v34  ;;  %v178_v34 = vld [vmem:[%s14054_s27 + $0xc8] sm:$0xff] }
 0x1b7   :  { %837 = vrot.lane.b32.xlu1 %v11013_v1, %s10105_s7  ;;  %742 = vrot.lane.b32.xlu0 %v673_v40, %s10103_s14 }
 0x1b9   :  { %v1306_v21 = vpop.permute.xlu1 %1305  ;;  %v1215_v12 = vpop.permute.xlu0 %1214 }
 0x1ba   :  { %v1616_v20 = vsel %vm1603_vm10, %v1583_v43, %v1306_v21  ;;  %v1584_v46 = vsel %vm1570_vm9, %v1551_v24, %v1215_v12 }
 0x1bb   :  { %1228 = vrot.lane.b32.xlu1 %v483_v23, %s10109_s2  ;;  %1137 = vrot.lane.b32.xlu0 %v11013_v1, %s10108_s24  ;;  %v247_v23 = vrot.slane %v177_v51, 7 }
 0x1bc   :  { %8851 = vmatprep.mubr.msk.f32.mxu0 %vm1636_vm11, %v1616_v20 }
 0x1bd   :  { %v1028_v42 = vpop.permute.xlu1 %1027  ;;  %v11072_v16 = vpop.permute.xlu0 %927  ;;  %v11095_v26 = vsel %vm288_vm0, 0.0, %v247_v23  ;;  %v347_v6 = vsel %vm288_vm0, %v247_v23, 0.0 }
 0x1be   :  { %v491_v57 = vrot.slane %v347_v6, 1  ;;  %v678_v10 = vrot.slane %v347_v6, 2  ;;  %v1519_v5 = vsel %vm1504_vm7, %v1486_v59, %v1028_v42  ;;  %v248_v42 = vrot.slane %v178_v34, 7 }
 0x1bf   :  { %941 = vrot.lane.b32.xlu1 %v486_v63, %s10106_s4  ;;  %839 = vrot.lane.b32.xlu0 %v11068_v32, %s10105_s7 }
 0x1c0   :  { %v11165_v55 = vsel %vm288_vm0, 0.0, %v248_v42 }
 0x1c1   :  { %v11087_v7 = vpop.permute.xlu1 %543  ;;  %v1308_v30 = vpop.permute.xlu0 %1307 }
 0x1c2   :  { %v1617_v62 = vsel %vm1603_vm10, %v1584_v46, %v1308_v30  ;;  %v179_v46 = vld [vmem:[%s14054_s27 + $0xd0] sm:$0xff]  ;;  %v493_v30 = vrot.slane %v11165_v55, 1 }
 0x1c3   :  { %1321 = vrot.lane.b32.xlu1 %v670_v38, %s10098_s3  ;;  %1230 = vrot.lane.b32.xlu0 %v486_v63, %s10109_s2  ;;  %v675_v38 = vrot.slane %v346_v19, 2  ;;  %v490_v63 = vrot.slane %v11095_v26, 1  ;;  %v1454_v19 = vsel %vm1438_vm5, %v1422_v52, %v11044_v39 }
 0x1c4   :  { %8852 = vmatmul.mubr.msk.f32.gmra.mxu0 %vm1636_vm11, %v1617_v62  ;;  %v1487_v37 = vsel %vm1471_vm6, %v1454_v19, %v11072_v16  ;;  %v348_v16 = vsel %vm288_vm0, %v248_v42, 0.0 }
 0x1c5   :  { %v1124_v18 = vpop.permute.xlu1 %1123  ;;  %v1030_v56 = vpop.permute.xlu0 %1029  ;;  %v676_v3 = vsel %vm604_vm1, %v674_v33, %v675_v38  ;;  %v492_v31 = vsel %vm417_vm2, %v490_v63, %v491_v57  ;;  %v494_v23 = vrot.slane %v348_v16, 1  ;;  %v680_v57 = vrot.slane %v11165_v55, 2 }
 0x1c6   :  { %v1552_v47 = vsel %vm1537_vm8, %v1519_v5, %v1124_v18  ;;  %v1520_v60 = vsel %vm1504_vm7, %v1487_v37, %v1030_v56  ;;  %v249_v18 = vrot.slane %v179_v46, 7 }
 0x1c7   :  { %943 = vrot.lane.b32.xlu1 %v489_v35, %s10106_s4  ;;  %557 = vrot.lane.b32.xlu0 %v489_v35, %s10104_s17  ;;  %v495_v56 = vsel %vm417_vm2, %v493_v30, %v494_v23 }
 0x1c8   :  { %v11190_v38 = vsel %vm288_vm0, 0.0, %v249_v18  ;;  %v349_v63 = vsel %vm288_vm0, %v249_v18, 0.0  ;;  %v181_v18 = vld [vmem:[%s14054_s27 + $0xe0] sm:$0xff] }
 0x1c9   :  { %v11102_v17 = vpop.permute.xlu1 %825  ;;  %v11104_v4 = vpop.permute.xlu0 %730  ;;  %v497_v58 = vrot.slane %v349_v63, 1  ;;  %v683_v5 = vrot.slane %v11190_v38, 2 }
 0x1cb   :  { %1323 = vrot.lane.b32.xlu1 %v673_v40, %s10098_s3  ;;  %1043 = vrot.lane.b32.xlu0 %v673_v40, %s10107_s30  ;;  %v677_v40 = vrot.slane %v11095_v26, 2 }
 0x1cd   :  { %v1217_v29 = vpop.permute.xlu1 %1216  ;;  %v11110_v54 = vpop.permute.xlu0 %1125  ;;  %v679_v21 = vsel %vm604_vm1, %v677_v40, %v678_v10 }
 0x1ce   :  { %v1585_v44 = vsel %vm1570_vm9, %v1552_v47, %v1217_v29  ;;  %v1553_v13 = vsel %vm1537_vm8, %v1520_v60, %v11110_v54  ;;  %v681_v29 = vrot.slane %v348_v16, 2  ;;  %v684_v47 = vrot.slane %v349_v63, 2 }
 0x1cf   :  { %744 = vrot.lane.b32.xlu1 %v676_v3, %s10103_s14  ;;  %559 = vrot.lane.b32.xlu0 %v492_v31, %s10104_s17 }
 0x1d0   :  { %v682_v40 = vsel %vm604_vm1, %v680_v57, %v681_v29  ;;  %v685_v52 = vsel %vm604_vm1, %v683_v5, %v684_v47  ;;  %v251_v57 = vrot.slane %v181_v18, 7 }
 0x1d1   :  { %v11122_v36 = vpop.permute.xlu1 %929  ;;  %v11124_v43 = vpop.permute.xlu0 %827 }
 0x1d3   :  { %1139 = vrot.lane.b32.xlu1 %v11068_v32, %s10108_s24  ;;  %1045 = vrot.lane.b32.xlu0 %v676_v3, %s10107_s30 }
 0x1d5   :  { %v1310_v12 = vpop.permute.xlu1 %1309  ;;  %v11135_v20 = vpop.permute.xlu0 %1218 }
 0x1d6   :  { %v1618_v11 = vsel %vm1603_vm10, %v1585_v44, %v1310_v12  ;;  %v1586_v39 = vsel %vm1570_vm9, %v1553_v13, %v11135_v20  ;;  %v1455_v44 = vsel %vm1438_vm5, %v10525_v28, %v11102_v17  ;;  %v1391_v28 = vsel %vm1374_vm3, %v10754_v41, %v11087_v7 }
 0x1d7   :  { %841 = vrot.lane.b32.xlu1 %v11095_v26, %s10105_s7  ;;  %746 = vrot.lane.b32.xlu0 %v679_v21, %s10103_s14  ;;  %v1488_v34 = vsel %vm1471_vm6, %v1455_v44, %v11122_v36  ;;  %v180_v36 = vld [vmem:[%s14054_s27 + $0xd8] sm:$0xff]  ;;  %v1423_v60 = vsel %vm1406_vm4, %v1391_v28, %v11104_v4 }
 0x1d8   :  { %8854 = vmatprep.mubr.msk.f32.mxu0 %vm1636_vm11, %v1618_v11  ;;  %v250_v41 = vrot.slane %v180_v36, 7  ;;  %v1456_v7 = vsel %vm1438_vm5, %v1423_v60, %v11124_v43 }
 0x1d9   :  { %v11152_v14 = vpop.permute.xlu1 %931  ;;  %v11154_v51 = vpop.permute.xlu0 %545 }
 0x1da   :  { %v350_v23 = vsel %vm288_vm0, %v250_v41, 0.0 }
 0x1db   :  { %1232 = vrot.lane.b32.xlu1 %v489_v35, %s10109_s2  ;;  %1141 = vrot.lane.b32.xlu0 %v11095_v26, %s10108_s24  ;;  %v687_v47 = vrot.slane %v350_v23, 2 }
 0x1dd   :  { %v11169_v24 = vpop.permute.xlu1 %1311  ;;  %v1032_v49 = vpop.permute.xlu0 %1031 }
 0x1de   :  { %v1619_v25 = vsel %vm1603_vm10, %v1586_v39, %v11169_v24  ;;  %v1521_v11 = vsel %vm1504_vm7, %v1488_v34, %v1032_v49  ;;  %v1489_v49 = vsel %vm1471_vm6, %v1456_v7, %v11152_v14 }
 0x1df   :  { %945 = vrot.lane.b32.xlu1 %v492_v31, %s10106_s4  ;;  %843 = vrot.lane.b32.xlu0 %v11165_v55, %s10105_s7 }
 0x1e0   :  { %8855 = vmatmul.mubr.msk.f32.gmra.mxu0 %vm1636_vm11, %v1619_v25  ;;  %v11251_v25 = vsel %vm288_vm0, 0.0, %v250_v41 }
 0x1e1   :  { %v11182_v62 = vpop.permute.xlu1 %732  ;;  %v11184_v35 = vpop.permute.xlu0 %547  ;;  %v686_v5 = vrot.slane %v11251_v25, 2 }
 0x1e3   :  { %1325 = vrot.lane.b32.xlu1 %v676_v3, %s10098_s3  ;;  %1234 = vrot.lane.b32.xlu0 %v492_v31, %s10109_s2  ;;  %v496_v3 = vrot.slane %v11190_v38, 1 }
 0x1e5   :  { %v1128_v6 = vpop.permute.xlu1 %1127  ;;  %v1034_v33 = vpop.permute.xlu0 %1033  ;;  %v498_v10 = vsel %vm417_vm2, %v496_v3, %v497_v58 }
 0x1e6   :  { %v1554_v15 = vsel %vm1537_vm8, %v1521_v11, %v1128_v6  ;;  %v1522_v16 = vsel %vm1504_vm7, %v1489_v49, %v1034_v33  ;;  %v500_v6 = vrot.slane %v350_v23, 1  ;;  %v688_v11 = vsel %vm604_vm1, %v686_v5, %v687_v47 }
 0x1e7   :  { %947 = vrot.lane.b32.xlu1 %v495_v56, %s10106_s4  ;;  %561 = vrot.lane.b32.xlu0 %v495_v56, %s10104_s17 }
 0x1e9   :  { %v11197_v31 = vpop.permute.xlu1 %829  ;;  %v11199_v22 = vpop.permute.xlu0 %734 }
 0x1eb   :  { %1327 = vrot.lane.b32.xlu1 %v679_v21, %s10098_s3  ;;  %1047 = vrot.lane.b32.xlu0 %v679_v21, %s10107_s30 }
 0x1ed   :  { %v1221_v50 = vpop.permute.xlu1 %1220  ;;  %v1130_v59 = vpop.permute.xlu0 %1129 }
 0x1ee   :  { %v1587_v17 = vsel %vm1570_vm9, %v1554_v15, %v1221_v50  ;;  %v1555_v4 = vsel %vm1537_vm8, %v1522_v16, %v1130_v59  ;;  %v11272_v50 = vsel %vm288_vm0, 0.0, %v251_v57  ;;  %v351_v59 = vsel %vm288_vm0, %v251_v57, 0.0 }
 0x1ef   :  { %748 = vrot.lane.b32.xlu1 %v682_v40, %s10103_s14  ;;  %563 = vrot.lane.b32.xlu0 %v498_v10, %s10104_s17  ;;  %v503_v44 = vrot.slane %v351_v59, 1  ;;  %v689_v36 = vrot.slane %v11272_v50, 2 }
 0x1f1   :  { %v11211_v12 = vpop.permute.xlu1 %933  ;;  %v11213_v21 = vpop.permute.xlu0 %831 }
 0x1f3   :  { %1143 = vrot.lane.b32.xlu1 %v11165_v55, %s10108_s24  ;;  %1049 = vrot.lane.b32.xlu0 %v682_v40, %s10107_s30 }
 0x1f5   :  { %v1314_v42 = vpop.permute.xlu1 %1313  ;;  %v1223_v19 = vpop.permute.xlu0 %1222 }
 0x1f6   :  { %v1620_v37 = vsel %vm1603_vm10, %v1587_v17, %v1314_v42  ;;  %v1588_v43 = vsel %vm1570_vm9, %v1555_v4, %v1223_v19  ;;  %v1392_v42 = vsel %vm1374_vm3, %v10808_v45, %v11154_v51  ;;  %v182_v4 = vld [vmem:[%s14054_s27 + $0xe8] sm:$0xff] }
 0x1f7   :  { %845 = vrot.lane.b32.xlu1 %v11190_v38, %s10105_s7  ;;  %750 = vrot.lane.b32.xlu0 %v685_v52, %s10103_s14  ;;  %v1424_v19 = vsel %vm1406_vm4, %v1392_v42, %v11182_v62 }
 0x1f8   :  { %8857 = vmatprep.mubr.msk.f32.mxu0 %vm1636_vm11, %v1620_v37  ;;  %v1457_v37 = vsel %vm1438_vm5, %v1424_v19, %v11197_v31 }
 0x1f9   :  { %v11239_v13 = vpop.permute.xlu1 %935  ;;  %v11241_v39 = vpop.permute.xlu0 %549  ;;  %v1490_v45 = vsel %vm1471_vm6, %v1457_v37, %v11211_v12 }
 0x1fb   :  { %1236 = vrot.lane.b32.xlu1 %v495_v56, %s10109_s2  ;;  %1145 = vrot.lane.b32.xlu0 %v11190_v38, %s10108_s24  ;;  %v499_v56 = vrot.slane %v11251_v25, 1 }
 0x1fd   :  { %v1316_v46 = vpop.permute.xlu1 %1315  ;;  %v1036_v30 = vpop.permute.xlu0 %1035  ;;  %v501_v29 = vsel %vm417_vm2, %v499_v56, %v500_v6 }
 0x1fe   :  { %v1621_v14 = vsel %vm1603_vm10, %v1588_v43, %v1316_v46  ;;  %v1523_v51 = vsel %vm1504_vm7, %v1490_v45, %v1036_v30  ;;  %v1393_v43 = vsel %vm1374_vm3, %v10840_v48, %v11184_v35  ;;  %v252_v30 = vrot.slane %v182_v4, 7 }
 0x1ff   :  { %949 = vrot.lane.b32.xlu1 %v498_v10, %s10106_s4  ;;  %847 = vrot.lane.b32.xlu0 %v11251_v25, %s10105_s7  ;;  %v1425_v46 = vsel %vm1406_vm4, %v1393_v43, %v11199_v22 }
 0x200   :  { %8858 = vmatmul.mubr.msk.f32.gmra.mxu0 %vm1636_vm11, %v1621_v14  ;;  %v1458_v23 = vsel %vm1438_vm5, %v1425_v46, %v11213_v21  ;;  %v11337_v56 = vsel %vm288_vm0, 0.0, %v252_v30 }
 0x201   :  { %v11264_v33 = vpop.permute.xlu1 %736  ;;  %v11266_v63 = vpop.permute.xlu0 %551  ;;  %v1491_v48 = vsel %vm1471_vm6, %v1458_v23, %v11239_v13 }
 0x203   :  { %1329 = vrot.lane.b32.xlu1 %v682_v40, %s10098_s3  ;;  %1238 = vrot.lane.b32.xlu0 %v498_v10, %s10109_s2  ;;  %v502_v40 = vrot.slane %v11272_v50, 1 }
 0x205   :  { %v1132_v3 = vpop.permute.xlu1 %1131  ;;  %v1038_v58 = vpop.permute.xlu0 %1037  ;;  %v504_v15 = vsel %vm417_vm2, %v502_v40, %v503_v44 }
 0x206   :  { %v1556_v62 = vsel %vm1537_vm8, %v1523_v51, %v1132_v3  ;;  %v1524_v35 = vsel %vm1504_vm7, %v1491_v48, %v1038_v58  ;;  %v352_v3 = vsel %vm288_vm0, %v252_v30, 0.0  ;;  %v505_v58 = vrot.slane %v11337_v56, 1 }
 0x207   :  { %951 = vrot.lane.b32.xlu1 %v501_v29, %s10106_s4  ;;  %565 = vrot.lane.b32.xlu0 %v501_v29, %s10104_s17 }
 0x209   :  { %v11279_v10 = vpop.permute.xlu1 %833  ;;  %v11281_v34 = vpop.permute.xlu0 %738 }
 0x20b   :  { %1331 = vrot.lane.b32.xlu1 %v685_v52, %s10098_s3  ;;  %1051 = vrot.lane.b32.xlu0 %v685_v52, %s10107_s30  ;;  %v690_v52 = vrot.slane %v351_v59, 2  ;;  %v506_v59 = vrot.slane %v352_v3, 1 }
 0x20d   :  { %v1225_v28 = vpop.permute.xlu1 %1224  ;;  %v1134_v17 = vpop.permute.xlu0 %1133  ;;  %v691_v7 = vsel %vm604_vm1, %v689_v36, %v690_v52  ;;  %v507_v44 = vsel %vm417_vm2, %v505_v58, %v506_v59  ;;  %v692_v36 = vrot.slane %v11337_v56, 2  ;;  %v693_v52 = vrot.slane %v352_v3, 2 }
 0x20e   :  { %v1589_v31 = vsel %vm1570_vm9, %v1556_v62, %v1225_v28  ;;  %v1557_v22 = vsel %vm1537_vm8, %v1524_v35, %v1134_v17 }
 0x20f   :  { %752 = vrot.lane.b32.xlu1 %v688_v11, %s10103_s14  ;;  %567 = vrot.lane.b32.xlu0 %v504_v15, %s10104_s17  ;;  %v694_v51 = vsel %vm604_vm1, %v692_v36, %v693_v52  ;;  %v11436_v36 = vld [vmem:[%s14057_s10] ss:$0 sm:$0xff] }
 0x211   :  { %v11297_v60 = vpop.permute.xlu1 %937  ;;  %v11299_v41 = vpop.permute.xlu0 %835 }
 0x213   :  { %1147 = vrot.lane.b32.xlu1 %v11251_v25, %s10108_s24  ;;  %1053 = vrot.lane.b32.xlu0 %v688_v11, %s10107_s30 }
 0x215   :  { %v1318_v49 = vpop.permute.xlu1 %1317  ;;  %v1227_v16 = vpop.permute.xlu0 %1226 }
 0x216   :  { %v1622_v12 = vsel %vm1603_vm10, %v1589_v31, %v1318_v49  ;;  %v1590_v21 = vsel %vm1570_vm9, %v1557_v22, %v1227_v16  ;;  %v1394_v16 = vsel %vm1374_vm3, %v10896_v61, %v11241_v39  ;;  %v8835_v39 = vpop.f32.mrf.mxu0 }
 0x217   :  { %849 = vrot.lane.b32.xlu1 %v11272_v50, %s10105_s7  ;;  %754 = vrot.lane.b32.xlu0 %v691_v7, %s10103_s14  ;;  %v1426_v4 = vsel %vm1406_vm4, %v1394_v16, %v11264_v33 }
 0x218   :  { %8860 = vmatprep.mubr.msk.f32.mxu0 %vm1636_vm11, %v1622_v12  ;;  %v1459_v43 = vsel %vm1438_vm5, %v1426_v4, %v11279_v10 }
 0x219   :  { %v11325_v14 = vpop.permute.xlu1 %939  ;;  %v11327_v18 = vpop.permute.xlu0 %553  ;;  %v1492_v61 = vsel %vm1471_vm6, %v1459_v43, %v11297_v60  ;;  %v184_v60 = vld [vmem:[%s14054_s27 + $0xf8] sm:$0xff] }
 0x21b   :  { %1240 = vrot.lane.b32.xlu1 %v501_v29, %s10109_s2  ;;  %1149 = vrot.lane.b32.xlu0 %v11272_v50, %s10108_s24  ;;  %v183_v29 = vld [vmem:[%s14054_s27 + $0xf0] sm:$0xff]  ;;  %s10114_s27 = smov 48  }
 0x21c   :  { %v253_v40 = vrot.slane %v183_v29, 7  ;;  %v11415_v29 = vld [vmem:[%s14056_s25] ss:$0 sm:$0xff] }
 0x21d   :  { %v1320_v6 = vpop.permute.xlu1 %1319  ;;  %v1040_v57 = vpop.permute.xlu0 %1039 }
 0x21e   :  { %v1623_v13 = vsel %vm1603_vm10, %v1590_v21, %v1320_v6  ;;  %v11358_v42 = vsel %vm288_vm0, 0.0, %v253_v40  ;;  %v353_v19 = vsel %vm288_vm0, %v253_v40, 0.0  ;;  %v1525_v23 = vsel %vm1504_vm7, %v1492_v61, %v1040_v57  ;;  %v1802_v6 = vpop.f32.mrf.mxu0 }
 0x21f   :  { %953 = vrot.lane.b32.xlu1 %v504_v15, %s10106_s4  ;;  %851 = vrot.lane.b32.xlu0 %v11337_v56, %s10105_s7  ;;  %v509_v37 = vrot.slane %v353_v19, 1  ;;  %v695_v12 = vrot.slane %v11358_v42, 2  ;;  %v1395_v57 = vsel %vm1374_vm3, %v10927_v53, %v11266_v63  ;;  %v1967_v59 = vmul.f32 %v11415_v29, %v1802_v6 }
 0x220   :  { %8861 = vmatmul.mubr.msk.f32.gmra.mxu0 %vm1636_vm11, %v1623_v13  ;;  %v1427_v3 = vsel %vm1406_vm4, %v1395_v57, %v11281_v34  ;;  %v254_v13 = vrot.slane %v184_v60, 7 }
 0x221   :  { %v11350_v5 = vpop.permute.xlu1 %740  ;;  %v11352_v47 = vpop.permute.xlu0 %555  ;;  %v1460_v53 = vsel %vm1438_vm5, %v1427_v3, %v11299_v41 }
 0x222   :  { %v1493_v34 = vsel %vm1471_vm6, %v1460_v53, %v11325_v14 }
 0x223   :  { %1333 = vrot.lane.b32.xlu1 %v688_v11, %s10098_s3  ;;  %1242 = vrot.lane.b32.xlu0 %v504_v15, %s10109_s2  ;;  %v508_v11 = vrot.slane %v11358_v42, 1 }
 0x225   :  { %v1136_v28 = vpop.permute.xlu1 %1135  ;;  %v1042_v17 = vpop.permute.xlu0 %1041  ;;  %v510_v62 = vsel %vm417_vm2, %v508_v11, %v509_v37  ;;  %v2005_v11 = vadd.f32 %v11436_v36, %v1967_v59 }
 0x226   :  { %v1558_v33 = vsel %vm1537_vm8, %v1525_v23, %v1136_v28  ;;  %v1526_v40 = vsel %vm1504_vm7, %v1493_v34, %v1042_v17  ;;  %v1968_v28 = vmul.f32 %v8835_v39, %v11415_v29  ;;  %v8838_v37 = vpop.f32.mrf.mxu0 }
 0x227   :  { %955 = vrot.lane.b32.xlu1 %v507_v44, %s10106_s4  ;;  %569 = vrot.lane.b32.xlu0 %v507_v44, %s10104_s17  ;;  %v2037_v43 = vmax.f32 %v2005_v11, 0.0  ;;  %v1970_v57 = vmul.f32 %v8838_v37, %v11415_v29  ;;  %v1396_v37 = vsel %vm1374_vm3, %v10982_v27, %v11327_v18 }
 0x228   :  { %v1812_v61 = vpop.f32.mrf.mxu0 }
 0x229   :  { %v11365_v15 = vpop.permute.xlu1 %837  ;;  %v11367_v45 = vpop.permute.xlu0 %742  ;;  %v1969_v6 = vmul.f32 %v11415_v29, %v1812_v61 }
 0x22a   :  { %v8841_v23 = vpop.f32.mrf.mxu0 }
 0x22b   :  { %1335 = vrot.lane.b32.xlu1 %v691_v7, %s10098_s3  ;;  %1055 = vrot.lane.b32.xlu0 %v691_v7, %s10107_s30  ;;  %v696_v7 = vrot.slane %v353_v19, 2  ;;  %v321_v19 = vsel %vm288_vm0, 0.0, %v254_v13  ;;  %v2007_v59 = vadd.f32 %v11436_v36, %v1969_v6 }
 0x22c   :  { %v894_v16 = vrot.slane %v321_v19, 1 }
 0x22d   :  { %v1229_v31 = vpop.permute.xlu1 %1228  ;;  %v1138_v49 = vpop.permute.xlu0 %1137  ;;  %v11395_v48 = vsel %vm604_vm1, %v695_v12, %v696_v7 }
 0x22e   :  { %v1591_v10 = vsel %vm1570_vm9, %v1558_v33, %v1229_v31  ;;  %v1559_v41 = vsel %vm1537_vm8, %v1526_v40, %v1138_v49  ;;  %v2006_v49 = vadd.f32 %v11436_v36, %v1968_v28  ;;  %v996_v33 = vrot.slane %v321_v19, 2 }
 0x22f   :  { %756 = vrot.lane.b32.xlu1 %v694_v51, %s10103_s14  ;;  %571 = vrot.lane.b32.xlu0 %v510_v62, %s10104_s17  ;;  %v2008_v40 = vadd.f32 %v11436_v36, %v1970_v57  ;;  %v1972_v28 = vmul.f32 %v8841_v23, %v11415_v29 }
 0x230   :  { %v2038_v39 = vmax.f32 %v2006_v49, 0.0 }
 0x231   :  { %v11383_v46 = vpop.permute.xlu1 %941  ;;  %v11385_v30 = vpop.permute.xlu0 %839  ;;  %v2040_v49 = vmax.f32 %v2008_v40, 0.0 }
 0x233   :  { %1151 = vrot.lane.b32.xlu1 %v11337_v56, %s10108_s24  ;;  %1057 = vrot.lane.b32.xlu0 %v694_v51, %s10107_s30 }
 0x235   :  { %v1322_v35 = vpop.permute.xlu1 %1321  ;;  %v1231_v22 = vpop.permute.xlu0 %1230 }
 0x236   :  { %v1624_v21 = vsel %vm1603_vm10, %v1591_v10, %v1322_v35  ;;  %v1592_v14 = vsel %vm1570_vm9, %v1559_v41, %v1231_v22 }
 0x237   :  { %853 = vrot.lane.b32.xlu1 %v11358_v42, %s10105_s7  ;;  %758 = vrot.lane.b32.xlu0 %v11395_v48, %s10103_s14 }
 0x238   :  { %8863 = vmatprep.mubr.msk.f32.mxu0 %vm1636_vm11, %v1624_v21  ;;  %v2069_v21 = vmax.f32 %v2037_v43, %v2038_v39 }
 0x239   :  { %v11419_v63 = vpop.permute.xlu1 %943  ;;  %v11421_v58 = vpop.permute.xlu0 %557 }
 0x23a   :  { %v2112_v53 = vrot.slane %v2069_v21, 7 }
 0x23b   :  { %1244 = vrot.lane.b32.xlu1 %v507_v44, %s10109_s2  ;;  %1153 = vrot.lane.b32.xlu0 %v11358_v42, %s10108_s24  ;;  %v354_v44 = vsel %vm288_vm0, %v254_v13, 0.0 }
 0x23c   :  { %v895_v4 = vrot.slane %v354_v44, 1  ;;  %v997_v35 = vrot.slane %v354_v44, 2  ;;  %v2039_v44 = vmax.f32 %v2007_v59, 0.0 }
 0x23d   :  { %v1324_v52 = vpop.permute.xlu1 %1323  ;;  %v1044_v17 = vpop.permute.xlu0 %1043 }
 0x23e   :  { %v1625_v31 = vsel %vm1603_vm10, %v1592_v14, %v1324_v52  ;;  %v896_v10 = vsel %vm417_vm2, %v894_v16, %v895_v4  ;;  %v11473_v52 = vsel %vm288_vm0, 0.0, %v2112_v53  ;;  %v2010_v16 = vadd.f32 %v11436_v36, %v1972_v28 }
 0x23f   :  { %957 = vrot.lane.b32.xlu1 %v510_v62, %s10106_s4  ;;  %855 = vrot.lane.b32.xlu0 %v321_v19, %s10105_s7  ;;  %v2204_v18 = vrot.slane %v11473_v52, 1  ;;  %v2070_v39 = vmax.f32 %v2039_v44, %v2040_v49  ;;  %s10110_s7 = smov 16  }
 0x240   :  { %8864 = vmatmul.mubr.msk.f32.gmra.mxu0 %vm1636_vm11, %v1625_v31  ;;  %v1428_v31 = vsel %vm1406_vm4, %v1396_v37, %v11350_v5 }
 0x241   :  { %v11446_v12 = vpop.permute.xlu1 %744  ;;  %v11448_v7 = vpop.permute.xlu0 %559  ;;  %v1461_v4 = vsel %vm1438_vm5, %v1428_v31, %v11365_v15 }
 0x242   :  { %v1494_v27 = vsel %vm1471_vm6, %v1461_v4, %v11383_v46 }
 0x243   :  { %1337 = vrot.lane.b32.xlu1 %v694_v51, %s10098_s3  ;;  %1246 = vrot.lane.b32.xlu0 %v510_v62, %s10109_s2  ;;  %v1822_v51 = vpop.f32.mrf.mxu0  ;;  %v998_v62 = vsel %vm604_vm1, %v996_v33, %v997_v35  ;;  %v1527_v5 = vsel %vm1504_vm7, %v1494_v27, %v1044_v17  ;;  %v2042_v33 = vmax.f32 %v2010_v16, 0.0  ;;  %v2113_v17 = vrot.slane %v2070_v39, 7 }
 0x244   :  { %v1971_v34 = vmul.f32 %v11415_v29, %v1822_v51  ;;  %v2291_v51 = vrot.slane %v11473_v52, 2 }
 0x245   :  { %v1140_v22 = vpop.permute.xlu1 %1139  ;;  %v11453_v60 = vpop.permute.xlu0 %1045  ;;  %v2161_v28 = vsel %vm288_vm0, %v2113_v17, 0.0 }
 0x246   :  { %v2009_v11 = vadd.f32 %v11436_v36, %v1971_v34  ;;  %v1560_v15 = vsel %vm1537_vm8, %v1527_v5, %v1140_v22  ;;  %v8844_v44 = vpop.f32.mrf.mxu0  ;;  %v2208_v49 = vrot.slane %v2161_v28, 1 }
 0x247   :  { %1059 = vrot.lane.b32.xlu1 %v11395_v48, %s10107_s30  ;;  %959 = vrot.lane.b32.xlu0 %v896_v10, %s10106_s4  ;;  %s10111_s4 = smov 24  }
 0x248   :  { %v2041_v23 = vmax.f32 %v2009_v11, 0.0  ;;  %v1832_v4 = vpop.f32.mrf.mxu0 }
 0x249   :  { %v11461_v3 = vpop.permute.xlu1 %841  ;;  %v11463_v13 = vpop.permute.xlu0 %746 }
 0x24b   :  { %1061 = vrot.lane.b32.xlu1 %v998_v62, %s10107_s30  ;;  %1339 = vrot.lane.b32.xlu0 %v11395_v48, %s10098_s3  ;;  %v2160_v48 = vsel %vm288_vm0, %v2112_v53, 0.0  ;;  %v2071_v53 = vmax.f32 %v2041_v23, %v2042_v33  ;;  %s10112_s30 = smov 32   ;;  %v8847_v33 = vpop.f32.mrf.mxu0 }
 0x24c   :  { %v2292_v57 = vrot.slane %v2160_v48, 2 }
 0x24d   :  { %v1233_v41 = vpop.permute.xlu1 %1232  ;;  %v1142_v14 = vpop.permute.xlu0 %1141 }
 0x24f   :  { %1248 = vrot.lane.b32.xlu1 %v896_v10, %s10109_s2  ;;  %1155 = vrot.lane.b32.xlu0 %v321_v19, %s10108_s24  ;;  %v2205_v19 = vrot.slane %v2160_v48, 1  ;;  %v1593_v10 = vsel %vm1570_vm9, %v1560_v15, %v1233_v41  ;;  %v2114_v41 = vrot.slane %v2071_v53, 7  ;;  %v1974_v15 = vmul.f32 %v8844_v44, %v11415_v29  ;;  %s10113_s24 = smov 40  }
 0x251   :  { %v11487_v43 = vpop.permute.xlu1 %945  ;;  %v11489_v61 = vpop.permute.xlu0 %843  ;;  %v2206_v6 = vsel %vm417_vm2, %v2204_v18, %v2205_v19  ;;  %v11537_v16 = vsel %vm288_vm0, 0.0, %v2114_v41  ;;  %v1973_v19 = vmul.f32 %v11415_v29, %v1832_v4  ;;  %v1398_v4 = vsel %vm1374_vm3, %v11068_v32, %v11421_v58  ;;  %v2090_v58 = vld [vmem:[%s14058_s26 + $0x28] sm:$0xff] }
 0x252   :  { %v2210_v23 = vrot.slane %v11537_v16, 1 }
 0x253   :  { %2246 = vrot.lane.b32.xlu1 %v10280_v9, %s10098_s3  ;;  %1341 = vrot.lane.b32.xlu0 %v998_v62, %s10098_s3  ;;  %v1397_v62 = vsel %vm1374_vm3, %v11013_v1, %v11352_v47  ;;  %v2293_v47 = vsel %vm604_vm1, %v2291_v51, %v2292_v57  ;;  %v2295_v51 = vrot.slane %v2161_v28, 2  ;;  %v2012_v57 = vadd.f32 %v11436_v36, %v1974_v15 }
 0x254   :  { %v1429_v22 = vsel %vm1406_vm4, %v1397_v62, %v11367_v45 }
 0x255   :  { %v1326_v35 = vpop.permute.xlu1 %1325  ;;  %v1235_v21 = vpop.permute.xlu0 %1234  ;;  %v1462_v59 = vsel %vm1438_vm5, %v1429_v22, %v11385_v30  ;;  %v11528_v30 = vsel %vm288_vm0, 0.0, %v2113_v17  ;;  %v2044_v44 = vmax.f32 %v2012_v57, 0.0 }
 0x256   :  { %v1626_v46 = vsel %vm1603_vm10, %v1593_v10, %v1326_v35  ;;  %v1495_v1 = vsel %vm1471_vm6, %v1462_v59, %v11419_v63  ;;  %v1842_v17 = vpop.f32.mrf.mxu0 }
 0x257   :  { %2333 = vrot.lane.b32.xlu1 %v10277_v8, %s10110_s7  ;;  %2248 = vrot.lane.b32.xlu0 %v2206_v6, %s10098_s3  ;;  %v1528_v45 = vsel %vm1504_vm7, %v1495_v1, %v11453_v60  ;;  %v2207_v60 = vrot.slane %v11528_v30, 1  ;;  %v2297_v1 = vrot.slane %v11537_v16, 2 }
 0x258   :  { %8866 = vmatprep.mubr.msk.f32.mxu0 %vm1636_vm11, %v1626_v46  ;;  %v1561_v63 = vsel %vm1537_vm8, %v1528_v45, %v1142_v14  ;;  %v2162_v14 = vsel %vm288_vm0, %v2114_v41, 0.0  ;;  %v2093_v41 = vld [vmem:[%s14058_s26 + $0x40] sm:$0xff]  ;;  %v2092_v45 = vld [vmem:[%s14058_s26 + $0x38] sm:$0xff] }
 0x259   :  { %v11514_v34 = vpop.permute.xlu1 %947  ;;  %v11516_v40 = vpop.permute.xlu0 %561  ;;  %v1594_v11 = vsel %vm1570_vm9, %v1561_v63, %v1235_v21  ;;  %v11550_v39 = vsel %vm417_vm2, %v2207_v60, %v2208_v49  ;;  %v2211_v5 = vrot.slane %v2162_v14, 1  ;;  %v2011_v21 = vadd.f32 %v11436_v36, %v1973_v19  ;;  %8881 = vmatprep.subr.mxu1 %v2093_v41  ;;  %v2091_v49 = vld [vmem:[%s14058_s26 + $0x30] sm:$0xff] }
 0x25a   :  { %v2298_v28 = vrot.slane %v2162_v14, 2  ;;  %v1976_v63 = vmul.f32 %v8847_v33, %v11415_v29  ;;  %8882 = vmatpush3.msra.mxu1 %v2093_v41  ;;  %v1430_v19 = vsel %vm1406_vm4, %v1398_v4, %v11446_v12 }
 0x25b   :  { %2380 = vrot.lane.b32.xlu1 %v11473_v52, %s10111_s4  ;;  %2335 = vrot.lane.b32.xlu0 %v2293_v47, %s10110_s7  ;;  %v11562_v46 = vsel %vm417_vm2, %v2210_v23, %v2211_v5  ;;  %v2043_v22 = vmax.f32 %v2011_v21, 0.0  ;;  %v1463_v5 = vsel %vm1438_vm5, %v1430_v19, %v11461_v3  ;;  %v2089_v3 = vld [vmem:[%s14058_s26 + $0x20] sm:$0xff] }
 0x25c   :  { %v11592_v60 = vsel %vm604_vm1, %v2297_v1, %v2298_v28  ;;  %8883 = vmatprep.subr.mxu1 %v2092_v45  ;;  %v2014_v23 = vadd.f32 %v11436_v36, %v1976_v63  ;;  %v1496_v21 = vsel %vm1471_vm6, %v1463_v5, %v11487_v43  ;;  %v2088_v28 = vld [vmem:[%s14058_s26 + $0x18] sm:$0xff] }
 0x25d   :  { %v1328_v37 = vpop.permute.xlu1 %1327  ;;  %v11532_v48 = vpop.permute.xlu0 %1047  ;;  %8884 = vmatpush3.msra.mxu1 %v2092_v45 }
 0x25e   :  { %v1627_v31 = vsel %vm1603_vm10, %v1594_v11, %v1328_v37  ;;  %8885 = vmatprep.subr.mxu1 %v2091_v49  ;;  %v2046_v57 = vmax.f32 %v2014_v23, 0.0 }
 0x25f   :  { %2436 = vrot.lane.b32.xlu1 %v2206_v6, %s10112_s30  ;;  %2382 = vrot.lane.b32.xlu0 %v11528_v30, %s10111_s4  ;;  %v2294_v6 = vrot.slane %v11528_v30, 2 }
 0x260   :  { %8867 = vmatmul.mubr.msk.f32.gmra.mxu0 %vm1636_vm11, %v1627_v31  ;;  %v2072_v31 = vmax.f32 %v2043_v22, %v2044_v44  ;;  %8886 = vmatpush3.msra.mxu1 %v2091_v49 }
 0x261   :  { %v11544_v27 = vpop.permute.xlu1 %748  ;;  %v11546_v18 = vpop.permute.xlu0 %563  ;;  %v11574_v59 = vsel %vm604_vm1, %v2294_v6, %v2295_v51  ;;  %v1529_v6 = vsel %vm1504_vm7, %v1496_v21, %v11532_v48  ;;  %8887 = vmatprep.subr.mxu1 %v2090_v58 }
 0x262   :  { %v2115_v33 = vrot.slane %v2072_v31, 7  ;;  %8888 = vmatpush3.msra.mxu1 %v2090_v58 }
 0x263   :  { %2438 = vrot.lane.b32.xlu1 %v11550_v39, %s10112_s30  ;;  %2250 = vrot.lane.b32.xlu0 %v11550_v39, %s10098_s3 }
 0x264   :  { %v11632_v1 = vsel %vm288_vm0, 0.0, %v2115_v33  ;;  %8889 = vmatprep.subr.mxu1 %v2089_v3  ;;  %v8850_v49 = vpop.f32.mrf.mxu0 }
 0x265   :  { %v1144_v10 = vpop.permute.xlu1 %1143  ;;  %v11558_v35 = vpop.permute.xlu0 %1049  ;;  %8890 = vmatpush3.msra.mxu1 %v2089_v3 }
 0x266   :  { %v1562_v51 = vsel %vm1537_vm8, %v1529_v6, %v1144_v10  ;;  %v1399_v10 = vsel %vm1374_vm3, %v11095_v26, %v11448_v7  ;;  %8891 = vmatprep.subr.mxu1 %v2088_v28 }
 0x267   :  { %2252 = vrot.lane.b32.xlu1 %v11562_v46, %s10098_s3  ;;  %2490 = vrot.lane.b32.xlu0 %v2293_v47, %s10113_s24  ;;  %v1975_v47 = vmul.f32 %v11415_v29, %v1842_v17  ;;  %v1431_v44 = vsel %vm1406_vm4, %v1399_v10, %v11463_v13  ;;  %v2213_v13 = vrot.slane %v11632_v1, 1 }
 0x268   :  { %v1464_v26 = vsel %vm1438_vm5, %v1431_v44, %v11489_v61  ;;  %8892 = vmatpush3.msra.mxu1 %v2088_v28  ;;  %v2300_v28 = vrot.slane %v11632_v1, 2 }
 0x269   :  { %v11569_v53 = vpop.permute.xlu1 %845  ;;  %v11571_v62 = vpop.permute.xlu0 %750  ;;  %v2013_v14 = vadd.f32 %v11436_v36, %v1975_v47  ;;  %v11645_v47 = vsel %vm288_vm0, %v2115_v33, 0.0  ;;  %v1497_v63 = vsel %vm1471_vm6, %v1464_v26, %v11514_v34  ;;  %v2086_v34 = vld [vmem:[%s14058_s26 + $0x8] sm:$0xff] }
 0x26a   :  { %v1530_v61 = vsel %vm1504_vm7, %v1497_v63, %v11558_v35  ;;  %v2301_v10 = vrot.slane %v11645_v47, 2 }
 0x26b   :  { %2492 = vrot.lane.b32.xlu1 %v11574_v59, %s10113_s24  ;;  %2337 = vrot.lane.b32.xlu0 %v11574_v59, %s10110_s7  ;;  %v2045_v12 = vmax.f32 %v2013_v14, 0.0 }
 0x26d   :  { %v1237_v11 = vpop.permute.xlu1 %1236  ;;  %v11589_v37 = vpop.permute.xlu0 %1145  ;;  %v2073_v41 = vmax.f32 %v2045_v12, %v2046_v57 }
 0x26e   :  { %v1595_v43 = vsel %vm1570_vm9, %v1562_v51, %v1237_v11  ;;  %v2214_v11 = vrot.slane %v11645_v47, 1  ;;  %v1563_v4 = vsel %vm1537_vm8, %v1530_v61, %v11589_v37  ;;  %v1852_v37 = vpop.f32.mrf.mxu0 }
 0x26f   :  { %2339 = vrot.lane.b32.xlu1 %v11592_v60, %s10110_s7  ;;  %2538 = vrot.lane.b32.xlu0 %v11528_v30, %s10114_s27  ;;  %v2116_v31 = vrot.slane %v2073_v41, 7  ;;  %v1977_v6 = vmul.f32 %v11415_v29, %v1852_v37 }
 0x270   :  { %v11677_v5 = vsel %vm417_vm2, %v2213_v13, %v2214_v11  ;;  %v2302_v13 = vsel %vm604_vm1, %v2300_v28, %v2301_v10 }
 0x271   :  { %v11610_v15 = vpop.permute.xlu1 %949  ;;  %v11612_v32 = vpop.permute.xlu0 %847  ;;  %v11683_v58 = vsel %vm288_vm0, 0.0, %v2116_v31  ;;  %v2164_v33 = vsel %vm288_vm0, %v2116_v31, 0.0 }
 0x272   :  { %v2216_v3 = vrot.slane %v11683_v58, 1  ;;  %v2217_v51 = vrot.slane %v2164_v33, 1  ;;  %v2303_v11 = vrot.slane %v11683_v58, 2  ;;  %v2304_v31 = vrot.slane %v2164_v33, 2 }
 0x273   :  { %2540 = vrot.lane.b32.xlu1 %v11537_v16, %s10114_s27  ;;  %2384 = vrot.lane.b32.xlu0 %v11537_v16, %s10111_s4 }
 0x275   :  { %v1330_v17 = vpop.permute.xlu1 %1329  ;;  %v1239_v22 = vpop.permute.xlu0 %1238 }
 0x276   :  { %v1628_v48 = vsel %vm1603_vm10, %v1595_v43, %v1330_v17  ;;  %v1596_v14 = vsel %vm1570_vm9, %v1563_v4, %v1239_v22  ;;  %v2015_v22 = vadd.f32 %v11436_v36, %v1977_v6 }
 0x277   :  { %2386 = vrot.lane.b32.xlu1 %v11632_v1, %s10111_s4  ;;  %2583 = vrot.lane.b32.xlu0 %v11550_v39, %s10115_s0  ;;  %v2087_v39 = vld [vmem:[%s14058_s26 + $0x10] sm:$0xff] }
 0x278   :  { %8869 = vmatprep.mubr.msk.f32.mxu0 %vm1636_vm11, %v1628_v48  ;;  %8893 = vmatprep.subr.mxu1 %v2087_v39  ;;  %v2218_v48 = vsel %vm417_vm2, %v2216_v3, %v2217_v51  ;;  %v2047_v63 = vmax.f32 %v2015_v22, 0.0 }
 0x279   :  { %v11652_v7 = vpop.permute.xlu1 %951  ;;  %v11654_v45 = vpop.permute.xlu0 %565  ;;  %8894 = vmatpush3.msra.mxu1 %v2087_v39 }
 0x27a   :  { %8895 = vmatprep.subr.mxu1 %v2086_v34 }
 0x27b   :  { %2585 = vrot.lane.b32.xlu1 %v11562_v46, %s10115_s0  ;;  %2440 = vrot.lane.b32.xlu0 %v11562_v46, %s10112_s30  ;;  %v2085_v46 = vld [vmem:[%s14058_s26] sm:$0xff] }
 0x27c   :  { %8896 = vmatpush3.msra.mxu1 %v2086_v34 }
 0x27d   :  { %v1332_v19 = vpop.permute.xlu1 %1331  ;;  %v1052_v23 = vpop.permute.xlu0 %1051  ;;  %8897 = vmatprep.subr.mxu1 %v2085_v46 }
 0x27e   :  { %v1629_v35 = vsel %vm1603_vm10, %v1596_v14, %v1332_v19  ;;  %8898 = vmatpush3.msra.mxu1 %v2085_v46  ;;  %v11721_v14 = vsel %vm604_vm1, %v2303_v11, %v2304_v31  ;;  %v1400_v19 = vsel %vm1374_vm3, %v11165_v55, %v11516_v40 }
 0x27f   :  { %2254 = vrot.lane.b32.xlu1 %v11677_v5, %s10098_s3  ;;  %2628 = vrot.lane.b32.xlu0 %v11574_v59, %s10116_s1  ;;  %v1978_v59 = vmul.f32 %v8850_v49, %v11415_v29  ;;  %v1432_v46 = vsel %vm1406_vm4, %v1400_v19, %v11544_v27 }
 0x280   :  { %8870 = vmatmul.mubr.msk.f32.gmra.mxu0 %vm1636_vm11, %v1629_v35  ;;  %v1465_v37 = vsel %vm1438_vm5, %v1432_v46, %v11569_v53 }
 0x281   :  { %v11691_v21 = vpop.permute.xlu1 %752  ;;  %v11693_v12 = vpop.permute.xlu0 %567  ;;  %v2016_v41 = vadd.f32 %v11436_v36, %v1978_v59  ;;  %v1498_v40 = vsel %vm1471_vm6, %v1465_v37, %v11610_v15 }
 0x282   :  { %v1531_v51 = vsel %vm1504_vm7, %v1498_v40, %v1052_v23  ;;  %v1401_v23 = vsel %vm1374_vm3, %v11190_v38, %v11546_v18 }
 0x283   :  { %2494 = vrot.lane.b32.xlu1 %v11592_v60, %s10113_s24  ;;  %2442 = vrot.lane.b32.xlu0 %v11677_v5, %s10112_s30 }
 0x284   :  { %v8853_v57 = vpop.f32.mrf.mxu0 }
 0x285   :  { %v1148_v43 = vpop.permute.xlu1 %1147  ;;  %v1054_v17 = vpop.permute.xlu0 %1053  ;;  %v1980_v49 = vmul.f32 %v8853_v57, %v11415_v29 }
 0x286   :  { %v1862_v44 = vpop.f32.mrf.mxu0  ;;  %v1564_v27 = vsel %vm1537_vm8, %v1531_v51, %v1148_v43 }
 0x287   :  { %2256 = vrot.lane.b32.xlu1 %v2218_v48, %s10098_s3  ;;  %2630 = vrot.lane.b32.xlu0 %v11592_v60, %s10116_s1  ;;  %v1979_v47 = vmul.f32 %v11415_v29, %v1862_v44  ;;  %v2048_v60 = vmax.f32 %v2016_v41, 0.0  ;;  %v2018_v33 = vadd.f32 %v11436_v36, %v1980_v49  ;;  %v1433_v44 = vsel %vm1406_vm4, %v1401_v23, %v11571_v62 }
 0x289   :  { %v11710_v26 = vpop.permute.xlu1 %849  ;;  %v11712_v39 = vpop.permute.xlu0 %754  ;;  %v2074_v4 = vmax.f32 %v2047_v63, %v2048_v60  ;;  %v2017_v35 = vadd.f32 %v11436_v36, %v1979_v47  ;;  %v2050_v53 = vmax.f32 %v2018_v33, 0.0  ;;  %v1466_v63 = vsel %vm1438_vm5, %v1433_v44, %v11612_v32 }
 0x28a   :  { %v1499_v18 = vsel %vm1471_vm6, %v1466_v63, %v11652_v7 }
 0x28b   :  { %2496 = vrot.lane.b32.xlu1 %v2302_v13, %s10113_s24  ;;  %2341 = vrot.lane.b32.xlu0 %v2302_v13, %s10110_s7  ;;  %v2117_v55 = vrot.slane %v2074_v4, 7  ;;  %v2049_v59 = vmax.f32 %v2017_v35, 0.0  ;;  %v1532_v60 = vsel %vm1504_vm7, %v1499_v18, %v1054_v17 }
 0x28d   :  { %v1241_v61 = vpop.permute.xlu1 %1240  ;;  %v1150_v34 = vpop.permute.xlu0 %1149  ;;  %v11751_v15 = vsel %vm288_vm0, 0.0, %v2117_v55  ;;  %v2075_v41 = vmax.f32 %v2049_v59, %v2050_v53  ;;  %v2165_v43 = vsel %vm288_vm0, %v2117_v55, 0.0 }
 0x28e   :  { %v1597_v57 = vsel %vm1570_vm9, %v1564_v27, %v1241_v61  ;;  %v2219_v31 = vrot.slane %v11751_v15, 1  ;;  %v1565_v62 = vsel %vm1537_vm8, %v1532_v60, %v1150_v34  ;;  %v2306_v53 = vrot.slane %v11751_v15, 2 }
 0x28f   :  { %2343 = vrot.lane.b32.xlu1 %v11721_v14, %s10110_s7  ;;  %2542 = vrot.lane.b32.xlu0 %v11632_v1, %s10114_s27  ;;  %v2118_v47 = vrot.slane %v2075_v41, 7 }
 0x291   :  { %v11736_v6 = vpop.permute.xlu1 %953  ;;  %v11738_v3 = vpop.permute.xlu0 %851  ;;  %v11781_v19 = vsel %vm288_vm0, 0.0, %v2118_v47  ;;  %v2166_v17 = vsel %vm288_vm0, %v2118_v47, 0.0  ;;  %v1402_v47 = vsel %vm1374_vm3, %v11251_v25, %v11654_v45 }
 0x292   :  { %v2222_v37 = vrot.slane %v11781_v19, 1  ;;  %v2223_v33 = vrot.slane %v2166_v17, 1  ;;  %v2309_v44 = vrot.slane %v11781_v19, 2  ;;  %v2310_v63 = vrot.slane %v2166_v17, 2 }
 0x293   :  { %2544 = vrot.lane.b32.xlu1 %v11683_v58, %s10114_s27  ;;  %2388 = vrot.lane.b32.xlu0 %v11683_v58, %s10111_s4  ;;  %v1434_v60 = vsel %vm1406_vm4, %v1402_v47, %v11691_v21 }
 0x294   :  { %v2224_v27 = vsel %vm417_vm2, %v2222_v37, %v2223_v33 }
 0x295   :  { %v1334_v22 = vpop.permute.xlu1 %1333  ;;  %v1243_v28 = vpop.permute.xlu0 %1242 }
 0x296   :  { %v1630_v10 = vsel %vm1603_vm10, %v1597_v57, %v1334_v22  ;;  %v1598_v32 = vsel %vm1570_vm9, %v1565_v62, %v1243_v28  ;;  %v2307_v57 = vrot.slane %v2165_v43, 2  ;;  %v1467_v62 = vsel %vm1438_vm5, %v1434_v60, %v11710_v26 }
 0x297   :  { %2390 = vrot.lane.b32.xlu1 %v11751_v15, %s10111_s4  ;;  %2587 = vrot.lane.b32.xlu0 %v11677_v5, %s10115_s0  ;;  %v2220_v5 = vrot.slane %v2165_v43, 1 }
 0x298   :  { %8872 = vmatprep.mubr.msk.f32.mxu0 %vm1636_vm11, %v1630_v10  ;;  %v2308_v41 = vsel %vm604_vm1, %v2306_v53, %v2307_v57 }
 0x299   :  { %v11766_v11 = vpop.permute.xlu1 %955  ;;  %v11768_v38 = vpop.permute.xlu0 %569  ;;  %v2221_v7 = vsel %vm417_vm2, %v2219_v31, %v2220_v5 }
 0x29b   :  { %2589 = vrot.lane.b32.xlu1 %v2218_v48, %s10115_s0  ;;  %2444 = vrot.lane.b32.xlu0 %v2218_v48, %s10112_s30 }
 0x29d   :  { %v1336_v49 = vpop.permute.xlu1 %1335  ;;  %v1056_v61 = vpop.permute.xlu0 %1055 }
 0x29e   :  { %v1631_v4 = vsel %vm1603_vm10, %v1598_v32, %v1336_v49 }
 0x29f   :  { %2258 = vrot.lane.b32.xlu1 %v2221_v7, %s10098_s3  ;;  %2632 = vrot.lane.b32.xlu0 %v2302_v13, %s10116_s1 }
 0x2a0   :  { %v8856_v48 = vpop.f32.mrf.mxu0  ;;  %8873 = vmatmul.mubr.msk.f32.gmra.mxu0 %vm1636_vm11, %v1631_v4  ;;  %v1500_v4 = vsel %vm1471_vm6, %v1467_v62, %v11736_v6  ;;  %v1403_v6 = vsel %vm1374_vm3, %v11272_v50, %v11693_v12 }
 0x2a1   :  { %v11787_v34 = vpop.permute.xlu1 %756  ;;  %v572_v35 = vpop.permute.xlu0 %571  ;;  %v1982_v13 = vmul.f32 %v8856_v48, %v11415_v29  ;;  %v1533_v25 = vsel %vm1504_vm7, %v1500_v4, %v1056_v61  ;;  %v1435_v33 = vsel %vm1406_vm4, %v1403_v6, %v11712_v39 }
 0x2a2   :  { %v1872_v46 = vpop.f32.mrf.mxu0  ;;  %v1405_v12 = vsel %vm1374_vm3, %v11358_v42, %v572_v35 }
 0x2a3   :  { %v1981_v55 = vmul.f32 %v11415_v29, %v1872_v46  ;;  %2498 = vrot.lane.b32.xlu1 %v11721_v14, %s10113_s24  ;;  %2446 = vrot.lane.b32.xlu0 %v2221_v7, %s10112_s30  ;;  %v2020_v22 = vadd.f32 %v11436_v36, %v1982_v13 }
 0x2a5   :  { %v1152_v40 = vpop.permute.xlu1 %1151  ;;  %v1058_v51 = vpop.permute.xlu0 %1057  ;;  %v2019_v59 = vadd.f32 %v11436_v36, %v1981_v55  ;;  %v2052_v43 = vmax.f32 %v2020_v22, 0.0  ;;  %v1468_v55 = vsel %vm1438_vm5, %v1435_v33, %v11738_v3 }
 0x2a6   :  { %v1566_v45 = vsel %vm1537_vm8, %v1533_v25, %v1152_v40  ;;  %v1501_v50 = vsel %vm1471_vm6, %v1468_v55, %v11766_v11  ;;  %v1404_v11 = vsel %vm1374_vm3, %v11337_v56, %v11768_v38  ;;  %vm2755_vm3 = vcmask 392192  }
 0x2a7   :  { %2260 = vrot.lane.b32.xlu1 %v2224_v27, %s10098_s3  ;;  %2634 = vrot.lane.b32.xlu0 %v11721_v14, %s10116_s1  ;;  %v2051_v23 = vmax.f32 %v2019_v59, 0.0  ;;  %v11807_v14 = vsel %vm604_vm1, %v2309_v44, %v2310_v63 }
 0x2a9   :  { %v854_v28 = vpop.permute.xlu1 %853  ;;  %v759_v10 = vpop.permute.xlu0 %758  ;;  %v2076_v5 = vmax.f32 %v2051_v23, %v2052_v43 }
 0x2aa   :  { %v1437_v39 = vsel %vm1406_vm4, %v1405_v12, %v759_v10  ;;  %v1436_v10 = vsel %vm1406_vm4, %v1404_v11, %v11787_v34  ;;  %vm2772_vm4 = vcmask 457728  }
 0x2ab   :  { %2500 = vrot.lane.b32.xlu1 %v2308_v41, %s10113_s24  ;;  %2345 = vrot.lane.b32.xlu0 %v2308_v41, %s10110_s7  ;;  %v2119_v17 = vrot.slane %v2076_v5, 7  ;;  %v1469_v63 = vsel %vm1438_vm5, %v1436_v10, %v854_v28 }
 0x2ad   :  { %v1245_v18 = vpop.permute.xlu1 %1244  ;;  %v1154_v31 = vpop.permute.xlu0 %1153  ;;  %v11831_v37 = vsel %vm288_vm0, 0.0, %v2119_v17  ;;  %v2167_v61 = vsel %vm288_vm0, %v2119_v17, 0.0 }
 0x2ae   :  { %v1599_v21 = vsel %vm1570_vm9, %v1566_v45, %v1245_v18  ;;  %v2430_v59 = vrot.slane %v11831_v37, 1  ;;  %v2431_v53 = vrot.slane %v2167_v61, 1  ;;  %v2484_v28 = vrot.slane %v11831_v37, 2 }
 0x2af   :  { %2347 = vrot.lane.b32.xlu1 %v11807_v14, %s10110_s7  ;;  %2546 = vrot.lane.b32.xlu0 %v11751_v15, %s10114_s27 }
 0x2b0   :  { %v2432_v44 = vsel %vm417_vm2, %v2430_v59, %v2431_v53 }
 0x2b1   :  { %v958_v32 = vpop.permute.xlu1 %957  ;;  %v856_v49 = vpop.permute.xlu0 %855 }
 0x2b2   :  { %v1470_v57 = vsel %vm1438_vm5, %v1437_v39, %v856_v49  ;;  %v1502_v56 = vsel %vm1471_vm6, %v1469_v63, %v958_v32  ;;  %vm2789_vm5 = vcmask 523264  }
 0x2b3   :  { %2548 = vrot.lane.b32.xlu1 %v11781_v19, %s10114_s27  ;;  %2392 = vrot.lane.b32.xlu0 %v11781_v19, %s10111_s4 }
 0x2b5   :  { %v1338_v48 = vpop.permute.xlu1 %1337  ;;  %v1247_v26 = vpop.permute.xlu0 %1246 }
 0x2b6   :  { %v1632_v46 = vsel %vm1603_vm10, %v1599_v21, %v1338_v48 }
 0x2b7   :  { %2394 = vrot.lane.b32.xlu1 %v11831_v37, %s10111_s4  ;;  %2591 = vrot.lane.b32.xlu0 %v2221_v7, %s10115_s0  ;;  %v1534_v7 = vsel %vm1504_vm7, %v1501_v50, %v1058_v51 }
 0x2b8   :  { %8875 = vmatprep.mubr.msk.f32.mxu0 %vm1636_vm11, %v1632_v46  ;;  %v1567_v3 = vsel %vm1537_vm8, %v1534_v7, %v1154_v31 }
 0x2b9   :  { %v1060_v13 = vpop.permute.xlu1 %1059  ;;  %v960_v40 = vpop.permute.xlu0 %959  ;;  %v1600_v42 = vsel %vm1570_vm9, %v1567_v3, %v1247_v26 }
 0x2ba   :  { %v1503_v35 = vsel %vm1471_vm6, %v1470_v57, %v960_v40  ;;  %v1535_v43 = vsel %vm1504_vm7, %v1502_v56, %v1060_v13  ;;  %vm2806_vm6 = vcmask 588800  }
 0x2bb   :  { %2593 = vrot.lane.b32.xlu1 %v2224_v27, %s10115_s0  ;;  %2448 = vrot.lane.b32.xlu0 %v2224_v27, %s10112_s30 }
 0x2bd   :  { %v1062_v22 = vpop.permute.xlu1 %1061  ;;  %v1340_v51 = vpop.permute.xlu0 %1339 }
 0x2be   :  { %v1536_v23 = vsel %vm1504_vm7, %v1503_v35, %v1062_v22  ;;  %v1633_v27 = vsel %vm1603_vm10, %v1600_v42, %v1340_v51  ;;  %vm3554_vm7 = vcmask 523527  }
 0x2bf   :  { %2450 = vrot.lane.b32.xlu1 %v2432_v44, %s10112_s30  ;;  %2636 = vrot.lane.b32.xlu0 %v2308_v41, %s10116_s1  ;;  %v1569_v34 = vsel %vm1537_vm8, %v1536_v23, %v11110_v54  ;;  %v2485_v41 = vrot.slane %v2167_v61, 2 }
 0x2c0   :  { %v8859_v38 = vpop.f32.mrf.mxu0  ;;  %8876 = vmatmul.mubr.msk.f32.gmra.mxu0 %vm1636_vm11, %v1633_v27  ;;  %v1602_v54 = vsel %vm1570_vm9, %v1569_v34, %v11135_v20 }
 0x2c1   :  { %v1984_v18 = vmul.f32 %v8859_v38, %v11415_v29  ;;  %v1249_v31 = vpop.permute.xlu1 %1248  ;;  %v1156_v5 = vpop.permute.xlu0 %1155  ;;  %v2486_v21 = vsel %vm604_vm1, %v2484_v28, %v2485_v41 }
 0x2c2   :  { %v1882_v47 = vpop.f32.mrf.mxu0  ;;  %v1568_v60 = vsel %vm1537_vm8, %v1535_v43, %v1156_v5  ;;  %vm3702_vm8 = vcmask 254977  }
 0x2c3   :  { %v2022_v62 = vadd.f32 %v11436_v36, %v1984_v18  ;;  %v1983_v32 = vmul.f32 %v11415_v29, %v1882_v47  ;;  %2638 = vrot.lane.b32.xlu1 %v11807_v14, %s10116_s1  ;;  %2502 = vrot.lane.b32.xlu0 %v11807_v14, %s10113_s24  ;;  %v1601_v17 = vsel %vm1570_vm9, %v1568_v60, %v1249_v31  ;;  %vm3851_vm9 = vcmask 522502  }
 0x2c4   :  { %v1635_v14 = vsel %vm1603_vm10, %v1602_v54, %v11169_v24 }
 0x2c5   :  { %v2021_v49 = vadd.f32 %v11436_v36, %v1983_v32  ;;  %v2247_v4 = vpop.permute.xlu1 %2246  ;;  %v1342_v25 = vpop.permute.xlu0 %1341  ;;  %v2054_v48 = vmax.f32 %v2022_v62, 0.0 }
 0x2c6   :  { %v1634_v45 = vsel %vm1603_vm10, %v1601_v17, %v1342_v25 }
 0x2c7   :  { %v2053_v26 = vmax.f32 %v2021_v49, 0.0  ;;  %2504 = vrot.lane.b32.xlu1 %v2486_v21, %s10113_s24  ;;  %8878 = vmatprep.mubr.msk.f32.mxu0 %vm1636_vm11, %v1634_v45 }
 0x2c8   :  { %8879 = vmatmul.mubr.msk.f32.gmra.mxu0 %vm1636_vm11, %v1635_v14  ;;  %vm14040_vm11 = vcmask 521477  }
 0x2c9   :  { %v2077_v20 = vmax.f32 %v2053_v26, %v2054_v48  ;;  %v2334_v46 = vpop.permute.xlu1 %2333  ;;  %v11894_v6 = vpop.permute.xlu0 %2248 }
 0x2cb   :  { %v2120_v61 = vrot.slane %v2077_v20, 7 }
 0x2cd   :  { %v11897_v33 = vsel %vm288_vm0, 0.0, %v2120_v61  ;;  %v2168_v55 = vsel %vm288_vm0, %v2120_v61, 0.0  ;;  %v2381_v13 = vpop.permute.xlu1 %2380  ;;  %v11900_v40 = vpop.permute.xlu0 %2335 }
 0x2ce   :  { %v2312_v50 = vrot.slane %v11897_v33, 2  ;;  %v2313_v12 = vrot.slane %v2168_v55, 2  ;;  %v2225_v24 = vrot.slane %v11897_v33, 1  ;;  %v2226_v59 = vrot.slane %v2168_v55, 1 }
 0x2d0   :  { %v11905_v53 = vsel %vm604_vm1, %v2312_v50, %v2313_v12  ;;  %v2227_v7 = vsel %vm417_vm2, %v2225_v24, %v2226_v59 }
 0x2d1   :  { %2349 = vrot.lane.b32.xlu1 %v11905_v53, %s10110_s7  ;;  %v2437_v39 = vpop.permute.xlu1 %2436  ;;  %v11910_v3 = vpop.permute.xlu0 %2382  ;;  %2262 = vrot.lane.b32.xlu0 %v2227_v7, %s10098_s3 }
 0x2d5   :  { %2552 = vrot.lane.b32.xlu1 %v10271_v2, %s10114_s27  ;;  %v11915_v57 = vpop.permute.xlu1 %2438  ;;  %v11917_v11 = vpop.permute.xlu0 %2250  ;;  %2550 = vrot.lane.b32.xlu0 %v11831_v37, %s10114_s27 }
 0x2d9   :  { %v11921_v42 = vpop.permute.xlu1 %2252  ;;  %v2491_v35 = vpop.permute.xlu0 %2490  ;;  %2396 = vrot.lane.b32.xlu0 %v11897_v33, %s10111_s4 }
 0x2dd   :  { %v2493_v22 = vpop.permute.xlu1 %2492  ;;  %v11925_v51 = vpop.permute.xlu0 %2337  ;;  %2595 = vrot.lane.b32.xlu0 %v2432_v44, %s10115_s0  ;;  %v2673_v44 = vsel %vm1603_vm10, %v10271_v2, %v2247_v4 }
 0x2de   :  { %v11943_v41 = vsel %vm2688_vm12, %v2673_v44, %v2334_v46  ;;  %v2674_v46 = vsel %vm1603_vm10, %v11473_v52, %v11894_v6 }
 0x2df   :  { %v2690_v61 = vsel %vm2688_vm12, %v2674_v46, %v11900_v40 }
 0x2e0   :  { %v8862_v10 = vpop.f32.mrf.mxu0  ;;  %v2706_v50 = vsel %vm2704_vm13, %v2690_v61, %v11910_v3 }
 0x2e1   :  { %v1986_v23 = vmul.f32 %v8862_v10, %v11415_v29  ;;  %v11929_v27 = vpop.permute.xlu1 %2339  ;;  %v2539_v63 = vpop.permute.xlu0 %2538  ;;  %2452 = vrot.lane.b32.xlu0 %v2227_v7, %s10112_s30  ;;  %v2723_v52 = vsel %vm2721_vm14, %v2706_v50, %v11915_v57 }
 0x2e2   :  { %v1892_v37 = vpop.f32.mrf.mxu0  ;;  %v2740_v6 = vsel %vm2738_vm15, %v2723_v52, %v2493_v22  ;;  %v12008_v22 = vld [vmem:[%s14056_s25] ss:$0 sm:$0xff] }
 0x2e3   :  { %v2024_v56 = vadd.f32 %v11436_v36, %v1986_v23  ;;  %v1985_v38 = vmul.f32 %v11415_v29, %v1892_v37  ;;  %v12016_v37 = vld [vmem:[%s14057_s10] ss:$0 sm:$0xff] }
 0x2e5   :  { %v2023_v43 = vadd.f32 %v11436_v36, %v1985_v38  ;;  %v2541_v34 = vpop.permute.xlu1 %2540  ;;  %v11935_v18 = vpop.permute.xlu0 %2384  ;;  %2640 = vrot.lane.b32.xlu0 %v2486_v21, %s10116_s1  ;;  %v2056_v31 = vmax.f32 %v2024_v56, 0.0  ;;  %v2705_v36 = vsel %vm2704_vm13, %v11943_v41, %v2381_v13 }
 0x2e6   :  { %v2722_v49 = vsel %vm2721_vm14, %v2705_v36, %v2437_v39  ;;  %v2757_v40 = vsel %vm2755_vm3, %v2740_v6, %v2541_v34  ;;  %v2675_v36 = vsel %vm1603_vm10, %v11528_v30, %v11917_v11 }
 0x2e7   :  { %v2055_v5 = vmax.f32 %v2023_v43, 0.0  ;;  %v2739_v25 = vsel %vm2738_vm15, %v2722_v49, %v2491_v35 }
 0x2e8   :  { %v2756_v45 = vsel %vm2755_vm3, %v2739_v25, %v2539_v63 }
 0x2e9   :  { %v2078_v28 = vmax.f32 %v2055_v5, %v2056_v31  ;;  %v11940_v47 = vpop.permute.xlu1 %2386  ;;  %v2584_v60 = vpop.permute.xlu0 %2583 }
 0x2ea   :  { %v2773_v48 = vsel %vm2772_vm4, %v2756_v45, %v2584_v60 }
 0x2eb   :  { %v2121_v29 = vrot.slane %v2078_v28, 7 }
 0x2ed   :  { %v2169_v62 = vsel %vm288_vm0, %v2121_v29, 0.0  ;;  %v2586_v2 = vpop.permute.xlu1 %2585  ;;  %v11949_v32 = vsel %vm288_vm0, 0.0, %v2121_v29  ;;  %v11951_v54 = vpop.permute.xlu0 %2440 }
 0x2ee   :  { %2398 = vrot.lane.b32.xlu1 %v11949_v32, %s10111_s4  ;;  %v2228_v4 = vrot.slane %v11949_v32, 1  ;;  %v2229_v17 = vrot.slane %v2169_v62, 1  ;;  %v2315_v55 = vrot.slane %v11949_v32, 2  ;;  %v2316_v13 = vrot.slane %v2169_v62, 2 }
 0x2ef   :  { %v2774_v59 = vsel %vm2772_vm4, %v2757_v40, %v2586_v2  ;;  %v2691_v2 = vsel %vm2688_vm12, %v2675_v36, %v11925_v51 }
 0x2f0   :  { %v11960_v21 = vsel %vm417_vm2, %v2228_v4, %v2229_v17  ;;  %v11990_v24 = vsel %vm604_vm1, %v2315_v55, %v2316_v13  ;;  %v2707_v49 = vsel %vm2704_vm13, %v2691_v2, %v11935_v18  ;;  %v2676_v55 = vsel %vm1603_vm10, %v11537_v16, %v11921_v42 }
 0x2f1   :  { %2454 = vrot.lane.b32.xlu0 %v11960_v21, %s10112_s30  ;;  %v11965_v26 = vpop.permute.xlu1 %2254  ;;  %v2629_v14 = vpop.permute.xlu0 %2628  ;;  %v2692_v13 = vsel %vm2688_vm12, %v2676_v55, %v11929_v27 }
 0x2f2   :  { %2597 = vrot.lane.b32.xlu1 %v10280_v9, %s10115_s0  ;;  %v2790_v20 = vsel %vm2789_vm5, %v2773_v48, %v2629_v14  ;;  %v2724_v48 = vsel %vm2721_vm14, %v2707_v49, %v11951_v54  ;;  %v2708_v52 = vsel %vm2704_vm13, %v2692_v13, %v11940_v47  ;;  %v2677_v2 = vsel %vm1603_vm10, %v11632_v1, %v11965_v26 }
 0x2f3   :  { %8899 = vmatprep.mubr.msk.f32.mxu1 %vm2806_vm6, %v2790_v20 }
 0x2f5   :  { %2642 = vrot.lane.b32.xlu0 %v10277_v8, %s10116_s1  ;;  %v2495_v9 = vpop.permute.xlu1 %2494  ;;  %v11981_v12 = vpop.permute.xlu0 %2442 }
 0x2f6   :  { %2264 = vrot.lane.b32.xlu1 %v11960_v21, %s10098_s3  ;;  %v2741_v51 = vsel %vm2738_vm15, %v2724_v48, %v2495_v9  ;;  %v2725_v40 = vsel %vm2721_vm14, %v2708_v52, %v11981_v12 }
 0x2f9   :  { %2351 = vrot.lane.b32.xlu0 %v11990_v24, %s10110_s7  ;;  %v11995_v8 = vpop.permute.xlu1 %2256  ;;  %v2631_v7 = vpop.permute.xlu0 %2630 }
 0x2fa   :  { %2506 = vrot.lane.b32.xlu1 %v11905_v53, %s10113_s24  ;;  %v2791_v39 = vsel %vm2789_vm5, %v2774_v59, %v2631_v7 }
 0x2fb   :  { %8900 = vmatmul.mubr.msk.f32.vlgmr.msra.gmra.mxu1 %vm2806_vm6, %v2791_v39 }
 0x2fd   :  { %2554 = vrot.lane.b32.xlu0 %v11949_v32, %s10114_s27  ;;  %v2497_v3 = vpop.permute.xlu1 %2496  ;;  %v12003_v57 = vpop.permute.xlu0 %2341 }
 0x2fe   :  { %v2742_v16 = vsel %vm2738_vm15, %v2725_v40, %v2497_v3 }
 0x300   :  { %v8865_v35 = vpop.f32.mrf.mxu0 }
 0x301   :  { %v1988_v10 = vmul.f32 %v12008_v22, %v8865_v35  ;;  %v12011_v23 = vpop.permute.xlu1 %2343  ;;  %v2543_v53 = vpop.permute.xlu0 %2542 }
 0x302   :  { %v1902_v63 = vpop.f32.mrf.mxu0  ;;  %v2758_v18 = vsel %vm2755_vm3, %v2741_v51, %v2543_v53 }
 0x303   :  { %v2026_v56 = vadd.f32 %v12016_v37, %v1988_v10  ;;  %v1987_v38 = vmul.f32 %v12008_v22, %v1902_v63 }
 0x305   :  { %v2025_v43 = vadd.f32 %v12016_v37, %v1987_v38  ;;  %v2545_v34 = vpop.permute.xlu1 %2544  ;;  %v12021_v44 = vpop.permute.xlu0 %2388  ;;  %v2058_v31 = vmax.f32 %v2026_v56, 0.0 }
 0x306   :  { %v2759_v42 = vsel %vm2755_vm3, %v2742_v16, %v2545_v34 }
 0x307   :  { %v2057_v5 = vmax.f32 %v2025_v43, 0.0 }
 0x309   :  { %v2079_v28 = vmax.f32 %v2057_v5, %v2058_v31  ;;  %v12023_v60 = vpop.permute.xlu1 %2390  ;;  %v2588_v29 = vpop.permute.xlu0 %2587 }
 0x30a   :  { %v2775_v20 = vsel %vm2772_vm4, %v2758_v18, %v2588_v29 }
 0x30b   :  { %v2122_v62 = vrot.slane %v2079_v28, 7 }
 0x30d   :  { %v2590_v4 = vpop.permute.xlu1 %2589  ;;  %v12033_v17 = vsel %vm288_vm0, 0.0, %v2122_v62  ;;  %v12035_v25 = vpop.permute.xlu0 %2444  ;;  %v2170_v45 = vsel %vm288_vm0, %v2122_v62, 0.0 }
 0x30e   :  { %2400 = vrot.lane.b32.xlu0 %v12033_v17, %s10111_s4  ;;  %v2231_v30 = vrot.slane %v12033_v17, 1  ;;  %v2232_v11 = vrot.slane %v2170_v45, 1  ;;  %v2318_v50 = vrot.slane %v12033_v17, 2  ;;  %v2319_v9 = vrot.slane %v2170_v45, 2 }
 0x30f   :  { %v2776_v47 = vsel %vm2772_vm4, %v2759_v42, %v2590_v4  ;;  %v2693_v4 = vsel %vm2688_vm12, %v2677_v2, %v12003_v57  ;;  %v2678_v57 = vsel %vm1603_vm10, %v11683_v58, %v11995_v8 }
 0x310   :  { %v12046_v14 = vsel %vm417_vm2, %v2231_v30, %v2232_v11  ;;  %v12074_v27 = vsel %vm604_vm1, %v2318_v50, %v2319_v9  ;;  %v2709_v45 = vsel %vm2704_vm13, %v2693_v4, %v12021_v44 }
 0x311   :  { %2266 = vrot.lane.b32.xlu1 %v12046_v14, %s10098_s3  ;;  %v12051_v46 = vpop.permute.xlu1 %2258  ;;  %v2633_v54 = vpop.permute.xlu0 %2632  ;;  %v2726_v18 = vsel %vm2721_vm14, %v2709_v45, %v12035_v25 }
 0x312   :  { %2599 = vrot.lane.b32.xlu0 %v11960_v21, %s10115_s0  ;;  %v2792_v61 = vsel %vm2789_vm5, %v2775_v20, %v2633_v54  ;;  %v2694_v20 = vsel %vm2688_vm12, %v2678_v57, %v12011_v23 }
 0x313   :  { %8902 = vmatprep.mubr.msk.f32.mxu1 %vm2806_vm6, %v2792_v61  ;;  %v2710_v25 = vsel %vm2704_vm13, %v2694_v20, %v12023_v60 }
 0x315   :  { %2508 = vrot.lane.b32.xlu1 %v11990_v24, %s10113_s24  ;;  %v2499_v21 = vpop.permute.xlu1 %2498  ;;  %v2447_v6 = vpop.permute.xlu0 %2446 }
 0x316   :  { %2456 = vrot.lane.b32.xlu0 %v12046_v14, %s10112_s30  ;;  %v2743_v44 = vsel %vm2738_vm15, %v2726_v18, %v2499_v21  ;;  %v2727_v58 = vsel %vm2721_vm14, %v2710_v25, %v2447_v6 }
 0x319   :  { %2353 = vrot.lane.b32.xlu1 %v12074_v27, %s10110_s7  ;;  %v12079_v59 = vpop.permute.xlu1 %2260  ;;  %v2635_v7 = vpop.permute.xlu0 %2634 }
 0x31a   :  { %2644 = vrot.lane.b32.xlu0 %v11990_v24, %s10116_s1  ;;  %v2793_v12 = vsel %vm2789_vm5, %v2776_v47, %v2635_v7  ;;  %v2680_v25 = vsel %vm1603_vm10, %v11781_v19, %v12079_v59 }
 0x31b   :  { %8903 = vmatmul.mubr.msk.f32.gmra.mxu1 %vm2806_vm6, %v2793_v12 }
 0x31d   :  { %2556 = vrot.lane.b32.xlu1 %v12033_v17, %s10114_s27  ;;  %v2501_v39 = vpop.permute.xlu1 %2500  ;;  %v12087_v3 = vpop.permute.xlu0 %2345 }
 0x31e   :  { %v2744_v23 = vsel %vm2738_vm15, %v2727_v58, %v2501_v39 }
 0x320   :  { %v8868_v35 = vpop.f32.mrf.mxu0 }
 0x321   :  { %v1990_v10 = vmul.f32 %v12008_v22, %v8868_v35  ;;  %v12090_v53 = vpop.permute.xlu1 %2347  ;;  %v2547_v63 = vpop.permute.xlu0 %2546 }
 0x322   :  { %v1912_v56 = vpop.f32.mrf.mxu0  ;;  %v2760_v54 = vsel %vm2755_vm3, %v2743_v44, %v2547_v63 }
 0x323   :  { %v2028_v38 = vadd.f32 %v12016_v37, %v1990_v10  ;;  %v1989_v24 = vmul.f32 %v12008_v22, %v1912_v56 }
 0x325   :  { %v2027_v43 = vadd.f32 %v12016_v37, %v1989_v24  ;;  %v2549_v34 = vpop.permute.xlu1 %2548  ;;  %v12095_v31 = vpop.permute.xlu0 %2392  ;;  %v2060_v5 = vmax.f32 %v2028_v38, 0.0 }
 0x326   :  { %v2761_v60 = vsel %vm2755_vm3, %v2744_v23, %v2549_v34 }
 0x327   :  { %v2059_v28 = vmax.f32 %v2027_v43, 0.0 }
 0x329   :  { %v2080_v29 = vmax.f32 %v2059_v28, %v2060_v5  ;;  %v12097_v36 = vpop.permute.xlu1 %2394  ;;  %v2592_v62 = vpop.permute.xlu0 %2591 }
 0x32a   :  { %v2777_v55 = vsel %vm2772_vm4, %v2760_v54, %v2592_v62 }
 0x32b   :  { %v2123_v49 = vrot.slane %v2080_v29, 7 }
 0x32d   :  { %v2171_v48 = vsel %vm288_vm0, %v2123_v49, 0.0  ;;  %v2594_v30 = vpop.permute.xlu1 %2593  ;;  %v12108_v11 = vsel %vm288_vm0, 0.0, %v2123_v49  ;;  %v12110_v51 = vpop.permute.xlu0 %2448  ;;  %v2679_v49 = vsel %vm1603_vm10, %v11751_v15, %v12051_v46 }
 0x32e   :  { %2402 = vrot.lane.b32.xlu1 %v12108_v11, %s10111_s4  ;;  %v2234_v1 = vrot.slane %v12108_v11, 1  ;;  %v2235_v26 = vrot.slane %v2171_v48, 1  ;;  %v2321_v9 = vrot.slane %v12108_v11, 2  ;;  %v2322_v52 = vrot.slane %v2171_v48, 2 }
 0x32f   :  { %v2778_v21 = vsel %vm2772_vm4, %v2761_v60, %v2594_v30  ;;  %v2695_v45 = vsel %vm2688_vm12, %v2679_v49, %v12087_v3 }
 0x330   :  { %v2236_v61 = vsel %vm417_vm2, %v2234_v1, %v2235_v26  ;;  %v2711_v48 = vsel %vm2704_vm13, %v2695_v45, %v12095_v31 }
 0x331   :  { %2458 = vrot.lane.b32.xlu0 %v2236_v61, %s10112_s30  ;;  %v12129_v13 = vpop.permute.xlu1 %2450  ;;  %v2637_v50 = vpop.permute.xlu0 %2636  ;;  %v2728_v26 = vsel %vm2721_vm14, %v2711_v48, %v12110_v51 }
 0x332   :  { %2601 = vrot.lane.b32.xlu1 %v12046_v14, %s10115_s0  ;;  %v2794_v8 = vsel %vm2789_vm5, %v2777_v55, %v2637_v50  ;;  %v2323_v14 = vsel %vm604_vm1, %v2321_v9, %v2322_v52  ;;  %v2696_v50 = vsel %vm2688_vm12, %v2680_v25, %v12090_v53 }
 0x333   :  { %8905 = vmatprep.mubr.msk.f32.mxu1 %vm2806_vm6, %v2794_v8  ;;  %v2712_v8 = vsel %vm2704_vm13, %v2696_v50, %v12097_v36 }
 0x334   :  { %v2729_v52 = vsel %vm2721_vm14, %v2712_v8, %v12129_v13 }
 0x335   :  { %2646 = vrot.lane.b32.xlu0 %v12074_v27, %s10116_s1  ;;  %v2639_v6 = vpop.permute.xlu1 %2638  ;;  %v2503_v16 = vpop.permute.xlu0 %2502 }
 0x336   :  { %v2795_v40 = vsel %vm2789_vm5, %v2778_v21, %v2639_v6  ;;  %2268 = vrot.lane.b32.xlu1 %v2236_v61, %s10098_s3  ;;  %v2745_v15 = vsel %vm2738_vm15, %v2728_v26, %v2503_v16 }
 0x337   :  { %8906 = vmatmul.mubr.msk.f32.gmra.mxu1 %vm2806_vm6, %v2795_v40 }
 0x339   :  { %2355 = vrot.lane.b32.xlu0 %v2323_v14, %s10110_s7  ;;  %v2505_v4 = vpop.permute.xlu1 %2504 }
 0x33a   :  { %2510 = vrot.lane.b32.xlu1 %v12074_v27, %s10113_s24  ;;  %v2746_v19 = vsel %vm2738_vm15, %v2729_v52, %v2505_v4 }
 0x33d   :  { %2558 = vrot.lane.b32.xlu0 %v12108_v11, %s10114_s27 }
 0x340   :  { %v8871_v42 = vpop.f32.mrf.mxu0 }
 0x341   :  { %v1992_v47 = vmul.f32 %v12008_v22, %v8871_v42 }
 0x342   :  { %v1922_v7 = vpop.f32.mrf.mxu0 }
 0x343   :  { %v2030_v12 = vadd.f32 %v12016_v37, %v1992_v47  ;;  %v1991_v39 = vmul.f32 %v12008_v22, %v1922_v7  ;;  %v12154_v35 = vpop.permute.xlu0 %2262  ;;  %v12183_v46 = vpop.permute.xlu1 %2349 }
 0x345   :  { %v2029_v10 = vadd.f32 %v12016_v37, %v1991_v39  ;;  %v2062_v63 = vmax.f32 %v2030_v12, 0.0 }
 0x347   :  { %v2061_v56 = vmax.f32 %v2029_v10, 0.0  ;;  %v2551_v38 = vpop.permute.xlu0 %2550  ;;  %v12193_v51 = vpop.permute.xlu1 %2552 }
 0x348   :  { %v2762_v3 = vsel %vm2755_vm3, %v2745_v15, %v2551_v38  ;;  %v2763_v53 = vsel %vm2755_vm3, %v2746_v19, %v12193_v51 }
 0x349   :  { %v2081_v27 = vmax.f32 %v2061_v56, %v2062_v63 }
 0x34b   :  { %v2124_v24 = vrot.slane %v2081_v27, 7  ;;  %v12157_v43 = vpop.permute.xlu0 %2396 }
 0x34c   :  { %v2713_v15 = vsel %vm2704_vm13, %v11943_v41, %v12157_v43 }
 0x34d   :  { %v12160_v34 = vsel %vm288_vm0, 0.0, %v2124_v24  ;;  %v2172_v5 = vsel %vm288_vm0, %v2124_v24, 0.0 }
 0x34e   :  { %2404 = vrot.lane.b32.xlu0 %v12160_v34, %s10111_s4  ;;  %v2237_v28 = vrot.slane %v12160_v34, 1  ;;  %v2238_v29 = vrot.slane %v2172_v5, 1  ;;  %v2324_v18 = vrot.slane %v12160_v34, 2  ;;  %v2325_v1 = vrot.slane %v2172_v5, 2 }
 0x34f   :  { %v2596_v62 = vpop.permute.xlu0 %2595 }
 0x350   :  { %v2239_v2 = vsel %vm417_vm2, %v2237_v28, %v2238_v29  ;;  %v2779_v31 = vsel %vm2772_vm4, %v2762_v3, %v2596_v62  ;;  %v2326_v44 = vsel %vm604_vm1, %v2324_v18, %v2325_v1 }
 0x351   :  { %2270 = vrot.lane.b32.xlu1 %v2239_v2, %s10098_s3 }
 0x352   :  { %2603 = vrot.lane.b32.xlu0 %v2236_v61, %s10115_s0 }
 0x353   :  { %v12176_v30 = vpop.permute.xlu0 %2452 }
 0x355   :  { %2512 = vrot.lane.b32.xlu1 %v2323_v14, %s10113_s24 }
 0x356   :  { %2460 = vrot.lane.b32.xlu0 %v2239_v2, %s10112_s30 }
 0x357   :  { %v2641_v57 = vpop.permute.xlu0 %2640 }
 0x358   :  { %v2796_v20 = vsel %vm2789_vm5, %v2779_v31, %v2641_v57  ;;  %v2730_v57 = vsel %vm2721_vm14, %v2713_v15, %v12176_v30 }
 0x359   :  { %2357 = vrot.lane.b32.xlu1 %v2326_v44, %s10110_s7  ;;  %8908 = vmatprep.mubr.msk.f32.mxu1 %vm2806_vm6, %v2796_v20 }
 0x35a   :  { %2648 = vrot.lane.b32.xlu0 %v2323_v14, %s10116_s1 }
 0x35d   :  { %2560 = vrot.lane.b32.xlu1 %v12160_v34, %s10114_s27 }
 0x360   :  { %v12197_v54 = vpop.permute.xlu1 %2398  ;;  %v8874_v61 = vpop.f32.mrf.mxu0 }
 0x361   :  { %v1994_v55 = vmul.f32 %v12008_v22, %v8874_v61 }
 0x362   :  { %v1932_v58 = vpop.f32.mrf.mxu0 }
 0x363   :  { %v2032_v23 = vadd.f32 %v12016_v37, %v1994_v55  ;;  %v1993_v60 = vmul.f32 %v12008_v22, %v1932_v58  ;;  %v12209_v9 = vpop.permute.xlu0 %2454 }
 0x364   :  { %v12213_v21 = vpop.permute.xlu1 %2597 }
 0x365   :  { %v2031_v59 = vadd.f32 %v12016_v37, %v1993_v60  ;;  %v2064_v6 = vmax.f32 %v2032_v23, 0.0  ;;  %v2780_v40 = vsel %vm2772_vm4, %v2763_v53, %v12213_v21 }
 0x367   :  { %v2063_v36 = vmax.f32 %v2031_v59, 0.0  ;;  %v12221_v14 = vpop.permute.xlu0 %2642 }
 0x368   :  { %v2797_v16 = vsel %vm2789_vm5, %v2780_v40, %v12221_v14  ;;  %v12246_v5 = vpop.permute.xlu1 %2264 }
 0x369   :  { %v2082_v13 = vmax.f32 %v2063_v36, %v2064_v6  ;;  %8909 = vmatmul.mubr.msk.f32.gmra.mxu1 %vm2806_vm6, %v2797_v16 }
 0x36b   :  { %v2125_v42 = vrot.slane %v2082_v13, 7  ;;  %v12238_v38 = vpop.permute.xlu0 %2351 }
 0x36c   :  { %v2507_v18 = vpop.permute.xlu1 %2506 }
 0x36d   :  { %v2173_v47 = vsel %vm288_vm0, %v2125_v42, 0.0  ;;  %v12228_v7 = vsel %vm288_vm0, 0.0, %v2125_v42  ;;  %v2747_v61 = vsel %vm2738_vm15, %v2730_v57, %v2507_v18  ;;  %v12325_v57 = vld [vmem:[#allocation7] ss:$0 sm:$0xff] }
 0x36e   :  { %2406 = vrot.lane.b32.xlu1 %v12228_v7, %s10111_s4  ;;  %v2240_v12 = vrot.slane %v12228_v7, 1  ;;  %v2241_v39 = vrot.slane %v2173_v47, 1  ;;  %v2327_v63 = vrot.slane %v12228_v7, 2  ;;  %v2328_v56 = vrot.slane %v2173_v47, 2 }
 0x36f   :  { %v2555_v24 = vpop.permute.xlu0 %2554 }
 0x370   :  { %v2242_v10 = vsel %vm417_vm2, %v2240_v12, %v2241_v39  ;;  %v2329_v27 = vsel %vm604_vm1, %v2327_v63, %v2328_v56  ;;  %v2764_v50 = vsel %vm2755_vm3, %v2747_v61, %v2555_v24 }
 0x371   :  { %2462 = vrot.lane.b32.xlu0 %v2242_v10, %s10112_s30 }
 0x372   :  { %2605 = vrot.lane.b32.xlu1 %v2239_v2, %s10115_s0 }
 0x375   :  { %2650 = vrot.lane.b32.xlu0 %v2326_v44, %s10116_s1 }
 0x376   :  { %2272 = vrot.lane.b32.xlu1 %v2242_v10, %s10098_s3 }
 0x379   :  { %2359 = vrot.lane.b32.xlu0 %v2329_v27, %s10110_s7 }
 0x37a   :  { %2514 = vrot.lane.b32.xlu1 %v2326_v44, %s10113_s24 }
 0x37d   :  { %2562 = vrot.lane.b32.xlu0 %v12228_v7, %s10114_s27 }
 0x380   :  { %v8877_v28 = vpop.f32.mrf.mxu0  ;;  %v12248_v29 = vpop.permute.xlu0 %2400 }
 0x381   :  { %v1996_v62 = vmul.f32 %v12008_v22, %v8877_v28  ;;  %v2681_v28 = vsel %vm1603_vm10, %v11897_v33, %v12154_v35 }
 0x382   :  { %v1942_v2 = vpop.f32.mrf.mxu0 }
 0x383   :  { %v2034_v49 = vadd.f32 %v12016_v37, %v1996_v62  ;;  %v1995_v4 = vmul.f32 %v12008_v22, %v1942_v2  ;;  %v12263_v25 = vpop.permute.xlu1 %2266 }
 0x384   :  { %v2600_v45 = vpop.permute.xlu0 %2599 }
 0x385   :  { %v2033_v48 = vadd.f32 %v12016_v37, %v1995_v4  ;;  %v2066_v1 = vmax.f32 %v2034_v49, 0.0  ;;  %v2781_v41 = vsel %vm2772_vm4, %v2764_v50, %v2600_v45  ;;  %v2697_v4 = vsel %vm2688_vm12, %v2681_v28, %v12183_v46 }
 0x386   :  { %v2714_v45 = vsel %vm2704_vm13, %v2697_v4, %v12197_v54 }
 0x387   :  { %v2065_v26 = vmax.f32 %v2033_v48, 0.0  ;;  %v2509_v6 = vpop.permute.xlu1 %2508  ;;  %v2731_v33 = vsel %vm2721_vm14, %v2714_v45, %v12209_v9 }
 0x388   :  { %v12257_v3 = vpop.permute.xlu0 %2456  ;;  %v8880_v31 = vpop.f32.mrf.mxu0  ;;  %v2748_v18 = vsel %vm2738_vm15, %v2731_v33, %v2509_v6 }
 0x389   :  { %v2083_v44 = vmax.f32 %v2065_v26, %v2066_v1  ;;  %v1998_v20 = vmul.f32 %v12008_v22, %v8880_v31  ;;  %v12323_v31 = vld [vmem:[#allocation4] ss:$0 sm:$0xff] }
 0x38a   :  { %v1952_v55 = vpop.f32.mrf.mxu0 }
 0x38b   :  { %v2126_v58 = vrot.slane %v2083_v44, 7  ;;  %v1997_v8 = vmul.f32 %v12008_v22, %v1952_v55  ;;  %v2036_v43 = vadd.f32 %v12016_v37, %v1998_v20  ;;  %v12283_v42 = vpop.permute.xlu1 %2353 }
 0x38c   :  { %v2645_v23 = vpop.permute.xlu0 %2644 }
 0x38d   :  { %v2035_v30 = vadd.f32 %v12016_v37, %v1997_v8  ;;  %v2798_v60 = vsel %vm2789_vm5, %v2781_v41, %v2645_v23  ;;  %v12272_v52 = vsel %vm288_vm0, 0.0, %v2126_v58  ;;  %v2174_v19 = vsel %vm288_vm0, %v2126_v58, 0.0 }
 0x38e   :  { %2408 = vrot.lane.b32.xlu0 %v12272_v52, %s10111_s4  ;;  %8911 = vmatprep.mubr.msk.f32.mxu1 %vm2806_vm6, %v2798_v60  ;;  %v2243_v22 = vrot.slane %v12272_v52, 1  ;;  %v2244_v53 = vrot.slane %v2174_v19, 1  ;;  %v2068_v36 = vmax.f32 %v2036_v43, 0.0  ;;  %v2330_v16 = vrot.slane %v12272_v52, 2 }
 0x38f   :  { %v2067_v59 = vmax.f32 %v2035_v30, 0.0  ;;  %v2331_v13 = vrot.slane %v2174_v19, 2  ;;  %v2557_v63 = vpop.permute.xlu1 %2556 }
 0x390   :  { %v2245_v37 = vsel %vm417_vm2, %v2243_v22, %v2244_v53  ;;  %v2765_v26 = vsel %vm2755_vm3, %v2748_v18, %v2557_v63  ;;  %v2682_v22 = vsel %vm1603_vm10, %v11949_v32, %v12246_v5 }
 0x391   :  { %v2084_v40 = vmax.f32 %v2067_v59, %v2068_v36  ;;  %2274 = vrot.lane.b32.xlu1 %v2245_v37, %s10098_s3  ;;  %v2332_v12 = vsel %vm604_vm1, %v2330_v16, %v2331_v13  ;;  %v2698_v53 = vsel %vm2688_vm12, %v2682_v22, %v12238_v38 }
 0x392   :  { %2607 = vrot.lane.b32.xlu0 %v2242_v10, %s10115_s0  ;;  %v2715_v6 = vsel %vm2704_vm13, %v2698_v53, %v12248_v29 }
 0x393   :  { %v2127_v47 = vrot.slane %v2084_v40, 7 }
 0x395   :  { %2516 = vrot.lane.b32.xlu1 %v2329_v27, %s10113_s24  ;;  %v2159_v39 = vsel %vm288_vm0, 0.0, %v2127_v47  ;;  %v2175_v10 = vsel %vm288_vm0, %v2127_v47, 0.0  ;;  %vm10117_vm0 = vmmov 0  }
 0x396   :  { %2464 = vrot.lane.b32.xlu0 %v2245_v37, %s10112_s30  ;;  %v2487_v56 = vrot.slane %v2159_v39, 2  ;;  %v2488_v24 = vrot.slane %v2175_v10, 2  ;;  %v2433_v2 = vrot.slane %v2159_v39, 1  ;;  %v2434_v49 = vrot.slane %v2175_v10, 1  ;;  %8986 = vmatprep.mubr.msk.f32.mxu0 %vm10117_vm0, %v10102_v0 }
 0x398   :  { %v2435_v1 = vsel %vm417_vm2, %v2433_v2, %v2434_v49  ;;  %v2683_v2 = vsel %vm1603_vm10, %v12033_v17, %v12263_v25  ;;  %vm3418_vm2 = vcmask 253952  }
 0x399   :  { %2361 = vrot.lane.b32.xlu1 %v2332_v12, %s10110_s7 }
 0x39a   :  { %2652 = vrot.lane.b32.xlu0 %v2329_v27, %s10116_s1  ;;  %v2489_v27 = vsel %vm604_vm1, %v2487_v56, %v2488_v24  ;;  %vm3558_vm1 = vcmask 1041409  }
 0x39d   :  { %2564 = vrot.lane.b32.xlu1 %v12272_v52, %s10114_s27 }
 0x39e   :  { %2518 = vrot.lane.b32.xlu0 %v2332_v12, %s10113_s24 }
 0x3a0   :  { %v12298_v62 = vpop.permute.xlu1 %2402 }
 0x3a1   :  { %2410 = vrot.lane.b32.xlu1 %v2159_v39, %s10111_s4 }
 0x3a2   :  { %2520 = vrot.lane.b32.xlu0 %v2489_v27, %s10113_s24  ;;  %s14059_s24 = sld [smem:[#allocation28_spill]] }
 0x3a3   :  { %v2459_v48 = vpop.permute.xlu0 %2458 }
 0x3a4   :  { %v2602_v35 = vpop.permute.xlu1 %2601 }
 0x3a5   :  { %2609 = vrot.lane.b32.xlu1 %v2245_v37, %s10115_s0  ;;  %v2782_v46 = vsel %vm2772_vm4, %v2765_v26, %v2602_v35  ;;  %v2732_v37 = vsel %vm2721_vm14, %v2715_v6, %v12257_v3 }
 0x3a6   :  { %2611 = vrot.lane.b32.xlu0 %v2435_v1, %s10115_s0 }
 0x3a7   :  { %v2647_v15 = vpop.permute.xlu0 %2646 }
 0x3a8   :  { %v2799_v54 = vsel %vm2789_vm5, %v2782_v46, %v2647_v15  ;;  %v12330_v8 = vpop.permute.xlu1 %2268 }
 0x3a9   :  { %8912 = vmatmul.mubr.msk.f32.gmra.mxu1 %vm2806_vm6, %v2799_v54  ;;  %2466 = vrot.lane.b32.xlu1 %v2435_v1, %s10112_s30  ;;  %v2684_v53 = vsel %vm1603_vm10, %v12108_v11, %v12330_v8 }
 0x3ab   :  { %v12320_v9 = vpop.permute.xlu0 %2355 }
 0x3ac   :  { %v2511_v59 = vpop.permute.xlu1 %2510  ;;  %v2700_v6 = vsel %vm2688_vm12, %v2684_v53, %v12320_v9 }
 0x3ad   :  { %2654 = vrot.lane.b32.xlu1 %v2332_v12, %s10116_s1  ;;  %v2749_v40 = vsel %vm2738_vm15, %v2732_v37, %v2511_v59 }
 0x3af   :  { %v2559_v20 = vpop.permute.xlu0 %2558 }
 0x3b0   :  { %v2766_v13 = vsel %vm2755_vm3, %v2749_v40, %v2559_v20 }
 0x3b1   :  { %2566 = vrot.lane.b32.xlu1 %v2159_v39, %s10114_s27 }
 0x3b5   :  { %2656 = vrot.lane.b32.xlu1 %v2489_v27, %s10116_s1  ;;  %v2699_v27 = vsel %vm2688_vm12, %v2683_v2, %v12283_v42 }
 0x3b6   :  { %v2716_v45 = vsel %vm2704_vm13, %v2699_v27, %v12298_v62 }
 0x3b7   :  { %v2733_v35 = vsel %vm2721_vm14, %v2716_v45, %v2459_v48 }
 0x3bb   :  { %v8901_v44 = vpop.f32.mrf.mxu1 }
 0x3bc   :  { %v3007_v61 = vmul.f32 %v8901_v44, %v12323_v31 }
 0x3bd   :  { %v2921_v55 = vpop.f32.mrf.mxu1 }
 0x3be   :  { %v3029_v50 = vadd.f32 %v12325_v57, %v3007_v61  ;;  %v3006_v58 = vmul.f32 %v12323_v31, %v2921_v55 }
 0x3c0   :  { %v3028_v41 = vadd.f32 %v12325_v57, %v3006_v58  ;;  %v12333_v43 = vpop.permute.xlu0 %2404  ;;  %v3045_v23 = vmax.f32 %v3029_v50, 0.0 }
 0x3c1   :  { %v2717_v37 = vsel %vm2704_vm13, %v2700_v6, %v12333_v43 }
 0x3c2   :  { %v3044_v30 = vmax.f32 %v3028_v41, 0.0 }
 0x3c3   :  { %v12347_v16 = vpop.permute.xlu1 %2270 }
 0x3c4   :  { %v12335_v60 = vmax.f32 %v3044_v30, %v3045_v23  ;;  %v2604_v19 = vpop.permute.xlu0 %2603  ;;  %v2685_v43 = vsel %vm1603_vm10, %v12160_v34, %v12347_v16 }
 0x3c5   :  { %v2783_v47 = vsel %vm2772_vm4, %v2766_v13, %v2604_v19 }
 0x3c7   :  { %v2513_v38 = vpop.permute.xlu1 %2512 }
 0x3c8   :  { %v2461_v36 = vpop.permute.xlu0 %2460  ;;  %v2750_v26 = vsel %vm2738_vm15, %v2733_v35, %v2513_v38 }
 0x3cb   :  { %v2358_v12 = vpop.permute.xlu1 %2357 }
 0x3cc   :  { %v2649_v32 = vpop.permute.xlu0 %2648 }
 0x3cd   :  { %v2800_v5 = vsel %vm2789_vm5, %v2783_v47, %v2649_v32  ;;  %v2734_v47 = vsel %vm2721_vm14, %v2717_v37, %v2461_v36 }
 0x3ce   :  { %8914 = vmatprep.mubr.msk.f32.mxu1 %vm2806_vm6, %v2800_v5 }
 0x3cf   :  { %v2561_v39 = vpop.permute.xlu1 %2560 }
 0x3d0   :  { %v2767_v46 = vsel %vm2755_vm3, %v2750_v26, %v2561_v39 }
 0x3db   :  { %v8904_v29 = vpop.f32.mrf.mxu1 }
 0x3dc   :  { %v3009_v10 = vmul.f32 %v8904_v29, %v12323_v31 }
 0x3dd   :  { %v2931_v3 = vpop.f32.mrf.mxu1 }
 0x3de   :  { %v3031_v63 = vadd.f32 %v12325_v57, %v3009_v10  ;;  %v3008_v56 = vmul.f32 %v12323_v31, %v2931_v3  ;;  %v2701_v3 = vsel %vm2688_vm12, %v2685_v43, %v2358_v12 }
 0x3e0   :  { %v3030_v24 = vadd.f32 %v12325_v57, %v3008_v56  ;;  %v2407_v28 = vpop.permute.xlu1 %2406  ;;  %v3047_v49 = vmax.f32 %v3031_v63, 0.0 }
 0x3e1   :  { %v2718_v56 = vsel %vm2704_vm13, %v2701_v3, %v2407_v28 }
 0x3e2   :  { %v3046_v4 = vmax.f32 %v3030_v24, 0.0 }
 0x3e3   :  { %v2463_v33 = vpop.permute.xlu0 %2462 }
 0x3e4   :  { %v2606_v18 = vpop.permute.xlu1 %2605  ;;  %v3061_v1 = vmax.f32 %v3046_v4, %v3047_v49  ;;  %v2735_v27 = vsel %vm2721_vm14, %v2718_v56, %v2463_v33 }
 0x3e5   :  { %v2784_v17 = vsel %vm2772_vm4, %v2767_v46, %v2606_v18 }
 0x3e6   :  { %3070 = vrot.lane.b32.xlu0 %v3061_v1, %s10098_s3 }
 0x3e7   :  { %v2651_v25 = vpop.permute.xlu0 %2650 }
 0x3e8   :  { %v2801_v42 = vsel %vm2789_vm5, %v2784_v17, %v2651_v25  ;;  %v2273_v44 = vpop.permute.xlu1 %2272 }
 0x3e9   :  { %8915 = vmatmul.mubr.msk.f32.gmra.mxu1 %vm2806_vm6, %v2801_v42  ;;  %v2686_v16 = vsel %vm1603_vm10, %v12228_v7, %v2273_v44 }
 0x3eb   :  { %v2360_v15 = vpop.permute.xlu0 %2359 }
 0x3ec   :  { %v2515_v23 = vpop.permute.xlu1 %2514  ;;  %v2702_v35 = vsel %vm2688_vm12, %v2686_v16, %v2360_v15 }
 0x3ed   :  { %v2751_v32 = vsel %vm2738_vm15, %v2734_v47, %v2515_v23 }
 0x3ef   :  { %v2563_v55 = vpop.permute.xlu0 %2562 }
 0x3f0   :  { %v2768_v5 = vsel %vm2755_vm3, %v2751_v32, %v2563_v55 }
 0x3f7   :  { %v8907_v62 = vpop.f32.mrf.mxu1 }
 0x3f8   :  { %v3011_v54 = vmul.f32 %v8907_v62, %v12323_v31 }
 0x3f9   :  { %v2941_v48 = vpop.f32.mrf.mxu1 }
 0x3fa   :  { %v3033_v20 = vadd.f32 %v12325_v57, %v3011_v54  ;;  %v3010_v61 = vmul.f32 %v12323_v31, %v2941_v48 }
 0x3fc   :  { %v3032_v50 = vadd.f32 %v12325_v57, %v3010_v61  ;;  %v3049_v58 = vmax.f32 %v3033_v20, 0.0 }
 0x3fe   :  { %v3048_v41 = vmax.f32 %v3032_v50, 0.0 }
 0x400   :  { %v3062_v30 = vmax.f32 %v3048_v41, %v3049_v58  ;;  %v2409_v19 = vpop.permute.xlu0 %2408 }
 0x401   :  { %v2719_v1 = vsel %vm2704_vm13, %v2702_v35, %v2409_v19 }
 0x402   :  { %3078 = vrot.lane.b32.xlu0 %v3062_v30, %s10110_s7 }
 0x403   :  { %v2275_v22 = vpop.permute.xlu1 %2274 }
 0x404   :  { %v2608_v59 = vpop.permute.xlu0 %2607  ;;  %v2687_v63 = vsel %vm1603_vm10, %v12272_v52, %v2275_v22 }
 0x405   :  { %v2785_v38 = vsel %vm2772_vm4, %v2768_v5, %v2608_v59 }
 0x407   :  { %v2517_v40 = vpop.permute.xlu1 %2516 }
 0x408   :  { %v2465_v13 = vpop.permute.xlu0 %2464  ;;  %v2752_v4 = vsel %vm2738_vm15, %v2735_v27, %v2517_v40 }
 0x409   :  { %v2736_v26 = vsel %vm2721_vm14, %v2719_v1, %v2465_v13 }
 0x40b   :  { %v2362_v29 = vpop.permute.xlu1 %2361 }
 0x40c   :  { %v2653_v39 = vpop.permute.xlu0 %2652  ;;  %v2703_v24 = vsel %vm2688_vm12, %v2687_v63, %v2362_v29 }
 0x40d   :  { %v2802_v11 = vsel %vm2789_vm5, %v2785_v38, %v2653_v39  ;;  %v3101_v39 = vld [vmem:[%s14059_s24 + $0x18] sm:$0xff] }
 0x40e   :  { %8917 = vmatprep.mubr.msk.f32.mxu1 %vm2806_vm6, %v2802_v11  ;;  %v3100_v11 = vld [vmem:[%s14059_s24 + $0x10] sm:$0xff]  ;;  %8923 = vmatprep.subr.mxu1 %v3101_v39 }
 0x40f   :  { %v2565_v9 = vpop.permute.xlu1 %2564  ;;  %8924 = vmatpush3.msra.mxu1 %v3101_v39 }
 0x410   :  { %v2519_v36 = vpop.permute.xlu0 %2518  ;;  %v2769_v34 = vsel %vm2755_vm3, %v2752_v4, %v2565_v9  ;;  %8925 = vmatprep.subr.mxu1 %v3100_v11 }
 0x411   :  { %v2753_v46 = vsel %vm2738_vm15, %v2736_v26, %v2519_v36  ;;  %8926 = vmatpush3.msra.mxu1 %v3100_v11 }
 0x413   :  { %v2411_v8 = vpop.permute.xlu1 %2410 }
 0x414   :  { %v2720_v49 = vsel %vm2704_vm13, %v2703_v24, %v2411_v8  ;;  %v2521_v12 = vpop.permute.xlu0 %2520 }
 0x417   :  { %v2610_v10 = vpop.permute.xlu1 %2609 }
 0x418   :  { %v2786_v52 = vsel %vm2772_vm4, %v2769_v34, %v2610_v10  ;;  %v2612_v42 = vpop.permute.xlu0 %2611 }
 0x41b   :  { %v2467_v2 = vpop.permute.xlu1 %2466 }
 0x41c   :  { %v2737_v45 = vsel %vm2721_vm14, %v2720_v49, %v2467_v2  ;;  %v3098_v2 = vld [vmem:[%s14059_s24] sm:$0xff] }
 0x41d   :  { %v2754_v18 = vsel %vm2738_vm15, %v2737_v45, %v2521_v12  ;;  %v3110_v12 = vld [vmem:[#allocation9 + $0x18] sm:$0xff]  ;;  %vm14043_vm15 = vcmask 258052  }
 0x41e   :  { %v2771_v7 = vsel %vm2755_vm3, %v2754_v18, %v12193_v51 }
 0x41f   :  { %v2655_v28 = vpop.permute.xlu1 %2654  ;;  %v2788_v15 = vsel %vm2772_vm4, %v2771_v7, %v12213_v21 }
 0x420   :  { %v2803_v33 = vsel %vm2789_vm5, %v2786_v52, %v2655_v28  ;;  %v2805_v51 = vsel %vm2789_vm5, %v2788_v15, %v12221_v14  ;;  %v12471_v15 = vld [vmem:[#allocation10 + $0x18] sm:$0xff] }
 0x421   :  { %8918 = vmatmul.mubr.msk.f32.gmra.mxu1 %vm2806_vm6, %v2803_v33  ;;  %8979 = vmatpush3.msra.mxu0 %v12471_v15 }
 0x422   :  { %8980 = vmatprep.subr.mxu0 %v10102_v0 }
 0x423   :  { %v2567_v17 = vpop.permute.xlu1 %2566 }
 0x424   :  { %v2770_v25 = vsel %vm2755_vm3, %v2753_v46, %v2567_v17  ;;  %vm4744_vm3 = vcmask 519427  }
 0x425   :  { %v2787_v54 = vsel %vm2772_vm4, %v2770_v25, %v2612_v42  ;;  %vm4893_vm4 = vcmask 259077  }
 0x427   :  { %v2657_v62 = vpop.permute.xlu1 %2656 }
 0x428   :  { %v2804_v48 = vsel %vm2789_vm5, %v2787_v54, %v2657_v62  ;;  %v12474_v62 = vld [vmem:[#allocation10 + $0x10] sm:$0xff] }
 0x429   :  { %v8910_v44 = vpop.f32.mrf.mxu1  ;;  %8920 = vmatprep.mubr.msk.f32.mxu1 %vm2806_vm6, %v2804_v48  ;;  %8981 = vmatpush3.msra.mxu0 %v12474_v62 }
 0x42a   :  { %v3013_v20 = vmul.f32 %v8910_v44, %v12323_v31  ;;  %8921 = vmatmul.mubr.msk.f32.gmra.mxu1 %vm2806_vm6, %v2805_v51  ;;  %8982 = vmatprep.subr.mxu0 %v10102_v0  ;;  %vm5042_vm6 = vcmask 518402  }
 0x42b   :  { %v2951_v61 = vpop.f32.mrf.mxu1 }
 0x42c   :  { %v3035_v55 = vadd.f32 %v12325_v57, %v3013_v20  ;;  %v3012_v21 = vmul.f32 %v12323_v31, %v2951_v61 }
 0x42e   :  { %v3034_v50 = vadd.f32 %v12325_v57, %v3012_v21  ;;  %v3051_v58 = vmax.f32 %v3035_v55, 0.0  ;;  %v3109_v55 = vld [vmem:[#allocation9 + $0x10] sm:$0xff]  ;;  %v3108_v21 = vld [vmem:[#allocation9 + $0x8] sm:$0xff] }
 0x430   :  { %v3050_v41 = vmax.f32 %v3034_v50, 0.0  ;;  %v3107_v50 = vld [vmem:[#allocation9] sm:$0xff] }
 0x432   :  { %v3063_v23 = vmax.f32 %v3050_v41, %v3051_v58  ;;  %v12497_v58 = vld [vmem:[%s14018_s8 + $0x18] sm:$0xff]  ;;  %v12504_v41 = vld [vmem:[%s14018_s8 + $0x10] sm:$0xff] }
 0x434   :  { %3086 = vrot.lane.b32.xlu0 %v3063_v23, %s10111_s4  ;;  %v12513_v23 = vld [vmem:[%s14018_s8 + $0x8] sm:$0xff] }
 0x458   :  { %v3071_v13 = vpop.permute.xlu0 %3070 }
 0x459   :  { %v3092_v32 = vsel %vm1603_vm10, %v12335_v60, %v3071_v13  ;;  %v3099_v60 = vld [vmem:[%s14059_s24 + $0x8] sm:$0xff] }
 0x45a   :  { %8927 = vmatprep.subr.mxu1 %v3099_v60 }
 0x45b   :  { %8928 = vmatpush3.msra.mxu1 %v3099_v60 }
 0x45c   :  { %8929 = vmatprep.subr.mxu1 %v3098_v2 }
 0x45d   :  { %8930 = vmatpush3.msra.mxu1 %v3098_v2 }
 0x45e   :  { %8934 = vmatprep.subr.mxu1 %v3110_v12 }
 0x469   :  { %v8913_v30 = vpop.f32.mrf.mxu1 }
 0x46a   :  { %v3015_v19 = vmul.f32 %v8913_v30, %v12323_v31  ;;  %v12520_v30 = vld [vmem:[%s14018_s8] sm:$0xff] }
 0x46b   :  { %v2961_v22 = vpop.f32.mrf.mxu1 }
 0x46c   :  { %v3037_v14 = vadd.f32 %v12325_v57, %v3015_v19  ;;  %v3014_v59 = vmul.f32 %v12323_v31, %v2961_v22 }
 0x46e   :  { %v3036_v53 = vadd.f32 %v12325_v57, %v3014_v59  ;;  %v3053_v6 = vmax.f32 %v3037_v14, 0.0  ;;  %v8442_v59 = vld [vmem:[%s14019_s9] ss:$0 sm:$0xff] }
 0x470   :  { %v3052_v37 = vmax.f32 %v3036_v53, 0.0 }
 0x472   :  { %v12432_v40 = vmax.f32 %v3052_v37, %v3053_v6 }
 0x474   :  { %v3079_v47 = vpop.permute.xlu0 %3078 }
 0x475   :  { %v3094_v5 = vsel %vm2688_vm12, %v3092_v32, %v3079_v47  ;;  %v8445_v32 = vld [vmem:[%s14022_s12] ss:$0 sm:$0xff] }
 0x4a6   :  { %v3087_v38 = vpop.permute.xlu0 %3086 }
 0x4a7   :  { %v12438_v29 = vsel %vm2704_vm13, %v3094_v5, %v3087_v38 }
 0x4a8   :  { %8931 = vmatprep.mubr.msk.f32.mxu1 %vm2721_vm14, %v12438_v29 }
 0x4a9   :  { %v8916_v9 = vpop.f32.mrf.mxu1 }
 0x4aa   :  { %v3017_v8 = vmul.f32 %v8916_v9, %v12323_v31 }
 0x4ab   :  { %v2971_v10 = vpop.f32.mrf.mxu1 }
 0x4ac   :  { %v3039_v43 = vadd.f32 %v12325_v57, %v3017_v8  ;;  %v3016_v36 = vmul.f32 %v12323_v31, %v2971_v10 }
 0x4ae   :  { %v3038_v3 = vadd.f32 %v12325_v57, %v3016_v36  ;;  %v3055_v63 = vmax.f32 %v3039_v43, 0.0 }
 0x4b0   :  { %v3054_v56 = vmax.f32 %v3038_v3, 0.0 }
 0x4b2   :  { %v3065_v24 = vmax.f32 %v3054_v56, %v3055_v63 }
 0x4b4   :  { %3072 = vrot.lane.b32.xlu1 %v3065_v24, %s10098_s3 }
 0x4e1   :  { %v8919_v27 = vpop.f32.mrf.mxu1 }
 0x4e2   :  { %v3019_v49 = vmul.f32 %v8919_v27, %v12323_v31 }
 0x4e3   :  { %v2981_v4 = vpop.f32.mrf.mxu1 }
 0x4e4   :  { %v3041_v45 = vadd.f32 %v12325_v57, %v3019_v49  ;;  %v3018_v34 = vmul.f32 %v12323_v31, %v2981_v4 }
 0x4e6   :  { %v3040_v16 = vadd.f32 %v12325_v57, %v3018_v34  ;;  %v3057_v52 = vmax.f32 %v3041_v45, 0.0 }
 0x4e8   :  { %v3056_v28 = vmax.f32 %v3040_v16, 0.0 }
 0x4ea   :  { %v3066_v35 = vmax.f32 %v3056_v28, %v3057_v52  ;;  %v8922_v18 = vpop.f32.mrf.mxu1 }
 0x4eb   :  { %v3021_v33 = vmul.f32 %v8922_v18, %v12323_v31 }
 0x4ec   :  { %3080 = vrot.lane.b32.xlu1 %v3066_v35, %s10110_s7  ;;  %v2991_v1 = vpop.f32.mrf.mxu1 }
 0x4ed   :  { %v3043_v26 = vadd.f32 %v12325_v57, %v3021_v33  ;;  %v3020_v46 = vmul.f32 %v12323_v31, %v2991_v1  ;;  %v12478_v31 = vld [vmem:[#allocation10 + $0x8] sm:$0xff] }
 0x4ee   :  { %8983 = vmatpush3.msra.mxu0 %v12478_v31 }
 0x4ef   :  { %v3042_v7 = vadd.f32 %v12325_v57, %v3020_v46  ;;  %v3059_v17 = vmax.f32 %v3043_v26, 0.0  ;;  %v12482_v57 = vld [vmem:[#allocation10] sm:$0xff]  ;;  %8984 = vmatprep.subr.mxu0 %v10102_v0 }
 0x4f0   :  { %8985 = vmatpush3.msra.mxu0 %v12482_v57 }
 0x4f1   :  { %v3058_v25 = vmax.f32 %v3042_v7, 0.0  ;;  %9000 = vmatprep.subr.mxu0 %v10102_v0 }
 0x4f3   :  { %v3067_v42 = vmax.f32 %v3058_v25, %v3059_v17 }
 0x4f5   :  { %3088 = vrot.lane.b32.xlu1 %v3067_v42, %s10111_s4 }
 0x526   :  { %v3073_v54 = vpop.permute.xlu1 %3072 }
 0x527   :  { %v3093_v44 = vsel %vm1603_vm10, %v12432_v40, %v3073_v54  ;;  %vm3999_vm10 = vcmask 256002  }
 0x55e   :  { %v3081_v48 = vpop.permute.xlu1 %3080 }
 0x55f   :  { %v3095_v20 = vsel %vm2688_vm12, %v3093_v44, %v3081_v48  ;;  %vm14042_vm12 = vcmask 257027  }
 0x567   :  { %v3089_v51 = vpop.permute.xlu1 %3088 }
 0x568   :  { %v3097_v61 = vsel %vm2704_vm13, %v3095_v20, %v3089_v51  ;;  %vm14041_vm13 = vcmask 520452  }
 0x569   :  { %8932 = vmatmul.mubr.msk.f32.vlgmr.msra.gmra.mxu1 %vm2721_vm14, %v3097_v61 }
 0x56a   :  { %8935 = vmatpush3.msra.mxu1 %v3110_v12  ;;  %8942 = vmatprep.mubr.msk.f32.mxu1 %vm2721_vm14, %v12438_v29 }
 0x56b   :  { %8936 = vmatprep.subr.mxu1 %v3109_v55 }
 0x56c   :  { %8937 = vmatpush3.msra.mxu1 %v3109_v55 }
 0x56d   :  { %8938 = vmatprep.subr.mxu1 %v3108_v21 }
 0x56e   :  { %8939 = vmatpush3.msra.mxu1 %v3108_v21 }
 0x56f   :  { %8940 = vmatprep.subr.mxu1 %v3107_v50 }
 0x570   :  { %8941 = vmatpush3.msra.mxu1 %v3107_v50 }
 0x571   :  { %8943 = vmatmul.mubr.msk.f32.vlgmr.msra.gmra.mxu1 %vm2721_vm14, %v3097_v61  ;;  %8945 = vmatprep.subr.mxu1 %v10102_v0 }
 0x572   :  { %8946 = vmatpush3.msra.mxu1 %v12497_v58  ;;  %8953 = vmatprep.mubr.msk.f32.mxu1 %vm10117_vm0, %v10102_v0 }
 0x573   :  { %8947 = vmatprep.subr.mxu1 %v10102_v0 }
 0x574   :  { %8948 = vmatpush3.msra.mxu1 %v12504_v41 }
 0x575   :  { %8949 = vmatprep.subr.mxu1 %v10102_v0 }
 0x576   :  { %8950 = vmatpush3.msra.mxu1 %v12513_v23 }
 0x577   :  { %8951 = vmatprep.subr.mxu1 %v10102_v0 }
 0x578   :  { %8952 = vmatpush3.msra.mxu1 %v12520_v30 }
 0x579   :  { %8954 = vmatmul.mubr.f32.vlgmr.msra.gmra.mxu1 %v10102_v0  ;;  %8956 = vmatprep.subr.mxu1 %v10102_v0 }
 0x57a   :  { %8957 = vmatpush3.msra.mxu1 %v12471_v15  ;;  %8964 = vmatprep.mubr.msk.f32.mxu1 %vm10117_vm0, %v10102_v0 }
 0x57b   :  { %8958 = vmatprep.subr.mxu1 %v10102_v0 }
 0x57c   :  { %8959 = vmatpush3.msra.mxu1 %v12474_v62 }
 0x57d   :  { %8960 = vmatprep.subr.mxu1 %v10102_v0 }
 0x57e   :  { %8961 = vmatpush3.msra.mxu1 %v12478_v31 }
 0x57f   :  { %8962 = vmatprep.subr.mxu1 %v10102_v0 }
 0x580   :  { %8963 = vmatpush3.msra.mxu1 %v12482_v57 }
 0x581   :  { %8965 = vmatmul.mubr.f32.vlgmr.msra.gmra.mxu1 %v10102_v0  ;;  %8967 = vmatprep.subr.mxu1 %v10102_v0 }
 0x582   :  { %8968 = vmatpush3.msra.mxu1 %v12497_v58  ;;  %8975 = vmatprep.mubr.msk.f32.mxu1 %vm10117_vm0, %v10102_v0 }
 0x583   :  { %8969 = vmatprep.subr.mxu1 %v10102_v0 }
 0x584   :  { %8970 = vmatpush3.msra.mxu1 %v12504_v41 }
 0x585   :  { %8971 = vmatprep.subr.mxu1 %v10102_v0 }
 0x586   :  { %8972 = vmatpush3.msra.mxu1 %v12513_v23 }
 0x587   :  { %8973 = vmatprep.subr.mxu1 %v10102_v0 }
 0x588   :  { %8974 = vmatpush3.msra.mxu1 %v12520_v30 }
 0x589   :  { %8989 = vmatprep.subr.mxu1 %v10102_v0 }
 0x629   :  { %v8933_v19 = vpop.f32.mrf.mxu1 }
 0x62a   :  { %v12551_v37 = vadd.f32 %v8933_v19, %v8442_v59 }
 0x62b   :  { %v3194_v22 = vpop.f32.mrf.mxu1 }
 0x62c   :  { %v12561_v60 = vadd.f32 %v8442_v59, %v3194_v22 }
 0x631   :  { %v8944_v14 = vpop.f32.mrf.mxu1 }
 0x632   :  { %v12557_v38 = vadd.f32 %v8944_v14, %v8445_v32 }
 0x633   :  { %v3275_v53 = vpop.f32.mrf.mxu1 }
 0x634   :  { %v12559_v29 = vadd.f32 %v8445_v32, %v3275_v53 }
 0x639   :  { %v3352_v6 = vpop.f32.mrf.mxu1 }
 0x63a   :  { %v3357_v40 = vrot.slane %v3352_v6, 1  ;;  %v3360_v43 = vadd.f32 %v3352_v6, %v12561_v60 }
 0x63b   :  { %v8955_v13 = vpop.f32.mrf.mxu1 }
 0x63c   :  { %v3361_v47 = vadd.f32 %v3357_v40, %v12551_v37  ;;  %v8448_v49 = vmul.f32 -1.442695, %v3360_v43 }
 0x63e   :  { %9414 = vtanh.f32 %v3361_v47  ;;  %v8449_v24 = vmul.f32 -1.442695, %v3361_v47 }
 0x641   :  { %v3487_v5 = vpop.f32.mrf.mxu1 }
 0x642   :  { %v3492_v39 = vrot.slane %v3487_v5, 1  ;;  %v3493_v11 = vrot.slane %v3487_v5, 2 }
 0x643   :  { %v8966_v9 = vpop.f32.mrf.mxu1 }
 0x644   :  { %v3496_v8 = vadd.f32 %v3492_v39, %v12559_v29  ;;  %v3497_v10 = vadd.f32 %v3493_v11, %v12557_v38 }
 0x646   :  { %9416 = vtanh.f32 %v3496_v8  ;;  %v8450_v2 = vmul.f32 -1.442695, %v3496_v8  ;;  %v8451_v27 = vmul.f32 -1.442695, %v3497_v10 }
 0x647   :  { %9418 = vtanh.f32 %v3497_v10 }
 0x648   :  { %9420 = vtanh.f32 %v3360_v43 }
 0x649   :  { %9422 = vpow2.f32 %v8449_v24 }
 0x64a   :  { %9424 = vpow2.f32 %v8450_v2 }
 0x64b   :  { %v9415_v36 = vpop.eup %9414  ;;  %9426 = vpow2.f32 %v8451_v27 }
 0x64c   :  { %3382 = vrot.lane.b32.xlu0 %v9415_v36, %s10116_s1  ;;  %9428 = vpow2.f32 %v8448_v49 }
 0x653   :  { %v9417_v3 = vpop.eup %9416 }
 0x654   :  { %v9419_v63 = vpop.eup %9418  ;;  %3516 = vrot.lane.b32.xlu1 %v9417_v3, %s10116_s1 }
 0x655   :  { %3518 = vrot.lane.b32.xlu0 %v9419_v63, %s10116_s1  ;;  %v9421_v56 = vpop.eup %9420 }
 0x656   :  { %v9423_v4 = vpop.eup %9422 }
 0x657   :  { %v3369_v45 = vadd.f32 1.0, %v9423_v4  ;;  %v9425_v34 = vpop.eup %9424 }
 0x658   :  { %3380 = vrot.lane.b32.xlu1 %v9421_v56, %s10116_s1  ;;  %v9427_v16 = vpop.eup %9426  ;;  %v3504_v12 = vadd.f32 1.0, %v9425_v34 }
 0x659   :  { %9430 = vrcp.f32 %v3369_v45  ;;  %v9429_v52 = vpop.eup %9428  ;;  %v3505_v28 = vadd.f32 1.0, %v9427_v16 }
 0x65a   :  { %v3368_v35 = vadd.f32 1.0, %v9429_v52  ;;  %9432 = vrcp.f32 %v3504_v12 }
 0x65b   :  { %9434 = vrcp.f32 %v3505_v28 }
 0x65c   :  { %9436 = vrcp.f32 %v3368_v35 }
 0x666   :  { %v9431_v18 = vpop.eup %9430 }
 0x667   :  { %v9433_v26 = vpop.eup %9432  ;;  %v3377_v20 = vmul.f32 0.0, %v9431_v18 }
 0x668   :  { %v9435_v7 = vpop.eup %9434  ;;  %v3512_v55 = vmul.f32 0.0, %v9433_v26 }
 0x669   :  { %v9437_v54 = vpop.eup %9436  ;;  %v3513_v21 = vmul.f32 0.0, %v9435_v7 }
 0x66a   :  { %v3376_v59 = vmul.f32 0.0, %v9437_v54 }
 0x6be   :  { %v3383_v33 = vpop.permute.xlu0 %3382 }
 0x6bf   :  { %v3387_v1 = vmul.f32 %v9431_v18, %v3383_v33 }
 0x6c1   :  { %3392 = vrot.lane.b32.xlu0 %v3387_v1, %s10112_s30 }
 0x6c6   :  { %v3517_v46 = vpop.permute.xlu1 %3516 }
 0x6c7   :  { %v3519_v17 = vpop.permute.xlu0 %3518  ;;  %v3522_v25 = vmul.f32 %v9433_v26, %v3517_v46 }
 0x6c8   :  { %v3523_v42 = vmul.f32 %v9435_v7, %v3519_v17 }
 0x6c9   :  { %3526 = vrot.lane.b32.xlu1 %v3522_v25, %s10112_s30 }
 0x6ca   :  { %3528 = vrot.lane.b32.xlu0 %v3523_v42, %s10112_s30  ;;  %v3381_v48 = vpop.permute.xlu1 %3380 }
 0x6cb   :  { %v3386_v44 = vmul.f32 %v9437_v54, %v3381_v48 }
 0x6cd   :  { %3390 = vrot.lane.b32.xlu1 %v3386_v44, %s10112_s30 }
 0x733   :  { %v3393_v51 = vpop.permute.xlu0 %3392 }
 0x734   :  { %v12574_v61 = vadd.f32 %v3393_v51, %v3377_v20 }
 0x736   :  { %9438 = vtanh.f32 %v12574_v61 }
 0x73b   :  { %v3527_v50 = vpop.permute.xlu1 %3526 }
 0x73c   :  { %v3529_v19 = vpop.permute.xlu0 %3528  ;;  %v12577_v22 = vadd.f32 %v3527_v50, %v3512_v55 }
 0x73d   :  { %v12579_v14 = vadd.f32 %v3529_v19, %v3513_v21 }
 0x73e   :  { %9440 = vtanh.f32 %v12577_v22 }
 0x73f   :  { %9442 = vtanh.f32 %v12579_v14  ;;  %v3391_v53 = vpop.permute.xlu1 %3390 }
 0x740   :  { %v12583_v6 = vadd.f32 %v3391_v53, %v3376_v59 }
 0x742   :  { %9444 = vtanh.f32 %v12583_v6 }
 0x743   :  { %v9439_v40 = vpop.eup %9438 }
 0x744   :  { %3404 = vrot.lane.b32.xlu0 %v9439_v40, %s10116_s1 }
 0x74b   :  { %v9441_v13 = vpop.eup %9440 }
 0x74c   :  { %v9443_v47 = vpop.eup %9442  ;;  %3538 = vrot.lane.b32.xlu1 %v9441_v13, %s10116_s1 }
 0x74d   :  { %3540 = vrot.lane.b32.xlu0 %v9443_v47, %s10116_s1 }
 0x74f   :  { %v9445_v32 = vpop.eup %9444 }
 0x750   :  { %3402 = vrot.lane.b32.xlu1 %v9445_v32, %s10116_s1 }
 0x7b6   :  { %v3405_v5 = vpop.permute.xlu0 %3404 }
 0x7b7   :  { %v12590_v11 = vmul.f32 %v9431_v18, %v3405_v5 }
 0x7b9   :  { %v3557_v63 = vrot.slane %v12590_v11, 7 }
 0x7be   :  { %v3539_v39 = vpop.permute.xlu1 %3538 }
 0x7bf   :  { %v3541_v9 = vpop.permute.xlu0 %3540  ;;  %v12592_v8 = vmul.f32 %v9433_v26, %v3539_v39 }
 0x7c0   :  { %v12594_v10 = vmul.f32 %v9435_v7, %v3541_v9 }
 0x7c1   :  { %v3705_v43 = vrot.slane %v12592_v8, 7 }
 0x7c2   :  { %v3706_v36 = vrot.slane %v12594_v10, 6  ;;  %v3403_v3 = vpop.permute.xlu1 %3402 }
 0x7c3   :  { %v12599_v56 = vmul.f32 %v9437_v54, %v3403_v3 }
 0x7c4   :  { %v3707_v24 = vsel %vm3558_vm1, %v3706_v36, %v3705_v43 }
 0x7c5   :  { %3708 = vrot.lane.b32.xlu1 %v3707_v24, %s10112_s30  ;;  %v3559_v2 = vsel %vm3558_vm1, %v3557_v63, %v12599_v56  ;;  %v3805_v24 = vrot.slane %v12577_v22, 1 }
 0x7c6   :  { %3560 = vrot.lane.b32.xlu0 %v3559_v2, %s10112_s30 }
 0x837   :  { %v3709_v27 = vpop.permute.xlu1 %3708 }
 0x838   :  { %8987 = vmatmul.mubr.msk.f32.vlgmr.msra.gmra.mxu0 %vm2721_vm14, %v3709_v27  ;;  %v3561_v49 = vpop.permute.xlu0 %3560 }
 0x839   :  { %8976 = vmatmul.mubr.msk.f32.vlgmr.msra.gmra.mxu1 %vm2721_vm14, %v3561_v49  ;;  %9001 = vmatpush3.msra.mxu0 %v12471_v15  ;;  %v3657_v49 = vrot.slane %v12574_v61, 7 }
 0x83a   :  { %8990 = vmatpush3.msra.mxu1 %v12497_v58  ;;  %9002 = vmatprep.subr.mxu0 %v10102_v0 }
 0x83b   :  { %8991 = vmatprep.subr.mxu1 %v10102_v0  ;;  %8997 = vmatprep.mubr.msk.f32.mxu1 %vm10117_vm0, %v10102_v0 }
 0x83c   :  { %8992 = vmatpush3.msra.mxu1 %v12504_v41  ;;  %9003 = vmatpush3.msra.mxu0 %v12474_v62 }
 0x83d   :  { %8993 = vmatprep.subr.mxu1 %v10102_v0  ;;  %9004 = vmatprep.subr.mxu0 %v10102_v0 }
 0x83e   :  { %8994 = vmatpush3.msra.mxu1 %v12513_v23  ;;  %9005 = vmatpush3.msra.mxu0 %v12478_v31 }
 0x83f   :  { %8995 = vmatprep.subr.mxu1 %v10102_v0  ;;  %9006 = vmatprep.subr.mxu0 %v10102_v0 }
 0x840   :  { %8996 = vmatpush3.msra.mxu1 %v12520_v30  ;;  %9007 = vmatpush3.msra.mxu0 %v12482_v57 }
 0x841   :  { %9008 = vmatprep.mubr.msk.f32.mxu0 %vm10117_vm0, %v10102_v0  ;;  %9011 = vmatprep.subr.mxu1 %v10102_v0 }
 0x842   :  { %9022 = vmatprep.subr.mxu0 %v10102_v0 }
 0x8f8   :  { %v3778_v4 = vpop.f32.mrf.mxu0 }
 0x8f9   :  { %v3783_v45 = vrot.slane %v3778_v4, 2  ;;  %v3630_v34 = vpop.f32.mrf.mxu1  ;;  %v3784_v18 = vrot.slane %v3778_v4, 3 }
 0x8fa   :  { %v8988_v16 = vpop.f32.mrf.mxu0  ;;  %v3635_v52 = vrot.slane %v3630_v34, 7  ;;  %v3639_v35 = vadd.f32 %v3630_v34, %v12551_v37 }
 0x8fb   :  { %v3787_v12 = vadd.f32 %v3783_v45, %v12559_v29  ;;  %v8977_v28 = vpop.f32.mrf.mxu1  ;;  %v3788_v1 = vadd.f32 %v3784_v18, %v12557_v38  ;;  %v3656_v45 = vrot.slane %v12583_v6, 7 }
 0x8fc   :  { %v3638_v33 = vadd.f32 %v3635_v52, %v12561_v60  ;;  %v8454_v42 = vmul.f32 -1.442695, %v3639_v35 }
 0x8fd   :  { %9446 = vtanh.f32 %v3787_v12  ;;  %v8456_v25 = vmul.f32 -1.442695, %v3787_v12  ;;  %v8457_v48 = vmul.f32 -1.442695, %v3788_v1 }
 0x8fe   :  { %9448 = vtanh.f32 %v3639_v35  ;;  %v8453_v54 = vmul.f32 -1.442695, %v3638_v33  ;;  %v3806_v35 = vrot.slane %v12579_v14, 1 }
 0x8ff   :  { %9450 = vtanh.f32 %v3638_v33 }
 0x900   :  { %9452 = vtanh.f32 %v3788_v1 }
 0x901   :  { %9454 = vpow2.f32 %v8456_v25 }
 0x902   :  { %9456 = vpow2.f32 %v8454_v42 }
 0x903   :  { %9458 = vpow2.f32 %v8453_v54 }
 0x904   :  { %9460 = vpow2.f32 %v8457_v48 }
 0x90a   :  { %v9447_v26 = vpop.eup %9446 }
 0x90b   :  { %3813 = vrot.lane.b32.xlu1 %v9447_v26, %s10116_s1  ;;  %v9449_v46 = vpop.eup %9448 }
 0x90c   :  { %v9451_v7 = vpop.eup %9450 }
 0x90d   :  { %3664 = vrot.lane.b32.xlu0 %v9451_v7, %s10116_s1  ;;  %v9453_v17 = vpop.eup %9452 }
 0x90e   :  { %v9455_v44 = vpop.eup %9454 }
 0x90f   :  { %3666 = vrot.lane.b32.xlu1 %v9449_v46, %s10116_s1  ;;  %v3795_v20 = vadd.f32 1.0, %v9455_v44  ;;  %v9457_v51 = vpop.eup %9456 }
 0x910   :  { %v9459_v55 = vpop.eup %9458  ;;  %v3647_v21 = vadd.f32 1.0, %v9457_v51 }
 0x911   :  { %3815 = vrot.lane.b32.xlu0 %v9453_v17, %s10116_s1  ;;  %9462 = vrcp.f32 %v3795_v20  ;;  %v3646_v50 = vadd.f32 1.0, %v9459_v55  ;;  %v9461_v19 = vpop.eup %9460 }
 0x912   :  { %9464 = vrcp.f32 %v3647_v21  ;;  %v3796_v59 = vadd.f32 1.0, %v9461_v19 }
 0x913   :  { %9466 = vrcp.f32 %v3646_v50 }
 0x914   :  { %9468 = vrcp.f32 %v3796_v59 }
 0x91e   :  { %v9463_v53 = vpop.eup %9462 }
 0x91f   :  { %v9465_v47 = vpop.eup %9464  ;;  %v3809_v2 = vmul.f32 %v9463_v53, %v3805_v24 }
 0x920   :  { %v9467_v39 = vpop.eup %9466  ;;  %v3661_v34 = vmul.f32 %v9465_v47, %v3657_v49 }
 0x921   :  { %v9469_v36 = vpop.eup %9468  ;;  %v3660_v12 = vmul.f32 %v9467_v39, %v3656_v45 }
 0x922   :  { %v3810_v61 = vmul.f32 %v9469_v36, %v3806_v35 }
 0x97d   :  { %v3814_v40 = vpop.permute.xlu1 %3813 }
 0x97e   :  { %v3819_v13 = vmul.f32 %v9463_v53, %v3814_v40 }
 0x97f   :  { %v3665_v9 = vpop.permute.xlu0 %3664 }
 0x980   :  { %3823 = vrot.lane.b32.xlu1 %v3819_v13, %s10112_s30  ;;  %v3670_v43 = vmul.f32 %v9467_v39, %v3665_v9 }
 0x981   :  { %v3667_v32 = vpop.permute.xlu1 %3666 }
 0x982   :  { %v3671_v5 = vmul.f32 %v9465_v47, %v3667_v32  ;;  %3674 = vrot.lane.b32.xlu0 %v3670_v43, %s10112_s30 }
 0x983   :  { %v3816_v3 = vpop.permute.xlu0 %3815 }
 0x984   :  { %3676 = vrot.lane.b32.xlu1 %v3671_v5, %s10112_s30  ;;  %v3820_v63 = vmul.f32 %v9469_v36, %v3816_v3 }
 0x986   :  { %3825 = vrot.lane.b32.xlu0 %v3820_v63, %s10112_s30 }
 0x9f2   :  { %v3824_v27 = vpop.permute.xlu1 %3823 }
 0x9f3   :  { %v12642_v4 = vadd.f32 %v3824_v27, %v3809_v2 }
 0x9f4   :  { %v3675_v28 = vpop.permute.xlu0 %3674 }
 0x9f5   :  { %9470 = vtanh.f32 %v12642_v4  ;;  %v12649_v18 = vadd.f32 %v3675_v28, %v3660_v12 }
 0x9f6   :  { %v3677_v16 = vpop.permute.xlu1 %3676 }
 0x9f7   :  { %v12646_v52 = vadd.f32 %v3677_v16, %v3661_v34 }
 0x9f8   :  { %v3826_v22 = vpop.permute.xlu0 %3825 }
 0x9f9   :  { %9472 = vtanh.f32 %v12646_v52  ;;  %v12653_v33 = vadd.f32 %v3826_v22, %v3810_v61 }
 0x9fa   :  { %9474 = vtanh.f32 %v12649_v18 }
 0x9fb   :  { %9476 = vtanh.f32 %v12653_v33 }
 0xa02   :  { %v9471_v6 = vpop.eup %9470 }
 0xa03   :  { %3835 = vrot.lane.b32.xlu1 %v9471_v6, %s10116_s1 }
 0xa06   :  { %v9473_v1 = vpop.eup %9472 }
 0xa07   :  { %3688 = vrot.lane.b32.xlu1 %v9473_v1, %s10116_s1  ;;  %v9475_v26 = vpop.eup %9474 }
 0xa08   :  { %3686 = vrot.lane.b32.xlu0 %v9475_v26, %s10116_s1  ;;  %v9477_v14 = vpop.eup %9476 }
 0xa0c   :  { %3837 = vrot.lane.b32.xlu0 %v9477_v14, %s10116_s1 }
 0xa75   :  { %v3836_v46 = vpop.permute.xlu1 %3835 }
 0xa76   :  { %v12664_v54 = vmul.f32 %v9463_v53, %v3836_v46 }
 0xa78   :  { %v4002_v55 = vrot.slane %v12664_v54, 6 }
 0xa79   :  { %v3689_v7 = vpop.permute.xlu1 %3688 }
 0xa7a   :  { %v3687_v17 = vpop.permute.xlu0 %3686  ;;  %v12662_v42 = vmul.f32 %v9465_v47, %v3689_v7 }
 0xa7b   :  { %v12660_v25 = vmul.f32 %v9467_v39, %v3687_v17 }
 0xa7d   :  { %v3854_v48 = vrot.slane %v12660_v25, 1 }
 0xa7e   :  { %v3838_v44 = vpop.permute.xlu0 %3837 }
 0xa7f   :  { %v12667_v20 = vmul.f32 %v9469_v36, %v3838_v44  ;;  %v3855_v51 = vsel %vm3558_vm1, %v12662_v42, %v3854_v48 }
 0xa80   :  { %3856 = vrot.lane.b32.xlu0 %v3855_v51, %s10112_s30 }
 0xa81   :  { %v4003_v21 = vrot.slane %v12667_v20, 5 }
 0xa83   :  { %v4004_v50 = vsel %vm3558_vm1, %v4003_v21, %v4002_v55 }
 0xa84   :  { %4005 = vrot.lane.b32.xlu1 %v4004_v50, %s10112_s30 }
 0xaf2   :  { %v3857_v19 = vpop.permute.xlu0 %3856 }
 0xaf3   :  { %8998 = vmatmul.mubr.msk.f32.vlgmr.msra.gmra.mxu1 %vm2721_vm14, %v3857_v19 }
 0xaf4   :  { %9012 = vmatpush3.msra.mxu1 %v12497_v58  ;;  %9019 = vmatprep.mubr.msk.f32.mxu1 %vm10117_vm0, %v10102_v0 }
 0xaf5   :  { %9013 = vmatprep.subr.mxu1 %v10102_v0 }
 0xaf6   :  { %v4006_v59 = vpop.permute.xlu1 %4005  ;;  %9014 = vmatpush3.msra.mxu1 %v12504_v41 }
 0xaf7   :  { %9009 = vmatmul.mubr.msk.f32.vlgmr.msra.gmra.mxu0 %vm2721_vm14, %v4006_v59  ;;  %9015 = vmatprep.subr.mxu1 %v10102_v0 }
 0xaf8   :  { %9016 = vmatpush3.msra.mxu1 %v12513_v23  ;;  %9023 = vmatpush3.msra.mxu0 %v12471_v15 }
 0xaf9   :  { %9017 = vmatprep.subr.mxu1 %v10102_v0  ;;  %9024 = vmatprep.subr.mxu0 %v10102_v0 }
 0xafa   :  { %9018 = vmatpush3.msra.mxu1 %v12520_v30  ;;  %9025 = vmatpush3.msra.mxu0 %v12474_v62 }
 0xafb   :  { %9026 = vmatprep.subr.mxu0 %v10102_v0  ;;  %9030 = vmatprep.mubr.msk.f32.mxu0 %vm10117_vm0, %v10102_v0 }
 0xafc   :  { %9027 = vmatpush3.msra.mxu0 %v12478_v31  ;;  %9033 = vmatprep.subr.mxu1 %v10102_v0 }
 0xafd   :  { %9028 = vmatprep.subr.mxu0 %v10102_v0 }
 0xafe   :  { %9029 = vmatpush3.msra.mxu0 %v12482_v57 }
 0xaff   :  { %9044 = vmatprep.subr.mxu0 %v10102_v0 }
 0xbb3   :  { %v3926_v53 = vpop.f32.mrf.mxu1 }
 0xbb4   :  { %v3931_v40 = vrot.slane %v3926_v53, 6  ;;  %v3932_v13 = vrot.slane %v3926_v53, 7 }
 0xbb5   :  { %v8999_v47 = vpop.f32.mrf.mxu1 }
 0xbb6   :  { %v3935_v32 = vadd.f32 %v3931_v40, %v12561_v60  ;;  %v3936_v5 = vadd.f32 %v3932_v13, %v12551_v37  ;;  %v3953_v40 = vrot.slane %v12649_v18, 7  ;;  %v3954_v13 = vrot.slane %v12646_v52, 7 }
 0xbb7   :  { %v4075_v39 = vpop.f32.mrf.mxu0 }
 0xbb8   :  { %9478 = vtanh.f32 %v3935_v32  ;;  %v4080_v9 = vrot.slane %v4075_v39, 3  ;;  %v4081_v43 = vrot.slane %v4075_v39, 4  ;;  %v8459_v45 = vmul.f32 -1.442695, %v3935_v32 }
 0xbb9   :  { %9480 = vtanh.f32 %v3936_v5  ;;  %v9010_v36 = vpop.f32.mrf.mxu0  ;;  %v8460_v34 = vmul.f32 -1.442695, %v3936_v5  ;;  %v4102_v39 = vrot.slane %v12642_v4, 1 }
 0xbba   :  { %v4084_v3 = vadd.f32 %v4080_v9, %v12559_v29  ;;  %v4085_v63 = vadd.f32 %v4081_v43, %v12557_v38  ;;  %v4103_v36 = vrot.slane %v12653_v33, 1 }
 0xbbc   :  { %9482 = vtanh.f32 %v4084_v3  ;;  %v8462_v16 = vmul.f32 -1.442695, %v4084_v3  ;;  %v8463_v12 = vmul.f32 -1.442695, %v4085_v63 }
 0xbbd   :  { %9484 = vtanh.f32 %v4085_v63 }
 0xbbe   :  { %9486 = vpow2.f32 %v8459_v45 }
 0xbbf   :  { %9488 = vpow2.f32 %v8460_v34 }
 0xbc0   :  { %9490 = vpow2.f32 %v8462_v16 }
 0xbc1   :  { %9492 = vpow2.f32 %v8463_v12 }
 0xbc5   :  { %v9479_v24 = vpop.eup %9478 }
 0xbc6   :  { %v9481_v2 = vpop.eup %9480  ;;  %3961 = vrot.lane.b32.xlu0 %v9479_v24, %s10116_s1 }
 0xbc7   :  { %3963 = vrot.lane.b32.xlu1 %v9481_v2, %s10116_s1 }
 0xbc9   :  { %v9483_v27 = vpop.eup %9482 }
 0xbca   :  { %v9485_v49 = vpop.eup %9484  ;;  %4110 = vrot.lane.b32.xlu0 %v9483_v27, %s10116_s1 }
 0xbcb   :  { %4112 = vrot.lane.b32.xlu1 %v9485_v49, %s10116_s1  ;;  %v9487_v28 = vpop.eup %9486 }
 0xbcc   :  { %v9489_v35 = vpop.eup %9488  ;;  %v3943_v61 = vadd.f32 1.0, %v9487_v28 }
 0xbcd   :  { %v9491_v22 = vpop.eup %9490  ;;  %v3944_v6 = vadd.f32 1.0, %v9489_v35 }
 0xbce   :  { %v9493_v1 = vpop.eup %9492  ;;  %9494 = vrcp.f32 %v3943_v61  ;;  %v4092_v26 = vadd.f32 1.0, %v9491_v22 }
 0xbcf   :  { %9496 = vrcp.f32 %v3944_v6  ;;  %v4093_v14 = vadd.f32 1.0, %v9493_v1 }
 0xbd0   :  { %9498 = vrcp.f32 %v4092_v26 }
 0xbd1   :  { %9500 = vrcp.f32 %v4093_v14 }
 0xbdb   :  { %v9495_v46 = vpop.eup %9494 }
 0xbdc   :  { %v9497_v17 = vpop.eup %9496  ;;  %v3957_v47 = vmul.f32 %v9495_v46, %v3953_v40 }
 0xbdd   :  { %v9499_v55 = vpop.eup %9498  ;;  %v3958_v32 = vmul.f32 %v9497_v17, %v3954_v13 }
 0xbde   :  { %v9501_v50 = vpop.eup %9500  ;;  %v4106_v63 = vmul.f32 %v9499_v55, %v4102_v39 }
 0xbdf   :  { %v4107_v18 = vmul.f32 %v9501_v50, %v4103_v36 }
 0xc38   :  { %v3962_v7 = vpop.permute.xlu0 %3961 }
 0xc39   :  { %v3967_v48 = vmul.f32 %v9495_v46, %v3962_v7  ;;  %v3964_v44 = vpop.permute.xlu1 %3963 }
 0xc3a   :  { %v3968_v51 = vmul.f32 %v9497_v17, %v3964_v44 }
 0xc3b   :  { %3971 = vrot.lane.b32.xlu0 %v3967_v48, %s10112_s30 }
 0xc3c   :  { %3973 = vrot.lane.b32.xlu1 %v3968_v51, %s10112_s30  ;;  %v4111_v21 = vpop.permute.xlu0 %4110 }
 0xc3d   :  { %v4113_v19 = vpop.permute.xlu1 %4112  ;;  %v4116_v59 = vmul.f32 %v9499_v55, %v4111_v21 }
 0xc3e   :  { %v4117_v53 = vmul.f32 %v9501_v50, %v4113_v19 }
 0xc3f   :  { %4120 = vrot.lane.b32.xlu0 %v4116_v59, %s10112_s30 }
 0xc40   :  { %4122 = vrot.lane.b32.xlu1 %v4117_v53, %s10112_s30 }
 0xcad   :  { %v3972_v5 = vpop.permute.xlu0 %3971 }
 0xcae   :  { %v3974_v9 = vpop.permute.xlu1 %3973  ;;  %v12713_v43 = vadd.f32 %v3972_v5, %v3957_v47 }
 0xcaf   :  { %v12716_v3 = vadd.f32 %v3974_v9, %v3958_v32 }
 0xcb0   :  { %9502 = vtanh.f32 %v12713_v43 }
 0xcb1   :  { %9504 = vtanh.f32 %v12716_v3  ;;  %v4121_v24 = vpop.permute.xlu0 %4120 }
 0xcb2   :  { %v4123_v52 = vpop.permute.xlu1 %4122  ;;  %v12720_v2 = vadd.f32 %v4121_v24, %v4106_v63 }
 0xcb3   :  { %v12722_v27 = vadd.f32 %v4123_v52, %v4107_v18 }
 0xcb4   :  { %9506 = vtanh.f32 %v12720_v2 }
 0xcb5   :  { %9508 = vtanh.f32 %v12722_v27 }
 0xcbd   :  { %v9503_v4 = vpop.eup %9502 }
 0xcbe   :  { %v9505_v33 = vpop.eup %9504  ;;  %3983 = vrot.lane.b32.xlu0 %v9503_v4, %s10116_s1 }
 0xcbf   :  { %3985 = vrot.lane.b32.xlu1 %v9505_v33, %s10116_s1 }
 0xcc1   :  { %v9507_v49 = vpop.eup %9506 }
 0xcc2   :  { %v9509_v45 = vpop.eup %9508  ;;  %4132 = vrot.lane.b32.xlu0 %v9507_v49, %s10116_s1 }
 0xcc3   :  { %4134 = vrot.lane.b32.xlu1 %v9509_v45, %s10116_s1 }
 0xd30   :  { %v3984_v34 = vpop.permute.xlu0 %3983 }
 0xd31   :  { %v3986_v16 = vpop.permute.xlu1 %3985  ;;  %v12730_v12 = vmul.f32 %v9495_v46, %v3984_v34 }
 0xd32   :  { %v12732_v28 = vmul.f32 %v9497_v17, %v3986_v16 }
 0xd33   :  { %v4151_v35 = vrot.slane %v12730_v12, 2 }
 0xd34   :  { %v4152_v61 = vrot.slane %v12732_v28, 1  ;;  %v4133_v22 = vpop.permute.xlu0 %4132 }
 0xd35   :  { %v4135_v6 = vpop.permute.xlu1 %4134  ;;  %v12736_v1 = vmul.f32 %v9499_v55, %v4133_v22 }
 0xd36   :  { %v12738_v26 = vmul.f32 %v9501_v50, %v4135_v6  ;;  %v4153_v14 = vsel %vm3558_vm1, %v4152_v61, %v4151_v35 }
 0xd37   :  { %v4300_v7 = vrot.slane %v12736_v1, 5  ;;  %4154 = vrot.lane.b32.xlu0 %v4153_v14, %s10112_s30 }
 0xd38   :  { %v4301_v46 = vrot.slane %v12738_v26, 4 }
 0xd3a   :  { %v4302_v17 = vsel %vm3558_vm1, %v4301_v46, %v4300_v7 }
 0xd3b   :  { %4303 = vrot.lane.b32.xlu1 %v4302_v17, %s10112_s30  ;;  %v4251_v17 = vrot.slane %v12713_v43, 7 }
 0xda9   :  { %v4155_v48 = vpop.permute.xlu0 %4154 }
 0xdaa   :  { %9020 = vmatmul.mubr.msk.f32.vlgmr.msra.gmra.mxu1 %vm2721_vm14, %v4155_v48  ;;  %v4252_v48 = vrot.slane %v12716_v3, 7 }
 0xdab   :  { %9034 = vmatpush3.msra.mxu1 %v12497_v58  ;;  %9041 = vmatprep.mubr.msk.f32.mxu1 %vm10117_vm0, %v10102_v0 }
 0xdac   :  { %9035 = vmatprep.subr.mxu1 %v10102_v0 }
 0xdad   :  { %v4304_v44 = vpop.permute.xlu1 %4303  ;;  %9036 = vmatpush3.msra.mxu1 %v12504_v41 }
 0xdae   :  { %9031 = vmatmul.mubr.msk.f32.vlgmr.msra.gmra.mxu0 %vm2721_vm14, %v4304_v44  ;;  %9037 = vmatprep.subr.mxu1 %v10102_v0 }
 0xdaf   :  { %9038 = vmatpush3.msra.mxu1 %v12513_v23  ;;  %9045 = vmatpush3.msra.mxu0 %v12471_v15 }
 0xdb0   :  { %9039 = vmatprep.subr.mxu1 %v10102_v0  ;;  %9046 = vmatprep.subr.mxu0 %v10102_v0 }
 0xdb1   :  { %9040 = vmatpush3.msra.mxu1 %v12520_v30  ;;  %9047 = vmatpush3.msra.mxu0 %v12474_v62 }
 0xdb2   :  { %9048 = vmatprep.subr.mxu0 %v10102_v0  ;;  %9052 = vmatprep.mubr.msk.f32.mxu0 %vm10117_vm0, %v10102_v0 }
 0xdb3   :  { %9049 = vmatpush3.msra.mxu0 %v12478_v31  ;;  %9055 = vmatprep.subr.mxu1 %v10102_v0 }
 0xdb4   :  { %9050 = vmatprep.subr.mxu0 %v10102_v0 }
 0xdb5   :  { %9051 = vmatpush3.msra.mxu0 %v12482_v57 }
 0xdb6   :  { %9066 = vmatprep.subr.mxu0 %v10102_v0 }
 0xe6a   :  { %v4224_v15 = vpop.f32.mrf.mxu1 }
 0xe6b   :  { %v4229_v58 = vrot.slane %v4224_v15, 5  ;;  %v4230_v41 = vrot.slane %v4224_v15, 6 }
 0xe6c   :  { %v9021_v23 = vpop.f32.mrf.mxu1 }
 0xe6d   :  { %v4233_v62 = vadd.f32 %v4229_v58, %v12561_v60  ;;  %v4234_v30 = vadd.f32 %v4230_v41, %v12551_v37  ;;  %v4400_v41 = vrot.slane %v12720_v2, 1 }
 0xe6e   :  { %v4373_v51 = vpop.f32.mrf.mxu0 }
 0xe6f   :  { %9510 = vtanh.f32 %v4233_v62  ;;  %v4378_v55 = vrot.slane %v4373_v51, 4  ;;  %v4379_v31 = vrot.slane %v4373_v51, 5  ;;  %v8465_v13 = vmul.f32 -1.442695, %v4233_v62 }
 0xe70   :  { %9512 = vtanh.f32 %v4234_v30  ;;  %v9032_v21 = vpop.f32.mrf.mxu0  ;;  %v8466_v47 = vmul.f32 -1.442695, %v4234_v30  ;;  %v4401_v30 = vrot.slane %v12722_v27, 1 }
 0xe71   :  { %v4382_v50 = vadd.f32 %v4378_v55, %v12559_v29  ;;  %v4383_v57 = vadd.f32 %v4379_v31, %v12557_v38 }
 0xe73   :  { %9514 = vtanh.f32 %v4382_v50  ;;  %v8468_v32 = vmul.f32 -1.442695, %v4382_v50  ;;  %v8469_v5 = vmul.f32 -1.442695, %v4383_v57 }
 0xe74   :  { %9516 = vtanh.f32 %v4383_v57 }
 0xe75   :  { %9518 = vpow2.f32 %v8465_v13 }
 0xe76   :  { %9520 = vpow2.f32 %v8466_v47 }
 0xe77   :  { %9522 = vpow2.f32 %v8468_v32 }
 0xe78   :  { %9524 = vpow2.f32 %v8469_v5 }
 0xe7c   :  { %v9511_v19 = vpop.eup %9510 }
 0xe7d   :  { %v9513_v59 = vpop.eup %9512  ;;  %4259 = vrot.lane.b32.xlu0 %v9511_v19, %s10116_s1 }
 0xe7e   :  { %4261 = vrot.lane.b32.xlu1 %v9513_v59, %s10116_s1 }
 0xe80   :  { %v9515_v53 = vpop.eup %9514 }
 0xe81   :  { %v9517_v40 = vpop.eup %9516  ;;  %4408 = vrot.lane.b32.xlu0 %v9515_v53, %s10116_s1 }
 0xe82   :  { %4410 = vrot.lane.b32.xlu1 %v9517_v40, %s10116_s1  ;;  %v9519_v39 = vpop.eup %9518 }
 0xe83   :  { %v9521_v9 = vpop.eup %9520  ;;  %v4241_v36 = vadd.f32 1.0, %v9519_v39 }
 0xe84   :  { %v9523_v63 = vpop.eup %9522  ;;  %v4242_v18 = vadd.f32 1.0, %v9521_v9 }
 0xe85   :  { %v9525_v24 = vpop.eup %9524  ;;  %9526 = vrcp.f32 %v4241_v36  ;;  %v4390_v52 = vadd.f32 1.0, %v9523_v63 }
 0xe86   :  { %9528 = vrcp.f32 %v4242_v18  ;;  %v4391_v4 = vadd.f32 1.0, %v9525_v24 }
 0xe87   :  { %9530 = vrcp.f32 %v4390_v52 }
 0xe88   :  { %9532 = vrcp.f32 %v4391_v4 }
 0xe92   :  { %v9527_v33 = vpop.eup %9526 }
 0xe93   :  { %v9529_v45 = vpop.eup %9528  ;;  %v4255_v44 = vmul.f32 %v9527_v33, %v4251_v17 }
 0xe94   :  { %v9531_v61 = vpop.eup %9530  ;;  %v4256_v15 = vmul.f32 %v9529_v45, %v4252_v48 }
 0xe95   :  { %v9533_v6 = vpop.eup %9532  ;;  %v4404_v55 = vmul.f32 %v9531_v61, %v4400_v41 }
 0xe96   :  { %v4405_v43 = vmul.f32 %v9533_v6, %v4401_v30 }
 0xeef   :  { %v4260_v49 = vpop.permute.xlu0 %4259 }
 0xef0   :  { %v4262_v34 = vpop.permute.xlu1 %4261  ;;  %v4265_v16 = vmul.f32 %v9527_v33, %v4260_v49 }
 0xef1   :  { %v4266_v35 = vmul.f32 %v9529_v45, %v4262_v34  ;;  %v12837_v34 = vld [vmem:[%s14018_s8 + $0x8] sm:$0xff] }
 0xef2   :  { %4269 = vrot.lane.b32.xlu0 %v4265_v16, %s10112_s30  ;;  %v12840_v16 = vld [vmem:[#allocation10 + $0x18] sm:$0xff] }
 0xef3   :  { %4271 = vrot.lane.b32.xlu1 %v4266_v35, %s10112_s30  ;;  %v4409_v22 = vpop.permute.xlu0 %4408  ;;  %v12848_v35 = vld [vmem:[%s14018_s8] sm:$0xff] }
 0xef4   :  { %v4411_v14 = vpop.permute.xlu1 %4410  ;;  %v4414_v7 = vmul.f32 %v9531_v61, %v4409_v22  ;;  %v12857_v22 = vld [vmem:[#allocation10 + $0x8] sm:$0xff] }
 0xef5   :  { %v4415_v46 = vmul.f32 %v9533_v6, %v4411_v14 }
 0xef6   :  { %4418 = vrot.lane.b32.xlu0 %v4414_v7, %s10112_s30 }
 0xef7   :  { %4420 = vrot.lane.b32.xlu1 %v4415_v46, %s10112_s30 }
 0xf64   :  { %v4270_v58 = vpop.permute.xlu0 %4269 }
 0xf65   :  { %v4272_v23 = vpop.permute.xlu1 %4271  ;;  %v12783_v62 = vadd.f32 %v4270_v58, %v4255_v44 }
 0xf66   :  { %v12786_v51 = vadd.f32 %v4272_v23, %v4256_v15 }
 0xf67   :  { %9534 = vtanh.f32 %v12783_v62 }
 0xf68   :  { %9536 = vtanh.f32 %v12786_v51  ;;  %v4419_v31 = vpop.permute.xlu0 %4418 }
 0xf69   :  { %v4421_v3 = vpop.permute.xlu1 %4420  ;;  %v12790_v21 = vadd.f32 %v4419_v31, %v4404_v55 }
 0xf6a   :  { %v12792_v50 = vadd.f32 %v4421_v3, %v4405_v43 }
 0xf6b   :  { %9538 = vtanh.f32 %v12790_v21 }
 0xf6c   :  { %9540 = vtanh.f32 %v12792_v50 }
 0xf74   :  { %v9535_v2 = vpop.eup %9534 }
 0xf75   :  { %v9537_v27 = vpop.eup %9536  ;;  %4281 = vrot.lane.b32.xlu0 %v9535_v2, %s10116_s1 }
 0xf76   :  { %4283 = vrot.lane.b32.xlu1 %v9537_v27, %s10116_s1 }
 0xf78   :  { %v9539_v57 = vpop.eup %9538 }
 0xf79   :  { %v9541_v19 = vpop.eup %9540  ;;  %4430 = vrot.lane.b32.xlu0 %v9539_v57, %s10116_s1 }
 0xf7a   :  { %4432 = vrot.lane.b32.xlu1 %v9541_v19, %s10116_s1 }
 0xfe7   :  { %v4282_v59 = vpop.permute.xlu0 %4281 }
 0xfe8   :  { %v4284_v53 = vpop.permute.xlu1 %4283  ;;  %v12800_v40 = vmul.f32 %v9527_v33, %v4282_v59  ;;  %v12820_v33 = vld [vmem:[%s14018_s8 + $0x18] sm:$0xff] }
 0xfe9   :  { %v12802_v13 = vmul.f32 %v9529_v45, %v4284_v53  ;;  %v12829_v45 = vld [vmem:[%s14018_s8 + $0x10] sm:$0xff] }
 0xfea   :  { %v4449_v47 = vrot.slane %v12800_v40, 3 }
 0xfeb   :  { %v4450_v32 = vrot.slane %v12802_v13, 2  ;;  %v4431_v5 = vpop.permute.xlu0 %4430 }
 0xfec   :  { %v4433_v39 = vpop.permute.xlu1 %4432  ;;  %v12806_v9 = vmul.f32 %v9531_v61, %v4431_v5  ;;  %v12851_v61 = vld [vmem:[#allocation10 + $0x10] sm:$0xff] }
 0xfed   :  { %v12808_v36 = vmul.f32 %v9533_v6, %v4433_v39  ;;  %v4451_v63 = vsel %vm3558_vm1, %v4450_v32, %v4449_v47  ;;  %v12862_v6 = vld [vmem:[#allocation10] sm:$0xff] }
 0xfee   :  { %v4598_v18 = vrot.slane %v12806_v9, 4  ;;  %4452 = vrot.lane.b32.xlu0 %v4451_v63, %s10112_s30 }
 0xfef   :  { %v4599_v24 = vrot.slane %v12808_v36, 3 }
 0xff1   :  { %v4600_v52 = vsel %vm3558_vm1, %v4599_v24, %v4598_v18 }
 0xff2   :  { %4601 = vrot.lane.b32.xlu1 %v4600_v52, %s10112_s30 }
0x1060   :  { %v4453_v4 = vpop.permute.xlu0 %4452 }
0x1061   :  { %9042 = vmatmul.mubr.msk.f32.vlgmr.msra.gmra.mxu1 %vm2721_vm14, %v4453_v4 }
0x1062   :  { %9056 = vmatpush3.msra.mxu1 %v12820_v33  ;;  %9063 = vmatprep.mubr.msk.f32.mxu1 %vm10117_vm0, %v10102_v0 }
0x1063   :  { %9057 = vmatprep.subr.mxu1 %v10102_v0 }
0x1064   :  { %v4602_v49 = vpop.permute.xlu1 %4601  ;;  %9058 = vmatpush3.msra.mxu1 %v12829_v45 }
0x1065   :  { %9053 = vmatmul.mubr.msk.f32.vlgmr.msra.gmra.mxu0 %vm2721_vm14, %v4602_v49  ;;  %9059 = vmatprep.subr.mxu1 %v10102_v0 }
0x1066   :  { %9060 = vmatpush3.msra.mxu1 %v12837_v34  ;;  %9067 = vmatpush3.msra.mxu0 %v12840_v16 }
0x1067   :  { %9061 = vmatprep.subr.mxu1 %v10102_v0  ;;  %9068 = vmatprep.subr.mxu0 %v10102_v0 }
0x1068   :  { %9062 = vmatpush3.msra.mxu1 %v12848_v35  ;;  %9069 = vmatpush3.msra.mxu0 %v12851_v61 }
0x1069   :  { %9070 = vmatprep.subr.mxu0 %v10102_v0  ;;  %9074 = vmatprep.mubr.msk.f32.mxu0 %vm10117_vm0, %v10102_v0 }
0x106a   :  { %9071 = vmatpush3.msra.mxu0 %v12857_v22  ;;  %9077 = vmatprep.subr.mxu1 %v10102_v0 }
0x106b   :  { %9072 = vmatprep.subr.mxu0 %v10102_v0 }
0x106c   :  { %9073 = vmatpush3.msra.mxu0 %v12862_v6 }
0x106d   :  { %9088 = vmatprep.subr.mxu0 %v10102_v0 }
0x1121   :  { %v4522_v14 = vpop.f32.mrf.mxu1 }
0x1122   :  { %v4527_v7 = vrot.slane %v4522_v14, 4  ;;  %v4528_v46 = vrot.slane %v4522_v14, 5 }
0x1123   :  { %v9043_v17 = vpop.f32.mrf.mxu1 }
0x1124   :  { %v4531_v48 = vadd.f32 %v4527_v7, %v12561_v60  ;;  %v4532_v44 = vadd.f32 %v4528_v46, %v12551_v37 }
0x1125   :  { %v4671_v15 = vpop.f32.mrf.mxu0 }
0x1126   :  { %9542 = vtanh.f32 %v4531_v48  ;;  %v4676_v58 = vrot.slane %v4671_v15, 5  ;;  %v4677_v41 = vrot.slane %v4671_v15, 6  ;;  %v8471_v27 = vmul.f32 -1.442695, %v4531_v48 }
0x1127   :  { %9544 = vtanh.f32 %v4532_v44  ;;  %v9054_v23 = vpop.f32.mrf.mxu0  ;;  %v8472_v57 = vmul.f32 -1.442695, %v4532_v44 }
0x1128   :  { %v4680_v30 = vadd.f32 %v4676_v58, %v12559_v29  ;;  %v4681_v55 = vadd.f32 %v4677_v41, %v12557_v38  ;;  %v4549_v23 = vrot.slane %v12783_v62, 7 }
0x112a   :  { %9546 = vtanh.f32 %v4680_v30  ;;  %v8474_v19 = vmul.f32 -1.442695, %v4680_v30  ;;  %v8475_v59 = vmul.f32 -1.442695, %v4681_v55  ;;  %v4550_v30 = vrot.slane %v12786_v51, 7 }
0x112b   :  { %9548 = vtanh.f32 %v4681_v55 }
0x112c   :  { %9550 = vpow2.f32 %v8471_v27 }
0x112d   :  { %9552 = vpow2.f32 %v8472_v57  ;;  %v4699_v57 = vrot.slane %v12792_v50, 1 }
0x112e   :  { %9554 = vpow2.f32 %v8474_v19 }
0x112f   :  { %9556 = vpow2.f32 %v8475_v59 }
0x1133   :  { %v9543_v43 = vpop.eup %9542 }
0x1134   :  { %v9545_v31 = vpop.eup %9544  ;;  %4557 = vrot.lane.b32.xlu0 %v9543_v43, %s10116_s1 }
0x1135   :  { %4559 = vrot.lane.b32.xlu1 %v9545_v31, %s10116_s1 }
0x1137   :  { %v9547_v3 = vpop.eup %9546 }
0x1138   :  { %v9549_v2 = vpop.eup %9548  ;;  %4706 = vrot.lane.b32.xlu0 %v9547_v3, %s10116_s1  ;;  %v4698_v3 = vrot.slane %v12790_v21, 1 }
0x1139   :  { %4708 = vrot.lane.b32.xlu1 %v9549_v2, %s10116_s1  ;;  %v9551_v53 = vpop.eup %9550 }
0x113a   :  { %v9553_v47 = vpop.eup %9552  ;;  %v4539_v32 = vadd.f32 1.0, %v9551_v53 }
0x113b   :  { %v9555_v5 = vpop.eup %9554  ;;  %v4540_v39 = vadd.f32 1.0, %v9553_v47 }
0x113c   :  { %v9557_v63 = vpop.eup %9556  ;;  %9558 = vrcp.f32 %v4539_v32  ;;  %v4688_v18 = vadd.f32 1.0, %v9555_v5 }
0x113d   :  { %9560 = vrcp.f32 %v4540_v39  ;;  %v4689_v24 = vadd.f32 1.0, %v9557_v63 }
0x113e   :  { %9562 = vrcp.f32 %v4688_v18 }
0x113f   :  { %9564 = vrcp.f32 %v4689_v24 }
0x1149   :  { %v9559_v52 = vpop.eup %9558 }
0x114a   :  { %v9561_v49 = vpop.eup %9560  ;;  %v4553_v55 = vmul.f32 %v9559_v52, %v4549_v23 }
0x114b   :  { %v9563_v17 = vpop.eup %9562  ;;  %v4554_v43 = vmul.f32 %v9561_v49, %v4550_v30 }
0x114c   :  { %v9565_v44 = vpop.eup %9564  ;;  %v4702_v59 = vmul.f32 %v9563_v17, %v4698_v3 }
0x114d   :  { %v4703_v62 = vmul.f32 %v9565_v44, %v4699_v57 }
0x11a6   :  { %v4558_v4 = vpop.permute.xlu0 %4557 }
0x11a7   :  { %v4560_v14 = vpop.permute.xlu1 %4559  ;;  %v4563_v7 = vmul.f32 %v9559_v52, %v4558_v4 }
0x11a8   :  { %v4564_v46 = vmul.f32 %v9561_v49, %v4560_v14 }
0x11a9   :  { %4567 = vrot.lane.b32.xlu0 %v4563_v7, %s10112_s30 }
0x11aa   :  { %4569 = vrot.lane.b32.xlu1 %v4564_v46, %s10112_s30  ;;  %v4707_v48 = vpop.permute.xlu0 %4706 }
0x11ab   :  { %v4709_v15 = vpop.permute.xlu1 %4708  ;;  %v4712_v58 = vmul.f32 %v9563_v17, %v4707_v48 }
0x11ac   :  { %v4713_v41 = vmul.f32 %v9565_v44, %v4709_v15 }
0x11ad   :  { %4716 = vrot.lane.b32.xlu0 %v4712_v58, %s10112_s30 }
0x11ae   :  { %4718 = vrot.lane.b32.xlu1 %v4713_v41, %s10112_s30 }
0x121b   :  { %v4568_v31 = vpop.permute.xlu0 %4567 }
0x121c   :  { %v4570_v2 = vpop.permute.xlu1 %4569  ;;  %v12881_v27 = vadd.f32 %v4568_v31, %v4553_v55 }
0x121d   :  { %v12884_v19 = vadd.f32 %v4570_v2, %v4554_v43 }
0x121e   :  { %9566 = vtanh.f32 %v12881_v27 }
0x121f   :  { %9568 = vtanh.f32 %v12884_v19  ;;  %v4717_v53 = vpop.permute.xlu0 %4716 }
0x1220   :  { %v4719_v51 = vpop.permute.xlu1 %4718  ;;  %v12888_v47 = vadd.f32 %v4717_v53, %v4702_v59 }
0x1221   :  { %v12890_v32 = vadd.f32 %v4719_v51, %v4703_v62 }
0x1222   :  { %9570 = vtanh.f32 %v12888_v47 }
0x1223   :  { %9572 = vtanh.f32 %v12890_v32 }
0x122b   :  { %v9567_v21 = vpop.eup %9566 }
0x122c   :  { %v9569_v50 = vpop.eup %9568  ;;  %4579 = vrot.lane.b32.xlu0 %v9567_v21, %s10116_s1 }
0x122d   :  { %4581 = vrot.lane.b32.xlu1 %v9569_v50, %s10116_s1 }
0x122f   :  { %v9571_v5 = vpop.eup %9570 }
0x1230   :  { %v9573_v39 = vpop.eup %9572  ;;  %4728 = vrot.lane.b32.xlu0 %v9571_v5, %s10116_s1 }
0x1231   :  { %4730 = vrot.lane.b32.xlu1 %v9573_v39, %s10116_s1 }
0x129e   :  { %v4580_v63 = vpop.permute.xlu0 %4579 }
0x129f   :  { %v4582_v18 = vpop.permute.xlu1 %4581  ;;  %v12898_v24 = vmul.f32 %v9559_v52, %v4580_v63 }
0x12a0   :  { %v12900_v4 = vmul.f32 %v9561_v49, %v4582_v18 }
0x12a1   :  { %v4747_v14 = vrot.slane %v12898_v24, 4 }
0x12a2   :  { %v4748_v7 = vrot.slane %v12900_v4, 3  ;;  %v4729_v46 = vpop.permute.xlu0 %4728 }
0x12a3   :  { %v4731_v48 = vpop.permute.xlu1 %4730  ;;  %v12904_v15 = vmul.f32 %v9563_v17, %v4729_v46 }
0x12a4   :  { %v12906_v58 = vmul.f32 %v9565_v44, %v4731_v48  ;;  %v4749_v41 = vsel %vm3558_vm1, %v4748_v7, %v4747_v14 }
0x12a5   :  { %v4896_v23 = vrot.slane %v12904_v15, 3  ;;  %4750 = vrot.lane.b32.xlu0 %v4749_v41, %s10112_s30 }
0x12a6   :  { %v4897_v52 = vrot.slane %v12906_v58, 2 }
0x12a8   :  { %v4898_v49 = vsel %vm3558_vm1, %v4897_v52, %v4896_v23 }
0x12a9   :  { %4899 = vrot.lane.b32.xlu1 %v4898_v49, %s10112_s30 }
0x1317   :  { %v4751_v30 = vpop.permute.xlu0 %4750 }
0x1318   :  { %9064 = vmatmul.mubr.msk.f32.vlgmr.msra.gmra.mxu1 %vm2721_vm14, %v4751_v30 }
0x1319   :  { %9078 = vmatpush3.msra.mxu1 %v12820_v33  ;;  %9085 = vmatprep.mubr.msk.f32.mxu1 %vm10117_vm0, %v10102_v0 }
0x131a   :  { %9079 = vmatprep.subr.mxu1 %v10102_v0 }
0x131b   :  { %v4900_v17 = vpop.permute.xlu1 %4899  ;;  %9080 = vmatpush3.msra.mxu1 %v12829_v45 }
0x131c   :  { %9075 = vmatmul.mubr.msk.f32.vlgmr.msra.gmra.mxu0 %vm2721_vm14, %v4900_v17  ;;  %9081 = vmatprep.subr.mxu1 %v10102_v0 }
0x131d   :  { %9082 = vmatpush3.msra.mxu1 %v12837_v34  ;;  %9089 = vmatpush3.msra.mxu0 %v12840_v16 }
0x131e   :  { %9083 = vmatprep.subr.mxu1 %v10102_v0  ;;  %9090 = vmatprep.subr.mxu0 %v10102_v0 }
0x131f   :  { %9084 = vmatpush3.msra.mxu1 %v12848_v35  ;;  %9091 = vmatpush3.msra.mxu0 %v12851_v61 }
0x1320   :  { %9092 = vmatprep.subr.mxu0 %v10102_v0  ;;  %9096 = vmatprep.mubr.msk.f32.mxu0 %vm10117_vm0, %v10102_v0 }
0x1321   :  { %9093 = vmatpush3.msra.mxu0 %v12857_v22  ;;  %9099 = vmatprep.subr.mxu1 %v10102_v0 }
0x1322   :  { %9094 = vmatprep.subr.mxu0 %v10102_v0 }
0x1323   :  { %9095 = vmatpush3.msra.mxu0 %v12862_v6 }
0x1324   :  { %9110 = vmatprep.subr.mxu0 %v10102_v0 }
0x13d8   :  { %v4820_v44 = vpop.f32.mrf.mxu1 }
0x13d9   :  { %v4825_v55 = vrot.slane %v4820_v44, 3  ;;  %v4826_v43 = vrot.slane %v4820_v44, 4 }
0x13da   :  { %v9065_v31 = vpop.f32.mrf.mxu1 }
0x13db   :  { %v4829_v3 = vadd.f32 %v4825_v55, %v12561_v60  ;;  %v4830_v2 = vadd.f32 %v4826_v43, %v12551_v37 }
0x13dc   :  { %v4969_v57 = vpop.f32.mrf.mxu0 }
0x13dd   :  { %9574 = vtanh.f32 %v4829_v3  ;;  %v4974_v59 = vrot.slane %v4969_v57, 6  ;;  %v4975_v62 = vrot.slane %v4969_v57, 7  ;;  %v8477_v18 = vmul.f32 -1.442695, %v4829_v3 }
0x13de   :  { %9576 = vtanh.f32 %v4830_v2  ;;  %v9076_v53 = vpop.f32.mrf.mxu0  ;;  %v8478_v14 = vmul.f32 -1.442695, %v4830_v2 }
0x13df   :  { %v4978_v51 = vadd.f32 %v4974_v59, %v12559_v29  ;;  %v4979_v21 = vadd.f32 %v4975_v62, %v12557_v38 }
0x13e1   :  { %9578 = vtanh.f32 %v4978_v51  ;;  %v8480_v7 = vmul.f32 -1.442695, %v4978_v51  ;;  %v8481_v46 = vmul.f32 -1.442695, %v4979_v21 }
0x13e2   :  { %9580 = vtanh.f32 %v4979_v21 }
0x13e3   :  { %9582 = vpow2.f32 %v8477_v18 }
0x13e4   :  { %9584 = vpow2.f32 %v8478_v14 }
0x13e5   :  { %9586 = vpow2.f32 %v8480_v7  ;;  %v4996_v7 = vrot.slane %v12888_v47, 1 }
0x13e6   :  { %9588 = vpow2.f32 %v8481_v46 }
0x13ea   :  { %v9575_v50 = vpop.eup %9574 }
0x13eb   :  { %v9577_v5 = vpop.eup %9576  ;;  %4855 = vrot.lane.b32.xlu0 %v9575_v50, %s10116_s1 }
0x13ec   :  { %4857 = vrot.lane.b32.xlu1 %v9577_v5, %s10116_s1  ;;  %v4847_v5 = vrot.slane %v12881_v27, 7 }
0x13ee   :  { %v9579_v39 = vpop.eup %9578 }
0x13ef   :  { %v9581_v63 = vpop.eup %9580  ;;  %5004 = vrot.lane.b32.xlu0 %v9579_v39, %s10116_s1  ;;  %v4848_v39 = vrot.slane %v12884_v19, 7 }
0x13f0   :  { %5006 = vrot.lane.b32.xlu1 %v9581_v63, %s10116_s1  ;;  %v9583_v48 = vpop.eup %9582 }
0x13f1   :  { %v9585_v41 = vpop.eup %9584  ;;  %v4837_v23 = vadd.f32 1.0, %v9583_v48 }
0x13f2   :  { %v9587_v52 = vpop.eup %9586  ;;  %v4838_v49 = vadd.f32 1.0, %v9585_v41  ;;  %v4997_v41 = vrot.slane %v12890_v32, 1 }
0x13f3   :  { %v9589_v30 = vpop.eup %9588  ;;  %9590 = vrcp.f32 %v4837_v23  ;;  %v4986_v17 = vadd.f32 1.0, %v9587_v52 }
0x13f4   :  { %9592 = vrcp.f32 %v4838_v49  ;;  %v4987_v44 = vadd.f32 1.0, %v9589_v30 }
0x13f5   :  { %9594 = vrcp.f32 %v4986_v17 }
0x13f6   :  { %9596 = vrcp.f32 %v4987_v44 }
0x1400   :  { %v9591_v55 = vpop.eup %9590 }
0x1401   :  { %v9593_v31 = vpop.eup %9592  ;;  %v4851_v63 = vmul.f32 %v9591_v55, %v4847_v5 }
0x1402   :  { %v9595_v59 = vpop.eup %9594  ;;  %v4852_v18 = vmul.f32 %v9593_v31, %v4848_v39 }
0x1403   :  { %v9597_v53 = vpop.eup %9596  ;;  %v5000_v52 = vmul.f32 %v9595_v59, %v4996_v7 }
0x1404   :  { %v5001_v27 = vmul.f32 %v9597_v53, %v4997_v41 }
0x145d   :  { %v4856_v43 = vpop.permute.xlu0 %4855 }
0x145e   :  { %v4858_v3 = vpop.permute.xlu1 %4857  ;;  %v4861_v2 = vmul.f32 %v9591_v55, %v4856_v43 }
0x145f   :  { %v4862_v57 = vmul.f32 %v9593_v31, %v4858_v3 }
0x1460   :  { %4865 = vrot.lane.b32.xlu0 %v4861_v2, %s10112_s30 }
0x1461   :  { %4867 = vrot.lane.b32.xlu1 %v4862_v57, %s10112_s30  ;;  %v5005_v62 = vpop.permute.xlu0 %5004 }
0x1462   :  { %v5007_v51 = vpop.permute.xlu1 %5006  ;;  %v5010_v21 = vmul.f32 %v9595_v59, %v5005_v62 }
0x1463   :  { %v5011_v50 = vmul.f32 %v9597_v53, %v5007_v51 }
0x1464   :  { %5014 = vrot.lane.b32.xlu0 %v5010_v21, %s10112_s30 }
0x1465   :  { %5016 = vrot.lane.b32.xlu1 %v5011_v50, %s10112_s30 }
0x14d2   :  { %v4866_v14 = vpop.permute.xlu0 %4865 }
0x14d3   :  { %v4868_v46 = vpop.permute.xlu1 %4867  ;;  %v12951_v48 = vadd.f32 %v4866_v14, %v4851_v63 }
0x14d4   :  { %v12954_v23 = vadd.f32 %v4868_v46, %v4852_v18 }
0x14d5   :  { %9598 = vtanh.f32 %v12951_v48 }
0x14d6   :  { %9600 = vtanh.f32 %v12954_v23  ;;  %v5015_v49 = vpop.permute.xlu0 %5014 }
0x14d7   :  { %v5017_v19 = vpop.permute.xlu1 %5016  ;;  %v12958_v30 = vadd.f32 %v5015_v49, %v5000_v52 }
0x14d8   :  { %v12960_v17 = vadd.f32 %v5017_v19, %v5001_v27 }
0x14d9   :  { %9602 = vtanh.f32 %v12958_v30 }
0x14da   :  { %9604 = vtanh.f32 %v12960_v17 }
0x14e2   :  { %v9599_v47 = vpop.eup %9598 }
0x14e3   :  { %v9601_v32 = vpop.eup %9600  ;;  %4877 = vrot.lane.b32.xlu0 %v9599_v47, %s10116_s1 }
0x14e4   :  { %4879 = vrot.lane.b32.xlu1 %v9601_v32, %s10116_s1 }
0x14e6   :  { %v9603_v44 = vpop.eup %9602 }
0x14e7   :  { %v9605_v43 = vpop.eup %9604  ;;  %5026 = vrot.lane.b32.xlu0 %v9603_v44, %s10116_s1 }
0x14e8   :  { %5028 = vrot.lane.b32.xlu1 %v9605_v43, %s10116_s1 }
0x1555   :  { %v4878_v3 = vpop.permute.xlu0 %4877 }
0x1556   :  { %v4880_v2 = vpop.permute.xlu1 %4879  ;;  %v12968_v57 = vmul.f32 %v9591_v55, %v4878_v3 }
0x1557   :  { %v12970_v62 = vmul.f32 %v9593_v31, %v4880_v2 }
0x1558   :  { %v5045_v51 = vrot.slane %v12968_v57, 5 }
0x1559   :  { %v5046_v21 = vrot.slane %v12970_v62, 4  ;;  %v5027_v50 = vpop.permute.xlu0 %5026 }
0x155a   :  { %v5029_v5 = vpop.permute.xlu1 %5028  ;;  %v12974_v39 = vmul.f32 %v9595_v59, %v5027_v50 }
0x155b   :  { %v12976_v63 = vmul.f32 %v9597_v53, %v5029_v5  ;;  %v5047_v18 = vsel %vm3558_vm1, %v5046_v21, %v5045_v51 }
0x155c   :  { %v5194_v14 = vrot.slane %v12974_v39, 2  ;;  %5048 = vrot.lane.b32.xlu0 %v5047_v18, %s10112_s30 }
0x155d   :  { %v5195_v55 = vrot.slane %v12976_v63, 1 }
0x155f   :  { %v5196_v31 = vsel %vm3558_vm1, %v5195_v55, %v5194_v14 }
0x1560   :  { %5197 = vrot.lane.b32.xlu1 %v5196_v31, %s10112_s30 }
0x15ce   :  { %v5049_v7 = vpop.permute.xlu0 %5048 }
0x15cf   :  { %9086 = vmatmul.mubr.msk.f32.vlgmr.msra.gmra.mxu1 %vm2721_vm14, %v5049_v7 }
0x15d0   :  { %9100 = vmatpush3.msra.mxu1 %v12820_v33  ;;  %9107 = vmatprep.mubr.msk.f32.mxu1 %vm10117_vm0, %v10102_v0 }
0x15d1   :  { %9101 = vmatprep.subr.mxu1 %v10102_v0 }
0x15d2   :  { %v5198_v59 = vpop.permute.xlu1 %5197  ;;  %9102 = vmatpush3.msra.mxu1 %v12829_v45 }
0x15d3   :  { %9097 = vmatmul.mubr.msk.f32.vlgmr.msra.gmra.mxu0 %vm2721_vm14, %v5198_v59  ;;  %9103 = vmatprep.subr.mxu1 %v10102_v0 }
0x15d4   :  { %9104 = vmatpush3.msra.mxu1 %v12837_v34  ;;  %9111 = vmatpush3.msra.mxu0 %v12840_v16 }
0x15d5   :  { %9105 = vmatprep.subr.mxu1 %v10102_v0  ;;  %9112 = vmatprep.subr.mxu0 %v10102_v0 }
0x15d6   :  { %9106 = vmatpush3.msra.mxu1 %v12848_v35  ;;  %9113 = vmatpush3.msra.mxu0 %v12851_v61 }
0x15d7   :  { %9114 = vmatprep.subr.mxu0 %v10102_v0  ;;  %9118 = vmatprep.mubr.msk.f32.mxu0 %vm10117_vm0, %v10102_v0 }
0x15d8   :  { %9115 = vmatpush3.msra.mxu0 %v12857_v22 }
0x15d9   :  { %9116 = vmatprep.subr.mxu0 %v10102_v0 }
0x15da   :  { %9117 = vmatpush3.msra.mxu0 %v12862_v6 }
0x168f   :  { %v5118_v33 = vpop.f32.mrf.mxu1 }
0x1690   :  { %v5123_v45 = vrot.slane %v5118_v33, 2  ;;  %v5124_v34 = vrot.slane %v5118_v33, 3 }
0x1691   :  { %v9087_v16 = vpop.f32.mrf.mxu1 }
0x1692   :  { %v5127_v53 = vadd.f32 %v5123_v45, %v12561_v60  ;;  %v5128_v35 = vadd.f32 %v5124_v34, %v12551_v37 }
0x1693   :  { %v5267_v61 = vpop.f32.mrf.mxu0 }
0x1694   :  { %9606 = vtanh.f32 %v5127_v53  ;;  %v5272_v46 = vrot.slane %v5267_v61, 7  ;;  %v5276_v22 = vadd.f32 %v5267_v61, %v12557_v38  ;;  %v8483_v47 = vmul.f32 -1.442695, %v5127_v53 }
0x1695   :  { %9608 = vtanh.f32 %v5128_v35  ;;  %v9098_v41 = vpop.f32.mrf.mxu0  ;;  %v8484_v32 = vmul.f32 -1.442695, %v5128_v35 }
0x1696   :  { %v5275_v52 = vadd.f32 %v5272_v46, %v12559_v29  ;;  %v8487_v43 = vmul.f32 -1.442695, %v5276_v22  ;;  %v5145_v41 = vrot.slane %v12951_v48, 7 }
0x1698   :  { %9610 = vtanh.f32 %v5275_v52  ;;  %v8486_v44 = vmul.f32 -1.442695, %v5275_v52  ;;  %v5146_v52 = vrot.slane %v12954_v23, 7 }
0x1699   :  { %9612 = vtanh.f32 %v5276_v22 }
0x169a   :  { %9614 = vpow2.f32 %v8483_v47 }
0x169b   :  { %9616 = vpow2.f32 %v8484_v32 }
0x169c   :  { %9618 = vpow2.f32 %v8486_v44 }
0x169d   :  { %9620 = vpow2.f32 %v8487_v43  ;;  %v5294_v43 = vrot.slane %v12960_v17, 1 }
0x16a1   :  { %v9607_v6 = vpop.eup %9606 }
0x16a2   :  { %v9609_v27 = vpop.eup %9608  ;;  %5153 = vrot.lane.b32.xlu0 %v9607_v6, %s10116_s1 }
0x16a3   :  { %5155 = vrot.lane.b32.xlu1 %v9609_v27, %s10116_s1 }
0x16a5   :  { %v9611_v49 = vpop.eup %9610 }
0x16a6   :  { %5301 = vrot.lane.b32.xlu0 %v9611_v49, %s10116_s1  ;;  %v9613_v19 = vpop.eup %9612  ;;  %v5293_v49 = vrot.slane %v12958_v30, 1 }
0x16a7   :  { %5303 = vrot.lane.b32.xlu1 %v9613_v19, %s10116_s1  ;;  %v9615_v3 = vpop.eup %9614 }
0x16a8   :  { %v9617_v2 = vpop.eup %9616  ;;  %v5135_v51 = vadd.f32 1.0, %v9615_v3 }
0x16a9   :  { %v9619_v21 = vpop.eup %9618  ;;  %v5136_v50 = vadd.f32 1.0, %v9617_v2 }
0x16aa   :  { %v9621_v5 = vpop.eup %9620  ;;  %9622 = vrcp.f32 %v5135_v51  ;;  %v5283_v18 = vadd.f32 1.0, %v9619_v21 }
0x16ab   :  { %9624 = vrcp.f32 %v5136_v50  ;;  %v5284_v14 = vadd.f32 1.0, %v9621_v5 }
0x16ac   :  { %9626 = vrcp.f32 %v5283_v18 }
0x16ad   :  { %9628 = vrcp.f32 %v5284_v14 }
0x16b7   :  { %v9623_v55 = vpop.eup %9622 }
0x16b8   :  { %v9625_v7 = vpop.eup %9624  ;;  %v5149_v22 = vmul.f32 %v9623_v55, %v5145_v41 }
0x16b9   :  { %v9627_v34 = vpop.eup %9626  ;;  %v5150_v6 = vmul.f32 %v9625_v7, %v5146_v52 }
0x16ba   :  { %v9629_v35 = vpop.eup %9628  ;;  %v5297_v44 = vmul.f32 %v9627_v34, %v5293_v49 }
0x16bb   :  { %v5298_v23 = vmul.f32 %v9629_v35, %v5294_v43 }
0x1714   :  { %v5154_v31 = vpop.permute.xlu0 %5153 }
0x1715   :  { %v5156_v59 = vpop.permute.xlu1 %5155  ;;  %v5159_v33 = vmul.f32 %v9623_v55, %v5154_v31 }
0x1716   :  { %v5160_v45 = vmul.f32 %v9625_v7, %v5156_v59 }
0x1717   :  { %5163 = vrot.lane.b32.xlu0 %v5159_v33, %s10112_s30 }
0x1718   :  { %5165 = vrot.lane.b32.xlu1 %v5160_v45, %s10112_s30  ;;  %v5302_v16 = vpop.permute.xlu0 %5301 }
0x1719   :  { %v5307_v53 = vmul.f32 %v9627_v34, %v5302_v16  ;;  %v5304_v61 = vpop.permute.xlu1 %5303 }
0x171a   :  { %v5308_v46 = vmul.f32 %v9629_v35, %v5304_v61 }
0x171b   :  { %5311 = vrot.lane.b32.xlu0 %v5307_v53, %s10112_s30 }
0x171c   :  { %5313 = vrot.lane.b32.xlu1 %v5308_v46, %s10112_s30 }
0x1789   :  { %v5164_v27 = vpop.permute.xlu0 %5163 }
0x178a   :  { %v5166_v19 = vpop.permute.xlu1 %5165  ;;  %v13019_v47 = vadd.f32 %v5164_v27, %v5149_v22 }
0x178b   :  { %v13021_v32 = vadd.f32 %v5166_v19, %v5150_v6 }
0x178c   :  { %9630 = vtanh.f32 %v13019_v47 }
0x178d   :  { %9632 = vtanh.f32 %v13021_v32  ;;  %v5312_v48 = vpop.permute.xlu0 %5311 }
0x178e   :  { %v13026_v3 = vadd.f32 %v5312_v48, %v5297_v44  ;;  %v5314_v2 = vpop.permute.xlu1 %5313 }
0x178f   :  { %v13029_v30 = vadd.f32 %v5314_v2, %v5298_v23 }
0x1790   :  { %9634 = vtanh.f32 %v13026_v3 }
0x1791   :  { %9636 = vtanh.f32 %v13029_v30 }
0x1799   :  { %v9631_v51 = vpop.eup %9630 }
0x179a   :  { %v9633_v21 = vpop.eup %9632  ;;  %5175 = vrot.lane.b32.xlu0 %v9631_v51, %s10116_s1 }
0x179b   :  { %5177 = vrot.lane.b32.xlu1 %v9633_v21, %s10116_s1 }
0x179d   :  { %v9635_v17 = vpop.eup %9634 }
0x179e   :  { %5323 = vrot.lane.b32.xlu0 %v9635_v17, %s10116_s1  ;;  %v9637_v50 = vpop.eup %9636 }
0x179f   :  { %5325 = vrot.lane.b32.xlu1 %v9637_v50, %s10116_s1 }
0x180c   :  { %v5176_v5 = vpop.permute.xlu0 %5175 }
0x180d   :  { %v5178_v18 = vpop.permute.xlu1 %5177  ;;  %v13036_v14 = vmul.f32 %v9623_v55, %v5176_v5 }
0x180e   :  { %v13038_v31 = vmul.f32 %v9625_v7, %v5178_v18 }
0x180f   :  { %v5342_v59 = vrot.slane %v13036_v14, 6 }
0x1810   :  { %v5343_v33 = vrot.slane %v13038_v31, 5  ;;  %v5324_v45 = vpop.permute.xlu0 %5323 }
0x1811   :  { %v13042_v16 = vmul.f32 %v9627_v34, %v5324_v45  ;;  %v5326_v61 = vpop.permute.xlu1 %5325 }
0x1812   :  { %v5344_v53 = vsel %vm3558_vm1, %v5343_v33, %v5342_v59  ;;  %v13047_v41 = vmul.f32 %v9629_v35, %v5326_v61 }
0x1813   :  { %v5491_v46 = vrot.slane %v13042_v16, 1  ;;  %5345 = vrot.lane.b32.xlu0 %v5344_v53, %s10112_s30 }
0x1815   :  { %v5492_v55 = vsel %vm3558_vm1, %v13047_v41, %v5491_v46 }
0x1816   :  { %5493 = vrot.lane.b32.xlu1 %v5492_v55, %s10112_s30 }
0x1885   :  { %v5346_v7 = vpop.permute.xlu0 %5345 }
0x1886   :  { %9108 = vmatmul.mubr.msk.f32.vlgmr.msra.gmra.mxu1 %vm2721_vm14, %v5346_v7 }
0x1888   :  { %v5494_v52 = vpop.permute.xlu1 %5493 }
0x1889   :  { %9119 = vmatmul.mubr.msk.f32.vlgmr.msra.gmra.mxu0 %vm2721_vm14, %v5494_v52 }
0x1946   :  { %v5415_v34 = vpop.f32.mrf.mxu1 }
0x1947   :  { %v5420_v22 = vrot.slane %v5415_v34, 1  ;;  %v5421_v6 = vrot.slane %v5415_v34, 2 }
0x1948   :  { %v9109_v27 = vpop.f32.mrf.mxu1 }
0x1949   :  { %v5424_v49 = vadd.f32 %v5420_v22, %v12561_v60  ;;  %v5425_v35 = vadd.f32 %v5421_v6, %v12551_v37  ;;  %v5563_v19 = vpop.f32.mrf.mxu0 }
0x194a   :  { %v5568_v44 = vrot.slane %v5563_v19, 1  ;;  %v5571_v43 = vadd.f32 %v5563_v19, %v12559_v29 }
0x194b   :  { %9638 = vtanh.f32 %v5424_v49  ;;  %v9120_v48 = vpop.f32.mrf.mxu0  ;;  %v8489_v60 = vmul.f32 -1.442695, %v5424_v49  ;;  %v8490_v29 = vmul.f32 -1.442695, %v5425_v35 }
0x194c   :  { %9640 = vtanh.f32 %v5425_v35  ;;  %v5572_v23 = vadd.f32 %v5568_v44, %v12557_v38  ;;  %v8492_v17 = vmul.f32 -1.442695, %v5571_v43 }
0x194d   :  { %9642 = vtanh.f32 %v5571_v43  ;;  %v5442_v43 = vrot.slane %v13019_v47, 7 }
0x194e   :  { %9644 = vtanh.f32 %v5572_v23  ;;  %v8493_v38 = vmul.f32 -1.442695, %v5572_v23 }
0x194f   :  { %9646 = vpow2.f32 %v8489_v60 }
0x1950   :  { %9648 = vpow2.f32 %v8490_v29 }
0x1951   :  { %9650 = vpow2.f32 %v8492_v17  ;;  %v5590_v17 = vrot.slane %v13029_v30, 1 }
0x1952   :  { %9652 = vpow2.f32 %v8493_v38 }
0x1958   :  { %v9639_v2 = vpop.eup %9638 }
0x1959   :  { %5450 = vrot.lane.b32.xlu0 %v9639_v2, %s10116_s1  ;;  %v9641_v51 = vpop.eup %9640  ;;  %v5443_v2 = vrot.slane %v13021_v32, 7 }
0x195a   :  { %v9643_v21 = vpop.eup %9642 }
0x195b   :  { %5597 = vrot.lane.b32.xlu1 %v9643_v21, %s10116_s1  ;;  %v9645_v37 = vpop.eup %9644 }
0x195c   :  { %v9647_v50 = vpop.eup %9646 }
0x195d   :  { %5452 = vrot.lane.b32.xlu0 %v9641_v51, %s10116_s1  ;;  %v9649_v5 = vpop.eup %9648  ;;  %v5432_v18 = vadd.f32 1.0, %v9647_v50  ;;  %v5589_v51 = vrot.slane %v13026_v3, 1 }
0x195e   :  { %v9651_v59 = vpop.eup %9650  ;;  %v5433_v33 = vadd.f32 1.0, %v9649_v5 }
0x195f   :  { %5599 = vrot.lane.b32.xlu1 %v9645_v37, %s10116_s1  ;;  %9654 = vrcp.f32 %v5432_v18  ;;  %v5579_v45 = vadd.f32 1.0, %v9651_v59  ;;  %v9653_v53 = vpop.eup %9652 }
0x1960   :  { %9656 = vrcp.f32 %v5433_v33  ;;  %v5580_v61 = vadd.f32 1.0, %v9653_v53 }
0x1961   :  { %9658 = vrcp.f32 %v5579_v45 }
0x1962   :  { %9660 = vrcp.f32 %v5580_v61 }
0x196c   :  { %v13062_v46 = vpop.eup %9654 }
0x196d   :  { %v13065_v52 = vpop.eup %9656  ;;  %v5446_v48 = vmul.f32 %v13062_v46, %v5442_v43 }
0x196e   :  { %v13068_v34 = vpop.eup %9658  ;;  %v5447_v60 = vmul.f32 %v13065_v52, %v5443_v2 }
0x196f   :  { %v13074_v35 = vpop.eup %9660  ;;  %v5593_v37 = vmul.f32 %v13068_v34, %v5589_v51 }
0x1970   :  { %v5594_v47 = vmul.f32 %v13074_v35, %v5590_v17 }
0x19cb   :  { %v5451_v55 = vpop.permute.xlu0 %5450 }
0x19cc   :  { %v5456_v7 = vmul.f32 %v13062_v46, %v5451_v55 }
0x19cd   :  { %v5598_v22 = vpop.permute.xlu1 %5597 }
0x19ce   :  { %5460 = vrot.lane.b32.xlu0 %v5456_v7, %s10112_s30  ;;  %v5603_v27 = vmul.f32 %v13068_v34, %v5598_v22 }
0x19cf   :  { %v5453_v6 = vpop.permute.xlu0 %5452 }
0x19d0   :  { %v5457_v49 = vmul.f32 %v13065_v52, %v5453_v6  ;;  %5607 = vrot.lane.b32.xlu1 %v5603_v27, %s10112_s30 }
0x19d1   :  { %v5600_v19 = vpop.permute.xlu1 %5599 }
0x19d2   :  { %5462 = vrot.lane.b32.xlu0 %v5457_v49, %s10112_s30  ;;  %v5604_v44 = vmul.f32 %v13074_v35, %v5600_v19 }
0x19d4   :  { %5609 = vrot.lane.b32.xlu1 %v5604_v44, %s10112_s30 }
0x19d6   :  { %3412 = vrot.lane.b32.xlu0 %v12599_v56, %s10112_s30 }
0x19d8   :  { %3548 = vrot.lane.b32.xlu1 %v12592_v8, %s10116_s1 }
0x1a40   :  { %v5461_v23 = vpop.permute.xlu0 %5460 }
0x1a41   :  { %v5466_v21 = vadd.f32 %v5461_v23, %v5446_v48 }
0x1a42   :  { %v5608_v29 = vpop.permute.xlu1 %5607 }
0x1a43   :  { %9662 = vtanh.f32 %v5466_v21  ;;  %v5613_v8 = vadd.f32 %v5608_v29, %v5593_v37 }
0x1a44   :  { %v5463_v56 = vpop.permute.xlu0 %5462 }
0x1a45   :  { %v5467_v38 = vadd.f32 %v5463_v56, %v5447_v60  ;;  %9664 = vtanh.f32 %v5613_v8 }
0x1a46   :  { %v5610_v32 = vpop.permute.xlu1 %5609 }
0x1a47   :  { %9666 = vtanh.f32 %v5467_v38  ;;  %v5614_v3 = vadd.f32 %v5610_v32, %v5594_v47  ;;  %v13238_v32 = vld [vmem:[#allocation12 + $0x18] sm:$0xff] }
0x1a48   :  { %v3413_v50 = vpop.permute.xlu0 %3412 }
0x1a49   :  { %3419 = vst.msk [vmem:[#allocation2] sm:$0x1] %vm3418_vm2, %v3413_v50  ;;  %9668 = vtanh.f32 %v5614_v3  ;;  %v13240_v50 = vld [vmem:[#allocation13 + $0x18] sm:$0xff] }
0x1a4a   :  { %v3549_v5 = vpop.permute.xlu1 %3548 }
0x1a4b   :  { %3555 = vst.msk [vmem:[#allocation2] sm:$0x80] %vm3554_vm7, %v3549_v5  ;;  %v13244_v5 = vld [vmem:[#allocation12 + $0x10] sm:$0xff] }
0x1a50   :  { %v9663_v18 = vpop.eup %9662 }
0x1a51   :  { %5472 = vrot.lane.b32.xlu0 %v9663_v18, %s10116_s1  ;;  %v13246_v18 = vld [vmem:[#allocation13 + $0x10] sm:$0xff] }
0x1a52   :  { %v9665_v30 = vpop.eup %9664 }
0x1a53   :  { %5619 = vrot.lane.b32.xlu1 %v9665_v30, %s10116_s1  ;;  %v13252_v30 = vld [vmem:[#allocation12 + $0x8] sm:$0xff] }
0x1a54   :  { %v9667_v59 = vpop.eup %9666 }
0x1a55   :  { %5474 = vrot.lane.b32.xlu0 %v9667_v59, %s10116_s1  ;;  %v13254_v59 = vld [vmem:[#allocation13 + $0x8] sm:$0xff] }
0x1a56   :  { %v9669_v33 = vpop.eup %9668 }
0x1a57   :  { %5621 = vrot.lane.b32.xlu1 %v9669_v33, %s10116_s1  ;;  %v13260_v33 = vld [vmem:[#allocation12] sm:$0xff] }
0x1a59   :  { %3696 = vrot.lane.b32.xlu0 %v12660_v25, %s10112_s30  ;;  %v5646_v25 = vld [vmem:[%s14023_s13 + $0x30] sm:$0xff] }
0x1a5b   :  { %3845 = vrot.lane.b32.xlu1 %v12664_v54, %s10116_s1  ;;  %v5645_v54 = vld [vmem:[%s14023_s13 + $0x28] sm:$0xff] }
0x1a5d   :  { %3993 = vrot.lane.b32.xlu0 %v12730_v12, %s10112_s30  ;;  %v5644_v12 = vld [vmem:[%s14023_s13 + $0x20] sm:$0xff] }
0x1a5f   :  { %4142 = vrot.lane.b32.xlu1 %v12736_v1, %s10116_s1  ;;  %v5643_v1 = vld [vmem:[%s14023_s13 + $0x18] sm:$0xff] }
0x1a61   :  { %4291 = vrot.lane.b32.xlu0 %v12800_v40, %s10112_s30  ;;  %v5642_v40 = vld [vmem:[%s14023_s13 + $0x10] sm:$0xff] }
0x1a63   :  { %4440 = vrot.lane.b32.xlu1 %v12806_v9, %s10116_s1  ;;  %v5641_v9 = vld [vmem:[%s14023_s13 + $0x8] sm:$0xff] }
0x1a65   :  { %3414 = vrot.lane.b32.xlu0 %v12590_v11, %s10112_s30  ;;  %v5647_v11 = vld [vmem:[%s14023_s13 + $0x38] sm:$0xff] }
0x1a66   :  { %9121 = vmatprep.subr.mxu1 %v5647_v11 }
0x1a67   :  { %3550 = vrot.lane.b32.xlu1 %v12594_v10, %s10116_s1  ;;  %v5660_v10 = vld [vmem:[%s14026_s16 + $0x38] sm:$0xff]  ;;  %9122 = vmatpush3.msra.mxu1 %v5647_v11  ;;  %v13264_v11 = vld [vmem:[#allocation13] sm:$0xff] }
0x1a68   :  { %9140 = vmatprep.subr.mxu0 %v5660_v10  ;;  %9123 = vmatprep.subr.mxu1 %v5646_v25 }
0x1a69   :  { %3698 = vrot.lane.b32.xlu0 %v12662_v42, %s10112_s30  ;;  %v5659_v42 = vld [vmem:[%s14026_s16 + $0x30] sm:$0xff]  ;;  %9141 = vmatpush3.msra.mxu0 %v5660_v10 }
0x1a6a   :  { %9142 = vmatprep.subr.mxu0 %v5659_v42  ;;  %9124 = vmatpush3.msra.mxu1 %v5646_v25 }
0x1a6b   :  { %3847 = vrot.lane.b32.xlu1 %v12667_v20, %s10116_s1  ;;  %9143 = vmatpush3.msra.mxu0 %v5659_v42  ;;  %v5658_v20 = vld [vmem:[%s14026_s16 + $0x28] sm:$0xff]  ;;  %v8494_v42 = vld [vmem:[%s14025_s15] ss:$0 sm:$0xff] }
0x1a6c   :  { %9125 = vmatprep.subr.mxu1 %v5645_v54  ;;  %9144 = vmatprep.subr.mxu0 %v5658_v20 }
0x1a6d   :  { %3995 = vrot.lane.b32.xlu0 %v12732_v28, %s10112_s30  ;;  %9126 = vmatpush3.msra.mxu1 %v5645_v54  ;;  %v5657_v28 = vld [vmem:[%s14026_s16 + $0x20] sm:$0xff] }
0x1a6e   :  { %9145 = vmatpush3.msra.mxu0 %v5658_v20  ;;  %9127 = vmatprep.subr.mxu1 %v5644_v12 }
0x1a6f   :  { %4144 = vrot.lane.b32.xlu1 %v12738_v26, %s10116_s1  ;;  %9146 = vmatprep.subr.mxu0 %v5657_v28  ;;  %v5656_v26 = vld [vmem:[%s14026_s16 + $0x18] sm:$0xff] }
0x1a70   :  { %9128 = vmatpush3.msra.mxu1 %v5644_v12  ;;  %9147 = vmatpush3.msra.mxu0 %v5657_v28 }
0x1a71   :  { %4293 = vrot.lane.b32.xlu0 %v12802_v13, %s10112_s30  ;;  %9129 = vmatprep.subr.mxu1 %v5643_v1  ;;  %v5655_v13 = vld [vmem:[%s14026_s16 + $0x10] sm:$0xff] }
0x1a72   :  { %9148 = vmatprep.subr.mxu0 %v5656_v26  ;;  %9130 = vmatpush3.msra.mxu1 %v5643_v1 }
0x1a73   :  { %4442 = vrot.lane.b32.xlu1 %v12808_v36, %s10116_s1  ;;  %9149 = vmatpush3.msra.mxu0 %v5656_v26  ;;  %v5654_v36 = vld [vmem:[%s14026_s16 + $0x8] sm:$0xff] }
0x1a74   :  { %9131 = vmatprep.subr.mxu1 %v5642_v40  ;;  %9150 = vmatprep.subr.mxu0 %v5655_v13 }
0x1a75   :  { %4589 = vrot.lane.b32.xlu0 %v12898_v24, %s10112_s30  ;;  %9132 = vmatpush3.msra.mxu1 %v5642_v40  ;;  %v8497_v40 = vld [vmem:[%s14028_s18] ss:$0 sm:$0xff] }
0x1a76   :  { %9151 = vmatpush3.msra.mxu0 %v5655_v13  ;;  %9133 = vmatprep.subr.mxu1 %v5641_v9 }
0x1a77   :  { %4738 = vrot.lane.b32.xlu1 %v12904_v15, %s10116_s1  ;;  %9152 = vmatprep.subr.mxu0 %v5654_v36  ;;  %v5640_v15 = vld [vmem:[%s14023_s13] sm:$0xff] }
0x1a78   :  { %9134 = vmatpush3.msra.mxu1 %v5641_v9  ;;  %9153 = vmatpush3.msra.mxu0 %v5654_v36 }
0x1a79   :  { %4887 = vrot.lane.b32.xlu0 %v12968_v57, %s10112_s30  ;;  %9135 = vmatprep.subr.mxu1 %v5640_v15 }
0x1a7a   :  { %9136 = vmatpush3.msra.mxu1 %v5640_v15 }
0x1a7b   :  { %5036 = vrot.lane.b32.xlu1 %v12974_v39, %s10116_s1  ;;  %9159 = vmatprep.subr.mxu1 %v10102_v0 }
0x1a7d   :  { %5185 = vrot.lane.b32.xlu0 %v13036_v14, %s10112_s30 }
0x1a7f   :  { %5333 = vrot.lane.b32.xlu1 %v13042_v16, %s10116_s1 }
0x1a81   :  { %4591 = vrot.lane.b32.xlu0 %v12900_v4, %s10112_s30 }
0x1a83   :  { %4740 = vrot.lane.b32.xlu1 %v12906_v58, %s10116_s1  ;;  %v5653_v58 = vld [vmem:[%s14026_s16] sm:$0xff] }
0x1a84   :  { %9154 = vmatprep.subr.mxu0 %v5653_v58 }
0x1a85   :  { %4889 = vrot.lane.b32.xlu0 %v12970_v62, %s10112_s30  ;;  %9155 = vmatpush3.msra.mxu0 %v5653_v58 }
0x1a86   :  { %9170 = vmatprep.subr.mxu0 %v10102_v0 }
0x1a87   :  { %5038 = vrot.lane.b32.xlu1 %v12976_v63, %s10116_s1 }
0x1a89   :  { %5187 = vrot.lane.b32.xlu0 %v13038_v31, %s10112_s30 }
0x1a8b   :  { %5335 = vrot.lane.b32.xlu1 %v13047_v41, %s10116_s1 }
0x1ac3   :  { %v5473_v24 = vpop.permute.xlu0 %5472 }
0x1ac4   :  { %v5478_v4 = vmul.f32 %v13062_v46, %v5473_v24 }
0x1ac5   :  { %v5620_v57 = vpop.permute.xlu1 %5619 }
0x1ac6   :  { %5482 = vrot.lane.b32.xlu0 %v5478_v4, %s10112_s30  ;;  %v5625_v62 = vmul.f32 %v13068_v34, %v5620_v57 }
0x1ac7   :  { %v5475_v39 = vpop.permute.xlu0 %5474 }
0x1ac8   :  { %v5479_v63 = vmul.f32 %v13065_v52, %v5475_v39  ;;  %5629 = vrot.lane.b32.xlu1 %v5625_v62, %s10116_s1 }
0x1ac9   :  { %v5622_v14 = vpop.permute.xlu1 %5621 }
0x1aca   :  { %5484 = vrot.lane.b32.xlu0 %v5479_v63, %s10112_s30  ;;  %v5626_v31 = vmul.f32 %v13074_v35, %v5622_v14 }
0x1acb   :  { %v3697_v16 = vpop.permute.xlu0 %3696 }
0x1acc   :  { %3703 = vst.msk [vmem:[#allocation2] sm:$0x2] %vm3702_vm8, %v3697_v16  ;;  %5631 = vrot.lane.b32.xlu1 %v5626_v31, %s10116_s1 }
0x1acd   :  { %v3846_v41 = vpop.permute.xlu1 %3845 }
0x1ace   :  { %3852 = vst.msk [vmem:[#allocation2] sm:$0x40] %vm3851_vm9, %v3846_v41 }
0x1acf   :  { %v3994_v45 = vpop.permute.xlu0 %3993 }
0x1ad0   :  { %4000 = vst.msk [vmem:[#allocation2] sm:$0x4] %vm3999_vm10, %v3994_v45 }
0x1ad1   :  { %v4143_v53 = vpop.permute.xlu1 %4142 }
0x1ad2   :  { %4149 = vst.msk [vmem:[#allocation2] sm:$0x20] %vm14040_vm11, %v4143_v53 }
0x1ad3   :  { %v4292_v61 = vpop.permute.xlu0 %4291 }
0x1ad4   :  { %4298 = vst.msk [vmem:[#allocation2] sm:$0x8] %vm14042_vm12, %v4292_v61 }
0x1ad5   :  { %v4441_v46 = vpop.permute.xlu1 %4440 }
0x1ad6   :  { %4447 = vst.msk [vmem:[#allocation2] sm:$0x10] %vm14041_vm13, %v4441_v46 }
0x1ad7   :  { %v3415_v55 = vpop.permute.xlu0 %3414 }
0x1ad8   :  { %3420 = vst.msk [vmem:[#allocation2 + $0x8] sm:$0x1] %vm3418_vm2, %v3415_v55 }
0x1ad9   :  { %v3551_v7 = vpop.permute.xlu1 %3550 }
0x1ada   :  { %3556 = vst.msk [vmem:[#allocation2 + $0x8] sm:$0x80] %vm3554_vm7, %v3551_v7 }
0x1adb   :  { %v3699_v52 = vpop.permute.xlu0 %3698 }
0x1adc   :  { %3704 = vst.msk [vmem:[#allocation2 + $0x8] sm:$0x2] %vm3702_vm8, %v3699_v52 }
0x1add   :  { %v3848_v34 = vpop.permute.xlu1 %3847 }
0x1ade   :  { %3853 = vst.msk [vmem:[#allocation2 + $0x8] sm:$0x40] %vm3851_vm9, %v3848_v34 }
0x1adf   :  { %v3996_v22 = vpop.permute.xlu0 %3995 }
0x1ae0   :  { %4001 = vst.msk [vmem:[#allocation2 + $0x8] sm:$0x4] %vm3999_vm10, %v3996_v22 }
0x1ae1   :  { %v4145_v6 = vpop.permute.xlu1 %4144 }
0x1ae2   :  { %4150 = vst.msk [vmem:[#allocation2 + $0x8] sm:$0x20] %vm14040_vm11, %v4145_v6  ;;  %vm5191_vm11 = vcmask 260102  }
0x1ae3   :  { %v4294_v27 = vpop.permute.xlu0 %4293 }
0x1ae4   :  { %4299 = vst.msk [vmem:[#allocation2 + $0x8] sm:$0x8] %vm14042_vm12, %v4294_v27  ;;  %vm5488_vm12 = vcmask 261127  }
0x1ae5   :  { %v4443_v49 = vpop.permute.xlu1 %4442 }
0x1ae6   :  { %4448 = vst.msk [vmem:[#allocation2 + $0x8] sm:$0x10] %vm14041_vm13, %v4443_v49  ;;  %vm5339_vm13 = vcmask 517377  }
0x1ae7   :  { %v4590_v35 = vpop.permute.xlu0 %4589 }
0x1ae8   :  { %4596 = vst.msk [vmem:[#allocation2] sm:$0x10] %vm14043_vm15, %v4590_v35 }
0x1ae9   :  { %v4739_v19 = vpop.permute.xlu1 %4738 }
0x1aea   :  { %4745 = vst.msk [vmem:[#allocation2] sm:$0x8] %vm4744_vm3, %v4739_v19 }
0x1aeb   :  { %v4888_v44 = vpop.permute.xlu0 %4887 }
0x1aec   :  { %4894 = vst.msk [vmem:[#allocation2] sm:$0x20] %vm4893_vm4, %v4888_v44 }
0x1aed   :  { %v5037_v43 = vpop.permute.xlu1 %5036 }
0x1aee   :  { %5043 = vst.msk [vmem:[#allocation2] sm:$0x4] %vm5042_vm6, %v5037_v43 }
0x1aef   :  { %v5186_v48 = vpop.permute.xlu0 %5185 }
0x1af0   :  { %5192 = vst.msk [vmem:[#allocation2] sm:$0x40] %vm5191_vm11, %v5186_v48 }
0x1af1   :  { %v5334_v23 = vpop.permute.xlu1 %5333 }
0x1af2   :  { %5340 = vst.msk [vmem:[#allocation2] sm:$0x2] %vm5339_vm13, %v5334_v23 }
0x1af3   :  { %v4592_v2 = vpop.permute.xlu0 %4591 }
0x1af4   :  { %4597 = vst.msk [vmem:[#allocation2 + $0x8] sm:$0x10] %vm14043_vm15, %v4592_v2  ;;  %vm5635_vm15 = vcmask 516352  }
0x1af5   :  { %v4741_v51 = vpop.permute.xlu1 %4740 }
0x1af6   :  { %4746 = vst.msk [vmem:[#allocation2 + $0x8] sm:$0x8] %vm4744_vm3, %v4741_v51 }
0x1af7   :  { %v4890_v21 = vpop.permute.xlu0 %4889 }
0x1af8   :  { %4895 = vst.msk [vmem:[#allocation2 + $0x8] sm:$0x20] %vm4893_vm4, %v4890_v21 }
0x1af9   :  { %v5039_v37 = vpop.permute.xlu1 %5038 }
0x1afa   :  { %5044 = vst.msk [vmem:[#allocation2 + $0x8] sm:$0x4] %vm5042_vm6, %v5039_v37 }
0x1afb   :  { %v5188_v60 = vpop.permute.xlu0 %5187 }
0x1afc   :  { %5193 = vst.msk [vmem:[#allocation2 + $0x8] sm:$0x40] %vm5191_vm11, %v5188_v60 }
0x1afd   :  { %v5336_v29 = vpop.permute.xlu1 %5335 }
0x1afe   :  { %5341 = vst.msk [vmem:[#allocation2 + $0x8] sm:$0x2] %vm5339_vm13, %v5336_v29 }
0x1b38   :  { %v5483_v56 = vpop.permute.xlu0 %5482 }
0x1b39   :  { %5489 = vst.msk [vmem:[#allocation2] sm:$0x80] %vm5488_vm12, %v5483_v56 }
0x1b3a   :  { %v5630_v17 = vpop.permute.xlu1 %5629 }
0x1b3b   :  { %5636 = vst.msk [vmem:[#allocation2] sm:$0x1] %vm5635_vm15, %v5630_v17 }
0x1b3c   :  { %v5485_v8 = vpop.permute.xlu0 %5484 }
0x1b3d   :  { %5490 = vst.msk [vmem:[#allocation2 + $0x8] sm:$0x80] %vm5488_vm12, %v5485_v8 }
0x1b3e   :  { %v5632_v38 = vpop.permute.xlu1 %5631 }
0x1b3f   :  { %5637 = vst.msk [vmem:[#allocation2 + $0x8] sm:$0x1] %vm5635_vm15, %v5632_v38 }
0x1b42   :  { %v5638_v47 = vld [vmem:[#allocation2] sm:$0xff] }
0x1b43   :  { %9137 = vmatprep.mubr.msk.f32.mxu1 %vm2789_vm5, %v5638_v47  ;;  %9156 = vmatprep.mubr.msk.f32.mxu0 %vm2789_vm5, %v5638_v47 }
0x1b46   :  { %v5639_v3 = vld [vmem:[#allocation2 + $0x8] sm:$0xff] }
0x1b47   :  { %9138 = vmatmul.mubr.msk.f32.vlgmr.msra.gmra.mxu1 %vm2789_vm5, %v5639_v3  ;;  %9157 = vmatmul.mubr.msk.f32.vlgmr.msra.gmra.mxu0 %vm2789_vm5, %v5639_v3 }
0x1b48   :  { %9160 = vmatpush3.msra.mxu1 %v13238_v32  ;;  %9171 = vmatpush3.msra.mxu0 %v13240_v50 }
0x1b49   :  { %9161 = vmatprep.subr.mxu1 %v10102_v0  ;;  %9172 = vmatprep.subr.mxu0 %v10102_v0 }
0x1b4a   :  { %9162 = vmatpush3.msra.mxu1 %v13244_v5  ;;  %9173 = vmatpush3.msra.mxu0 %v13246_v18 }
0x1b4b   :  { %9163 = vmatprep.subr.mxu1 %v10102_v0  ;;  %9174 = vmatprep.subr.mxu0 %v10102_v0 }
0x1b4c   :  { %9164 = vmatpush3.msra.mxu1 %v13252_v30  ;;  %9175 = vmatpush3.msra.mxu0 %v13254_v59 }
0x1b4d   :  { %9165 = vmatprep.subr.mxu1 %v10102_v0  ;;  %9176 = vmatprep.subr.mxu0 %v10102_v0 }
0x1b4e   :  { %9166 = vmatpush3.msra.mxu1 %v13260_v33  ;;  %9167 = vmatprep.mubr.msk.f32.mxu1 %vm10117_vm0, %v10102_v0 }
0x1b4f   :  { %9177 = vmatpush3.msra.mxu0 %v13264_v11  ;;  %9178 = vmatprep.mubr.msk.f32.mxu0 %vm10117_vm0, %v10102_v0 }
0x1b50   :  { %9168 = vmatmul.mubr.f32.vlgmr.msra.gmra.mxu1 %v10102_v0  ;;  %9179 = vmatmul.mubr.f32.vlgmr.msra.gmra.mxu0 %v10102_v0 }
0x1b51   :  { %9181 = vmatprep.subr.mxu1 %v10102_v0  ;;  %9192 = vmatprep.subr.mxu0 %v10102_v0 }
0x1b52   :  { %9182 = vmatpush3.msra.mxu1 %v13238_v32  ;;  %9193 = vmatpush3.msra.mxu0 %v13240_v50 }
0x1b53   :  { %9183 = vmatprep.subr.mxu1 %v10102_v0  ;;  %9194 = vmatprep.subr.mxu0 %v10102_v0 }
0x1b54   :  { %9184 = vmatpush3.msra.mxu1 %v13244_v5  ;;  %9195 = vmatpush3.msra.mxu0 %v13246_v18 }
0x1b55   :  { %9185 = vmatprep.subr.mxu1 %v10102_v0  ;;  %9196 = vmatprep.subr.mxu0 %v10102_v0 }
0x1b56   :  { %9186 = vmatpush3.msra.mxu1 %v13252_v30  ;;  %9189 = vmatprep.mubr.msk.f32.mxu1 %vm10117_vm0, %v10102_v0 }
0x1b57   :  { %9187 = vmatprep.subr.mxu1 %v10102_v0  ;;  %9197 = vmatpush3.msra.mxu0 %v13254_v59 }
0x1b58   :  { %9188 = vmatpush3.msra.mxu1 %v13260_v33  ;;  %9198 = vmatprep.subr.mxu0 %v10102_v0 }
0x1b59   :  { %9199 = vmatpush3.msra.mxu0 %v13264_v11  ;;  %9200 = vmatprep.mubr.msk.f32.mxu0 %vm10117_vm0, %v10102_v0 }
0x1b5a   :  { %9203 = vmatprep.subr.mxu1 %v10102_v0  ;;  %9214 = vmatprep.subr.mxu0 %v10102_v0 }
0x1c07   :  { %v9139_v10 = vpop.f32.mrf.mxu1  ;;  %v9158_v25 = vpop.f32.mrf.mxu0 }
0x1c08   :  { %v13301_v1 = vadd.f32 %v9139_v10, %v8494_v42  ;;  %v13309_v58 = vadd.f32 %v9158_v25, %v8497_v40 }
0x1c09   :  { %v5744_v54 = vpop.f32.mrf.mxu1  ;;  %v5825_v20 = vpop.f32.mrf.mxu0 }
0x1c0a   :  { %v13307_v15 = vadd.f32 %v8497_v40, %v5825_v20  ;;  %v13313_v39 = vadd.f32 %v8494_v42, %v5744_v54 }
0x1c10   :  { %v5900_v12 = vpop.f32.mrf.mxu1  ;;  %v6034_v28 = vpop.f32.mrf.mxu0 }
0x1c11   :  { %v5905_v26 = vrot.slane %v5900_v12, 1  ;;  %v6039_v13 = vrot.slane %v6034_v28, 1  ;;  %v6040_v4 = vrot.slane %v6034_v28, 2  ;;  %v5908_v63 = vadd.f32 %v5900_v12, %v13313_v39 }
0x1c12   :  { %v9169_v9 = vpop.f32.mrf.mxu1  ;;  %v9180_v36 = vpop.f32.mrf.mxu0 }
0x1c13   :  { %v5909_v24 = vadd.f32 %v5905_v26, %v13301_v1  ;;  %v6043_v57 = vadd.f32 %v6039_v13, %v13307_v15  ;;  %v6044_v62 = vadd.f32 %v6040_v4, %v13309_v58  ;;  %v8500_v46 = vmul.f32 -1.442695, %v5908_v63 }
0x1c15   :  { %9670 = vtanh.f32 %v5909_v24  ;;  %v8501_v45 = vmul.f32 -1.442695, %v5909_v24  ;;  %v8502_v53 = vmul.f32 -1.442695, %v6043_v57  ;;  %v8503_v61 = vmul.f32 -1.442695, %v6044_v62 }
0x1c16   :  { %9672 = vtanh.f32 %v6043_v57 }
0x1c17   :  { %9674 = vtanh.f32 %v6044_v62 }
0x1c18   :  { %9676 = vtanh.f32 %v5908_v63 }
0x1c19   :  { %9678 = vpow2.f32 %v8501_v45 }
0x1c1a   :  { %9680 = vpow2.f32 %v8502_v53 }
0x1c1b   :  { %9682 = vpow2.f32 %v8503_v61 }
0x1c1c   :  { %9684 = vpow2.f32 %v8500_v46 }
0x1c22   :  { %v9671_v14 = vpop.eup %9670 }
0x1c23   :  { %5930 = vrot.lane.b32.xlu0 %v9671_v14, %s10116_s1  ;;  %v9673_v31 = vpop.eup %9672 }
0x1c24   :  { %v9675_v16 = vpop.eup %9674  ;;  %6063 = vrot.lane.b32.xlu1 %v9673_v31, %s10116_s1 }
0x1c25   :  { %v9677_v41 = vpop.eup %9676 }
0x1c26   :  { %v9679_v55 = vpop.eup %9678 }
0x1c27   :  { %6065 = vrot.lane.b32.xlu0 %v9675_v16, %s10116_s1  ;;  %v5917_v7 = vadd.f32 1.0, %v9679_v55  ;;  %v9681_v52 = vpop.eup %9680 }
0x1c28   :  { %5928 = vrot.lane.b32.xlu1 %v9677_v41, %s10116_s1  ;;  %v9683_v34 = vpop.eup %9682  ;;  %v6051_v22 = vadd.f32 1.0, %v9681_v52 }
0x1c29   :  { %9686 = vrcp.f32 %v5917_v7  ;;  %v9685_v6 = vpop.eup %9684  ;;  %v6052_v27 = vadd.f32 1.0, %v9683_v34 }
0x1c2a   :  { %v5916_v49 = vadd.f32 1.0, %v9685_v6  ;;  %9688 = vrcp.f32 %v6051_v22 }
0x1c2b   :  { %9690 = vrcp.f32 %v6052_v27 }
0x1c2c   :  { %9692 = vrcp.f32 %v5916_v49 }
0x1c36   :  { %v9687_v35 = vpop.eup %9686 }
0x1c37   :  { %v9689_v43 = vpop.eup %9688  ;;  %v5925_v56 = vmul.f32 0.0, %v9687_v35 }
0x1c38   :  { %v9691_v23 = vpop.eup %9690  ;;  %v6059_v38 = vmul.f32 0.0, %v9689_v43 }
0x1c39   :  { %v9693_v37 = vpop.eup %9692  ;;  %v6060_v3 = vmul.f32 0.0, %v9691_v23 }
0x1c3a   :  { %v5924_v54 = vmul.f32 0.0, %v9693_v37 }
0x1c95   :  { %v5931_v19 = vpop.permute.xlu0 %5930 }
0x1c96   :  { %v5935_v44 = vmul.f32 %v9687_v35, %v5931_v19  ;;  %v6064_v48 = vpop.permute.xlu1 %6063 }
0x1c97   :  { %v6069_v2 = vmul.f32 %v9689_v43, %v6064_v48 }
0x1c98   :  { %5940 = vrot.lane.b32.xlu0 %v5935_v44, %s10112_s30 }
0x1c99   :  { %v6066_v51 = vpop.permute.xlu0 %6065  ;;  %6073 = vrot.lane.b32.xlu1 %v6069_v2, %s10112_s30 }
0x1c9a   :  { %v6070_v21 = vmul.f32 %v9691_v23, %v6066_v51  ;;  %v5929_v60 = vpop.permute.xlu1 %5928 }
0x1c9b   :  { %v5934_v29 = vmul.f32 %v9693_v37, %v5929_v60 }
0x1c9c   :  { %6075 = vrot.lane.b32.xlu0 %v6070_v21, %s10112_s30 }
0x1c9d   :  { %5938 = vrot.lane.b32.xlu1 %v5934_v29, %s10112_s30 }
0x1d0a   :  { %v5941_v17 = vpop.permute.xlu0 %5940 }
0x1d0b   :  { %v13324_v8 = vadd.f32 %v5941_v17, %v5925_v56  ;;  %v6074_v47 = vpop.permute.xlu1 %6073 }
0x1d0c   :  { %v13327_v10 = vadd.f32 %v6074_v47, %v6059_v38 }
0x1d0d   :  { %9694 = vtanh.f32 %v13324_v8 }
0x1d0e   :  { %v6076_v25 = vpop.permute.xlu0 %6075  ;;  %9696 = vtanh.f32 %v13327_v10 }
0x1d0f   :  { %v13329_v42 = vadd.f32 %v6076_v25, %v6060_v3  ;;  %v5939_v20 = vpop.permute.xlu1 %5938 }
0x1d10   :  { %v13333_v12 = vadd.f32 %v5939_v20, %v5924_v54 }
0x1d11   :  { %9698 = vtanh.f32 %v13329_v42 }
0x1d12   :  { %9700 = vtanh.f32 %v13333_v12 }
0x1d1a   :  { %v9695_v28 = vpop.eup %9694 }
0x1d1b   :  { %5952 = vrot.lane.b32.xlu0 %v9695_v28, %s10116_s1  ;;  %v9697_v26 = vpop.eup %9696 }
0x1d1c   :  { %6085 = vrot.lane.b32.xlu1 %v9697_v26, %s10116_s1 }
0x1d1e   :  { %v9699_v40 = vpop.eup %9698 }
0x1d1f   :  { %6087 = vrot.lane.b32.xlu0 %v9699_v40, %s10116_s1  ;;  %v9701_v13 = vpop.eup %9700 }
0x1d20   :  { %5950 = vrot.lane.b32.xlu1 %v9701_v13, %s10116_s1 }
0x1d8d   :  { %v5953_v9 = vpop.permute.xlu0 %5952 }
0x1d8e   :  { %v6086_v36 = vpop.permute.xlu1 %6085  ;;  %v13340_v24 = vmul.f32 %v9687_v35, %v5953_v9 }
0x1d8f   :  { %v13342_v4 = vmul.f32 %v9689_v43, %v6086_v36 }
0x1d90   :  { %v6103_v16 = vrot.slane %v13340_v24, 7 }
0x1d91   :  { %v6088_v57 = vpop.permute.xlu0 %6087  ;;  %v6249_v63 = vrot.slane %v13342_v4, 7 }
0x1d92   :  { %v13344_v62 = vmul.f32 %v9691_v23, %v6088_v57  ;;  %v5951_v31 = vpop.permute.xlu1 %5950 }
0x1d93   :  { %v13349_v41 = vmul.f32 %v9693_v37, %v5951_v31 }
0x1d94   :  { %v6250_v14 = vrot.slane %v13344_v62, 6 }
0x1d95   :  { %v6104_v53 = vsel %vm3558_vm1, %v6103_v16, %v13349_v41 }
0x1d96   :  { %v6251_v45 = vsel %vm3558_vm1, %v6250_v14, %v6249_v63  ;;  %6105 = vrot.lane.b32.xlu0 %v6104_v53, %s10112_s30  ;;  %v6201_v53 = vrot.slane %v13333_v12, 7 }
0x1d97   :  { %6252 = vrot.lane.b32.xlu1 %v6251_v45, %s10112_s30  ;;  %v6349_v45 = vrot.slane %v13327_v10, 1 }
0x1e08   :  { %v6106_v46 = vpop.permute.xlu0 %6105 }
0x1e09   :  { %v6253_v61 = vpop.permute.xlu1 %6252  ;;  %9190 = vmatmul.mubr.msk.f32.vlgmr.msra.gmra.mxu1 %vm2721_vm14, %v6106_v46 }
0x1e0a   :  { %9201 = vmatmul.mubr.msk.f32.vlgmr.msra.gmra.mxu0 %vm2721_vm14, %v6253_v61  ;;  %9204 = vmatpush3.msra.mxu1 %v13238_v32 }
0x1e0b   :  { %9215 = vmatpush3.msra.mxu0 %v13240_v50  ;;  %9205 = vmatprep.subr.mxu1 %v10102_v0 }
0x1e0c   :  { %9216 = vmatprep.subr.mxu0 %v10102_v0  ;;  %9206 = vmatpush3.msra.mxu1 %v13244_v5 }
0x1e0d   :  { %9217 = vmatpush3.msra.mxu0 %v13246_v18  ;;  %9207 = vmatprep.subr.mxu1 %v10102_v0 }
0x1e0e   :  { %9218 = vmatprep.subr.mxu0 %v10102_v0  ;;  %9208 = vmatpush3.msra.mxu1 %v13252_v30 }
0x1e0f   :  { %9219 = vmatpush3.msra.mxu0 %v13254_v59  ;;  %9209 = vmatprep.subr.mxu1 %v10102_v0 }
0x1e10   :  { %9220 = vmatprep.subr.mxu0 %v10102_v0  ;;  %9211 = vmatprep.mubr.msk.f32.mxu1 %vm10117_vm0, %v10102_v0 }
0x1e11   :  { %9210 = vmatpush3.msra.mxu1 %v13260_v33  ;;  %9221 = vmatpush3.msra.mxu0 %v13264_v11 }
0x1e12   :  { %9222 = vmatprep.mubr.msk.f32.mxu0 %vm10117_vm0, %v10102_v0  ;;  %9225 = vmatprep.subr.mxu1 %v10102_v0 }
0x1e13   :  { %9236 = vmatprep.subr.mxu0 %v10102_v0 }
0x1ec9   :  { %v6175_v7 = vpop.f32.mrf.mxu1 }
0x1eca   :  { %v6322_v55 = vpop.f32.mrf.mxu0  ;;  %v6180_v34 = vrot.slane %v6175_v7, 7  ;;  %v6184_v19 = vadd.f32 %v6175_v7, %v13301_v1 }
0x1ecb   :  { %v6327_v52 = vrot.slane %v6322_v55, 2  ;;  %v9191_v6 = vpop.f32.mrf.mxu1  ;;  %v6328_v27 = vrot.slane %v6322_v55, 3  ;;  %v6202_v55 = vrot.slane %v13324_v8, 7 }
0x1ecc   :  { %v9202_v22 = vpop.f32.mrf.mxu0  ;;  %v6183_v35 = vadd.f32 %v6180_v34, %v13313_v39  ;;  %v8506_v37 = vmul.f32 -1.442695, %v6184_v19 }
0x1ecd   :  { %v6331_v49 = vadd.f32 %v6327_v52, %v13307_v15  ;;  %v6332_v44 = vadd.f32 %v6328_v27, %v13309_v58  ;;  %v6350_v22 = vrot.slane %v13329_v42, 1 }
0x1ece   :  { %v8505_v21 = vmul.f32 -1.442695, %v6183_v35 }
0x1ecf   :  { %9702 = vtanh.f32 %v6331_v49  ;;  %v8508_v51 = vmul.f32 -1.442695, %v6331_v49  ;;  %v8509_v60 = vmul.f32 -1.442695, %v6332_v44 }
0x1ed0   :  { %9704 = vtanh.f32 %v6183_v35 }
0x1ed1   :  { %9706 = vtanh.f32 %v6184_v19 }
0x1ed2   :  { %9708 = vtanh.f32 %v6332_v44 }
0x1ed3   :  { %9710 = vpow2.f32 %v8508_v51 }
0x1ed4   :  { %9712 = vpow2.f32 %v8505_v21 }
0x1ed5   :  { %9714 = vpow2.f32 %v8506_v37 }
0x1ed6   :  { %9716 = vpow2.f32 %v8509_v60 }
0x1edc   :  { %v9703_v43 = vpop.eup %9702 }
0x1edd   :  { %6357 = vrot.lane.b32.xlu1 %v9703_v43, %s10116_s1  ;;  %v9705_v48 = vpop.eup %9704 }
0x1ede   :  { %6209 = vrot.lane.b32.xlu0 %v9705_v48, %s10116_s1  ;;  %v9707_v23 = vpop.eup %9706 }
0x1edf   :  { %v9709_v2 = vpop.eup %9708 }
0x1ee0   :  { %v9711_v29 = vpop.eup %9710 }
0x1ee1   :  { %6211 = vrot.lane.b32.xlu1 %v9707_v23, %s10116_s1  ;;  %v9713_v56 = vpop.eup %9712  ;;  %v6339_v17 = vadd.f32 1.0, %v9711_v29 }
0x1ee2   :  { %6359 = vrot.lane.b32.xlu0 %v9709_v2, %s10116_s1  ;;  %v9715_v38 = vpop.eup %9714  ;;  %v6191_v47 = vadd.f32 1.0, %v9713_v56 }
0x1ee3   :  { %v9717_v3 = vpop.eup %9716  ;;  %v6192_v25 = vadd.f32 1.0, %v9715_v38  ;;  %9718 = vrcp.f32 %v6339_v17 }
0x1ee4   :  { %9720 = vrcp.f32 %v6191_v47  ;;  %v6340_v54 = vadd.f32 1.0, %v9717_v3 }
0x1ee5   :  { %9722 = vrcp.f32 %v6192_v25 }
0x1ee6   :  { %9724 = vrcp.f32 %v6340_v54 }
0x1ef0   :  { %v9719_v20 = vpop.eup %9718 }
0x1ef1   :  { %v9721_v40 = vpop.eup %9720  ;;  %v6353_v61 = vmul.f32 %v9719_v20, %v6349_v45 }
0x1ef2   :  { %v9723_v36 = vpop.eup %9722  ;;  %v6205_v7 = vmul.f32 %v9721_v40, %v6201_v53 }
0x1ef3   :  { %v9725_v14 = vpop.eup %9724  ;;  %v6206_v27 = vmul.f32 %v9723_v36, %v6202_v55 }
0x1ef4   :  { %v6354_v10 = vmul.f32 %v9725_v14, %v6350_v22 }
0x1f4f   :  { %v6358_v28 = vpop.permute.xlu1 %6357 }
0x1f50   :  { %v6363_v26 = vmul.f32 %v9719_v20, %v6358_v28  ;;  %v6210_v13 = vpop.permute.xlu0 %6209 }
0x1f51   :  { %v6215_v9 = vmul.f32 %v9721_v40, %v6210_v13 }
0x1f52   :  { %6367 = vrot.lane.b32.xlu1 %v6363_v26, %s10112_s30 }
0x1f53   :  { %v6212_v57 = vpop.permute.xlu1 %6211  ;;  %6219 = vrot.lane.b32.xlu0 %v6215_v9, %s10112_s30 }
0x1f54   :  { %v6216_v63 = vmul.f32 %v9723_v36, %v6212_v57  ;;  %v6360_v31 = vpop.permute.xlu0 %6359 }
0x1f55   :  { %v6364_v16 = vmul.f32 %v9725_v14, %v6360_v31 }
0x1f56   :  { %6221 = vrot.lane.b32.xlu1 %v6216_v63, %s10112_s30 }
0x1f57   :  { %6369 = vrot.lane.b32.xlu0 %v6364_v16, %s10112_s30 }
0x1fc4   :  { %v6368_v46 = vpop.permute.xlu1 %6367 }
0x1fc5   :  { %v13393_v52 = vadd.f32 %v6368_v46, %v6353_v61  ;;  %v6220_v34 = vpop.permute.xlu0 %6219 }
0x1fc6   :  { %v13396_v6 = vadd.f32 %v6220_v34, %v6205_v7 }
0x1fc7   :  { %9726 = vtanh.f32 %v13393_v52 }
0x1fc8   :  { %v6222_v49 = vpop.permute.xlu1 %6221  ;;  %9728 = vtanh.f32 %v13396_v6 }
0x1fc9   :  { %v13400_v12 = vadd.f32 %v6222_v49, %v6206_v27  ;;  %v6370_v35 = vpop.permute.xlu0 %6369 }
0x1fca   :  { %v13402_v19 = vadd.f32 %v6370_v35, %v6354_v10 }
0x1fcb   :  { %9730 = vtanh.f32 %v13400_v12 }
0x1fcc   :  { %9732 = vtanh.f32 %v13402_v19 }
0x1fd4   :  { %v9727_v8 = vpop.eup %9726 }
0x1fd5   :  { %6379 = vrot.lane.b32.xlu1 %v9727_v8, %s10116_s1  ;;  %v9729_v42 = vpop.eup %9728 }
0x1fd6   :  { %6231 = vrot.lane.b32.xlu0 %v9729_v42, %s10116_s1 }
0x1fd8   :  { %v9731_v44 = vpop.eup %9730 }
0x1fd9   :  { %6233 = vrot.lane.b32.xlu1 %v9731_v44, %s10116_s1  ;;  %v9733_v43 = vpop.eup %9732 }
0x1fda   :  { %6381 = vrot.lane.b32.xlu0 %v9733_v43, %s10116_s1 }
0x2047   :  { %v6380_v48 = vpop.permute.xlu1 %6379 }
0x2048   :  { %v6232_v23 = vpop.permute.xlu0 %6231  ;;  %v13413_v37 = vmul.f32 %v9719_v20, %v6380_v48 }
0x2049   :  { %v13410_v2 = vmul.f32 %v9721_v40, %v6232_v23 }
0x204a   :  { %v6544_v38 = vrot.slane %v13413_v37, 6 }
0x204b   :  { %v6234_v51 = vpop.permute.xlu1 %6233  ;;  %v6397_v21 = vrot.slane %v13410_v2, 1 }
0x204c   :  { %v13415_v60 = vmul.f32 %v9723_v36, %v6234_v51  ;;  %v6382_v29 = vpop.permute.xlu0 %6381 }
0x204d   :  { %v13417_v56 = vmul.f32 %v9725_v14, %v6382_v29 }
0x204e   :  { %v6398_v17 = vsel %vm3558_vm1, %v13415_v60, %v6397_v21 }
0x204f   :  { %6399 = vrot.lane.b32.xlu0 %v6398_v17, %s10112_s30  ;;  %v6545_v47 = vrot.slane %v13417_v56, 5 }
0x2051   :  { %v6546_v3 = vsel %vm3558_vm1, %v6545_v47, %v6544_v38 }
0x2052   :  { %6547 = vrot.lane.b32.xlu1 %v6546_v3, %s10112_s30 }
0x20c1   :  { %v6400_v25 = vpop.permute.xlu0 %6399 }
0x20c2   :  { %9212 = vmatmul.mubr.msk.f32.vlgmr.msra.gmra.mxu1 %vm2721_vm14, %v6400_v25 }
0x20c3   :  { %9226 = vmatpush3.msra.mxu1 %v13238_v32  ;;  %9233 = vmatprep.mubr.msk.f32.mxu1 %vm10117_vm0, %v10102_v0 }
0x20c4   :  { %9227 = vmatprep.subr.mxu1 %v10102_v0  ;;  %v6548_v54 = vpop.permute.xlu1 %6547 }
0x20c5   :  { %9228 = vmatpush3.msra.mxu1 %v13244_v5  ;;  %9223 = vmatmul.mubr.msk.f32.vlgmr.msra.gmra.mxu0 %vm2721_vm14, %v6548_v54 }
0x20c6   :  { %9229 = vmatprep.subr.mxu1 %v10102_v0  ;;  %9237 = vmatpush3.msra.mxu0 %v13240_v50 }
0x20c7   :  { %9230 = vmatpush3.msra.mxu1 %v13252_v30  ;;  %9238 = vmatprep.subr.mxu0 %v10102_v0 }
0x20c8   :  { %9231 = vmatprep.subr.mxu1 %v10102_v0  ;;  %9239 = vmatpush3.msra.mxu0 %v13246_v18 }
0x20c9   :  { %9232 = vmatpush3.msra.mxu1 %v13260_v33  ;;  %9240 = vmatprep.subr.mxu0 %v10102_v0 }
0x20ca   :  { %9244 = vmatprep.mubr.msk.f32.mxu0 %vm10117_vm0, %v10102_v0  ;;  %9241 = vmatpush3.msra.mxu0 %v13254_v59 }
0x20cb   :  { %9247 = vmatprep.subr.mxu1 %v10102_v0  ;;  %9242 = vmatprep.subr.mxu0 %v10102_v0 }
0x20cc   :  { %9243 = vmatpush3.msra.mxu0 %v13264_v11 }
0x20cd   :  { %9258 = vmatprep.subr.mxu0 %v10102_v0 }
0x2182   :  { %v6469_v20 = vpop.f32.mrf.mxu1 }
0x2183   :  { %v6474_v28 = vrot.slane %v6469_v20, 6  ;;  %v6475_v26 = vrot.slane %v6469_v20, 7 }
0x2184   :  { %v9213_v40 = vpop.f32.mrf.mxu1 }
0x2185   :  { %v6478_v13 = vadd.f32 %v6474_v28, %v13313_v39  ;;  %v6479_v9 = vadd.f32 %v6475_v26, %v13301_v1  ;;  %v6617_v36 = vpop.f32.mrf.mxu0  ;;  %v6496_v28 = vrot.slane %v13396_v6, 7  ;;  %v6497_v26 = vrot.slane %v13400_v12, 7 }
0x2186   :  { %v6622_v57 = vrot.slane %v6617_v36, 3  ;;  %v6623_v63 = vrot.slane %v6617_v36, 4  ;;  %v6644_v36 = vrot.slane %v13393_v52, 1 }
0x2187   :  { %9734 = vtanh.f32 %v6478_v13  ;;  %v9224_v14 = vpop.f32.mrf.mxu0  ;;  %v8511_v55 = vmul.f32 -1.442695, %v6478_v13  ;;  %v8512_v7 = vmul.f32 -1.442695, %v6479_v9 }
0x2188   :  { %9736 = vtanh.f32 %v6479_v9  ;;  %v6626_v31 = vadd.f32 %v6622_v57, %v13307_v15  ;;  %v6627_v16 = vadd.f32 %v6623_v63, %v13309_v58  ;;  %v6645_v14 = vrot.slane %v13402_v19, 1 }
0x218a   :  { %9738 = vtanh.f32 %v6626_v31  ;;  %v8514_v34 = vmul.f32 -1.442695, %v6626_v31  ;;  %v8515_v22 = vmul.f32 -1.442695, %v6627_v16 }
0x218b   :  { %9740 = vtanh.f32 %v6627_v16 }
0x218c   :  { %9742 = vpow2.f32 %v8511_v55 }
0x218d   :  { %9744 = vpow2.f32 %v8512_v7 }
0x218e   :  { %9746 = vpow2.f32 %v8514_v34 }
0x218f   :  { %9748 = vpow2.f32 %v8515_v22 }
0x2194   :  { %v9735_v45 = vpop.eup %9734 }
0x2195   :  { %v9737_v53 = vpop.eup %9736  ;;  %6504 = vrot.lane.b32.xlu0 %v9735_v45, %s10116_s1 }
0x2196   :  { %6506 = vrot.lane.b32.xlu1 %v9737_v53, %s10116_s1 }
0x2197   :  { %v9739_v61 = vpop.eup %9738 }
0x2198   :  { %v9741_v46 = vpop.eup %9740 }
0x2199   :  { %6652 = vrot.lane.b32.xlu0 %v9739_v61, %s10116_s1  ;;  %v9743_v27 = vpop.eup %9742 }
0x219a   :  { %6654 = vrot.lane.b32.xlu1 %v9741_v46, %s10116_s1  ;;  %v9745_v49 = vpop.eup %9744  ;;  %v6486_v10 = vadd.f32 1.0, %v9743_v27 }
0x219b   :  { %v9747_v35 = vpop.eup %9746  ;;  %v6487_v8 = vadd.f32 1.0, %v9745_v49 }
0x219c   :  { %v9749_v42 = vpop.eup %9748  ;;  %9750 = vrcp.f32 %v6486_v10  ;;  %v6634_v44 = vadd.f32 1.0, %v9747_v35 }
0x219d   :  { %9752 = vrcp.f32 %v6487_v8  ;;  %v6635_v43 = vadd.f32 1.0, %v9749_v42 }
0x219e   :  { %9754 = vrcp.f32 %v6634_v44 }
0x219f   :  { %9756 = vrcp.f32 %v6635_v43 }
0x21a9   :  { %v9751_v48 = vpop.eup %9750 }
0x21aa   :  { %v9753_v51 = vpop.eup %9752  ;;  %v6500_v40 = vmul.f32 %v9751_v48, %v6496_v28 }
0x21ab   :  { %v9755_v38 = vpop.eup %9754  ;;  %v6501_v13 = vmul.f32 %v9753_v51, %v6497_v26 }
0x21ac   :  { %v9757_v3 = vpop.eup %9756  ;;  %v6648_v16 = vmul.f32 %v9755_v38, %v6644_v36 }
0x21ad   :  { %v6649_v6 = vmul.f32 %v9757_v3, %v6645_v14 }
0x2207   :  { %v6505_v23 = vpop.permute.xlu0 %6504 }
0x2208   :  { %v6510_v21 = vmul.f32 %v9751_v48, %v6505_v23  ;;  %v6507_v29 = vpop.permute.xlu1 %6506 }
0x2209   :  { %v6511_v17 = vmul.f32 %v9753_v51, %v6507_v29 }
0x220a   :  { %6514 = vrot.lane.b32.xlu0 %v6510_v21, %s10112_s30 }
0x220b   :  { %6516 = vrot.lane.b32.xlu1 %v6511_v17, %s10112_s30  ;;  %v6653_v47 = vpop.permute.xlu0 %6652 }
0x220c   :  { %v6655_v25 = vpop.permute.xlu1 %6654  ;;  %v6658_v54 = vmul.f32 %v9755_v38, %v6653_v47 }
0x220d   :  { %v6659_v20 = vmul.f32 %v9757_v3, %v6655_v25 }
0x220e   :  { %6662 = vrot.lane.b32.xlu0 %v6658_v54, %s10112_s30 }
0x220f   :  { %6664 = vrot.lane.b32.xlu1 %v6659_v20, %s10112_s30 }
0x227c   :  { %v6515_v9 = vpop.permute.xlu0 %6514 }
0x227d   :  { %v6517_v57 = vpop.permute.xlu1 %6516  ;;  %v13463_v63 = vadd.f32 %v6515_v9, %v6500_v40 }
0x227e   :  { %v13466_v31 = vadd.f32 %v6517_v57, %v6501_v13 }
0x227f   :  { %9758 = vtanh.f32 %v13463_v63 }
0x2280   :  { %9760 = vtanh.f32 %v13466_v31  ;;  %v6663_v45 = vpop.permute.xlu0 %6662 }
0x2281   :  { %v6665_v12 = vpop.permute.xlu1 %6664  ;;  %v13470_v53 = vadd.f32 %v6663_v45, %v6648_v16 }
0x2282   :  { %v13472_v61 = vadd.f32 %v6665_v12, %v6649_v6 }
0x2283   :  { %9762 = vtanh.f32 %v13470_v53 }
0x2284   :  { %9764 = vtanh.f32 %v13472_v61 }
0x228c   :  { %v9759_v52 = vpop.eup %9758 }
0x228d   :  { %v9761_v19 = vpop.eup %9760  ;;  %6526 = vrot.lane.b32.xlu0 %v9759_v52, %s10116_s1 }
0x228e   :  { %6528 = vrot.lane.b32.xlu1 %v9761_v19, %s10116_s1 }
0x2290   :  { %v9763_v46 = vpop.eup %9762 }
0x2291   :  { %v9765_v55 = vpop.eup %9764  ;;  %6674 = vrot.lane.b32.xlu0 %v9763_v46, %s10116_s1 }
0x2292   :  { %6676 = vrot.lane.b32.xlu1 %v9765_v55, %s10116_s1 }
0x22ff   :  { %v6527_v7 = vpop.permute.xlu0 %6526 }
0x2300   :  { %v6529_v34 = vpop.permute.xlu1 %6528  ;;  %v13480_v22 = vmul.f32 %v9751_v48, %v6527_v7 }
0x2301   :  { %v13482_v27 = vmul.f32 %v9753_v51, %v6529_v34 }
0x2302   :  { %v6692_v49 = vrot.slane %v13480_v22, 2 }
0x2303   :  { %v6693_v10 = vrot.slane %v13482_v27, 1  ;;  %v6675_v35 = vpop.permute.xlu0 %6674 }
0x2304   :  { %v6677_v8 = vpop.permute.xlu1 %6676  ;;  %v13486_v42 = vmul.f32 %v9755_v38, %v6675_v35 }
0x2305   :  { %v13488_v44 = vmul.f32 %v9757_v3, %v6677_v8  ;;  %v6694_v43 = vsel %vm3558_vm1, %v6693_v10, %v6692_v49 }
0x2306   :  { %v6840_v23 = vrot.slane %v13486_v42, 5  ;;  %6695 = vrot.lane.b32.xlu0 %v6694_v43, %s10112_s30 }
0x2307   :  { %v6841_v48 = vrot.slane %v13488_v44, 4 }
0x2309   :  { %v6842_v51 = vsel %vm3558_vm1, %v6841_v48, %v6840_v23 }
0x230a   :  { %6843 = vrot.lane.b32.xlu1 %v6842_v51, %s10112_s30  ;;  %v6792_v51 = vrot.slane %v13463_v63, 7 }
0x2378   :  { %v6696_v21 = vpop.permute.xlu0 %6695 }
0x2379   :  { %9234 = vmatmul.mubr.msk.f32.vlgmr.msra.gmra.mxu1 %vm2721_vm14, %v6696_v21  ;;  %v6793_v21 = vrot.slane %v13466_v31, 7 }
0x237a   :  { %9248 = vmatpush3.msra.mxu1 %v13238_v32  ;;  %9255 = vmatprep.mubr.msk.f32.mxu1 %vm10117_vm0, %v10102_v0 }
0x237b   :  { %9249 = vmatprep.subr.mxu1 %v10102_v0 }
0x237c   :  { %v6844_v29 = vpop.permute.xlu1 %6843  ;;  %9250 = vmatpush3.msra.mxu1 %v13244_v5 }
0x237d   :  { %9245 = vmatmul.mubr.msk.f32.vlgmr.msra.gmra.mxu0 %vm2721_vm14, %v6844_v29  ;;  %9251 = vmatprep.subr.mxu1 %v10102_v0 }
0x237e   :  { %9252 = vmatpush3.msra.mxu1 %v13252_v30  ;;  %9259 = vmatpush3.msra.mxu0 %v13240_v50 }
0x237f   :  { %9253 = vmatprep.subr.mxu1 %v10102_v0  ;;  %9260 = vmatprep.subr.mxu0 %v10102_v0 }
0x2380   :  { %9254 = vmatpush3.msra.mxu1 %v13260_v33  ;;  %9261 = vmatpush3.msra.mxu0 %v13246_v18 }
0x2381   :  { %9262 = vmatprep.subr.mxu0 %v10102_v0  ;;  %9266 = vmatprep.mubr.msk.f32.mxu0 %vm10117_vm0, %v10102_v0 }
0x2382   :  { %9263 = vmatpush3.msra.mxu0 %v13254_v59  ;;  %9269 = vmatprep.subr.mxu1 %v10102_v0 }
0x2383   :  { %9264 = vmatprep.subr.mxu0 %v10102_v0 }
0x2384   :  { %9265 = vmatpush3.msra.mxu0 %v13264_v11 }
0x2385   :  { %9280 = vmatprep.subr.mxu0 %v10102_v0 }
0x2439   :  { %v6765_v32 = vpop.f32.mrf.mxu1 }
0x243a   :  { %v6770_v50 = vrot.slane %v6765_v32, 5  ;;  %v6771_v5 = vrot.slane %v6765_v32, 6 }
0x243b   :  { %v9235_v30 = vpop.f32.mrf.mxu1 }
0x243c   :  { %v6774_v18 = vadd.f32 %v6770_v50, %v13313_v39  ;;  %v6775_v33 = vadd.f32 %v6771_v5, %v13301_v1  ;;  %v6940_v5 = vrot.slane %v13470_v53, 1 }
0x243d   :  { %v6913_v17 = vpop.f32.mrf.mxu0 }
0x243e   :  { %9766 = vtanh.f32 %v6774_v18  ;;  %v6918_v38 = vrot.slane %v6913_v17, 4  ;;  %v6919_v59 = vrot.slane %v6913_v17, 5  ;;  %v8517_v26 = vmul.f32 -1.442695, %v6774_v18 }
0x243f   :  { %9768 = vtanh.f32 %v6775_v33  ;;  %v9246_v47 = vpop.f32.mrf.mxu0  ;;  %v8518_v40 = vmul.f32 -1.442695, %v6775_v33  ;;  %v6941_v33 = vrot.slane %v13472_v61, 1 }
0x2440   :  { %v6922_v3 = vadd.f32 %v6918_v38, %v13307_v15  ;;  %v6923_v11 = vadd.f32 %v6919_v59, %v13309_v58 }
0x2442   :  { %9770 = vtanh.f32 %v6922_v3  ;;  %v8520_v13 = vmul.f32 -1.442695, %v6922_v3  ;;  %v8521_v9 = vmul.f32 -1.442695, %v6923_v11 }
0x2443   :  { %9772 = vtanh.f32 %v6923_v11 }
0x2444   :  { %9774 = vpow2.f32 %v8517_v26 }
0x2445   :  { %9776 = vpow2.f32 %v8518_v40 }
0x2446   :  { %9778 = vpow2.f32 %v8520_v13 }
0x2447   :  { %9780 = vpow2.f32 %v8521_v9 }
0x244b   :  { %v9767_v25 = vpop.eup %9766 }
0x244c   :  { %v9769_v54 = vpop.eup %9768  ;;  %6800 = vrot.lane.b32.xlu0 %v9767_v25, %s10116_s1 }
0x244d   :  { %6802 = vrot.lane.b32.xlu1 %v9769_v54, %s10116_s1 }
0x244f   :  { %v9771_v20 = vpop.eup %9770 }
0x2450   :  { %v9773_v28 = vpop.eup %9772  ;;  %6948 = vrot.lane.b32.xlu0 %v9771_v20, %s10116_s1 }
0x2451   :  { %6950 = vrot.lane.b32.xlu1 %v9773_v28, %s10116_s1  ;;  %v9775_v36 = vpop.eup %9774 }
0x2452   :  { %v9777_v57 = vpop.eup %9776  ;;  %v6782_v14 = vadd.f32 1.0, %v9775_v36 }
0x2453   :  { %v9779_v16 = vpop.eup %9778  ;;  %v6783_v6 = vadd.f32 1.0, %v9777_v57 }
0x2454   :  { %v9781_v45 = vpop.eup %9780  ;;  %9782 = vrcp.f32 %v6782_v14  ;;  %v6930_v12 = vadd.f32 1.0, %v9779_v16 }
0x2455   :  { %9784 = vrcp.f32 %v6783_v6  ;;  %v6931_v52 = vadd.f32 1.0, %v9781_v45 }
0x2456   :  { %9786 = vrcp.f32 %v6930_v12 }
0x2457   :  { %9788 = vrcp.f32 %v6931_v52 }
0x2461   :  { %v9783_v19 = vpop.eup %9782 }
0x2462   :  { %v9785_v55 = vpop.eup %9784  ;;  %v6796_v29 = vmul.f32 %v9783_v19, %v6792_v51 }
0x2463   :  { %v9787_v10 = vpop.eup %9786  ;;  %v6797_v32 = vmul.f32 %v9785_v55, %v6793_v21 }
0x2464   :  { %v9789_v8 = vpop.eup %9788  ;;  %v6944_v38 = vmul.f32 %v9787_v10, %v6940_v5 }
0x2465   :  { %v6945_v63 = vmul.f32 %v9789_v8, %v6941_v33 }
0x24be   :  { %v6801_v46 = vpop.permute.xlu0 %6800 }
0x24bf   :  { %v6803_v7 = vpop.permute.xlu1 %6802  ;;  %v6806_v34 = vmul.f32 %v9783_v19, %v6801_v46 }
0x24c0   :  { %v6807_v49 = vmul.f32 %v9785_v55, %v6803_v7  ;;  %v13578_v7 = vld [vmem:[#allocation12 + $0x8] sm:$0xff] }
0x24c1   :  { %6810 = vrot.lane.b32.xlu0 %v6806_v34, %s10112_s30  ;;  %v13581_v34 = vld [vmem:[#allocation13 + $0x18] sm:$0xff] }
0x24c2   :  { %6812 = vrot.lane.b32.xlu1 %v6807_v49, %s10112_s30  ;;  %v6949_v35 = vpop.permute.xlu0 %6948  ;;  %v13586_v49 = vld [vmem:[#allocation12] sm:$0xff] }
0x24c3   :  { %v6951_v43 = vpop.permute.xlu1 %6950  ;;  %v6954_v23 = vmul.f32 %v9787_v10, %v6949_v35  ;;  %v13595_v35 = vld [vmem:[#allocation13 + $0x8] sm:$0xff] }
0x24c4   :  { %v6955_v48 = vmul.f32 %v9789_v8, %v6951_v43 }
0x24c5   :  { %6958 = vrot.lane.b32.xlu0 %v6954_v23, %s10112_s30 }
0x24c6   :  { %6960 = vrot.lane.b32.xlu1 %v6955_v48, %s10112_s30 }
0x2533   :  { %v6811_v50 = vpop.permute.xlu0 %6810 }
0x2534   :  { %v6813_v30 = vpop.permute.xlu1 %6812  ;;  %v13533_v18 = vadd.f32 %v6811_v50, %v6796_v29 }
0x2535   :  { %v13536_v17 = vadd.f32 %v6813_v30, %v6797_v32 }
0x2536   :  { %9790 = vtanh.f32 %v13533_v18 }
0x2537   :  { %9792 = vtanh.f32 %v13536_v17  ;;  %v6959_v59 = vpop.permute.xlu0 %6958 }
0x2538   :  { %v6961_v31 = vpop.permute.xlu1 %6960  ;;  %v13540_v47 = vadd.f32 %v6959_v59, %v6944_v38 }
0x2539   :  { %v13542_v3 = vadd.f32 %v6961_v31, %v6945_v63 }
0x253a   :  { %9794 = vtanh.f32 %v13540_v47 }
0x253b   :  { %9796 = vtanh.f32 %v13542_v3 }
0x2543   :  { %v9791_v53 = vpop.eup %9790 }
0x2544   :  { %v9793_v61 = vpop.eup %9792  ;;  %6822 = vrot.lane.b32.xlu0 %v9791_v53, %s10116_s1 }
0x2545   :  { %6824 = vrot.lane.b32.xlu1 %v9793_v61, %s10116_s1 }
0x2547   :  { %v9795_v11 = vpop.eup %9794 }
0x2548   :  { %v9797_v25 = vpop.eup %9796  ;;  %6970 = vrot.lane.b32.xlu0 %v9795_v11, %s10116_s1 }
0x2549   :  { %6972 = vrot.lane.b32.xlu1 %v9797_v25, %s10116_s1 }
0x25b6   :  { %v6823_v54 = vpop.permute.xlu0 %6822 }
0x25b7   :  { %v6825_v20 = vpop.permute.xlu1 %6824  ;;  %v13550_v28 = vmul.f32 %v9783_v19, %v6823_v54  ;;  %v13567_v19 = vld [vmem:[#allocation12 + $0x18] sm:$0xff] }
0x25b8   :  { %v13552_v26 = vmul.f32 %v9785_v55, %v6825_v20  ;;  %v13573_v55 = vld [vmem:[#allocation12 + $0x10] sm:$0xff] }
0x25b9   :  { %v6988_v40 = vrot.slane %v13550_v28, 3 }
0x25ba   :  { %v6989_v13 = vrot.slane %v13552_v26, 2  ;;  %v6971_v9 = vpop.permute.xlu0 %6970 }
0x25bb   :  { %v6973_v36 = vpop.permute.xlu1 %6972  ;;  %v13556_v57 = vmul.f32 %v9787_v10, %v6971_v9  ;;  %v13589_v10 = vld [vmem:[#allocation13 + $0x10] sm:$0xff] }
0x25bc   :  { %v13558_v14 = vmul.f32 %v9789_v8, %v6973_v36  ;;  %v6990_v16 = vsel %vm3558_vm1, %v6989_v13, %v6988_v40  ;;  %v13600_v8 = vld [vmem:[#allocation13] sm:$0xff] }
0x25bd   :  { %v7136_v6 = vrot.slane %v13556_v57, 4  ;;  %6991 = vrot.lane.b32.xlu0 %v6990_v16, %s10112_s30 }
0x25be   :  { %v7137_v45 = vrot.slane %v13558_v14, 3 }
0x25c0   :  { %v7138_v12 = vsel %vm3558_vm1, %v7137_v45, %v7136_v6 }
0x25c1   :  { %7139 = vrot.lane.b32.xlu1 %v7138_v12, %s10112_s30 }
0x262f   :  { %v6992_v52 = vpop.permute.xlu0 %6991 }
0x2630   :  { %9256 = vmatmul.mubr.msk.f32.vlgmr.msra.gmra.mxu1 %vm2721_vm14, %v6992_v52 }
0x2631   :  { %9270 = vmatpush3.msra.mxu1 %v13567_v19  ;;  %9277 = vmatprep.mubr.msk.f32.mxu1 %vm10117_vm0, %v10102_v0 }
0x2632   :  { %9271 = vmatprep.subr.mxu1 %v10102_v0 }
0x2633   :  { %v7140_v46 = vpop.permute.xlu1 %7139  ;;  %9272 = vmatpush3.msra.mxu1 %v13573_v55 }
0x2634   :  { %9267 = vmatmul.mubr.msk.f32.vlgmr.msra.gmra.mxu0 %vm2721_vm14, %v7140_v46  ;;  %9273 = vmatprep.subr.mxu1 %v10102_v0 }
0x2635   :  { %9274 = vmatpush3.msra.mxu1 %v13578_v7  ;;  %9281 = vmatpush3.msra.mxu0 %v13581_v34 }
0x2636   :  { %9275 = vmatprep.subr.mxu1 %v10102_v0  ;;  %9282 = vmatprep.subr.mxu0 %v10102_v0 }
0x2637   :  { %9276 = vmatpush3.msra.mxu1 %v13586_v49  ;;  %9283 = vmatpush3.msra.mxu0 %v13589_v10 }
0x2638   :  { %9284 = vmatprep.subr.mxu0 %v10102_v0  ;;  %9288 = vmatprep.mubr.msk.f32.mxu0 %vm10117_vm0, %v10102_v0 }
0x2639   :  { %9285 = vmatpush3.msra.mxu0 %v13595_v35  ;;  %9291 = vmatprep.subr.mxu1 %v10102_v0 }
0x263a   :  { %9286 = vmatprep.subr.mxu0 %v10102_v0 }
0x263b   :  { %9287 = vmatpush3.msra.mxu0 %v13600_v8 }
0x263c   :  { %9302 = vmatprep.subr.mxu0 %v10102_v0 }
0x26f0   :  { %v7061_v43 = vpop.f32.mrf.mxu1 }
0x26f1   :  { %v7066_v23 = vrot.slane %v7061_v43, 4  ;;  %v7067_v48 = vrot.slane %v7061_v43, 5 }
0x26f2   :  { %v9257_v51 = vpop.f32.mrf.mxu1 }
0x26f3   :  { %v7070_v21 = vadd.f32 %v7066_v23, %v13313_v39  ;;  %v7071_v29 = vadd.f32 %v7067_v48, %v13301_v1 }
0x26f4   :  { %v7209_v32 = vpop.f32.mrf.mxu0 }
0x26f5   :  { %9798 = vtanh.f32 %v7070_v21  ;;  %v7214_v50 = vrot.slane %v7209_v32, 5  ;;  %v7215_v5 = vrot.slane %v7209_v32, 6  ;;  %v8523_v61 = vmul.f32 -1.442695, %v7070_v21 }
0x26f6   :  { %9800 = vtanh.f32 %v7071_v29  ;;  %v9268_v30 = vpop.f32.mrf.mxu0  ;;  %v8524_v11 = vmul.f32 -1.442695, %v7071_v29 }
0x26f7   :  { %v7218_v33 = vadd.f32 %v7214_v50, %v13307_v15  ;;  %v7219_v38 = vadd.f32 %v7215_v5, %v13309_v58  ;;  %v7088_v30 = vrot.slane %v13533_v18, 7 }
0x26f9   :  { %9802 = vtanh.f32 %v7218_v33  ;;  %v8526_v25 = vmul.f32 -1.442695, %v7218_v33  ;;  %v8527_v54 = vmul.f32 -1.442695, %v7219_v38  ;;  %v7089_v33 = vrot.slane %v13536_v17, 7 }
0x26fa   :  { %9804 = vtanh.f32 %v7219_v38 }
0x26fb   :  { %9806 = vpow2.f32 %v8523_v61 }
0x26fc   :  { %9808 = vpow2.f32 %v8524_v11  ;;  %v7237_v11 = vrot.slane %v13542_v3, 1 }
0x26fd   :  { %9810 = vpow2.f32 %v8526_v25 }
0x26fe   :  { %9812 = vpow2.f32 %v8527_v54 }
0x2702   :  { %v9799_v63 = vpop.eup %9798 }
0x2703   :  { %v9801_v59 = vpop.eup %9800  ;;  %7096 = vrot.lane.b32.xlu0 %v9799_v63, %s10116_s1 }
0x2704   :  { %7098 = vrot.lane.b32.xlu1 %v9801_v59, %s10116_s1 }
0x2706   :  { %v9803_v31 = vpop.eup %9802 }
0x2707   :  { %v9805_v53 = vpop.eup %9804  ;;  %7244 = vrot.lane.b32.xlu0 %v9803_v31, %s10116_s1  ;;  %v7236_v31 = vrot.slane %v13540_v47, 1 }
0x2708   :  { %7246 = vrot.lane.b32.xlu1 %v9805_v53, %s10116_s1  ;;  %v9807_v20 = vpop.eup %9806 }
0x2709   :  { %v9809_v40 = vpop.eup %9808  ;;  %v7078_v13 = vadd.f32 1.0, %v9807_v20 }
0x270a   :  { %v9811_v9 = vpop.eup %9810  ;;  %v7079_v36 = vadd.f32 1.0, %v9809_v40 }
0x270b   :  { %v9813_v16 = vpop.eup %9812  ;;  %9814 = vrcp.f32 %v7078_v13  ;;  %v7226_v6 = vadd.f32 1.0, %v9811_v9 }
0x270c   :  { %9816 = vrcp.f32 %v7079_v36  ;;  %v7227_v45 = vadd.f32 1.0, %v9813_v16 }
0x270d   :  { %9818 = vrcp.f32 %v7226_v6 }
0x270e   :  { %9820 = vrcp.f32 %v7227_v45 }
0x2718   :  { %v9815_v12 = vpop.eup %9814 }
0x2719   :  { %v9817_v46 = vpop.eup %9816  ;;  %v7092_v38 = vmul.f32 %v9815_v12, %v7088_v30 }
0x271a   :  { %v9819_v51 = vpop.eup %9818  ;;  %v7093_v63 = vmul.f32 %v9817_v46, %v7089_v33 }
0x271b   :  { %v9821_v29 = vpop.eup %9820  ;;  %v7240_v54 = vmul.f32 %v9819_v51, %v7236_v31 }
0x271c   :  { %v7241_v18 = vmul.f32 %v9821_v29, %v7237_v11 }
0x2775   :  { %v7097_v52 = vpop.permute.xlu0 %7096 }
0x2776   :  { %v7099_v43 = vpop.permute.xlu1 %7098  ;;  %v7102_v23 = vmul.f32 %v9815_v12, %v7097_v52 }
0x2777   :  { %v7103_v48 = vmul.f32 %v9817_v46, %v7099_v43 }
0x2778   :  { %7106 = vrot.lane.b32.xlu0 %v7102_v23, %s10112_s30 }
0x2779   :  { %7108 = vrot.lane.b32.xlu1 %v7103_v48, %s10112_s30  ;;  %v7245_v21 = vpop.permute.xlu0 %7244 }
0x277a   :  { %v7247_v32 = vpop.permute.xlu1 %7246  ;;  %v7250_v50 = vmul.f32 %v9819_v51, %v7245_v21 }
0x277b   :  { %v7251_v5 = vmul.f32 %v9821_v29, %v7247_v32 }
0x277c   :  { %7254 = vrot.lane.b32.xlu0 %v7250_v50, %s10112_s30 }
0x277d   :  { %7256 = vrot.lane.b32.xlu1 %v7251_v5, %s10112_s30 }
0x27ea   :  { %v7107_v59 = vpop.permute.xlu0 %7106 }
0x27eb   :  { %v7109_v53 = vpop.permute.xlu1 %7108  ;;  %v13619_v61 = vadd.f32 %v7107_v59, %v7092_v38 }
0x27ec   :  { %v13622_v25 = vadd.f32 %v7109_v53, %v7093_v63 }
0x27ed   :  { %9822 = vtanh.f32 %v13619_v61 }
0x27ee   :  { %9824 = vtanh.f32 %v13622_v25  ;;  %v7255_v20 = vpop.permute.xlu0 %7254 }
0x27ef   :  { %v7257_v17 = vpop.permute.xlu1 %7256  ;;  %v13626_v40 = vadd.f32 %v7255_v20, %v7240_v54 }
0x27f0   :  { %v13628_v13 = vadd.f32 %v7257_v17, %v7241_v18 }
0x27f1   :  { %9826 = vtanh.f32 %v13626_v40 }
0x27f2   :  { %9828 = vtanh.f32 %v13628_v13 }
0x27fa   :  { %v9823_v47 = vpop.eup %9822 }
0x27fb   :  { %v9825_v3 = vpop.eup %9824  ;;  %7118 = vrot.lane.b32.xlu0 %v9823_v47, %s10116_s1 }
0x27fc   :  { %7120 = vrot.lane.b32.xlu1 %v9825_v3, %s10116_s1 }
0x27fe   :  { %v9827_v9 = vpop.eup %9826 }
0x27ff   :  { %v9829_v36 = vpop.eup %9828  ;;  %7266 = vrot.lane.b32.xlu0 %v9827_v9, %s10116_s1 }
0x2800   :  { %7268 = vrot.lane.b32.xlu1 %v9829_v36, %s10116_s1 }
0x286d   :  { %v7119_v16 = vpop.permute.xlu0 %7118 }
0x286e   :  { %v7121_v6 = vpop.permute.xlu1 %7120  ;;  %v13636_v45 = vmul.f32 %v9815_v12, %v7119_v16 }
0x286f   :  { %v13638_v52 = vmul.f32 %v9817_v46, %v7121_v6 }
0x2870   :  { %v7284_v43 = vrot.slane %v13636_v45, 4 }
0x2871   :  { %v7285_v23 = vrot.slane %v13638_v52, 3  ;;  %v7267_v48 = vpop.permute.xlu0 %7266 }
0x2872   :  { %v7269_v21 = vpop.permute.xlu1 %7268  ;;  %v13642_v32 = vmul.f32 %v9819_v51, %v7267_v48 }
0x2873   :  { %v13644_v50 = vmul.f32 %v9821_v29, %v7269_v21  ;;  %v7286_v5 = vsel %vm3558_vm1, %v7285_v23, %v7284_v43 }
0x2874   :  { %v7432_v30 = vrot.slane %v13642_v32, 3  ;;  %7287 = vrot.lane.b32.xlu0 %v7286_v5, %s10112_s30 }
0x2875   :  { %v7433_v12 = vrot.slane %v13644_v50, 2 }
0x2877   :  { %v7434_v46 = vsel %vm3558_vm1, %v7433_v12, %v7432_v30 }
0x2878   :  { %7435 = vrot.lane.b32.xlu1 %v7434_v46, %s10112_s30 }
0x28e6   :  { %v7288_v33 = vpop.permute.xlu0 %7287 }
0x28e7   :  { %9278 = vmatmul.mubr.msk.f32.vlgmr.msra.gmra.mxu1 %vm2721_vm14, %v7288_v33 }
0x28e8   :  { %9292 = vmatpush3.msra.mxu1 %v13567_v19  ;;  %9299 = vmatprep.mubr.msk.f32.mxu1 %vm10117_vm0, %v10102_v0 }
0x28e9   :  { %9293 = vmatprep.subr.mxu1 %v10102_v0 }
0x28ea   :  { %v7436_v51 = vpop.permute.xlu1 %7435  ;;  %9294 = vmatpush3.msra.mxu1 %v13573_v55 }
0x28eb   :  { %9289 = vmatmul.mubr.msk.f32.vlgmr.msra.gmra.mxu0 %vm2721_vm14, %v7436_v51  ;;  %9295 = vmatprep.subr.mxu1 %v10102_v0 }
0x28ec   :  { %9296 = vmatpush3.msra.mxu1 %v13578_v7  ;;  %9303 = vmatpush3.msra.mxu0 %v13581_v34 }
0x28ed   :  { %9297 = vmatprep.subr.mxu1 %v10102_v0  ;;  %9304 = vmatprep.subr.mxu0 %v10102_v0 }
0x28ee   :  { %9298 = vmatpush3.msra.mxu1 %v13586_v49  ;;  %9305 = vmatpush3.msra.mxu0 %v13589_v10 }
0x28ef   :  { %9306 = vmatprep.subr.mxu0 %v10102_v0  ;;  %9310 = vmatprep.mubr.msk.f32.mxu0 %vm10117_vm0, %v10102_v0 }
0x28f0   :  { %9307 = vmatpush3.msra.mxu0 %v13595_v35  ;;  %9313 = vmatprep.subr.mxu1 %v10102_v0 }
0x28f1   :  { %9308 = vmatprep.subr.mxu0 %v10102_v0 }
0x28f2   :  { %9309 = vmatpush3.msra.mxu0 %v13600_v8 }
0x28f3   :  { %9324 = vmatprep.subr.mxu0 %v10102_v0 }
0x29a7   :  { %v7357_v29 = vpop.f32.mrf.mxu1 }
0x29a8   :  { %v7362_v38 = vrot.slane %v7357_v29, 3  ;;  %v7363_v63 = vrot.slane %v7357_v29, 4 }
0x29a9   :  { %v9279_v59 = vpop.f32.mrf.mxu1 }
0x29aa   :  { %v7366_v31 = vadd.f32 %v7362_v38, %v13313_v39  ;;  %v7367_v53 = vadd.f32 %v7363_v63, %v13301_v1 }
0x29ab   :  { %v7505_v11 = vpop.f32.mrf.mxu0 }
0x29ac   :  { %9830 = vtanh.f32 %v7366_v31  ;;  %v7510_v54 = vrot.slane %v7505_v11, 6  ;;  %v7511_v18 = vrot.slane %v7505_v11, 7  ;;  %v8529_v6 = vmul.f32 -1.442695, %v7366_v31 }
0x29ad   :  { %9832 = vtanh.f32 %v7367_v53  ;;  %v9290_v20 = vpop.f32.mrf.mxu0  ;;  %v8530_v43 = vmul.f32 -1.442695, %v7367_v53 }
0x29ae   :  { %v7514_v17 = vadd.f32 %v7510_v54, %v13307_v15  ;;  %v7515_v47 = vadd.f32 %v7511_v18, %v13309_v58 }
0x29b0   :  { %9834 = vtanh.f32 %v7514_v17  ;;  %v8532_v23 = vmul.f32 -1.442695, %v7514_v17  ;;  %v8533_v48 = vmul.f32 -1.442695, %v7515_v47 }
0x29b1   :  { %9836 = vtanh.f32 %v7515_v47 }
0x29b2   :  { %9838 = vpow2.f32 %v8529_v6 }
0x29b3   :  { %9840 = vpow2.f32 %v8530_v43 }
0x29b4   :  { %9842 = vpow2.f32 %v8532_v23  ;;  %v7532_v23 = vrot.slane %v13626_v40, 1 }
0x29b5   :  { %9844 = vpow2.f32 %v8533_v48 }
0x29b9   :  { %v9831_v3 = vpop.eup %9830 }
0x29ba   :  { %v9833_v9 = vpop.eup %9832  ;;  %7392 = vrot.lane.b32.xlu0 %v9831_v3, %s10116_s1 }
0x29bb   :  { %7394 = vrot.lane.b32.xlu1 %v9833_v9, %s10116_s1  ;;  %v7384_v9 = vrot.slane %v13619_v61, 7 }
0x29bd   :  { %v9835_v36 = vpop.eup %9834 }
0x29be   :  { %v9837_v16 = vpop.eup %9836  ;;  %7540 = vrot.lane.b32.xlu0 %v9835_v36, %s10116_s1  ;;  %v7385_v36 = vrot.slane %v13622_v25, 7 }
0x29bf   :  { %7542 = vrot.lane.b32.xlu1 %v9837_v16, %s10116_s1  ;;  %v9839_v21 = vpop.eup %9838 }
0x29c0   :  { %v9841_v5 = vpop.eup %9840  ;;  %v7374_v30 = vadd.f32 1.0, %v9839_v21 }
0x29c1   :  { %v9843_v12 = vpop.eup %9842  ;;  %v7375_v46 = vadd.f32 1.0, %v9841_v5  ;;  %v7533_v5 = vrot.slane %v13628_v13, 1 }
0x29c2   :  { %v9845_v33 = vpop.eup %9844  ;;  %9846 = vrcp.f32 %v7374_v30  ;;  %v7522_v51 = vadd.f32 1.0, %v9843_v12 }
0x29c3   :  { %9848 = vrcp.f32 %v7375_v46  ;;  %v7523_v29 = vadd.f32 1.0, %v9845_v33 }
0x29c4   :  { %9850 = vrcp.f32 %v7522_v51 }
0x29c5   :  { %9852 = vrcp.f32 %v7523_v29 }
0x29cf   :  { %v9847_v38 = vpop.eup %9846 }
0x29d0   :  { %v9849_v59 = vpop.eup %9848  ;;  %v7388_v16 = vmul.f32 %v9847_v38, %v7384_v9 }
0x29d1   :  { %v9851_v54 = vpop.eup %9850  ;;  %v7389_v6 = vmul.f32 %v9849_v59, %v7385_v36 }
0x29d2   :  { %v9853_v20 = vpop.eup %9852  ;;  %v7536_v12 = vmul.f32 %v9851_v54, %v7532_v23 }
0x29d3   :  { %v7537_v61 = vmul.f32 %v9853_v20, %v7533_v5 }
0x2a2c   :  { %v7393_v63 = vpop.permute.xlu0 %7392 }
0x2a2d   :  { %v7395_v31 = vpop.permute.xlu1 %7394  ;;  %v7398_v53 = vmul.f32 %v9847_v38, %v7393_v63 }
0x2a2e   :  { %v7399_v11 = vmul.f32 %v9849_v59, %v7395_v31 }
0x2a2f   :  { %7402 = vrot.lane.b32.xlu0 %v7398_v53, %s10112_s30 }
0x2a30   :  { %7404 = vrot.lane.b32.xlu1 %v7399_v11, %s10112_s30  ;;  %v7541_v18 = vpop.permute.xlu0 %7540 }
0x2a31   :  { %v7543_v17 = vpop.permute.xlu1 %7542  ;;  %v7546_v47 = vmul.f32 %v9851_v54, %v7541_v18 }
0x2a32   :  { %v7547_v3 = vmul.f32 %v9853_v20, %v7543_v17 }
0x2a33   :  { %7550 = vrot.lane.b32.xlu0 %v7546_v47, %s10112_s30 }
0x2a34   :  { %7552 = vrot.lane.b32.xlu1 %v7547_v3, %s10112_s30 }
0x2aa1   :  { %v7403_v43 = vpop.permute.xlu0 %7402 }
0x2aa2   :  { %v7405_v48 = vpop.permute.xlu1 %7404  ;;  %v13689_v21 = vadd.f32 %v7403_v43, %v7388_v16 }
0x2aa3   :  { %v13692_v30 = vadd.f32 %v7405_v48, %v7389_v6 }
0x2aa4   :  { %9854 = vtanh.f32 %v13689_v21 }
0x2aa5   :  { %9856 = vtanh.f32 %v13692_v30  ;;  %v7551_v46 = vpop.permute.xlu0 %7550 }
0x2aa6   :  { %v7553_v25 = vpop.permute.xlu1 %7552  ;;  %v13696_v33 = vadd.f32 %v7551_v46, %v7536_v12 }
0x2aa7   :  { %v13698_v51 = vadd.f32 %v7553_v25, %v7537_v61 }
0x2aa8   :  { %9858 = vtanh.f32 %v13696_v33 }
0x2aa9   :  { %9860 = vtanh.f32 %v13698_v51 }
0x2ab1   :  { %v9855_v40 = vpop.eup %9854 }
0x2ab2   :  { %v9857_v13 = vpop.eup %9856  ;;  %7414 = vrot.lane.b32.xlu0 %v9855_v40, %s10116_s1 }
0x2ab3   :  { %7416 = vrot.lane.b32.xlu1 %v9857_v13, %s10116_s1 }
0x2ab5   :  { %v9859_v29 = vpop.eup %9858 }
0x2ab6   :  { %v9861_v63 = vpop.eup %9860  ;;  %7562 = vrot.lane.b32.xlu0 %v9859_v29, %s10116_s1 }
0x2ab7   :  { %7564 = vrot.lane.b32.xlu1 %v9861_v63, %s10116_s1 }
0x2b24   :  { %v7415_v31 = vpop.permute.xlu0 %7414 }
0x2b25   :  { %v7417_v53 = vpop.permute.xlu1 %7416  ;;  %v13706_v11 = vmul.f32 %v9847_v38, %v7415_v31 }
0x2b26   :  { %v13708_v18 = vmul.f32 %v9849_v59, %v7417_v53 }
0x2b27   :  { %v7580_v17 = vrot.slane %v13706_v11, 5 }
0x2b28   :  { %v7581_v47 = vrot.slane %v13708_v18, 4  ;;  %v7563_v3 = vpop.permute.xlu0 %7562 }
0x2b29   :  { %v7565_v9 = vpop.permute.xlu1 %7564  ;;  %v13712_v36 = vmul.f32 %v9851_v54, %v7563_v3 }
0x2b2a   :  { %v13714_v16 = vmul.f32 %v9853_v20, %v7565_v9  ;;  %v7582_v6 = vsel %vm3558_vm1, %v7581_v47, %v7580_v17 }
0x2b2b   :  { %v7728_v43 = vrot.slane %v13712_v36, 2  ;;  %7583 = vrot.lane.b32.xlu0 %v7582_v6, %s10112_s30 }
0x2b2c   :  { %v7729_v38 = vrot.slane %v13714_v16, 1 }
0x2b2e   :  { %v7730_v59 = vsel %vm3558_vm1, %v7729_v38, %v7728_v43 }
0x2b2f   :  { %7731 = vrot.lane.b32.xlu1 %v7730_v59, %s10112_s30 }
0x2b9d   :  { %v7584_v23 = vpop.permute.xlu0 %7583 }
0x2b9e   :  { %9300 = vmatmul.mubr.msk.f32.vlgmr.msra.gmra.mxu1 %vm2721_vm14, %v7584_v23 }
0x2b9f   :  { %9314 = vmatpush3.msra.mxu1 %v13567_v19  ;;  %9321 = vmatprep.mubr.msk.f32.mxu1 %vm10117_vm0, %v10102_v0 }
0x2ba0   :  { %9315 = vmatprep.subr.mxu1 %v10102_v0 }
0x2ba1   :  { %v7732_v54 = vpop.permute.xlu1 %7731  ;;  %9316 = vmatpush3.msra.mxu1 %v13573_v55 }
0x2ba2   :  { %9311 = vmatmul.mubr.msk.f32.vlgmr.msra.gmra.mxu0 %vm2721_vm14, %v7732_v54  ;;  %9317 = vmatprep.subr.mxu1 %v10102_v0 }
0x2ba3   :  { %9318 = vmatpush3.msra.mxu1 %v13578_v7  ;;  %9325 = vmatpush3.msra.mxu0 %v13581_v34 }
0x2ba4   :  { %9319 = vmatprep.subr.mxu1 %v10102_v0  ;;  %9326 = vmatprep.subr.mxu0 %v10102_v0 }
0x2ba5   :  { %9320 = vmatpush3.msra.mxu1 %v13586_v49  ;;  %9327 = vmatpush3.msra.mxu0 %v13589_v10 }
0x2ba6   :  { %9328 = vmatprep.subr.mxu0 %v10102_v0  ;;  %9332 = vmatprep.mubr.msk.f32.mxu0 %vm10117_vm0, %v10102_v0  ;;  %vm14061_vm0 = vcmask 257027  }
0x2ba7   :  { %9329 = vmatpush3.msra.mxu0 %v13595_v35 }
0x2ba8   :  { %9330 = vmatprep.subr.mxu0 %v10102_v0 }
0x2ba9   :  { %9331 = vmatpush3.msra.mxu0 %v13600_v8 }
0x2c5e   :  { %v7653_v19 = vpop.f32.mrf.mxu1 }
0x2c5f   :  { %v7658_v55 = vrot.slane %v7653_v19, 2  ;;  %v7659_v7 = vrot.slane %v7653_v19, 3 }
0x2c60   :  { %v9301_v34 = vpop.f32.mrf.mxu1 }
0x2c61   :  { %v7662_v20 = vadd.f32 %v7658_v55, %v13313_v39  ;;  %v7663_v49 = vadd.f32 %v7659_v7, %v13301_v1 }
0x2c62   :  { %v7801_v10 = vpop.f32.mrf.mxu0 }
0x2c63   :  { %9862 = vtanh.f32 %v7662_v20  ;;  %v7806_v48 = vrot.slane %v7801_v10, 7  ;;  %v7810_v35 = vadd.f32 %v7801_v10, %v13309_v58  ;;  %v8535_v25 = vmul.f32 -1.442695, %v7662_v20 }
0x2c64   :  { %9864 = vtanh.f32 %v7663_v49  ;;  %v9312_v5 = vpop.f32.mrf.mxu0  ;;  %v8536_v40 = vmul.f32 -1.442695, %v7663_v49 }
0x2c65   :  { %v7809_v12 = vadd.f32 %v7806_v48, %v13307_v15  ;;  %v8539_v29 = vmul.f32 -1.442695, %v7810_v35  ;;  %v7680_v48 = vrot.slane %v13689_v21, 7  ;;  %v7681_v5 = vrot.slane %v13692_v30, 7 }
0x2c67   :  { %9866 = vtanh.f32 %v7809_v12  ;;  %v8538_v13 = vmul.f32 -1.442695, %v7809_v12 }
0x2c68   :  { %9868 = vtanh.f32 %v7810_v35 }
0x2c69   :  { %9870 = vpow2.f32 %v8535_v25 }
0x2c6a   :  { %9872 = vpow2.f32 %v8536_v40 }
0x2c6b   :  { %9874 = vpow2.f32 %v8538_v13  ;;  %v7828_v13 = vrot.slane %v13698_v51, 1 }
0x2c6c   :  { %9876 = vpow2.f32 %v8539_v29 }
0x2c70   :  { %v9863_v0 = vpop.eup %9862 }
0x2c71   :  { %v9865_v8 = vpop.eup %9864  ;;  %7688 = vrot.lane.b32.xlu0 %v9863_v0, %s10116_s1 }
0x2c72   :  { %7690 = vrot.lane.b32.xlu1 %v9865_v8, %s10116_s1  ;;  %v7827_v8 = vrot.slane %v13696_v33, 1 }
0x2c74   :  { %v9867_v61 = vpop.eup %9866 }
0x2c75   :  { %7835 = vrot.lane.b32.xlu0 %v9867_v61, %s10116_s1  ;;  %v9869_v46 = vpop.eup %9868 }
0x2c76   :  { %7837 = vrot.lane.b32.xlu1 %v9869_v46, %s10116_s1  ;;  %v9871_v63 = vpop.eup %9870 }
0x2c77   :  { %v9873_v31 = vpop.eup %9872  ;;  %v7670_v53 = vadd.f32 1.0, %v9871_v63 }
0x2c78   :  { %v9875_v17 = vpop.eup %9874  ;;  %v7671_v47 = vadd.f32 1.0, %v9873_v31 }
0x2c79   :  { %v9877_v3 = vpop.eup %9876  ;;  %9878 = vrcp.f32 %v7670_v53  ;;  %v7817_v9 = vadd.f32 1.0, %v9875_v17 }
0x2c7a   :  { %9880 = vrcp.f32 %v7671_v47  ;;  %v7818_v6 = vadd.f32 1.0, %v9877_v3 }
0x2c7b   :  { %9882 = vrcp.f32 %v7817_v9 }
0x2c7c   :  { %9884 = vrcp.f32 %v7818_v6 }
0x2c86   :  { %v9879_v43 = vpop.eup %9878 }
0x2c87   :  { %v9881_v59 = vpop.eup %9880  ;;  %v7684_v12 = vmul.f32 %v9879_v43, %v7680_v48 }
0x2c88   :  { %v9883_v55 = vpop.eup %9882  ;;  %v7685_v35 = vmul.f32 %v9881_v59, %v7681_v5 }
0x2c89   :  { %v9885_v20 = vpop.eup %9884  ;;  %v7831_v40 = vmul.f32 %v9883_v55, %v7827_v8 }
0x2c8a   :  { %v7832_v30 = vmul.f32 %v9885_v20, %v7828_v13 }
0x2ce3   :  { %v7689_v38 = vpop.permute.xlu0 %7688 }
0x2ce4   :  { %v7691_v23 = vpop.permute.xlu1 %7690  ;;  %v7694_v54 = vmul.f32 %v9879_v43, %v7689_v38 }
0x2ce5   :  { %v7695_v19 = vmul.f32 %v9881_v59, %v7691_v23 }
0x2ce6   :  { %7698 = vrot.lane.b32.xlu0 %v7694_v54, %s10112_s30 }
0x2ce7   :  { %7700 = vrot.lane.b32.xlu1 %v7695_v19, %s10112_s30  ;;  %v7836_v7 = vpop.permute.xlu0 %7835 }
0x2ce8   :  { %v7841_v34 = vmul.f32 %v9883_v55, %v7836_v7  ;;  %v7838_v49 = vpop.permute.xlu1 %7837 }
0x2ce9   :  { %v7842_v10 = vmul.f32 %v9885_v20, %v7838_v49 }
0x2cea   :  { %7845 = vrot.lane.b32.xlu0 %v7841_v34, %s10112_s30 }
0x2ceb   :  { %7847 = vrot.lane.b32.xlu1 %v7842_v10, %s10112_s30 }
0x2d58   :  { %v7699_v0 = vpop.permute.xlu0 %7698 }
0x2d59   :  { %v7701_v61 = vpop.permute.xlu1 %7700  ;;  %v13757_v46 = vadd.f32 %v7699_v0, %v7684_v12 }
0x2d5a   :  { %v13759_v25 = vadd.f32 %v7701_v61, %v7685_v35 }
0x2d5b   :  { %9886 = vtanh.f32 %v13757_v46 }
0x2d5c   :  { %9888 = vtanh.f32 %v13759_v25  ;;  %v7846_v21 = vpop.permute.xlu0 %7845 }
0x2d5d   :  { %v13764_v29 = vadd.f32 %v7846_v21, %v7831_v40  ;;  %v7848_v63 = vpop.permute.xlu1 %7847 }
0x2d5e   :  { %v13767_v33 = vadd.f32 %v7848_v63, %v7832_v30 }
0x2d5f   :  { %9890 = vtanh.f32 %v13764_v29 }
0x2d60   :  { %9892 = vtanh.f32 %v13767_v33 }
0x2d68   :  { %v9887_v31 = vpop.eup %9886 }
0x2d69   :  { %v9889_v53 = vpop.eup %9888  ;;  %7710 = vrot.lane.b32.xlu0 %v9887_v31, %s10116_s1 }
0x2d6a   :  { %7712 = vrot.lane.b32.xlu1 %v9889_v53, %s10116_s1 }
0x2d6c   :  { %v9891_v51 = vpop.eup %9890 }
0x2d6d   :  { %7857 = vrot.lane.b32.xlu0 %v9891_v51, %s10116_s1  ;;  %v9893_v17 = vpop.eup %9892 }
0x2d6e   :  { %7859 = vrot.lane.b32.xlu1 %v9893_v17, %s10116_s1 }
0x2ddb   :  { %v7711_v47 = vpop.permute.xlu0 %7710 }
0x2ddc   :  { %v7713_v3 = vpop.permute.xlu1 %7712  ;;  %v13774_v9 = vmul.f32 %v9879_v43, %v7711_v47 }
0x2ddd   :  { %v13776_v6 = vmul.f32 %v9881_v59, %v7713_v3 }
0x2dde   :  { %v7875_v38 = vrot.slane %v13774_v9, 6 }
0x2ddf   :  { %v7876_v23 = vrot.slane %v13776_v6, 5  ;;  %v7858_v54 = vpop.permute.xlu0 %7857 }
0x2de0   :  { %v13780_v19 = vmul.f32 %v9883_v55, %v7858_v54  ;;  %v7860_v34 = vpop.permute.xlu1 %7859 }
0x2de1   :  { %v7877_v7 = vsel %vm3558_vm1, %v7876_v23, %v7875_v38  ;;  %v13785_v10 = vmul.f32 %v9885_v20, %v7860_v34 }
0x2de2   :  { %v8023_v49 = vrot.slane %v13780_v19, 1  ;;  %7878 = vrot.lane.b32.xlu0 %v7877_v7, %s10112_s30 }
0x2de4   :  { %v8024_v43 = vsel %vm3558_vm1, %v13785_v10, %v8023_v49  ;;  %vm14062_vm1 = vcmask 520452  }
0x2de5   :  { %8025 = vrot.lane.b32.xlu1 %v8024_v43, %s10112_s30 }
0x2e54   :  { %v7879_v59 = vpop.permute.xlu0 %7878 }
0x2e55   :  { %9322 = vmatmul.mubr.msk.f32.vlgmr.msra.gmra.mxu1 %vm2721_vm14, %v7879_v59 }
0x2e57   :  { %v8026_v48 = vpop.permute.xlu1 %8025 }
0x2e58   :  { %9333 = vmatmul.mubr.msk.f32.vlgmr.msra.gmra.mxu0 %vm2721_vm14, %v8026_v48  ;;  %vm14060_vm14 = vcmask 521477  }
0x2f15   :  { %v7948_v55 = vpop.f32.mrf.mxu1 }
0x2f16   :  { %v7953_v5 = vrot.slane %v7948_v55, 1  ;;  %v7954_v12 = vrot.slane %v7948_v55, 2 }
0x2f17   :  { %v9323_v35 = vpop.f32.mrf.mxu1 }
0x2f18   :  { %v7957_v0 = vadd.f32 %v7953_v5, %v13313_v39  ;;  %v7958_v20 = vadd.f32 %v7954_v12, %v13301_v1  ;;  %v8095_v8 = vpop.f32.mrf.mxu0 }
0x2f19   :  { %v8100_v61 = vrot.slane %v8095_v8, 1  ;;  %v8103_v40 = vadd.f32 %v8095_v8, %v13307_v15 }
0x2f1a   :  { %9894 = vtanh.f32 %v7957_v0  ;;  %v9334_v13 = vpop.f32.mrf.mxu0  ;;  %v8541_v39 = vmul.f32 -1.442695, %v7957_v0  ;;  %v8542_v15 = vmul.f32 -1.442695, %v7958_v20 }
0x2f1b   :  { %9896 = vtanh.f32 %v7958_v20  ;;  %v8104_v21 = vadd.f32 %v8100_v61, %v13309_v58  ;;  %v8544_v53 = vmul.f32 -1.442695, %v8103_v40  ;;  %v7975_v61 = vrot.slane %v13757_v46, 7 }
0x2f1c   :  { %9898 = vtanh.f32 %v8103_v40 }
0x2f1d   :  { %9900 = vtanh.f32 %v8104_v21  ;;  %v8545_v58 = vmul.f32 -1.442695, %v8104_v21  ;;  %v7976_v21 = vrot.slane %v13759_v25, 7 }
0x2f1e   :  { %9902 = vpow2.f32 %v8541_v39 }
0x2f1f   :  { %9904 = vpow2.f32 %v8542_v15  ;;  %v8122_v15 = vrot.slane %v13767_v33, 1 }
0x2f20   :  { %9906 = vpow2.f32 %v8544_v53 }
0x2f21   :  { %9908 = vpow2.f32 %v8545_v58 }
0x2f27   :  { %v9895_v30 = vpop.eup %9894 }
0x2f28   :  { %7983 = vrot.lane.b32.xlu0 %v9895_v30, %s10116_s1  ;;  %v9897_v63 = vpop.eup %9896  ;;  %v8121_v30 = vrot.slane %v13764_v29, 1 }
0x2f29   :  { %v9899_v31 = vpop.eup %9898 }
0x2f2a   :  { %8129 = vrot.lane.b32.xlu1 %v9899_v31, %s10116_s1  ;;  %v9901_v1 = vpop.eup %9900 }
0x2f2b   :  { %v9903_v51 = vpop.eup %9902 }
0x2f2c   :  { %7985 = vrot.lane.b32.xlu0 %v9897_v63, %s10116_s1  ;;  %v9905_v17 = vpop.eup %9904  ;;  %v7965_v47 = vadd.f32 1.0, %v9903_v51 }
0x2f2d   :  { %v9907_v3 = vpop.eup %9906  ;;  %v7966_v38 = vadd.f32 1.0, %v9905_v17 }
0x2f2e   :  { %8131 = vrot.lane.b32.xlu1 %v9901_v1, %s10116_s1  ;;  %9910 = vrcp.f32 %v7965_v47  ;;  %v8111_v23 = vadd.f32 1.0, %v9907_v3  ;;  %v9909_v54 = vpop.eup %9908 }
0x2f2f   :  { %9912 = vrcp.f32 %v7966_v38  ;;  %v8112_v7 = vadd.f32 1.0, %v9909_v54  ;;  %v8278_v38 = vld [vmem:[%s14031_s21 + $0x48] sm:$0xff]  ;;  %v8277_v54 = vld [vmem:[%s14031_s21 + $0x40] sm:$0xff] }
0x2f30   :  { %9914 = vrcp.f32 %v8111_v23 }
0x2f31   :  { %9916 = vrcp.f32 %v8112_v7 }
0x2f3b   :  { %v13800_v34 = vpop.eup %9910 }
0x2f3c   :  { %v13803_v59 = vpop.eup %9912  ;;  %v7979_v40 = vmul.f32 %v13800_v34, %v7975_v61 }
0x2f3d   :  { %v13806_v48 = vpop.eup %9914  ;;  %v7980_v1 = vmul.f32 %v13803_v59, %v7976_v21 }
0x2f3e   :  { %v13812_v0 = vpop.eup %9916  ;;  %v8125_v31 = vmul.f32 %v13806_v48, %v8121_v30 }
0x2f3f   :  { %v8126_v46 = vmul.f32 %v13812_v0, %v8122_v15 }
0x2f9a   :  { %v7984_v49 = vpop.permute.xlu0 %7983 }
0x2f9b   :  { %v7989_v43 = vmul.f32 %v13800_v34, %v7984_v49 }
0x2f9c   :  { %v8130_v55 = vpop.permute.xlu1 %8129 }
0x2f9d   :  { %7993 = vrot.lane.b32.xlu0 %v7989_v43, %s10112_s30  ;;  %v8135_v12 = vmul.f32 %v13806_v48, %v8130_v55  ;;  %v8275_v43 = vld [vmem:[%s14031_s21 + $0x30] sm:$0xff] }
0x2f9e   :  { %v7986_v5 = vpop.permute.xlu0 %7985 }
0x2f9f   :  { %v7990_v35 = vmul.f32 %v13803_v59, %v7986_v5  ;;  %8139 = vrot.lane.b32.xlu1 %v8135_v12, %s10112_s30  ;;  %v8273_v5 = vld [vmem:[%s14031_s21 + $0x20] sm:$0xff] }
0x2fa0   :  { %v8132_v20 = vpop.permute.xlu1 %8131 }
0x2fa1   :  { %7995 = vrot.lane.b32.xlu0 %v7990_v35, %s10112_s30  ;;  %v8136_v8 = vmul.f32 %v13812_v0, %v8132_v20 }
0x2fa3   :  { %8141 = vrot.lane.b32.xlu1 %v8136_v8, %s10112_s30 }
0x2fa5   :  { %5960 = vrot.lane.b32.xlu0 %v13349_v41, %s10112_s30 }
0x2fa7   :  { %6095 = vrot.lane.b32.xlu1 %v13342_v4, %s10116_s1 }
0x300f   :  { %v7994_v13 = vpop.permute.xlu0 %7993 }
0x3010   :  { %v7999_v63 = vadd.f32 %v7994_v13, %v7979_v40 }
0x3011   :  { %v8140_v39 = vpop.permute.xlu1 %8139 }
0x3012   :  { %9918 = vtanh.f32 %v7999_v63  ;;  %v8145_v4 = vadd.f32 %v8140_v39, %v8125_v31 }
0x3013   :  { %v7996_v41 = vpop.permute.xlu0 %7995 }
0x3014   :  { %v8000_v53 = vadd.f32 %v7996_v41, %v7980_v1  ;;  %9920 = vtanh.f32 %v8145_v4 }
0x3015   :  { %v8142_v58 = vpop.permute.xlu1 %8141 }
0x3016   :  { %9922 = vtanh.f32 %v8000_v53  ;;  %v8146_v51 = vadd.f32 %v8142_v58, %v8126_v46 }
0x3017   :  { %v5961_v25 = vpop.permute.xlu0 %5960 }
0x3018   :  { %5966 = vst.msk [vmem:[#allocation3] sm:$0x1] %vm3418_vm2, %v5961_v25  ;;  %9924 = vtanh.f32 %v8146_v51 }
0x3019   :  { %v6096_v29 = vpop.permute.xlu1 %6095 }
0x301a   :  { %6101 = vst.msk [vmem:[#allocation3] sm:$0x80] %vm3554_vm7, %v6096_v29 }
0x301f   :  { %v9919_v17 = vpop.eup %9918 }
0x3020   :  { %8005 = vrot.lane.b32.xlu0 %v9919_v17, %s10116_s1  ;;  %v8272_v17 = vld [vmem:[%s14031_s21 + $0x18] sm:$0xff] }
0x3021   :  { %v9921_v47 = vpop.eup %9920 }
0x3022   :  { %8151 = vrot.lane.b32.xlu1 %v9921_v47, %s10116_s1  ;;  %v8271_v47 = vld [vmem:[%s14031_s21 + $0x10] sm:$0xff] }
0x3023   :  { %v9923_v33 = vpop.eup %9922 }
0x3024   :  { %8007 = vrot.lane.b32.xlu0 %v9923_v33, %s10116_s1  ;;  %v8270_v33 = vld [vmem:[%s14031_s21 + $0x8] sm:$0xff] }
0x3025   :  { %v9925_v3 = vpop.eup %9924 }
0x3026   :  { %8153 = vrot.lane.b32.xlu1 %v9925_v3, %s10116_s1  ;;  %v8269_v3 = vld [vmem:[%s14031_s21] sm:$0xff] }
0x3028   :  { %6241 = vrot.lane.b32.xlu0 %v13410_v2, %s10112_s30  ;;  %v8176_v2 = vld [vmem:[%s14029_s19 + $0x28] sm:$0xff] }
0x302a   :  { %6389 = vrot.lane.b32.xlu1 %v13413_v37, %s10116_s1  ;;  %v8175_v37 = vld [vmem:[%s14029_s19 + $0x20] sm:$0xff] }
0x302c   :  { %6536 = vrot.lane.b32.xlu0 %v13480_v22, %s10112_s30 }
0x302e   :  { %6684 = vrot.lane.b32.xlu1 %v13486_v42, %s10116_s1 }
0x3030   :  { %6832 = vrot.lane.b32.xlu0 %v13550_v28, %s10112_s30 }
0x3032   :  { %6980 = vrot.lane.b32.xlu1 %v13556_v57, %s10116_s1 }
0x3034   :  { %5962 = vrot.lane.b32.xlu0 %v13340_v24, %s10112_s30  ;;  %v8178_v24 = vld [vmem:[%s14029_s19 + $0x38] sm:$0xff] }
0x3035   :  { %9335 = vmatprep.subr.mxu1 %v8178_v24 }
0x3036   :  { %6097 = vrot.lane.b32.xlu1 %v13344_v62, %s10116_s1  ;;  %9336 = vmatpush3.msra.mxu1 %v8178_v24  ;;  %v8177_v62 = vld [vmem:[%s14029_s19 + $0x30] sm:$0xff]  ;;  %v8546_v24 = vld [vmem:[%s14030_s20] ss:$0 sm:$0xff] }
0x3037   :  { %9337 = vmatprep.subr.mxu1 %v8177_v62 }
0x3038   :  { %6243 = vrot.lane.b32.xlu0 %v13415_v60, %s10112_s30  ;;  %9338 = vmatpush3.msra.mxu1 %v8177_v62  ;;  %v8174_v60 = vld [vmem:[%s14029_s19 + $0x18] sm:$0xff] }
0x3039   :  { %9339 = vmatprep.subr.mxu1 %v8176_v2 }
0x303a   :  { %6391 = vrot.lane.b32.xlu1 %v13417_v56, %s10116_s1  ;;  %9340 = vmatpush3.msra.mxu1 %v8176_v2  ;;  %v8173_v56 = vld [vmem:[%s14029_s19 + $0x10] sm:$0xff] }
0x303b   :  { %9341 = vmatprep.subr.mxu1 %v8175_v37 }
0x303c   :  { %6538 = vrot.lane.b32.xlu0 %v13482_v27, %s10112_s30  ;;  %9342 = vmatpush3.msra.mxu1 %v8175_v37  ;;  %v8172_v27 = vld [vmem:[%s14029_s19 + $0x8] sm:$0xff] }
0x303d   :  { %9343 = vmatprep.subr.mxu1 %v8174_v60 }
0x303e   :  { %6686 = vrot.lane.b32.xlu1 %v13488_v44, %s10116_s1  ;;  %9344 = vmatpush3.msra.mxu1 %v8174_v60  ;;  %v8171_v44 = vld [vmem:[%s14029_s19] sm:$0xff] }
0x303f   :  { %9345 = vmatprep.subr.mxu1 %v8173_v56 }
0x3040   :  { %6834 = vrot.lane.b32.xlu0 %v13552_v26, %s10112_s30  ;;  %9346 = vmatpush3.msra.mxu1 %v8173_v56 }
0x3041   :  { %9347 = vmatprep.subr.mxu1 %v8172_v27 }
0x3042   :  { %6982 = vrot.lane.b32.xlu1 %v13558_v14, %s10116_s1  ;;  %9348 = vmatpush3.msra.mxu1 %v8172_v27  ;;  %v8549_v27 = vld [vmem:[%s14032_s22] ss:$0 sm:$0xff] }
0x3043   :  { %9349 = vmatprep.subr.mxu1 %v8171_v44 }
0x3044   :  { %7128 = vrot.lane.b32.xlu0 %v13636_v45, %s10112_s30  ;;  %9350 = vmatpush3.msra.mxu1 %v8171_v44  ;;  %v8284_v45 = vld [vmem:[%s14031_s21 + $0x78] sm:$0xff] }
0x3045   :  { %9354 = vmatprep.subr.mxu0 %v8284_v45 }
0x3046   :  { %7276 = vrot.lane.b32.xlu1 %v13642_v32, %s10116_s1  ;;  %9355 = vmatpush3.msra.mxu0 %v8284_v45 }
0x3048   :  { %7424 = vrot.lane.b32.xlu0 %v13706_v11, %s10112_s30 }
0x304a   :  { %7572 = vrot.lane.b32.xlu1 %v13712_v36, %s10116_s1  ;;  %v8281_v36 = vld [vmem:[%s14031_s21 + $0x60] sm:$0xff] }
0x304c   :  { %7720 = vrot.lane.b32.xlu0 %v13774_v9, %s10112_s30  ;;  %v8280_v9 = vld [vmem:[%s14031_s21 + $0x58] sm:$0xff] }
0x304e   :  { %7867 = vrot.lane.b32.xlu1 %v13780_v19, %s10116_s1  ;;  %v8279_v19 = vld [vmem:[%s14031_s21 + $0x50] sm:$0xff] }
0x3050   :  { %7130 = vrot.lane.b32.xlu0 %v13638_v52, %s10112_s30  ;;  %v8283_v52 = vld [vmem:[%s14031_s21 + $0x70] sm:$0xff] }
0x3051   :  { %9356 = vmatprep.subr.mxu0 %v8283_v52 }
0x3052   :  { %7278 = vrot.lane.b32.xlu1 %v13644_v50, %s10116_s1  ;;  %v8282_v50 = vld [vmem:[%s14031_s21 + $0x68] sm:$0xff]  ;;  %9357 = vmatpush3.msra.mxu0 %v8283_v52 }
0x3053   :  { %9358 = vmatprep.subr.mxu0 %v8282_v50 }
0x3054   :  { %7426 = vrot.lane.b32.xlu0 %v13708_v18, %s10112_s30  ;;  %9359 = vmatpush3.msra.mxu0 %v8282_v50 }
0x3055   :  { %9360 = vmatprep.subr.mxu0 %v8281_v36 }
0x3056   :  { %7574 = vrot.lane.b32.xlu1 %v13714_v16, %s10116_s1  ;;  %9361 = vmatpush3.msra.mxu0 %v8281_v36 }
0x3057   :  { %9362 = vmatprep.subr.mxu0 %v8280_v9 }
0x3058   :  { %7722 = vrot.lane.b32.xlu0 %v13776_v6, %s10112_s30  ;;  %9363 = vmatpush3.msra.mxu0 %v8280_v9 }
0x3059   :  { %9364 = vmatprep.subr.mxu0 %v8279_v19 }
0x305a   :  { %7869 = vrot.lane.b32.xlu1 %v13785_v10, %s10116_s1  ;;  %9365 = vmatpush3.msra.mxu0 %v8279_v19 }
0x305b   :  { %9366 = vmatprep.subr.mxu0 %v8278_v38 }
0x305c   :  { %9367 = vmatpush3.msra.mxu0 %v8278_v38 }
0x305d   :  { %9368 = vmatprep.subr.mxu0 %v8277_v54 }
0x305e   :  { %9369 = vmatpush3.msra.mxu0 %v8277_v54 }
0x3092   :  { %v8006_v22 = vpop.permute.xlu0 %8005 }
0x3093   :  { %v8011_v42 = vmul.f32 %v13800_v34, %v8006_v22  ;;  %v8276_v34 = vld [vmem:[%s14031_s21 + $0x38] sm:$0xff] }
0x3094   :  { %v8152_v28 = vpop.permute.xlu1 %8151  ;;  %9370 = vmatprep.subr.mxu0 %v8276_v34 }
0x3095   :  { %8015 = vrot.lane.b32.xlu0 %v8011_v42, %s10112_s30  ;;  %v8157_v26 = vmul.f32 %v13806_v48, %v8152_v28  ;;  %9371 = vmatpush3.msra.mxu0 %v8276_v34  ;;  %v8274_v48 = vld [vmem:[%s14031_s21 + $0x28] sm:$0xff]  ;;  %s10118_s21 = smov [#allocation15]  }
0x3096   :  { %v8008_v57 = vpop.permute.xlu0 %8007  ;;  %9372 = vmatprep.subr.mxu0 %v8275_v43  ;;  %s8374_s26 = sshll.u32 %s10118_s21, 4  ;;  %s8375_s26 = int_to_ptr.vmem [resolvable:$true] %s8374_s26 }
0x3097   :  { %v8012_v14 = vmul.f32 %v13803_v59, %v8008_v57  ;;  %8161 = vrot.lane.b32.xlu1 %v8157_v26, %s10116_s1  ;;  %9373 = vmatpush3.msra.mxu0 %v8275_v43  ;;  %s10064_s20 = scalar_lea.vmem %s8375_s26, 256  ;;  %p10069_p3 = scmp.lt.s32.totalorder %s8375_s26, %s8375_s26 }
0x3098   :  { %v8154_v32 = vpop.permute.xlu1 %8153  ;;  %9374 = vmatprep.subr.mxu0 %v8274_v48  ;;  %p10065_p2 = scmp.ne.s32.totalorder %s8375_s26, %s10064_s20  ;;  %p10070_p4 = scmp.lt.s32.totalorder %s10064_s20, %s10064_s20 }
0x3099   :  { %8017 = vrot.lane.b32.xlu0 %v8012_v14, %s10112_s30  ;;  %v8158_v11 = vmul.f32 %v13812_v0, %v8154_v32  ;;  %9375 = vmatpush3.msra.mxu0 %v8274_v48 }
0x309a   :  { %v6242_v18 = vpop.permute.xlu0 %6241  ;;  %9376 = vmatprep.subr.mxu0 %v8273_v5  ;;  %p10071_p5 = por %p10070_p4, %p10069_p3 }
0x309b   :  { %6247 = vst.msk [vmem:[#allocation3] sm:$0x2] %vm3702_vm8, %v6242_v18  ;;  %8163 = vrot.lane.b32.xlu1 %v8158_v11, %s10116_s1  ;;  %9377 = vmatpush3.msra.mxu0 %v8273_v5 }
0x309c   :  { %v6390_v16 = vpop.permute.xlu1 %6389  ;;  %9378 = vmatprep.subr.mxu0 %v8272_v17  ;;  %p10072_p6 = pnand %p10071_p5, %p10065_p2 }
0x309d   :  { %6395 = vst.msk [vmem:[#allocation3] sm:$0x40] %vm3851_vm9, %v6390_v16  ;;  %9379 = vmatpush3.msra.mxu0 %v8272_v17 }
0x309e   :  { %v6537_v6 = vpop.permute.xlu0 %6536  ;;  %9380 = vmatprep.subr.mxu0 %v8271_v47 }
0x309f   :  { %6542 = vst.msk [vmem:[#allocation3] sm:$0x4] %vm3999_vm10, %v6537_v6  ;;  %9381 = vmatpush3.msra.mxu0 %v8271_v47 }
0x30a0   :  { %v6685_v10 = vpop.permute.xlu1 %6684  ;;  %9382 = vmatprep.subr.mxu0 %v8270_v33 }
0x30a1   :  { %6690 = vst.msk [vmem:[#allocation3] sm:$0x20] %vm14060_vm14, %v6685_v10  ;;  %9383 = vmatpush3.msra.mxu0 %v8270_v33 }
0x30a2   :  { %v6833_v23 = vpop.permute.xlu0 %6832  ;;  %9384 = vmatprep.subr.mxu0 %v8269_v3 }
0x30a3   :  { %6838 = vst.msk [vmem:[#allocation3] sm:$0x8] %vm14061_vm0, %v6833_v23  ;;  %9385 = vmatpush3.msra.mxu0 %v8269_v3 }
0x30a4   :  { %v6981_v7 = vpop.permute.xlu1 %6980 }
0x30a5   :  { %6986 = vst.msk [vmem:[#allocation3] sm:$0x10] %vm14062_vm1, %v6981_v7 }
0x30a6   :  { %v5963_v49 = vpop.permute.xlu0 %5962 }
0x30a7   :  { %5967 = vst.msk [vmem:[#allocation3 + $0x8] sm:$0x1] %vm3418_vm2, %v5963_v49  ;;  %vm14063_vm2 = vmmov %vm14060_vm14  ;;  %vm14066_vm14 = vcmask 258052  }
0x30a8   :  { %v6098_v59 = vpop.permute.xlu1 %6097 }
0x30a9   :  { %6102 = vst.msk [vmem:[#allocation3 + $0x8] sm:$0x80] %vm3554_vm7, %v6098_v59  ;;  %vm14064_vm7 = vmmov %vm14061_vm0 }
0x30aa   :  { %v6244_v55 = vpop.permute.xlu0 %6243 }
0x30ab   :  { %6248 = vst.msk [vmem:[#allocation3 + $0x8] sm:$0x2] %vm3702_vm8, %v6244_v55  ;;  %vm14065_vm8 = vmmov %vm14062_vm1 }
0x30ac   :  { %v6392_v12 = vpop.permute.xlu1 %6391 }
0x30ad   :  { %6396 = vst.msk [vmem:[#allocation3 + $0x8] sm:$0x40] %vm3851_vm9, %v6392_v12  ;;  %vm14067_vm9 = vmmov %vm14066_vm14 }
0x30ae   :  { %v6539_v35 = vpop.permute.xlu0 %6538 }
0x30af   :  { %6543 = vst.msk [vmem:[#allocation3 + $0x8] sm:$0x4] %vm3999_vm10, %v6539_v35 }
0x30b0   :  { %v6687_v0 = vpop.permute.xlu1 %6686 }
0x30b1   :  { %6691 = vst.msk [vmem:[#allocation3 + $0x8] sm:$0x20] %vm14063_vm2, %v6687_v0 }
0x30b2   :  { %v6835_v20 = vpop.permute.xlu0 %6834 }
0x30b3   :  { %6839 = vst.msk [vmem:[#allocation3 + $0x8] sm:$0x8] %vm14064_vm7, %v6835_v20 }
0x30b4   :  { %v6983_v8 = vpop.permute.xlu1 %6982 }
0x30b5   :  { %6987 = vst.msk [vmem:[#allocation3 + $0x8] sm:$0x10] %vm14065_vm8, %v6983_v8 }
0x30b6   :  { %v7129_v61 = vpop.permute.xlu0 %7128 }
0x30b7   :  { %7134 = vst.msk [vmem:[#allocation3] sm:$0x10] %vm14066_vm14, %v7129_v61 }
0x30b8   :  { %v7277_v40 = vpop.permute.xlu1 %7276 }
0x30b9   :  { %7282 = vst.msk [vmem:[#allocation3] sm:$0x8] %vm4744_vm3, %v7277_v40 }
0x30ba   :  { %v7425_v13 = vpop.permute.xlu0 %7424 }
0x30bb   :  { %7430 = vst.msk [vmem:[#allocation3] sm:$0x20] %vm4893_vm4, %v7425_v13 }
0x30bc   :  { %v7573_v21 = vpop.permute.xlu1 %7572 }
0x30bd   :  { %7578 = vst.msk [vmem:[#allocation3] sm:$0x4] %vm5042_vm6, %v7573_v21 }
0x30be   :  { %v7721_v30 = vpop.permute.xlu0 %7720 }
0x30bf   :  { %7726 = vst.msk [vmem:[#allocation3] sm:$0x40] %vm5191_vm11, %v7721_v30 }
0x30c0   :  { %v7868_v63 = vpop.permute.xlu1 %7867 }
0x30c1   :  { %7873 = vst.msk [vmem:[#allocation3] sm:$0x2] %vm5339_vm13, %v7868_v63 }
0x30c2   :  { %v7131_v31 = vpop.permute.xlu0 %7130 }
0x30c3   :  { %7135 = vst.msk [vmem:[#allocation3 + $0x8] sm:$0x10] %vm14067_vm9, %v7131_v31 }
0x30c4   :  { %v7279_v1 = vpop.permute.xlu1 %7278 }
0x30c5   :  { %7283 = vst.msk [vmem:[#allocation3 + $0x8] sm:$0x8] %vm4744_vm3, %v7279_v1 }
0x30c6   :  { %v7427_v39 = vpop.permute.xlu0 %7426 }
0x30c7   :  { %7431 = vst.msk [vmem:[#allocation3 + $0x8] sm:$0x20] %vm4893_vm4, %v7427_v39 }
0x30c8   :  { %v7575_v41 = vpop.permute.xlu1 %7574 }
0x30c9   :  { %7579 = vst.msk [vmem:[#allocation3 + $0x8] sm:$0x4] %vm5042_vm6, %v7575_v41 }
0x30ca   :  { %v7723_v15 = vpop.permute.xlu0 %7722 }
0x30cb   :  { %7727 = vst.msk [vmem:[#allocation3 + $0x8] sm:$0x40] %vm5191_vm11, %v7723_v15 }
0x30cc   :  { %v7870_v4 = vpop.permute.xlu1 %7869 }
0x30cd   :  { %7874 = vst.msk [vmem:[#allocation3 + $0x8] sm:$0x2] %vm5339_vm13, %v7870_v4 }
0x3107   :  { %v8016_v53 = vpop.permute.xlu0 %8015 }
0x3108   :  { %8021 = vst.msk [vmem:[#allocation3] sm:$0x80] %vm5488_vm12, %v8016_v53 }
0x3109   :  { %v8162_v46 = vpop.permute.xlu1 %8161 }
0x310a   :  { %8167 = vst.msk [vmem:[#allocation3] sm:$0x1] %vm5635_vm15, %v8162_v46 }
0x310b   :  { %v8018_v58 = vpop.permute.xlu0 %8017 }
0x310c   :  { %8022 = vst.msk [vmem:[#allocation3 + $0x8] sm:$0x80] %vm5488_vm12, %v8018_v58 }
0x310d   :  { %v8164_v25 = vpop.permute.xlu1 %8163 }
0x310e   :  { %8168 = vst.msk [vmem:[#allocation3 + $0x8] sm:$0x1] %vm5635_vm15, %v8164_v25 }
0x3111   :  { %v8169_v51 = vld [vmem:[#allocation3] sm:$0xff] }
0x3112   :  { %9351 = vmatprep.mubr.msk.f32.mxu1 %vm2789_vm5, %v8169_v51 }
0x3115   :  { %v8170_v29 = vld [vmem:[#allocation3 + $0x8] sm:$0xff] }
0x3116   :  { %9352 = vmatmul.mubr.msk.f32.vlgmr.msra.gmra.mxu1 %vm2789_vm5, %v8170_v29 }
0x31d6   :  { %v9353_v62 = vpop.f32.mrf.mxu1 }
0x31d7   :  { %v8264_v2 = vadd.f32 %v9353_v62, %v8546_v24 }
0x31d8   :  { %v8258_v37 = vpop.f32.mrf.mxu1 }
0x31d9   :  { %v8259_v60 = vadd.f32 %v8546_v24, %v8258_v37  ;;  %v8268_v22 = vmax.f32 %v8264_v2, 0.0 }
0x31db   :  { %v8267_v56 = vmax.f32 %v8259_v60, 0.0 }
0x31dd   :  { %9386 = vmatprep.mubr.f32.mxu0 %v8267_v56 }
0x31de   :  { %9387 = vmatmul.mubr.f32.vlgmr.msra.gmra.mxu0 %v8268_v22 }
0x329e   :  { %v9388_v42 = vpop.f32.mrf.mxu0 }
0x329f   :  { %v8364_v44 = vadd.f32 %v9388_v42, %v8549_v27 }
0x32a0   :  { %v8358_v28 = vpop.f32.mrf.mxu0 }
0x32a1   :  { %8368 = vst [vmem:[#allocation15 + $0x8] sm:$0xff] %v8364_v44  ;;  %v8359_v26 = vadd.f32 %v8549_v27, %v8358_v28 }
0x32a3   :  { %8367 = vst [vmem:[#allocation15] sm:$0xff] %v8359_v26 }
0x32a4   :  { %10075 = shalt.err (!%p10072_p6)
}
0x32a5   :  { %8380 = dma.vmem_to_hbm [thread:$0]  %s8375_s26, 256, %s14033_s23, [#allocation6], %s10097_s29, %s10097_s29, %s10098_s3  }
0x32a6   :  { %10092 = dma.done.wait [#allocation6], 256  }
0x32a7   :  { %10093 = vsyncadd [#allocation6], 4294967040 }
0x32a8   :  { %8384 = vsyncpa [#allocation5], 1 }
0x32a9   :  { %8385 = vsyncpa [#allocation8], 1 }
0x32aa   :  { %8386 = vsyncpa [#allocation11], 1 }
0x32ab   :  { %8387 = vsyncpa [#allocation14], 1 }
0x32ac   :  { %8388 = vsyncpa [#allocation6], 1 }

</bundles_post_ra>
